<compile_context>
chip_gen: v7x
topology: tpu7x:2x2x1
jax: 0.10.0
libtpu: 0.0.40
codegen_flags: <defaults>
</compile_context>

<pallas_src>
import functools
import math

import jax
import jax.numpy as jnp
from jax.experimental import pallas as pl
from jax.experimental.pallas import tpu as pltpu


def _silu(x):
    return x * jax.nn.sigmoid(x)


# ------------------------------ fused kernel ---------------------------------


def middle_block_kernel(
    x_ref, t_ref,
    # ResBlock 0
    w1a_ref, b1a_ref, w2a_ref, b2a_ref, wca_ref, bca_ref,
    # Attention (fused QKV + output projection)
    wqkv_ref, bqkv_ref, wo_ref, bo_ref,
    # ResBlock 1
    w1b_ref, b1b_ref, w2b_ref, b2b_ref, wcb_ref, bcb_ref,
    # output
    o_ref,
    # scratch
    pad_ref,   # (H+2, W+2, C) f32  : zero-padded conv input (border written once)
    col_ref,   # (H*W, 9*C)    bf16 : im2col slab
    *, heads):
    H, W, C = x_ref.shape
    L = H * W
    dh = C // heads
    b = pl.program_id(0)

    # Zero the padded scratch once per image; only its interior is ever written
    # below, so the 1-pixel zero border persists for all four convolutions.
    pad_ref[...] = jnp.zeros_like(pad_ref)

    t_row = t_ref[pl.ds(b, 1), :]                     # (1, cond) for this image

    def conv3x3(w_ref, b_ref):
        # im2col: taps written in PAIRS -> bf16 column stores are 128 lanes wide
        # at 128-aligned offsets; only the trailing tap is a 64-lane masked
        # store (5 stores/conv instead of 9 masked ones).  Each tap is sliced
        # straight off pad_ref (no materialized padded tensor).
        for p2 in range(4):
            i0, i1 = 2 * p2, 2 * p2 + 1
            dy0, dx0 = divmod(i0, 3)
            dy1, dx1 = divmod(i1, 3)
            t0 = pad_ref[dy0:dy0 + H, dx0:dx0 + W, :].reshape(L, C)
            t1 = pad_ref[dy1:dy1 + H, dx1:dx1 + W, :].reshape(L, C)
            col_ref[:, i0 * C:(i1 + 1) * C] = jnp.concatenate(
                [t0, t1], axis=-1).astype(jnp.bfloat16)
        t8 = pad_ref[2:2 + H, 2:2 + W, :].reshape(L, C)
        col_ref[:, 8 * C:9 * C] = t8.astype(jnp.bfloat16)
        return (jnp.dot(col_ref[...], w_ref[...],
                        preferred_element_type=jnp.float32) + b_ref[0])

    def resblock(x2d, wc_ref, bc_ref, w1_ref, b1_ref, w2_ref, b2_ref):
        # FiLM conditioning: tiny (1,cond)x(cond,2C) matmul kept in f32.
        cond = (jnp.dot(t_row, wc_ref[...], preferred_element_type=jnp.float32)
                + bc_ref[0])                          # (1, 2C)
        scale, fbias = cond[:, :C], cond[:, C:]       # chunk(2, dim=1)
        # conv1 on silu(x)   (silu(0)=0 so the zero border stays exact)
        pad_ref[1:H + 1, 1:W + 1, :] = _silu(x2d).reshape(H, W, C)
        h = conv3x3(w1_ref, b1_ref)                   # (L, C) f32
        h = _silu(scale * h + fbias)                  # Dropout == identity (eval)
        # conv2 + residual
        pad_ref[1:H + 1, 1:W + 1, :] = h.reshape(H, W, C)
        return x2d + conv3x3(w2_ref, b2_ref)

    def attention(x2d):
        xb = x2d.astype(jnp.bfloat16)
        # Fused Q|K|V projection: one (L,C)x(C,3C) matmul instead of three.
        qkv = (jnp.dot(xb, wqkv_ref[...], preferred_element_type=jnp.float32)
               + bqkv_ref[0])                         # (L, 3C)
        q = qkv[:, :C] * (1.0 / math.sqrt(dh))
        k = qkv[:, C:2 * C]
        v = qkv[:, 2 * C:]
        # All heads batched: one score einsum, ONE softmax, one context einsum,
        # and ONE (L,C)x(C,C) output matmul (no per-head folds / accumulator).
        qh = jnp.stack([q[:, hd * dh:(hd + 1) * dh] for hd in range(heads)],
                       axis=0).astype(jnp.bfloat16)   # (heads, L, dh)
        kh = jnp.stack([k[:, hd * dh:(hd + 1) * dh] for hd in range(heads)],
                       axis=0).astype(jnp.bfloat16)
        vh = jnp.stack([v[:, hd * dh:(hd + 1) * dh] for hd in range(heads)],
                       axis=0).astype(jnp.bfloat16)
        s = jnp.einsum("hqd,hkd->hqk", qh, kh,
                       preferred_element_type=jnp.float32)     # (heads, L, L)
        s = s - jnp.max(s, axis=-1, keepdims=True)
        p = jnp.exp(s)
        p = p * pl.reciprocal(jnp.sum(p, axis=-1, keepdims=True), approx=True)
        ov = jnp.einsum("hqk,hkd->hqd", p.astype(jnp.bfloat16), vh,
                        preferred_element_type=jnp.float32)    # (heads, L, dh)
        ctx = jnp.concatenate([ov[hd] for hd in range(heads)], axis=-1)  # (L, C)
        y = (jnp.dot(ctx.astype(jnp.bfloat16), wo_ref[...],
                     preferred_element_type=jnp.float32) + bo_ref[0])
        return x2d + y

    x2d = x_ref[...].reshape(L, C)
    out = resblock(x2d, wca_ref, bca_ref, w1a_ref, b1a_ref, w2a_ref, b2a_ref)
    out = attention(out)
    out = resblock(out, wcb_ref, bcb_ref, w1b_ref, b1b_ref, w2b_ref, b2b_ref)
    o_ref[...] = out.reshape(H, W, C)


# ------------------------------ wrapper ---------------------------------------


def middle_block(x, t, params, heads):
    B, H, W, C = x.shape
    bf = jnp.bfloat16

    # Weight prep (reshape / pack / bf16 cast) is done once here, outside the
    # kernel; under jit it is hoisted out of any surrounding step loop.
    def prep_res(p):
        # (3,3,Cin,Cout) -> (9*Cin, Cout), matching im2col column order (dy,dx,ci).
        return [p["w1"].reshape(9 * C, C).astype(bf), p["b1"],
                p["w2"].reshape(9 * C, C).astype(bf), p["b2"],
                p["wc"], p["bc"]]

    a = params["attn"]
    wqkv = jnp.concatenate([a["wq"], a["wk"], a["wv"]], axis=1).astype(bf)  # (C, 3C)
    bqkv = jnp.concatenate([a["bq"], a["bk"], a["bv"]], axis=1)             # (1, 3C)
    args = ([x, t]
            + prep_res(params["res0"])
            + [wqkv, bqkv, a["wo"].astype(bf), a["bo"]]
            + prep_res(params["res1"]))

    def full_spec(arr):
        nd = arr.ndim
        return pl.BlockSpec(arr.shape, lambda b, _n=nd: (0,) * _n)

    in_specs = ([pl.BlockSpec((None, H, W, C), lambda b: (b, 0, 0, 0))]  # x per image
                + [full_spec(arr) for arr in args[1:]])                  # t + weights

    kern = functools.partial(middle_block_kernel, heads=heads)
    return pl.pallas_call(
        kern,
        out_shape=jax.ShapeDtypeStruct((B, H, W, C), jnp.float32),
        grid=(B,),
        in_specs=in_specs,
        out_specs=pl.BlockSpec((None, H, W, C), lambda b: (b, 0, 0, 0)),
        scratch_shapes=[
            pltpu.VMEM((H + 2, W + 2, C), jnp.float32),
            pltpu.VMEM((H * W, 9 * C), jnp.bfloat16),
        ],
        compiler_params=pltpu.CompilerParams(
            dimension_semantics=("parallel",),   # 2-image grid -> both TCs on v7x
            vmem_limit_bytes=32 * 1024 * 1024,
        ),
    )(*args)


# ------------------------------ param init ------------------------------------


def init_params(key, C, cond_size):
    def nrm(k, shape, s=0.05):
        return s * jax.random.normal(k, shape, jnp.float32)

    ks = iter(jax.random.split(key, 24))

    def res_params():
        return dict(
            w1=nrm(next(ks), (3, 3, C, C)),     # project_in  (as (ky,kx,Cin,Cout))
            b1=nrm(next(ks), (1, C)),
            w2=nrm(next(ks), (3, 3, C, C)),     # project_out (zero_module in original)
            b2=nrm(next(ks), (1, C)),
            wc=nrm(next(ks), (cond_size, 2 * C)),
            bc=nrm(next(ks), (1, 2 * C)),
        )

    attn = dict(
        wq=nrm(next(ks), (C, C)), bq=nrm(next(ks), (1, C)),
        wk=nrm(next(ks), (C, C)), bk=nrm(next(ks), (1, C)),
        wv=nrm(next(ks), (C, C)), bv=nrm(next(ks), (1, C)),
        wo=nrm(next(ks), (C, C)), bo=nrm(next(ks), (1, C)),  # zero_module in original
    )
    return dict(res0=res_params(), attn=attn, res1=res_params())


# --------------------------------- main ----------------------------------------

if __name__ == "__main__":
    B, C, H, W = 2, 64, 8, 8          # size=64 channels
    cond_size, heads = 32, 8

    key = jax.random.PRNGKey(0)
    kx, kt, kp = jax.random.split(key, 3)
    # inputs in NHWC (equivalent to PyTorch NCHW (B, C, H, W) = (2, 64, 8, 8))
    x = jax.random.normal(kx, (B, H, W, C), jnp.float32)
    time = jax.random.normal(kt, (B, cond_size), jnp.float32)
    params = init_params(kp, C, cond_size)

    mb = jax.jit(functools.partial(middle_block, heads=heads))
    out = jax.block_until_ready(mb(x, time, params))

    assert out.shape == (B, H, W, C)
    assert bool(jnp.all(jnp.isfinite(out)))
    print("KERNEL_OK")
</pallas_src>

<mosaic_0001>
module attributes {stable_mosaic.version = 11 : i64} {
  func.func @middle_block_kernel(%arg0: i32, %arg1: memref<1x8x8x64xf32, #tpu.memory_space<vmem>>, %arg2: memref<2x32xf32, #tpu.memory_space<vmem>>, %arg3: memref<576x64xbf16, #tpu.memory_space<vmem>>, %arg4: memref<1x64xf32, #tpu.memory_space<vmem>>, %arg5: memref<576x64xbf16, #tpu.memory_space<vmem>>, %arg6: memref<1x64xf32, #tpu.memory_space<vmem>>, %arg7: memref<32x128xf32, #tpu.memory_space<vmem>>, %arg8: memref<1x128xf32, #tpu.memory_space<vmem>>, %arg9: memref<64x192xbf16, #tpu.memory_space<vmem>>, %arg10: memref<1x192xf32, #tpu.memory_space<vmem>>, %arg11: memref<64x64xbf16, #tpu.memory_space<vmem>>, %arg12: memref<1x64xf32, #tpu.memory_space<vmem>>, %arg13: memref<576x64xbf16, #tpu.memory_space<vmem>>, %arg14: memref<1x64xf32, #tpu.memory_space<vmem>>, %arg15: memref<576x64xbf16, #tpu.memory_space<vmem>>, %arg16: memref<1x64xf32, #tpu.memory_space<vmem>>, %arg17: memref<32x128xf32, #tpu.memory_space<vmem>>, %arg18: memref<1x128xf32, #tpu.memory_space<vmem>>, %arg19: memref<1x8x8x64xf32, #tpu.memory_space<vmem>>, %arg20: memref<10x10x64xf32, #tpu.memory_space<vmem>>, %arg21: memref<64x576xbf16, #tpu.memory_space<vmem>>) attributes {dimension_semantics = [#tpu.dimension_semantics<parallel>], iteration_bounds = array<i64: 2>, scalar_prefetch = 0 : i64, scratch_operands = 2 : i64, tpu.core_type = #tpu.core_type<tc>, window_params = [{transform_indices = @transform_0, window_bounds = array<i64: 1, 8, 8, 64>}, {pipeline_mode = #tpu.pipeline_mode<synchronous>, transform_indices = @transform_1, window_bounds = array<i64: 2, 32>}, {pipeline_mode = #tpu.pipeline_mode<synchronous>, transform_indices = @transform_2, window_bounds = array<i64: 576, 64>}, {pipeline_mode = #tpu.pipeline_mode<synchronous>, transform_indices = @transform_3, window_bounds = array<i64: 1, 64>}, {pipeline_mode = #tpu.pipeline_mode<synchronous>, transform_indices = @transform_4, window_bounds = array<i64: 576, 64>}, {pipeline_mode = #tpu.pipeline_mode<synchronous>, transform_indices = @transform_5, window_bounds = array<i64: 1, 64>}, {pipeline_mode = #tpu.pipeline_mode<synchronous>, transform_indices = @transform_6, window_bounds = array<i64: 32, 128>}, {pipeline_mode = #tpu.pipeline_mode<synchronous>, transform_indices = @transform_7, window_bounds = array<i64: 1, 128>}, {pipeline_mode = #tpu.pipeline_mode<synchronous>, transform_indices = @transform_8, window_bounds = array<i64: 64, 192>}, {pipeline_mode = #tpu.pipeline_mode<synchronous>, transform_indices = @transform_9, window_bounds = array<i64: 1, 192>}, {pipeline_mode = #tpu.pipeline_mode<synchronous>, transform_indices = @transform_10, window_bounds = array<i64: 64, 64>}, {pipeline_mode = #tpu.pipeline_mode<synchronous>, transform_indices = @transform_11, window_bounds = array<i64: 1, 64>}, {pipeline_mode = #tpu.pipeline_mode<synchronous>, transform_indices = @transform_12, window_bounds = array<i64: 576, 64>}, {pipeline_mode = #tpu.pipeline_mode<synchronous>, transform_indices = @transform_13, window_bounds = array<i64: 1, 64>}, {pipeline_mode = #tpu.pipeline_mode<synchronous>, transform_indices = @transform_14, window_bounds = array<i64: 576, 64>}, {pipeline_mode = #tpu.pipeline_mode<synchronous>, transform_indices = @transform_15, window_bounds = array<i64: 1, 64>}, {pipeline_mode = #tpu.pipeline_mode<synchronous>, transform_indices = @transform_16, window_bounds = array<i64: 32, 128>}, {pipeline_mode = #tpu.pipeline_mode<synchronous>, transform_indices = @transform_17, window_bounds = array<i64: 1, 128>}, {transform_indices = @transform_18, window_bounds = array<i64: 1, 8, 8, 64>}]} {
    %cst = arith.constant 0.000000e+00 : f32
    %0 = vector.broadcast %cst : f32 to vector<10x10x64xf32>
    %c0 = arith.constant 0 : index
    %c0_0 = arith.constant 0 : index
    %c0_1 = arith.constant 0 : index
    %1 = vector.load %arg20[%c0, %c0_0, %c0_1] : memref<10x10x64xf32, #tpu.memory_space<vmem>>, vector<10x10x64xf32>
    tpu.vector_store %arg20[%c0, %c0_0, %c0_1], %0 {strides = array<i32>} : memref<10x10x64xf32, #tpu.memory_space<vmem>>, vector<10x10x64xf32>,
    %2 = arith.index_cast %arg0 : i32 to index
    %c0_2 = arith.constant 0 : index
    %3 = vector.load %arg2[%2, %c0_2] : memref<2x32xf32, #tpu.memory_space<vmem>>, vector<1x32xf32>
    %c0_3 = arith.constant 0 : index
    %c0_4 = arith.constant 0 : index
    %c0_5 = arith.constant 0 : index
    %c0_6 = arith.constant 0 : index
    %4 = vector.load %arg1[%c0_3, %c0_4, %c0_5, %c0_6] : memref<1x8x8x64xf32, #tpu.memory_space<vmem>>, vector<1x8x8x64xf32>
    %5 = vector.shape_cast %4 : vector<1x8x8x64xf32> to vector<8x8x64xf32>
    %6 = vector.shape_cast %5 : vector<8x8x64xf32> to vector<64x64xf32>
    %c0_7 = arith.constant 0 : index
    %c0_8 = arith.constant 0 : index
    %7 = vector.load %arg7[%c0_7, %c0_8] : memref<32x128xf32, #tpu.memory_space<vmem>>, vector<32x128xf32>
    %cst_9 = arith.constant dense<0.000000e+00> : vector<1x128xf32>
    %8 = tpu.matmul %3, %7, %cst_9 {dimension_numbers = #tpu.dot_dimension_numbers<[1], [0], [0], [1], [0, 0, 1, 1], [], []>} : vector<1x32xf32>, vector<32x128xf32>, vector<1x128xf32> -> vector<1x128xf32>
    %c0_10 = arith.constant 0 : index
    %c0_11 = arith.constant 0 : index
    %9 = vector.load %arg8[%c0_10, %c0_11] : memref<1x128xf32, #tpu.memory_space<vmem>>, vector<1x128xf32>
    %10 = vector.shape_cast %9 : vector<1x128xf32> to vector<128xf32>
    %11 = vector.shape_cast %10 : vector<128xf32> to vector<1x128xf32>
    %12 = arith.addf %8, %11 : vector<1x128xf32>
    %13 = vector.extract_strided_slice %12 {offsets = [0, 0], sizes = [1, 64], strides = [1, 1]} : vector<1x128xf32> to vector<1x64xf32>
    %14 = vector.extract_strided_slice %12 {offsets = [0, 64], sizes = [1, 64], strides = [1, 1]} : vector<1x128xf32> to vector<1x64xf32>
    %15 = arith.negf %6 : vector<64x64xf32>
    %16 = math.exp %15 : vector<64x64xf32>
    %cst_12 = arith.constant 1.000000e+00 : f32
    %17 = vector.broadcast %cst_12 : f32 to vector<64x64xf32>
    %18 = arith.addf %17, %16 : vector<64x64xf32>
    %19 = arith.divf %17, %18 : vector<64x64xf32>
    %20 = arith.mulf %6, %19 : vector<64x64xf32>
    %21 = vector.shape_cast %20 : vector<64x64xf32> to vector<8x8x64xf32>
    %c1 = arith.constant 1 : index
    %c1_13 = arith.constant 1 : index
    %c0_14 = arith.constant 0 : index
    %22 = vector.load %arg20[%c1, %c1_13, %c0_14] : memref<10x10x64xf32, #tpu.memory_space<vmem>>, vector<8x8x64xf32>
    tpu.vector_store %arg20[%c1, %c1_13, %c0_14], %21 {strides = array<i32>} : memref<10x10x64xf32, #tpu.memory_space<vmem>>, vector<8x8x64xf32>,
    %c0_15 = arith.constant 0 : index
    %c0_16 = arith.constant 0 : index
    %c0_17 = arith.constant 0 : index
    %23 = vector.load %arg20[%c0_15, %c0_16, %c0_17] : memref<10x10x64xf32, #tpu.memory_space<vmem>>, vector<8x8x64xf32>
    %24 = vector.shape_cast %23 : vector<8x8x64xf32> to vector<64x64xf32>
    %c0_18 = arith.constant 0 : index
    %c1_19 = arith.constant 1 : index
    %c0_20 = arith.constant 0 : index
    %25 = vector.load %arg20[%c0_18, %c1_19, %c0_20] : memref<10x10x64xf32, #tpu.memory_space<vmem>>, vector<8x8x64xf32>
    %26 = vector.shape_cast %25 : vector<8x8x64xf32> to vector<64x64xf32>
    %27 = tpu.concatenate %24, %26 in 1 : vector<64x64xf32>, vector<64x64xf32> -> vector<64x128xf32>
    %28 = arith.truncf %27 : vector<64x128xf32> to vector<64x128xbf16>
    %c0_21 = arith.constant 0 : index
    %c0_22 = arith.constant 0 : index
    %29 = vector.load %arg21[%c0_21, %c0_22] : memref<64x576xbf16, #tpu.memory_space<vmem>>, vector<64x128xbf16>
    tpu.vector_store %arg21[%c0_21, %c0_22], %28 {strides = array<i32>} : memref<64x576xbf16, #tpu.memory_space<vmem>>, vector<64x128xbf16>,
    %c0_23 = arith.constant 0 : index
    %c2 = arith.constant 2 : index
    %c0_24 = arith.constant 0 : index
    %30 = vector.load %arg20[%c0_23, %c2, %c0_24] : memref<10x10x64xf32, #tpu.memory_space<vmem>>, vector<8x8x64xf32>
    %31 = vector.shape_cast %30 : vector<8x8x64xf32> to vector<64x64xf32>
    %c1_25 = arith.constant 1 : index
    %c0_26 = arith.constant 0 : index
    %c0_27 = arith.constant 0 : index
    %32 = vector.load %arg20[%c1_25, %c0_26, %c0_27] : memref<10x10x64xf32, #tpu.memory_space<vmem>>, vector<8x8x64xf32>
    %33 = vector.shape_cast %32 : vector<8x8x64xf32> to vector<64x64xf32>
    %34 = tpu.concatenate %31, %33 in 1 : vector<64x64xf32>, vector<64x64xf32> -> vector<64x128xf32>
    %35 = arith.truncf %34 : vector<64x128xf32> to vector<64x128xbf16>
    %c0_28 = arith.constant 0 : index
    %c128 = arith.constant 128 : index
    %36 = vector.load %arg21[%c0_28, %c128] : memref<64x576xbf16, #tpu.memory_space<vmem>>, vector<64x128xbf16>
    tpu.vector_store %arg21[%c0_28, %c128], %35 {strides = array<i32>} : memref<64x576xbf16, #tpu.memory_space<vmem>>, vector<64x128xbf16>,
    %c1_29 = arith.constant 1 : index
    %c1_30 = arith.constant 1 : index
    %c0_31 = arith.constant 0 : index
    %37 = vector.load %arg20[%c1_29, %c1_30, %c0_31] : memref<10x10x64xf32, #tpu.memory_space<vmem>>, vector<8x8x64xf32>
    %38 = vector.shape_cast %37 : vector<8x8x64xf32> to vector<64x64xf32>
    %c1_32 = arith.constant 1 : index
    %c2_33 = arith.constant 2 : index
    %c0_34 = arith.constant 0 : index
    %39 = vector.load %arg20[%c1_32, %c2_33, %c0_34] : memref<10x10x64xf32, #tpu.memory_space<vmem>>, vector<8x8x64xf32>
    %40 = vector.shape_cast %39 : vector<8x8x64xf32> to vector<64x64xf32>
    %41 = tpu.concatenate %38, %40 in 1 : vector<64x64xf32>, vector<64x64xf32> -> vector<64x128xf32>
    %42 = arith.truncf %41 : vector<64x128xf32> to vector<64x128xbf16>
    %c0_35 = arith.constant 0 : index
    %c256 = arith.constant 256 : index
    %43 = vector.load %arg21[%c0_35, %c256] : memref<64x576xbf16, #tpu.memory_space<vmem>>, vector<64x128xbf16>
    tpu.vector_store %arg21[%c0_35, %c256], %42 {strides = array<i32>} : memref<64x576xbf16, #tpu.memory_space<vmem>>, vector<64x128xbf16>,
    %c2_36 = arith.constant 2 : index
    %c0_37 = arith.constant 0 : index
    %c0_38 = arith.constant 0 : index
    %44 = vector.load %arg20[%c2_36, %c0_37, %c0_38] : memref<10x10x64xf32, #tpu.memory_space<vmem>>, vector<8x8x64xf32>
    %45 = vector.shape_cast %44 : vector<8x8x64xf32> to vector<64x64xf32>
    %c2_39 = arith.constant 2 : index
    %c1_40 = arith.constant 1 : index
    %c0_41 = arith.constant 0 : index
    %46 = vector.load %arg20[%c2_39, %c1_40, %c0_41] : memref<10x10x64xf32, #tpu.memory_space<vmem>>, vector<8x8x64xf32>
    %47 = vector.shape_cast %46 : vector<8x8x64xf32> to vector<64x64xf32>
    %48 = tpu.concatenate %45, %47 in 1 : vector<64x64xf32>, vector<64x64xf32> -> vector<64x128xf32>
    %49 = arith.truncf %48 : vector<64x128xf32> to vector<64x128xbf16>
    %c0_42 = arith.constant 0 : index
    %c384 = arith.constant 384 : index
    %50 = vector.load %arg21[%c0_42, %c384] : memref<64x576xbf16, #tpu.memory_space<vmem>>, vector<64x128xbf16>
    tpu.vector_store %arg21[%c0_42, %c384], %49 {strides = array<i32>} : memref<64x576xbf16, #tpu.memory_space<vmem>>, vector<64x128xbf16>,
    %c2_43 = arith.constant 2 : index
    %c2_44 = arith.constant 2 : index
    %c0_45 = arith.constant 0 : index
    %51 = vector.load %arg20[%c2_43, %c2_44, %c0_45] : memref<10x10x64xf32, #tpu.memory_space<vmem>>, vector<8x8x64xf32>
    %52 = vector.shape_cast %51 : vector<8x8x64xf32> to vector<64x64xf32>
    %53 = arith.truncf %52 : vector<64x64xf32> to vector<64x64xbf16>
    %c0_46 = arith.constant 0 : index
    %c512 = arith.constant 512 : index
    %54 = vector.load %arg21[%c0_46, %c512] : memref<64x576xbf16, #tpu.memory_space<vmem>>, vector<64x64xbf16>
    tpu.vector_store %arg21[%c0_46, %c512], %53 {strides = array<i32>} : memref<64x576xbf16, #tpu.memory_space<vmem>>, vector<64x64xbf16>,
    %c0_47 = arith.constant 0 : index
    %c0_48 = arith.constant 0 : index
    %55 = vector.load %arg21[%c0_47, %c0_48] : memref<64x576xbf16, #tpu.memory_space<vmem>>, vector<64x576xbf16>
    %c0_49 = arith.constant 0 : index
    %c0_50 = arith.constant 0 : index
    %56 = vector.load %arg3[%c0_49, %c0_50] : memref<576x64xbf16, #tpu.memory_space<vmem>>, vector<576x64xbf16>
    %cst_51 = arith.constant dense<0.000000e+00> : vector<64x64xf32>
    %57 = tpu.matmul %55, %56, %cst_51 {dimension_numbers = #tpu.dot_dimension_numbers<[1], [0], [0], [1], [0, 0, 1, 1], [], []>} : vector<64x576xbf16>, vector<576x64xbf16>, vector<64x64xf32> -> vector<64x64xf32>
    %c0_52 = arith.constant 0 : index
    %c0_53 = arith.constant 0 : index
    %58 = vector.load %arg4[%c0_52, %c0_53] : memref<1x64xf32, #tpu.memory_space<vmem>>, vector<1x64xf32>
    %59 = vector.shape_cast %58 : vector<1x64xf32> to vector<64xf32>
    %60 = vector.shape_cast %59 : vector<64xf32> to vector<1x64xf32>
    %61 = vector.broadcast %60 : vector<1x64xf32> to vector<64x64xf32>
    %62 = arith.addf %57, %61 : vector<64x64xf32>
    %63 = vector.broadcast %13 : vector<1x64xf32> to vector<64x64xf32>
    %64 = arith.mulf %63, %62 : vector<64x64xf32>
    %65 = vector.broadcast %14 : vector<1x64xf32> to vector<64x64xf32>
    %66 = arith.addf %64, %65 : vector<64x64xf32>
    %67 = arith.negf %66 : vector<64x64xf32>
    %68 = math.exp %67 : vector<64x64xf32>
    %cst_54 = arith.constant 1.000000e+00 : f32
    %69 = vector.broadcast %cst_54 : f32 to vector<64x64xf32>
    %70 = arith.addf %69, %68 : vector<64x64xf32>
    %71 = arith.divf %69, %70 : vector<64x64xf32>
    %72 = arith.mulf %66, %71 : vector<64x64xf32>
    %73 = vector.shape_cast %72 : vector<64x64xf32> to vector<8x8x64xf32>
    %c1_55 = arith.constant 1 : index
    %c1_56 = arith.constant 1 : index
    %c0_57 = arith.constant 0 : index
    %74 = vector.load %arg20[%c1_55, %c1_56, %c0_57] : memref<10x10x64xf32, #tpu.memory_space<vmem>>, vector<8x8x64xf32>
    tpu.vector_store %arg20[%c1_55, %c1_56, %c0_57], %73 {strides = array<i32>} : memref<10x10x64xf32, #tpu.memory_space<vmem>>, vector<8x8x64xf32>,
    %c0_58 = arith.constant 0 : index
    %c0_59 = arith.constant 0 : index
    %c0_60 = arith.constant 0 : index
    %75 = vector.load %arg20[%c0_58, %c0_59, %c0_60] : memref<10x10x64xf32, #tpu.memory_space<vmem>>, vector<8x8x64xf32>
    %76 = vector.shape_cast %75 : vector<8x8x64xf32> to vector<64x64xf32>
    %c0_61 = arith.constant 0 : index
    %c1_62 = arith.constant 1 : index
    %c0_63 = arith.constant 0 : index
    %77 = vector.load %arg20[%c0_61, %c1_62, %c0_63] : memref<10x10x64xf32, #tpu.memory_space<vmem>>, vector<8x8x64xf32>
    %78 = vector.shape_cast %77 : vector<8x8x64xf32> to vector<64x64xf32>
    %79 = tpu.concatenate %76, %78 in 1 : vector<64x64xf32>, vector<64x64xf32> -> vector<64x128xf32>
    %80 = arith.truncf %79 : vector<64x128xf32> to vector<64x128xbf16>
    %c0_64 = arith.constant 0 : index
    %c0_65 = arith.constant 0 : index
    %81 = vector.load %arg21[%c0_64, %c0_65] : memref<64x576xbf16, #tpu.memory_space<vmem>>, vector<64x128xbf16>
    tpu.vector_store %arg21[%c0_64, %c0_65], %80 {strides = array<i32>} : memref<64x576xbf16, #tpu.memory_space<vmem>>, vector<64x128xbf16>,
    %c0_66 = arith.constant 0 : index
    %c2_67 = arith.constant 2 : index
    %c0_68 = arith.constant 0 : index
    %82 = vector.load %arg20[%c0_66, %c2_67, %c0_68] : memref<10x10x64xf32, #tpu.memory_space<vmem>>, vector<8x8x64xf32>
    %83 = vector.shape_cast %82 : vector<8x8x64xf32> to vector<64x64xf32>
    %c1_69 = arith.constant 1 : index
    %c0_70 = arith.constant 0 : index
    %c0_71 = arith.constant 0 : index
    %84 = vector.load %arg20[%c1_69, %c0_70, %c0_71] : memref<10x10x64xf32, #tpu.memory_space<vmem>>, vector<8x8x64xf32>
    %85 = vector.shape_cast %84 : vector<8x8x64xf32> to vector<64x64xf32>
    %86 = tpu.concatenate %83, %85 in 1 : vector<64x64xf32>, vector<64x64xf32> -> vector<64x128xf32>
    %87 = arith.truncf %86 : vector<64x128xf32> to vector<64x128xbf16>
    %c0_72 = arith.constant 0 : index
    %c128_73 = arith.constant 128 : index
    %88 = vector.load %arg21[%c0_72, %c128_73] : memref<64x576xbf16, #tpu.memory_space<vmem>>, vector<64x128xbf16>
    tpu.vector_store %arg21[%c0_72, %c128_73], %87 {strides = array<i32>} : memref<64x576xbf16, #tpu.memory_space<vmem>>, vector<64x128xbf16>,
    %c1_74 = arith.constant 1 : index
    %c1_75 = arith.constant 1 : index
    %c0_76 = arith.constant 0 : index
    %89 = vector.load %arg20[%c1_74, %c1_75, %c0_76] : memref<10x10x64xf32, #tpu.memory_space<vmem>>, vector<8x8x64xf32>
    %90 = vector.shape_cast %89 : vector<8x8x64xf32> to vector<64x64xf32>
    %c1_77 = arith.constant 1 : index
    %c2_78 = arith.constant 2 : index
    %c0_79 = arith.constant 0 : index
    %91 = vector.load %arg20[%c1_77, %c2_78, %c0_79] : memref<10x10x64xf32, #tpu.memory_space<vmem>>, vector<8x8x64xf32>
    %92 = vector.shape_cast %91 : vector<8x8x64xf32> to vector<64x64xf32>
    %93 = tpu.concatenate %90, %92 in 1 : vector<64x64xf32>, vector<64x64xf32> -> vector<64x128xf32>
    %94 = arith.truncf %93 : vector<64x128xf32> to vector<64x128xbf16>
    %c0_80 = arith.constant 0 : index
    %c256_81 = arith.constant 256 : index
    %95 = vector.load %arg21[%c0_80, %c256_81] : memref<64x576xbf16, #tpu.memory_space<vmem>>, vector<64x128xbf16>
    tpu.vector_store %arg21[%c0_80, %c256_81], %94 {strides = array<i32>} : memref<64x576xbf16, #tpu.memory_space<vmem>>, vector<64x128xbf16>,
    %c2_82 = arith.constant 2 : index
    %c0_83 = arith.constant 0 : index
    %c0_84 = arith.constant 0 : index
    %96 = vector.load %arg20[%c2_82, %c0_83, %c0_84] : memref<10x10x64xf32, #tpu.memory_space<vmem>>, vector<8x8x64xf32>
    %97 = vector.shape_cast %96 : vector<8x8x64xf32> to vector<64x64xf32>
    %c2_85 = arith.constant 2 : index
    %c1_86 = arith.constant 1 : index
    %c0_87 = arith.constant 0 : index
    %98 = vector.load %arg20[%c2_85, %c1_86, %c0_87] : memref<10x10x64xf32, #tpu.memory_space<vmem>>, vector<8x8x64xf32>
    %99 = vector.shape_cast %98 : vector<8x8x64xf32> to vector<64x64xf32>
    %100 = tpu.concatenate %97, %99 in 1 : vector<64x64xf32>, vector<64x64xf32> -> vector<64x128xf32>
    %101 = arith.truncf %100 : vector<64x128xf32> to vector<64x128xbf16>
    %c0_88 = arith.constant 0 : index
    %c384_89 = arith.constant 384 : index
    %102 = vector.load %arg21[%c0_88, %c384_89] : memref<64x576xbf16, #tpu.memory_space<vmem>>, vector<64x128xbf16>
    tpu.vector_store %arg21[%c0_88, %c384_89], %101 {strides = array<i32>} : memref<64x576xbf16, #tpu.memory_space<vmem>>, vector<64x128xbf16>,
    %c2_90 = arith.constant 2 : index
    %c2_91 = arith.constant 2 : index
    %c0_92 = arith.constant 0 : index
    %103 = vector.load %arg20[%c2_90, %c2_91, %c0_92] : memref<10x10x64xf32, #tpu.memory_space<vmem>>, vector<8x8x64xf32>
    %104 = vector.shape_cast %103 : vector<8x8x64xf32> to vector<64x64xf32>
    %105 = arith.truncf %104 : vector<64x64xf32> to vector<64x64xbf16>
    %c0_93 = arith.constant 0 : index
    %c512_94 = arith.constant 512 : index
    %106 = vector.load %arg21[%c0_93, %c512_94] : memref<64x576xbf16, #tpu.memory_space<vmem>>, vector<64x64xbf16>
    tpu.vector_store %arg21[%c0_93, %c512_94], %105 {strides = array<i32>} : memref<64x576xbf16, #tpu.memory_space<vmem>>, vector<64x64xbf16>,
    %c0_95 = arith.constant 0 : index
    %c0_96 = arith.constant 0 : index
    %107 = vector.load %arg21[%c0_95, %c0_96] : memref<64x576xbf16, #tpu.memory_space<vmem>>, vector<64x576xbf16>
    %c0_97 = arith.constant 0 : index
    %c0_98 = arith.constant 0 : index
    %108 = vector.load %arg5[%c0_97, %c0_98] : memref<576x64xbf16, #tpu.memory_space<vmem>>, vector<576x64xbf16>
    %cst_99 = arith.constant dense<0.000000e+00> : vector<64x64xf32>
    %109 = tpu.matmul %107, %108, %cst_99 {dimension_numbers = #tpu.dot_dimension_numbers<[1], [0], [0], [1], [0, 0, 1, 1], [], []>} : vector<64x576xbf16>, vector<576x64xbf16>, vector<64x64xf32> -> vector<64x64xf32>
    %c0_100 = arith.constant 0 : index
    %c0_101 = arith.constant 0 : index
    %110 = vector.load %arg6[%c0_100, %c0_101] : memref<1x64xf32, #tpu.memory_space<vmem>>, vector<1x64xf32>
    %111 = vector.shape_cast %110 : vector<1x64xf32> to vector<64xf32>
    %112 = vector.shape_cast %111 : vector<64xf32> to vector<1x64xf32>
    %113 = vector.broadcast %112 : vector<1x64xf32> to vector<64x64xf32>
    %114 = arith.addf %109, %113 : vector<64x64xf32>
    %115 = arith.addf %6, %114 : vector<64x64xf32>
    %116 = arith.truncf %115 : vector<64x64xf32> to vector<64x64xbf16>
    %c0_102 = arith.constant 0 : index
    %c0_103 = arith.constant 0 : index
    %117 = vector.load %arg9[%c0_102, %c0_103] : memref<64x192xbf16, #tpu.memory_space<vmem>>, vector<64x192xbf16>
    %cst_104 = arith.constant dense<0.000000e+00> : vector<64x192xf32>
    %118 = tpu.matmul %116, %117, %cst_104 {dimension_numbers = #tpu.dot_dimension_numbers<[1], [0], [0], [1], [0, 0, 1, 1], [], []>} : vector<64x64xbf16>, vector<64x192xbf16>, vector<64x192xf32> -> vector<64x192xf32>
    %c0_105 = arith.constant 0 : index
    %c0_106 = arith.constant 0 : index
    %119 = vector.load %arg10[%c0_105, %c0_106] : memref<1x192xf32, #tpu.memory_space<vmem>>, vector<1x192xf32>
    %120 = vector.shape_cast %119 : vector<1x192xf32> to vector<192xf32>
    %121 = vector.shape_cast %120 : vector<192xf32> to vector<1x192xf32>
    %122 = vector.broadcast %121 : vector<1x192xf32> to vector<64x192xf32>
    %123 = arith.addf %118, %122 : vector<64x192xf32>
    %124 = vector.extract_strided_slice %123 {offsets = [0, 0], sizes = [64, 64], strides = [1, 1]} : vector<64x192xf32> to vector<64x64xf32>
    %cst_107 = arith.constant 0.353553385 : f32
    %125 = vector.broadcast %cst_107 : f32 to vector<64x64xf32>
    %126 = arith.mulf %124, %125 : vector<64x64xf32>
    %127 = vector.extract_strided_slice %123 {offsets = [0, 64], sizes = [64, 64], strides = [1, 1]} : vector<64x192xf32> to vector<64x64xf32>
    %128 = vector.extract_strided_slice %123 {offsets = [0, 128], sizes = [64, 64], strides = [1, 1]} : vector<64x192xf32> to vector<64x64xf32>
    %129 = vector.extract_strided_slice %126 {offsets = [0, 0], sizes = [64, 8], strides = [1, 1]} : vector<64x64xf32> to vector<64x8xf32>
    %130 = vector.extract_strided_slice %126 {offsets = [0, 8], sizes = [64, 8], strides = [1, 1]} : vector<64x64xf32> to vector<64x8xf32>
    %131 = vector.extract_strided_slice %126 {offsets = [0, 16], sizes = [64, 8], strides = [1, 1]} : vector<64x64xf32> to vector<64x8xf32>
    %132 = vector.extract_strided_slice %126 {offsets = [0, 24], sizes = [64, 8], strides = [1, 1]} : vector<64x64xf32> to vector<64x8xf32>
    %133 = vector.extract_strided_slice %126 {offsets = [0, 32], sizes = [64, 8], strides = [1, 1]} : vector<64x64xf32> to vector<64x8xf32>
    %134 = vector.extract_strided_slice %126 {offsets = [0, 40], sizes = [64, 8], strides = [1, 1]} : vector<64x64xf32> to vector<64x8xf32>
    %135 = vector.extract_strided_slice %126 {offsets = [0, 48], sizes = [64, 8], strides = [1, 1]} : vector<64x64xf32> to vector<64x8xf32>
    %136 = vector.extract_strided_slice %126 {offsets = [0, 56], sizes = [64, 8], strides = [1, 1]} : vector<64x64xf32> to vector<64x8xf32>
    %137 = vector.shape_cast %129 : vector<64x8xf32> to vector<1x64x8xf32>
    %138 = vector.shape_cast %130 : vector<64x8xf32> to vector<1x64x8xf32>
    %139 = vector.shape_cast %131 : vector<64x8xf32> to vector<1x64x8xf32>
    %140 = vector.shape_cast %132 : vector<64x8xf32> to vector<1x64x8xf32>
    %141 = vector.shape_cast %133 : vector<64x8xf32> to vector<1x64x8xf32>
    %142 = vector.shape_cast %134 : vector<64x8xf32> to vector<1x64x8xf32>
    %143 = vector.shape_cast %135 : vector<64x8xf32> to vector<1x64x8xf32>
    %144 = vector.shape_cast %136 : vector<64x8xf32> to vector<1x64x8xf32>
    %145 = tpu.concatenate %137, %138, %139, %140, %141, %142, %143, %144 in 0 : vector<1x64x8xf32>, vector<1x64x8xf32>, vector<1x64x8xf32>, vector<1x64x8xf32>, vector<1x64x8xf32>, vector<1x64x8xf32>, vector<1x64x8xf32>, vector<1x64x8xf32> -> vector<8x64x8xf32>
    %146 = arith.truncf %145 : vector<8x64x8xf32> to vector<8x64x8xbf16>
    %147 = vector.extract_strided_slice %127 {offsets = [0, 0], sizes = [64, 8], strides = [1, 1]} : vector<64x64xf32> to vector<64x8xf32>
    %148 = vector.extract_strided_slice %127 {offsets = [0, 8], sizes = [64, 8], strides = [1, 1]} : vector<64x64xf32> to vector<64x8xf32>
    %149 = vector.extract_strided_slice %127 {offsets = [0, 16], sizes = [64, 8], strides = [1, 1]} : vector<64x64xf32> to vector<64x8xf32>
    %150 = vector.extract_strided_slice %127 {offsets = [0, 24], sizes = [64, 8], strides = [1, 1]} : vector<64x64xf32> to vector<64x8xf32>
    %151 = vector.extract_strided_slice %127 {offsets = [0, 32], sizes = [64, 8], strides = [1, 1]} : vector<64x64xf32> to vector<64x8xf32>
    %152 = vector.extract_strided_slice %127 {offsets = [0, 40], sizes = [64, 8], strides = [1, 1]} : vector<64x64xf32> to vector<64x8xf32>
    %153 = vector.extract_strided_slice %127 {offsets = [0, 48], sizes = [64, 8], strides = [1, 1]} : vector<64x64xf32> to vector<64x8xf32>
    %154 = vector.extract_strided_slice %127 {offsets = [0, 56], sizes = [64, 8], strides = [1, 1]} : vector<64x64xf32> to vector<64x8xf32>
    %155 = vector.shape_cast %147 : vector<64x8xf32> to vector<1x64x8xf32>
    %156 = vector.shape_cast %148 : vector<64x8xf32> to vector<1x64x8xf32>
    %157 = vector.shape_cast %149 : vector<64x8xf32> to vector<1x64x8xf32>
    %158 = vector.shape_cast %150 : vector<64x8xf32> to vector<1x64x8xf32>
    %159 = vector.shape_cast %151 : vector<64x8xf32> to vector<1x64x8xf32>
    %160 = vector.shape_cast %152 : vector<64x8xf32> to vector<1x64x8xf32>
    %161 = vector.shape_cast %153 : vector<64x8xf32> to vector<1x64x8xf32>
    %162 = vector.shape_cast %154 : vector<64x8xf32> to vector<1x64x8xf32>
    %163 = tpu.concatenate %155, %156, %157, %158, %159, %160, %161, %162 in 0 : vector<1x64x8xf32>, vector<1x64x8xf32>, vector<1x64x8xf32>, vector<1x64x8xf32>, vector<1x64x8xf32>, vector<1x64x8xf32>, vector<1x64x8xf32>, vector<1x64x8xf32> -> vector<8x64x8xf32>
    %164 = arith.truncf %163 : vector<8x64x8xf32> to vector<8x64x8xbf16>
    %165 = vector.extract_strided_slice %128 {offsets = [0, 0], sizes = [64, 8], strides = [1, 1]} : vector<64x64xf32> to vector<64x8xf32>
    %166 = vector.extract_strided_slice %128 {offsets = [0, 8], sizes = [64, 8], strides = [1, 1]} : vector<64x64xf32> to vector<64x8xf32>
    %167 = vector.extract_strided_slice %128 {offsets = [0, 16], sizes = [64, 8], strides = [1, 1]} : vector<64x64xf32> to vector<64x8xf32>
    %168 = vector.extract_strided_slice %128 {offsets = [0, 24], sizes = [64, 8], strides = [1, 1]} : vector<64x64xf32> to vector<64x8xf32>
    %169 = vector.extract_strided_slice %128 {offsets = [0, 32], sizes = [64, 8], strides = [1, 1]} : vector<64x64xf32> to vector<64x8xf32>
    %170 = vector.extract_strided_slice %128 {offsets = [0, 40], sizes = [64, 8], strides = [1, 1]} : vector<64x64xf32> to vector<64x8xf32>
    %171 = vector.extract_strided_slice %128 {offsets = [0, 48], sizes = [64, 8], strides = [1, 1]} : vector<64x64xf32> to vector<64x8xf32>
    %172 = vector.extract_strided_slice %128 {offsets = [0, 56], sizes = [64, 8], strides = [1, 1]} : vector<64x64xf32> to vector<64x8xf32>
    %173 = vector.shape_cast %165 : vector<64x8xf32> to vector<1x64x8xf32>
    %174 = vector.shape_cast %166 : vector<64x8xf32> to vector<1x64x8xf32>
    %175 = vector.shape_cast %167 : vector<64x8xf32> to vector<1x64x8xf32>
    %176 = vector.shape_cast %168 : vector<64x8xf32> to vector<1x64x8xf32>
    %177 = vector.shape_cast %169 : vector<64x8xf32> to vector<1x64x8xf32>
    %178 = vector.shape_cast %170 : vector<64x8xf32> to vector<1x64x8xf32>
    %179 = vector.shape_cast %171 : vector<64x8xf32> to vector<1x64x8xf32>
    %180 = vector.shape_cast %172 : vector<64x8xf32> to vector<1x64x8xf32>
    %181 = tpu.concatenate %173, %174, %175, %176, %177, %178, %179, %180 in 0 : vector<1x64x8xf32>, vector<1x64x8xf32>, vector<1x64x8xf32>, vector<1x64x8xf32>, vector<1x64x8xf32>, vector<1x64x8xf32>, vector<1x64x8xf32>, vector<1x64x8xf32> -> vector<8x64x8xf32>
    %182 = arith.truncf %181 : vector<8x64x8xf32> to vector<8x64x8xbf16>
    "tpu.trace_start"() <{level = 10 : i32, message = "hqd,hkd->hqk"}> : () -> ()
    %cst_108 = arith.constant dense<0.000000e+00> : vector<8x64x64xf32>
    %183 = tpu.matmul %146, %164, %cst_108 {dimension_numbers = #tpu.dot_dimension_numbers<[2], [2], [1], [1], [0, 0, 0, 1, 1, 1], [0], [0]>} : vector<8x64x8xbf16>, vector<8x64x8xbf16>, vector<8x64x64xf32> -> vector<8x64x64xf32>
    "tpu.trace_stop"() : () -> ()
    %cst_109 = arith.constant dense<0xFF800000> : vector<8x64xf32>
    %184 = vector.multi_reduction <maximumf>, %183, %cst_109 [2] : vector<8x64x64xf32> to vector<8x64xf32>
    %185 = vector.shape_cast %184 : vector<8x64xf32> to vector<8x64x1xf32>
    %186 = vector.broadcast %185 : vector<8x64x1xf32> to vector<8x64x64xf32>
    %187 = arith.subf %183, %186 : vector<8x64x64xf32>
    %188 = math.exp %187 : vector<8x64x64xf32>
    %cst_110 = arith.constant dense<0.000000e+00> : vector<8x64xf32>
    %189 = vector.multi_reduction <add>, %188, %cst_110 [2] : vector<8x64x64xf32> to vector<8x64xf32>
    %190 = vector.shape_cast %189 : vector<8x64xf32> to vector<8x64x1xf32>
    %191 = tpu.reciprocal %190 {approx = true} : vector<8x64x1xf32> -> vector<8x64x1xf32>
    %192 = vector.broadcast %191 : vector<8x64x1xf32> to vector<8x64x64xf32>
    %193 = arith.mulf %188, %192 : vector<8x64x64xf32>
    %194 = arith.truncf %193 : vector<8x64x64xf32> to vector<8x64x64xbf16>
    "tpu.trace_start"() <{level = 10 : i32, message = "hqk,hkd->hqd"}> : () -> ()
    %cst_111 = arith.constant dense<0.000000e+00> : vector<8x64x8xf32>
    %195 = tpu.matmul %194, %182, %cst_111 {dimension_numbers = #tpu.dot_dimension_numbers<[2], [1], [1], [2], [0, 0, 0, 1, 1, 2], [0], [0]>} : vector<8x64x64xbf16>, vector<8x64x8xbf16>, vector<8x64x8xf32> -> vector<8x64x8xf32>
    "tpu.trace_stop"() : () -> ()
    %196 = vector.extract_strided_slice %195 {offsets = [0, 0, 0], sizes = [1, 64, 8], strides = [1, 1, 1]} : vector<8x64x8xf32> to vector<1x64x8xf32>
    %197 = vector.shape_cast %196 : vector<1x64x8xf32> to vector<64x8xf32>
    %198 = vector.extract_strided_slice %195 {offsets = [1, 0, 0], sizes = [1, 64, 8], strides = [1, 1, 1]} : vector<8x64x8xf32> to vector<1x64x8xf32>
    %199 = vector.shape_cast %198 : vector<1x64x8xf32> to vector<64x8xf32>
    %200 = vector.extract_strided_slice %195 {offsets = [2, 0, 0], sizes = [1, 64, 8], strides = [1, 1, 1]} : vector<8x64x8xf32> to vector<1x64x8xf32>
    %201 = vector.shape_cast %200 : vector<1x64x8xf32> to vector<64x8xf32>
    %202 = vector.extract_strided_slice %195 {offsets = [3, 0, 0], sizes = [1, 64, 8], strides = [1, 1, 1]} : vector<8x64x8xf32> to vector<1x64x8xf32>
    %203 = vector.shape_cast %202 : vector<1x64x8xf32> to vector<64x8xf32>
    %204 = vector.extract_strided_slice %195 {offsets = [4, 0, 0], sizes = [1, 64, 8], strides = [1, 1, 1]} : vector<8x64x8xf32> to vector<1x64x8xf32>
    %205 = vector.shape_cast %204 : vector<1x64x8xf32> to vector<64x8xf32>
    %206 = vector.extract_strided_slice %195 {offsets = [5, 0, 0], sizes = [1, 64, 8], strides = [1, 1, 1]} : vector<8x64x8xf32> to vector<1x64x8xf32>
    %207 = vector.shape_cast %206 : vector<1x64x8xf32> to vector<64x8xf32>
    %208 = vector.extract_strided_slice %195 {offsets = [6, 0, 0], sizes = [1, 64, 8], strides = [1, 1, 1]} : vector<8x64x8xf32> to vector<1x64x8xf32>
    %209 = vector.shape_cast %208 : vector<1x64x8xf32> to vector<64x8xf32>
    %210 = vector.extract_strided_slice %195 {offsets = [7, 0, 0], sizes = [1, 64, 8], strides = [1, 1, 1]} : vector<8x64x8xf32> to vector<1x64x8xf32>
    %211 = vector.shape_cast %210 : vector<1x64x8xf32> to vector<64x8xf32>
    %212 = tpu.concatenate %197, %199, %201, %203, %205, %207, %209, %211 in 1 : vector<64x8xf32>, vector<64x8xf32>, vector<64x8xf32>, vector<64x8xf32>, vector<64x8xf32>, vector<64x8xf32>, vector<64x8xf32>, vector<64x8xf32> -> vector<64x64xf32>
    %213 = arith.truncf %212 : vector<64x64xf32> to vector<64x64xbf16>
    %c0_112 = arith.constant 0 : index
    %c0_113 = arith.constant 0 : index
    %214 = vector.load %arg11[%c0_112, %c0_113] : memref<64x64xbf16, #tpu.memory_space<vmem>>, vector<64x64xbf16>
    %cst_114 = arith.constant dense<0.000000e+00> : vector<64x64xf32>
    %215 = tpu.matmul %213, %214, %cst_114 {dimension_numbers = #tpu.dot_dimension_numbers<[1], [0], [0], [1], [0, 0, 1, 1], [], []>} : vector<64x64xbf16>, vector<64x64xbf16>, vector<64x64xf32> -> vector<64x64xf32>
    %c0_115 = arith.constant 0 : index
    %c0_116 = arith.constant 0 : index
    %216 = vector.load %arg12[%c0_115, %c0_116] : memref<1x64xf32, #tpu.memory_space<vmem>>, vector<1x64xf32>
    %217 = vector.shape_cast %216 : vector<1x64xf32> to vector<64xf32>
    %218 = vector.shape_cast %217 : vector<64xf32> to vector<1x64xf32>
    %219 = vector.broadcast %218 : vector<1x64xf32> to vector<64x64xf32>
    %220 = arith.addf %215, %219 : vector<64x64xf32>
    %221 = arith.addf %115, %220 : vector<64x64xf32>
    %c0_117 = arith.constant 0 : index
    %c0_118 = arith.constant 0 : index
    %222 = vector.load %arg17[%c0_117, %c0_118] : memref<32x128xf32, #tpu.memory_space<vmem>>, vector<32x128xf32>
    %cst_119 = arith.constant dense<0.000000e+00> : vector<1x128xf32>
    %223 = tpu.matmul %3, %222, %cst_119 {dimension_numbers = #tpu.dot_dimension_numbers<[1], [0], [0], [1], [0, 0, 1, 1], [], []>} : vector<1x32xf32>, vector<32x128xf32>, vector<1x128xf32> -> vector<1x128xf32>
    %c0_120 = arith.constant 0 : index
    %c0_121 = arith.constant 0 : index
    %224 = vector.load %arg18[%c0_120, %c0_121] : memref<1x128xf32, #tpu.memory_space<vmem>>, vector<1x128xf32>
    %225 = vector.shape_cast %224 : vector<1x128xf32> to vector<128xf32>
    %226 = vector.shape_cast %225 : vector<128xf32> to vector<1x128xf32>
    %227 = arith.addf %223, %226 : vector<1x128xf32>
    %228 = vector.extract_strided_slice %227 {offsets = [0, 0], sizes = [1, 64], strides = [1, 1]} : vector<1x128xf32> to vector<1x64xf32>
    %229 = vector.extract_strided_slice %227 {offsets = [0, 64], sizes = [1, 64], strides = [1, 1]} : vector<1x128xf32> to vector<1x64xf32>
    %230 = arith.negf %221 : vector<64x64xf32>
    %231 = math.exp %230 : vector<64x64xf32>
    %cst_122 = arith.constant 1.000000e+00 : f32
    %232 = vector.broadcast %cst_122 : f32 to vector<64x64xf32>
    %233 = arith.addf %232, %231 : vector<64x64xf32>
    %234 = arith.divf %232, %233 : vector<64x64xf32>
    %235 = arith.mulf %221, %234 : vector<64x64xf32>
    %236 = vector.shape_cast %235 : vector<64x64xf32> to vector<8x8x64xf32>
    %c1_123 = arith.constant 1 : index
    %c1_124 = arith.constant 1 : index
    %c0_125 = arith.constant 0 : index
    %237 = vector.load %arg20[%c1_123, %c1_124, %c0_125] : memref<10x10x64xf32, #tpu.memory_space<vmem>>, vector<8x8x64xf32>
    tpu.vector_store %arg20[%c1_123, %c1_124, %c0_125], %236 {strides = array<i32>} : memref<10x10x64xf32, #tpu.memory_space<vmem>>, vector<8x8x64xf32>,
    %c0_126 = arith.constant 0 : index
    %c0_127 = arith.constant 0 : index
    %c0_128 = arith.constant 0 : index
    %238 = vector.load %arg20[%c0_126, %c0_127, %c0_128] : memref<10x10x64xf32, #tpu.memory_space<vmem>>, vector<8x8x64xf32>
    %239 = vector.shape_cast %238 : vector<8x8x64xf32> to vector<64x64xf32>
    %c0_129 = arith.constant 0 : index
    %c1_130 = arith.constant 1 : index
    %c0_131 = arith.constant 0 : index
    %240 = vector.load %arg20[%c0_129, %c1_130, %c0_131] : memref<10x10x64xf32, #tpu.memory_space<vmem>>, vector<8x8x64xf32>
    %241 = vector.shape_cast %240 : vector<8x8x64xf32> to vector<64x64xf32>
    %242 = tpu.concatenate %239, %241 in 1 : vector<64x64xf32>, vector<64x64xf32> -> vector<64x128xf32>
    %243 = arith.truncf %242 : vector<64x128xf32> to vector<64x128xbf16>
    %c0_132 = arith.constant 0 : index
    %c0_133 = arith.constant 0 : index
    %244 = vector.load %arg21[%c0_132, %c0_133] : memref<64x576xbf16, #tpu.memory_space<vmem>>, vector<64x128xbf16>
    tpu.vector_store %arg21[%c0_132, %c0_133], %243 {strides = array<i32>} : memref<64x576xbf16, #tpu.memory_space<vmem>>, vector<64x128xbf16>,
    %c0_134 = arith.constant 0 : index
    %c2_135 = arith.constant 2 : index
    %c0_136 = arith.constant 0 : index
    %245 = vector.load %arg20[%c0_134, %c2_135, %c0_136] : memref<10x10x64xf32, #tpu.memory_space<vmem>>, vector<8x8x64xf32>
    %246 = vector.shape_cast %245 : vector<8x8x64xf32> to vector<64x64xf32>
    %c1_137 = arith.constant 1 : index
    %c0_138 = arith.constant 0 : index
    %c0_139 = arith.constant 0 : index
    %247 = vector.load %arg20[%c1_137, %c0_138, %c0_139] : memref<10x10x64xf32, #tpu.memory_space<vmem>>, vector<8x8x64xf32>
    %248 = vector.shape_cast %247 : vector<8x8x64xf32> to vector<64x64xf32>
    %249 = tpu.concatenate %246, %248 in 1 : vector<64x64xf32>, vector<64x64xf32> -> vector<64x128xf32>
    %250 = arith.truncf %249 : vector<64x128xf32> to vector<64x128xbf16>
    %c0_140 = arith.constant 0 : index
    %c128_141 = arith.constant 128 : index
    %251 = vector.load %arg21[%c0_140, %c128_141] : memref<64x576xbf16, #tpu.memory_space<vmem>>, vector<64x128xbf16>
    tpu.vector_store %arg21[%c0_140, %c128_141], %250 {strides = array<i32>} : memref<64x576xbf16, #tpu.memory_space<vmem>>, vector<64x128xbf16>,
    %c1_142 = arith.constant 1 : index
    %c1_143 = arith.constant 1 : index
    %c0_144 = arith.constant 0 : index
    %252 = vector.load %arg20[%c1_142, %c1_143, %c0_144] : memref<10x10x64xf32, #tpu.memory_space<vmem>>, vector<8x8x64xf32>
    %253 = vector.shape_cast %252 : vector<8x8x64xf32> to vector<64x64xf32>
    %c1_145 = arith.constant 1 : index
    %c2_146 = arith.constant 2 : index
    %c0_147 = arith.constant 0 : index
    %254 = vector.load %arg20[%c1_145, %c2_146, %c0_147] : memref<10x10x64xf32, #tpu.memory_space<vmem>>, vector<8x8x64xf32>
    %255 = vector.shape_cast %254 : vector<8x8x64xf32> to vector<64x64xf32>
    %256 = tpu.concatenate %253, %255 in 1 : vector<64x64xf32>, vector<64x64xf32> -> vector<64x128xf32>
    %257 = arith.truncf %256 : vector<64x128xf32> to vector<64x128xbf16>
    %c0_148 = arith.constant 0 : index
    %c256_149 = arith.constant 256 : index
    %258 = vector.load %arg21[%c0_148, %c256_149] : memref<64x576xbf16, #tpu.memory_space<vmem>>, vector<64x128xbf16>
    tpu.vector_store %arg21[%c0_148, %c256_149], %257 {strides = array<i32>} : memref<64x576xbf16, #tpu.memory_space<vmem>>, vector<64x128xbf16>,
    %c2_150 = arith.constant 2 : index
    %c0_151 = arith.constant 0 : index
    %c0_152 = arith.constant 0 : index
    %259 = vector.load %arg20[%c2_150, %c0_151, %c0_152] : memref<10x10x64xf32, #tpu.memory_space<vmem>>, vector<8x8x64xf32>
    %260 = vector.shape_cast %259 : vector<8x8x64xf32> to vector<64x64xf32>
    %c2_153 = arith.constant 2 : index
    %c1_154 = arith.constant 1 : index
    %c0_155 = arith.constant 0 : index
    %261 = vector.load %arg20[%c2_153, %c1_154, %c0_155] : memref<10x10x64xf32, #tpu.memory_space<vmem>>, vector<8x8x64xf32>
    %262 = vector.shape_cast %261 : vector<8x8x64xf32> to vector<64x64xf32>
    %263 = tpu.concatenate %260, %262 in 1 : vector<64x64xf32>, vector<64x64xf32> -> vector<64x128xf32>
    %264 = arith.truncf %263 : vector<64x128xf32> to vector<64x128xbf16>
    %c0_156 = arith.constant 0 : index
    %c384_157 = arith.constant 384 : index
    %265 = vector.load %arg21[%c0_156, %c384_157] : memref<64x576xbf16, #tpu.memory_space<vmem>>, vector<64x128xbf16>
    tpu.vector_store %arg21[%c0_156, %c384_157], %264 {strides = array<i32>} : memref<64x576xbf16, #tpu.memory_space<vmem>>, vector<64x128xbf16>,
    %c2_158 = arith.constant 2 : index
    %c2_159 = arith.constant 2 : index
    %c0_160 = arith.constant 0 : index
    %266 = vector.load %arg20[%c2_158, %c2_159, %c0_160] : memref<10x10x64xf32, #tpu.memory_space<vmem>>, vector<8x8x64xf32>
    %267 = vector.shape_cast %266 : vector<8x8x64xf32> to vector<64x64xf32>
    %268 = arith.truncf %267 : vector<64x64xf32> to vector<64x64xbf16>
    %c0_161 = arith.constant 0 : index
    %c512_162 = arith.constant 512 : index
    %269 = vector.load %arg21[%c0_161, %c512_162] : memref<64x576xbf16, #tpu.memory_space<vmem>>, vector<64x64xbf16>
    tpu.vector_store %arg21[%c0_161, %c512_162], %268 {strides = array<i32>} : memref<64x576xbf16, #tpu.memory_space<vmem>>, vector<64x64xbf16>,
    %c0_163 = arith.constant 0 : index
    %c0_164 = arith.constant 0 : index
    %270 = vector.load %arg21[%c0_163, %c0_164] : memref<64x576xbf16, #tpu.memory_space<vmem>>, vector<64x576xbf16>
    %c0_165 = arith.constant 0 : index
    %c0_166 = arith.constant 0 : index
    %271 = vector.load %arg13[%c0_165, %c0_166] : memref<576x64xbf16, #tpu.memory_space<vmem>>, vector<576x64xbf16>
    %cst_167 = arith.constant dense<0.000000e+00> : vector<64x64xf32>
    %272 = tpu.matmul %270, %271, %cst_167 {dimension_numbers = #tpu.dot_dimension_numbers<[1], [0], [0], [1], [0, 0, 1, 1], [], []>} : vector<64x576xbf16>, vector<576x64xbf16>, vector<64x64xf32> -> vector<64x64xf32>
    %c0_168 = arith.constant 0 : index
    %c0_169 = arith.constant 0 : index
    %273 = vector.load %arg14[%c0_168, %c0_169] : memref<1x64xf32, #tpu.memory_space<vmem>>, vector<1x64xf32>
    %274 = vector.shape_cast %273 : vector<1x64xf32> to vector<64xf32>
    %275 = vector.shape_cast %274 : vector<64xf32> to vector<1x64xf32>
    %276 = vector.broadcast %275 : vector<1x64xf32> to vector<64x64xf32>
    %277 = arith.addf %272, %276 : vector<64x64xf32>
    %278 = vector.broadcast %228 : vector<1x64xf32> to vector<64x64xf32>
    %279 = arith.mulf %278, %277 : vector<64x64xf32>
    %280 = vector.broadcast %229 : vector<1x64xf32> to vector<64x64xf32>
    %281 = arith.addf %279, %280 : vector<64x64xf32>
    %282 = arith.negf %281 : vector<64x64xf32>
    %283 = math.exp %282 : vector<64x64xf32>
    %cst_170 = arith.constant 1.000000e+00 : f32
    %284 = vector.broadcast %cst_170 : f32 to vector<64x64xf32>
    %285 = arith.addf %284, %283 : vector<64x64xf32>
    %286 = arith.divf %284, %285 : vector<64x64xf32>
    %287 = arith.mulf %281, %286 : vector<64x64xf32>
    %288 = vector.shape_cast %287 : vector<64x64xf32> to vector<8x8x64xf32>
    %c1_171 = arith.constant 1 : index
    %c1_172 = arith.constant 1 : index
    %c0_173 = arith.constant 0 : index
    %289 = vector.load %arg20[%c1_171, %c1_172, %c0_173] : memref<10x10x64xf32, #tpu.memory_space<vmem>>, vector<8x8x64xf32>
    tpu.vector_store %arg20[%c1_171, %c1_172, %c0_173], %288 {strides = array<i32>} : memref<10x10x64xf32, #tpu.memory_space<vmem>>, vector<8x8x64xf32>,
    %c0_174 = arith.constant 0 : index
    %c0_175 = arith.constant 0 : index
    %c0_176 = arith.constant 0 : index
    %290 = vector.load %arg20[%c0_174, %c0_175, %c0_176] : memref<10x10x64xf32, #tpu.memory_space<vmem>>, vector<8x8x64xf32>
    %291 = vector.shape_cast %290 : vector<8x8x64xf32> to vector<64x64xf32>
    %c0_177 = arith.constant 0 : index
    %c1_178 = arith.constant 1 : index
    %c0_179 = arith.constant 0 : index
    %292 = vector.load %arg20[%c0_177, %c1_178, %c0_179] : memref<10x10x64xf32, #tpu.memory_space<vmem>>, vector<8x8x64xf32>
    %293 = vector.shape_cast %292 : vector<8x8x64xf32> to vector<64x64xf32>
    %294 = tpu.concatenate %291, %293 in 1 : vector<64x64xf32>, vector<64x64xf32> -> vector<64x128xf32>
    %295 = arith.truncf %294 : vector<64x128xf32> to vector<64x128xbf16>
    %c0_180 = arith.constant 0 : index
    %c0_181 = arith.constant 0 : index
    %296 = vector.load %arg21[%c0_180, %c0_181] : memref<64x576xbf16, #tpu.memory_space<vmem>>, vector<64x128xbf16>
    tpu.vector_store %arg21[%c0_180, %c0_181], %295 {strides = array<i32>} : memref<64x576xbf16, #tpu.memory_space<vmem>>, vector<64x128xbf16>,
    %c0_182 = arith.constant 0 : index
    %c2_183 = arith.constant 2 : index
    %c0_184 = arith.constant 0 : index
    %297 = vector.load %arg20[%c0_182, %c2_183, %c0_184] : memref<10x10x64xf32, #tpu.memory_space<vmem>>, vector<8x8x64xf32>
    %298 = vector.shape_cast %297 : vector<8x8x64xf32> to vector<64x64xf32>
    %c1_185 = arith.constant 1 : index
    %c0_186 = arith.constant 0 : index
    %c0_187 = arith.constant 0 : index
    %299 = vector.load %arg20[%c1_185, %c0_186, %c0_187] : memref<10x10x64xf32, #tpu.memory_space<vmem>>, vector<8x8x64xf32>
    %300 = vector.shape_cast %299 : vector<8x8x64xf32> to vector<64x64xf32>
    %301 = tpu.concatenate %298, %300 in 1 : vector<64x64xf32>, vector<64x64xf32> -> vector<64x128xf32>
    %302 = arith.truncf %301 : vector<64x128xf32> to vector<64x128xbf16>
    %c0_188 = arith.constant 0 : index
    %c128_189 = arith.constant 128 : index
    %303 = vector.load %arg21[%c0_188, %c128_189] : memref<64x576xbf16, #tpu.memory_space<vmem>>, vector<64x128xbf16>
    tpu.vector_store %arg21[%c0_188, %c128_189], %302 {strides = array<i32>} : memref<64x576xbf16, #tpu.memory_space<vmem>>, vector<64x128xbf16>,
    %c1_190 = arith.constant 1 : index
    %c1_191 = arith.constant 1 : index
    %c0_192 = arith.constant 0 : index
    %304 = vector.load %arg20[%c1_190, %c1_191, %c0_192] : memref<10x10x64xf32, #tpu.memory_space<vmem>>, vector<8x8x64xf32>
    %305 = vector.shape_cast %304 : vector<8x8x64xf32> to vector<64x64xf32>
    %c1_193 = arith.constant 1 : index
    %c2_194 = arith.constant 2 : index
    %c0_195 = arith.constant 0 : index
    %306 = vector.load %arg20[%c1_193, %c2_194, %c0_195] : memref<10x10x64xf32, #tpu.memory_space<vmem>>, vector<8x8x64xf32>
    %307 = vector.shape_cast %306 : vector<8x8x64xf32> to vector<64x64xf32>
    %308 = tpu.concatenate %305, %307 in 1 : vector<64x64xf32>, vector<64x64xf32> -> vector<64x128xf32>
    %309 = arith.truncf %308 : vector<64x128xf32> to vector<64x128xbf16>
    %c0_196 = arith.constant 0 : index
    %c256_197 = arith.constant 256 : index
    %310 = vector.load %arg21[%c0_196, %c256_197] : memref<64x576xbf16, #tpu.memory_space<vmem>>, vector<64x128xbf16>
    tpu.vector_store %arg21[%c0_196, %c256_197], %309 {strides = array<i32>} : memref<64x576xbf16, #tpu.memory_space<vmem>>, vector<64x128xbf16>,
    %c2_198 = arith.constant 2 : index
    %c0_199 = arith.constant 0 : index
    %c0_200 = arith.constant 0 : index
    %311 = vector.load %arg20[%c2_198, %c0_199, %c0_200] : memref<10x10x64xf32, #tpu.memory_space<vmem>>, vector<8x8x64xf32>
    %312 = vector.shape_cast %311 : vector<8x8x64xf32> to vector<64x64xf32>
    %c2_201 = arith.constant 2 : index
    %c1_202 = arith.constant 1 : index
    %c0_203 = arith.constant 0 : index
    %313 = vector.load %arg20[%c2_201, %c1_202, %c0_203] : memref<10x10x64xf32, #tpu.memory_space<vmem>>, vector<8x8x64xf32>
    %314 = vector.shape_cast %313 : vector<8x8x64xf32> to vector<64x64xf32>
    %315 = tpu.concatenate %312, %314 in 1 : vector<64x64xf32>, vector<64x64xf32> -> vector<64x128xf32>
    %316 = arith.truncf %315 : vector<64x128xf32> to vector<64x128xbf16>
    %c0_204 = arith.constant 0 : index
    %c384_205 = arith.constant 384 : index
    %317 = vector.load %arg21[%c0_204, %c384_205] : memref<64x576xbf16, #tpu.memory_space<vmem>>, vector<64x128xbf16>
    tpu.vector_store %arg21[%c0_204, %c384_205], %316 {strides = array<i32>} : memref<64x576xbf16, #tpu.memory_space<vmem>>, vector<64x128xbf16>,
    %c2_206 = arith.constant 2 : index
    %c2_207 = arith.constant 2 : index
    %c0_208 = arith.constant 0 : index
    %318 = vector.load %arg20[%c2_206, %c2_207, %c0_208] : memref<10x10x64xf32, #tpu.memory_space<vmem>>, vector<8x8x64xf32>
    %319 = vector.shape_cast %318 : vector<8x8x64xf32> to vector<64x64xf32>
    %320 = arith.truncf %319 : vector<64x64xf32> to vector<64x64xbf16>
    %c0_209 = arith.constant 0 : index
    %c512_210 = arith.constant 512 : index
    %321 = vector.load %arg21[%c0_209, %c512_210] : memref<64x576xbf16, #tpu.memory_space<vmem>>, vector<64x64xbf16>
    tpu.vector_store %arg21[%c0_209, %c512_210], %320 {strides = array<i32>} : memref<64x576xbf16, #tpu.memory_space<vmem>>, vector<64x64xbf16>,
    %c0_211 = arith.constant 0 : index
    %c0_212 = arith.constant 0 : index
    %322 = vector.load %arg21[%c0_211, %c0_212] : memref<64x576xbf16, #tpu.memory_space<vmem>>, vector<64x576xbf16>
    %c0_213 = arith.constant 0 : index
    %c0_214 = arith.constant 0 : index
    %323 = vector.load %arg15[%c0_213, %c0_214] : memref<576x64xbf16, #tpu.memory_space<vmem>>, vector<576x64xbf16>
    %cst_215 = arith.constant dense<0.000000e+00> : vector<64x64xf32>
    %324 = tpu.matmul %322, %323, %cst_215 {dimension_numbers = #tpu.dot_dimension_numbers<[1], [0], [0], [1], [0, 0, 1, 1], [], []>} : vector<64x576xbf16>, vector<576x64xbf16>, vector<64x64xf32> -> vector<64x64xf32>
    %c0_216 = arith.constant 0 : index
    %c0_217 = arith.constant 0 : index
    %325 = vector.load %arg16[%c0_216, %c0_217] : memref<1x64xf32, #tpu.memory_space<vmem>>, vector<1x64xf32>
    %326 = vector.shape_cast %325 : vector<1x64xf32> to vector<64xf32>
    %327 = vector.shape_cast %326 : vector<64xf32> to vector<1x64xf32>
    %328 = vector.broadcast %327 : vector<1x64xf32> to vector<64x64xf32>
    %329 = arith.addf %324, %328 : vector<64x64xf32>
    %330 = arith.addf %221, %329 : vector<64x64xf32>
    %331 = vector.shape_cast %330 : vector<64x64xf32> to vector<8x8x64xf32>
    %c0_218 = arith.constant 0 : index
    %c0_219 = arith.constant 0 : index
    %c0_220 = arith.constant 0 : index
    %c0_221 = arith.constant 0 : index
    %332 = vector.load %arg19[%c0_218, %c0_219, %c0_220, %c0_221] : memref<1x8x8x64xf32, #tpu.memory_space<vmem>>, vector<1x8x8x64xf32>
    %333 = vector.shape_cast %332 : vector<1x8x8x64xf32> to vector<8x8x64xf32>
    %334 = vector.shape_cast %331 : vector<8x8x64xf32> to vector<1x8x8x64xf32>
    tpu.vector_store %arg19[%c0_218, %c0_219, %c0_220, %c0_221], %334 {strides = array<i32>} : memref<1x8x8x64xf32, #tpu.memory_space<vmem>>, vector<1x8x8x64xf32>,
    return
  }
  func.func @transform_0(%arg0: i32) -> (i32, i32, i32, i32) {
    %c0_i32 = arith.constant 0 : i32
    %c0_i32_0 = arith.constant 0 : i32
    %c0_i32_1 = arith.constant 0 : i32
    %c0_i32_2 = arith.constant 0 : i32
    return %arg0, %c0_i32, %c0_i32_0, %c0_i32_1 : i32, i32, i32, i32
  }
  func.func @transform_1(%arg0: i32) -> (i32, i32) {
    %c0_i32 = arith.constant 0 : i32
    %c0_i32_0 = arith.constant 0 : i32
    %c0_i32_1 = arith.constant 0 : i32
    return %c0_i32, %c0_i32_0 : i32, i32
  }
  func.func @transform_2(%arg0: i32) -> (i32, i32) {
    %c0_i32 = arith.constant 0 : i32
    %c0_i32_0 = arith.constant 0 : i32
    %c0_i32_1 = arith.constant 0 : i32
    return %c0_i32, %c0_i32_0 : i32, i32
  }
  func.func @transform_3(%arg0: i32) -> (i32, i32) {
    %c0_i32 = arith.constant 0 : i32
    %c0_i32_0 = arith.constant 0 : i32
    %c0_i32_1 = arith.constant 0 : i32
    return %c0_i32, %c0_i32_0 : i32, i32
  }
  func.func @transform_4(%arg0: i32) -> (i32, i32) {
    %c0_i32 = arith.constant 0 : i32
    %c0_i32_0 = arith.constant 0 : i32
    %c0_i32_1 = arith.constant 0 : i32
    return %c0_i32, %c0_i32_0 : i32, i32
  }
  func.func @transform_5(%arg0: i32) -> (i32, i32) {
    %c0_i32 = arith.constant 0 : i32
    %c0_i32_0 = arith.constant 0 : i32
    %c0_i32_1 = arith.constant 0 : i32
    return %c0_i32, %c0_i32_0 : i32, i32
  }
  func.func @transform_6(%arg0: i32) -> (i32, i32) {
    %c0_i32 = arith.constant 0 : i32
    %c0_i32_0 = arith.constant 0 : i32
    %c0_i32_1 = arith.constant 0 : i32
    return %c0_i32, %c0_i32_0 : i32, i32
  }
  func.func @transform_7(%arg0: i32) -> (i32, i32) {
    %c0_i32 = arith.constant 0 : i32
    %c0_i32_0 = arith.constant 0 : i32
    %c0_i32_1 = arith.constant 0 : i32
    return %c0_i32, %c0_i32_0 : i32, i32
  }
  func.func @transform_8(%arg0: i32) -> (i32, i32) {
    %c0_i32 = arith.constant 0 : i32
    %c0_i32_0 = arith.constant 0 : i32
    %c0_i32_1 = arith.constant 0 : i32
    return %c0_i32, %c0_i32_0 : i32, i32
  }
  func.func @transform_9(%arg0: i32) -> (i32, i32) {
    %c0_i32 = arith.constant 0 : i32
    %c0_i32_0 = arith.constant 0 : i32
    %c0_i32_1 = arith.constant 0 : i32
    return %c0_i32, %c0_i32_0 : i32, i32
  }
  func.func @transform_10(%arg0: i32) -> (i32, i32) {
    %c0_i32 = arith.constant 0 : i32
    %c0_i32_0 = arith.constant 0 : i32
    %c0_i32_1 = arith.constant 0 : i32
    return %c0_i32, %c0_i32_0 : i32, i32
  }
  func.func @transform_11(%arg0: i32) -> (i32, i32) {
    %c0_i32 = arith.constant 0 : i32
    %c0_i32_0 = arith.constant 0 : i32
    %c0_i32_1 = arith.constant 0 : i32
    return %c0_i32, %c0_i32_0 : i32, i32
  }
  func.func @transform_12(%arg0: i32) -> (i32, i32) {
    %c0_i32 = arith.constant 0 : i32
    %c0_i32_0 = arith.constant 0 : i32
    %c0_i32_1 = arith.constant 0 : i32
    return %c0_i32, %c0_i32_0 : i32, i32
  }
  func.func @transform_13(%arg0: i32) -> (i32, i32) {
    %c0_i32 = arith.constant 0 : i32
    %c0_i32_0 = arith.constant 0 : i32
    %c0_i32_1 = arith.constant 0 : i32
    return %c0_i32, %c0_i32_0 : i32, i32
  }
  func.func @transform_14(%arg0: i32) -> (i32, i32) {
    %c0_i32 = arith.constant 0 : i32
    %c0_i32_0 = arith.constant 0 : i32
    %c0_i32_1 = arith.constant 0 : i32
    return %c0_i32, %c0_i32_0 : i32, i32
  }
  func.func @transform_15(%arg0: i32) -> (i32, i32) {
    %c0_i32 = arith.constant 0 : i32
    %c0_i32_0 = arith.constant 0 : i32
    %c0_i32_1 = arith.constant 0 : i32
    return %c0_i32, %c0_i32_0 : i32, i32
  }
  func.func @transform_16(%arg0: i32) -> (i32, i32) {
    %c0_i32 = arith.constant 0 : i32
    %c0_i32_0 = arith.constant 0 : i32
    %c0_i32_1 = arith.constant 0 : i32
    return %c0_i32, %c0_i32_0 : i32, i32
  }
  func.func @transform_17(%arg0: i32) -> (i32, i32) {
    %c0_i32 = arith.constant 0 : i32
    %c0_i32_0 = arith.constant 0 : i32
    %c0_i32_1 = arith.constant 0 : i32
    return %c0_i32, %c0_i32_0 : i32, i32
  }
  func.func @transform_18(%arg0: i32) -> (i32, i32, i32, i32) {
    %c0_i32 = arith.constant 0 : i32
    %c0_i32_0 = arith.constant 0 : i32
    %c0_i32_1 = arith.constant 0 : i32
    %c0_i32_2 = arith.constant 0 : i32
    return %arg0, %c0_i32, %c0_i32_0, %c0_i32_1 : i32, i32, i32, i32
  }
}

</mosaic_0001>

<bundles_post_ra>
// kernel: middle_block.1
= control target key start
LH: loop header
LB: loop body
LE: loop exit
PB: predicated region body
PF: predicated region fallthrough
CT: control target
= control target key end

     0   :  { %s13583_s0 = inlined_call_operand.vmem [shape: f32[2,8,8,64], index: 0, kind: input, shape index: {}]   ;;  %s13584_s1 = inlined_call_operand.vmem [shape: f32[2,32], index: 1, kind: input, shape index: {}]   ;;  %s13585_s2 = inlined_call_operand.vmem [shape: bf16[576,64], index: 2, kind: input, shape index: {}]   ;;  %s13586_s3 = inlined_call_operand.vmem [shape: f32[1,64], index: 3, kind: input, shape index: {}]   ;;  %s13587_s4 = inlined_call_operand.vmem [shape: bf16[576,64], index: 4, kind: input, shape index: {}]   ;;  %s13588_s5 = inlined_call_operand.vmem [shape: f32[1,64], index: 5, kind: input, shape index: {}]   ;;  %s13589_s6 = inlined_call_operand.vmem [shape: f32[32,128], index: 6, kind: input, shape index: {}]   ;;  %s13590_s7 = inlined_call_operand.vmem [shape: f32[1,128], index: 7, kind: input, shape index: {}]   ;;  %s13591_s8 = inlined_call_operand.vmem [shape: bf16[64,192], index: 8, kind: input, shape index: {}]   ;;  %s13592_s9 = inlined_call_operand.vmem [shape: f32[1,192], index: 9, kind: input, shape index: {}]   ;;  %s13593_s10 = inlined_call_operand.vmem [shape: bf16[64,64], index: 10, kind: input, shape index: {}]   ;;  %s13594_s11 = inlined_call_operand.vmem [shape: f32[1,64], index: 11, kind: input, shape index: {}]   ;;  %s13595_s12 = inlined_call_operand.vmem [shape: bf16[576,64], index: 12, kind: input, shape index: {}]   ;;  %s13596_s13 = inlined_call_operand.vmem [shape: f32[1,64], index: 13, kind: input, shape index: {}]   ;;  %s13597_s14 = inlined_call_operand.vmem [shape: bf16[576,64], index: 14, kind: input, shape index: {}]   ;;  %s13598_s15 = inlined_call_operand.vmem [shape: f32[1,64], index: 15, kind: input, shape index: {}]   ;;  %s13599_s16 = inlined_call_operand.vmem [shape: f32[32,128], index: 16, kind: input, shape index: {}]   ;;  %s13600_s17 = inlined_call_operand.vmem [shape: f32[1,128], index: 17, kind: input, shape index: {}]   ;;  %s13601_s18 = inlined_call_operand.hbm [shape: f32[2,8,8,64], index: 18, kind: output, shape index: {}]  }
   0x1   :  { %13685 = sst [smem:[#allocation73_spill]] %s13583_s0 }
   0x2   :  { %13686 = sst [smem:[#allocation74_spill]] %s13584_s1 }
   0x3   :  { %13687 = sst [smem:[#allocation75_spill]] %s13585_s2 }
   0x4   :  { %13688 = sst [smem:[#allocation76_spill]] %s13589_s6 }
   0x5   :  { %13689 = sst [smem:[#allocation77_spill]] %s13601_s18 }
   0x6   :  { %23 = vsyncpa [#allocation5], 0 }
   0x7   :  { %25 = vsyncpa [#allocation5 + $0x1], 0  ;;  %s10569_s27 = smov 0   ;;  %s10571_s28 = smov 0  }
   0x8   :  { %s10573_s29 = smov 0   ;;  %s10575_s30 = smov 0  }
   0x9 LB: > { %13690 = sst [smem:[#allocation7_spill]] %s10439_s27  ;;  %s10590_s0 = sadd.s32 4294967295, %s10451_s30   ;;  %s10451_s30 = sphi %s10575_s30, %s13848_s30   ;;  %s10447_s29 = sphi %s10573_s29, %s13850_s29   ;;  %s10443_s28 = sphi %s10571_s28, %s13852_s28   ;;  %s10439_s27 = sphi %s10569_s27, %s13851_s27  }
   0xa   : > { %13691 = sst [smem:[#allocation8_spill]] %s10447_s29  ;;  %s7699_s19 = sadd.s32 4294967294, %s10451_s30  }
   0xb   : > { %13692 = sst [smem:[#allocation9_spill]] %s10451_s30  ;;  %s10594_s1 = sadd.s32 1, %s10451_s30  }
   0xc   : > { %13693 = sst [smem:[#allocation10_spill]] %s10594_s1  ;;  %s421_s20 = sadd.s32 1, %s10447_s29 }
   0xd   : > { %s418_s21 = ssub.s32 %s10451_s30, %s10594_s1  ;;  %p431_p0 = scmp.ne.s32.totalorder %s10447_s29, %s10443_s28 }
   0xe   : > { %p419_p1 = scmp.eq.s32.totalorder %s418_s21, 0  ;;  %p432_p2 = scmp.eq.s32.totalorder %s10590_s0, 1 }
   0xf   : > { %p437_p3 = scmp.ne.s32.totalorder %s10443_s28, %s10439_s27  ;;  %p438_p4 = scmp.eq.s32.totalorder %s7699_s19, 1 }
  0x10   : > { %s10605_s22 = scalar_select %p419_p1, %s10447_s29, %s421_s20  }
  0x11   : > { %p10607_p5 = por %p432_p2, %p431_p0  ;;  %p10611_p6 = por %p438_p4, %p437_p3 }
  0x12   : > { %13694 = sst [smem:[#allocation11_spill]] %s10605_s22  ;;  %p7702_p7 = scmp.ge.s32.totalorder %s10451_s30, 1 }
  0x13   : > { %s13695_s2 = scalar_select %p10607_p5, 1, 0 }
  0x14   : > { %s13697_s23 = scalar_select %p10611_p6, 1, 0 }
  0x15   : > { %13696 = sst [smem:[#allocation12_spill]] %s13695_s2  ;;  %p515_p8 = scmp.lt.s32.totalorder %s10451_s30, 3 }
  0x16   : > { %13698 = sst [smem:[#allocation13_spill]] %s13697_s23 }
  0x17   : > { %p516_p9 = pnand %p7702_p7, %p515_p8 }
  0x19   : > { %519 = sbr.rel (%p516_p9) target bundleno = 3543 (0xdd7), region = 92 }
  0x20   : > { %p569_p10 = scmp.lt.s32.totalorder %s10590_s0, 1  ;;  %vm575_vm0 = vcmask 523264   ;;  %vm577_vm1 = vcmask 517120   ;;  %v13612_v0 = vmov 0.0   ;;  %v13613_v1 = vmov 0.0|0.0   ;;  %s13699_s6 = sld [smem:[#allocation76_spill]] }
  0x21   : > { %579 = vst.msk [vmem:[#allocation2 + $0x10] sm:$0xff] %vm575_vm0, %v13612_v0  ;;  %581 = vst.msk [vmem:[#allocation2 + $0x20] sm:$0xff] %vm575_vm0, %v13612_v0  ;;  %8852 = vmatprep.subr.bf16.mxu0 %v13613_v1  ;;  %vm10455_vm2 = vmmov 0   ;;  %s13700_s23 = sld [smem:[#allocation74_spill]]  ;;  %s13701_s20 = sld [smem:[#allocation75_spill]]  ;;  %vm612_vm3 = vcmask 261120  }
  0x22   : > { %580 = vst.msk [vmem:[#allocation2 + $0x18] sm:$0x3] %vm577_vm1, %v13612_v0  ;;  %582 = vst.msk [vmem:[#allocation2 + $0x28] sm:$0x3] %vm577_vm1, %v13612_v0  ;;  %s570_s22 = scalar_select %p569_p10, %s10590_s0, 1  ;;  %8502 = vmatprep.mubr.msk.f32.mxu0 %vm10455_vm2, %v13612_v0  ;;  %vm3229_vm4 = vcmask 64512  }
  0x23   : > { %576 = vst.msk [vmem:[#allocation2] sm:$0xff] %vm575_vm0, %v13612_v0  ;;  %583 = vst.msk [vmem:[#allocation2 + $0x30] sm:$0xff] %vm575_vm0, %v13612_v0  ;;  %s13702_s18 = sld [smem:[#allocation73_spill]]  ;;  %s10456_s27 = smov 64   ;;  %vm5610_vm5 = vcmask 130048   ;;  %vm5619_vm6 = vcmask 195584  }
  0x24   : > { %578 = vst.msk [vmem:[#allocation2 + $0x8] sm:$0x3] %vm577_vm1, %v13612_v0  ;;  %584 = vst.msk [vmem:[#allocation2 + $0x38] sm:$0x3] %vm577_vm1, %v13612_v0  ;;  %s7994_s21 = sshll.u32 %s570_s22, 6  ;;  %s10460_s29 = smov 104  }
  0x25   : > { %585 = vst.msk [vmem:[#allocation2 + $0x40] sm:$0xff] %vm575_vm0, %v13612_v0  ;;  %587 = vst.msk [vmem:[#allocation2 + $0x50] sm:$0xff] %vm575_vm0, %v13612_v0  ;;  %s10461_s1 = smov 96   ;;  %s10462_s22 = smov 88   ;;  %vm5636_vm7 = vcmask 326656   ;;  %vm5645_vm8 = vcmask 392192  }
  0x26   : > { %586 = vst.msk [vmem:[#allocation2 + $0x48] sm:$0x3] %vm577_vm1, %v13612_v0  ;;  %588 = vst.msk [vmem:[#allocation2 + $0x58] sm:$0x3] %vm577_vm1, %v13612_v0  ;;  %v607_v2 = vld [vmem:[%s13699_s6] sm:$0xff]  ;;  %v608_v3 = vld [vmem:[%s13699_s6 + $0x8] sm:$0xff] }
  0x27   : > { %589 = vst.msk [vmem:[#allocation2 + $0x60] sm:$0xff] %vm575_vm0, %v13612_v0  ;;  %591 = vst.msk [vmem:[#allocation2 + $0x70] sm:$0xff] %vm575_vm0, %v13612_v0  ;;  %v609_v4 = vld [vmem:[%s13699_s6 + $0x10] sm:$0xff]  ;;  %v8853_v5 = vpack.c.bf16 %v608_v3, %v607_v2  ;;  %v610_v6 = vld [vmem:[%s13699_s6 + $0x18] sm:$0xff]  ;;  %s10680_s26 = scalar_lea.vmem %s13700_s23, %s10590_s0  ;;  %s10463_s6 = smov 80   ;;  %vm5654_vm9 = vcmask 457728  }
  0x28   : > { %590 = vst.msk [vmem:[#allocation2 + $0x68] sm:$0x3] %vm577_vm1, %v13612_v0  ;;  %592 = vst.msk [vmem:[#allocation2 + $0x78] sm:$0x3] %vm577_vm1, %v13612_v0  ;;  %v9835_v7 = vld [vmem:[%s13701_s20 + $0x40] sm:$0xff]   ;;  %v8856_v8 = vpack.c.bf16 %v610_v6, %v609_v4  ;;  %v9837_v10 = vld [vmem:[%s13701_s20 + $0x48] sm:$0xff]  }
  0x29   : > { %593 = vst.msk [vmem:[#allocation2 + $0x80] sm:$0xff] %vm575_vm0, %v13612_v0  ;;  %595 = vst.msk [vmem:[#allocation2 + $0x90] sm:$0xff] %vm575_vm0, %v13612_v0  ;;  %8854 = vmatpush3.bf16.msra.mxu0 %v8853_v5  ;;  %v9836_v9 = vld [vmem:[%s13701_s20] sm:$0xff]   ;;  %s10691_s2 = scalar_lea.vmem %s13702_s18, %s7994_s21  ;;  %8001 = vmatprep.subr.bf16.mxu1 %v9835_v7  ;;  %v9838_v28 = vld [vmem:[%s13701_s20 + $0x8] sm:$0xff]   ;;  %s10459_s21 = smov 112  }
  0x2a   : > { %594 = vst.msk [vmem:[#allocation2 + $0x88] sm:$0x3] %vm577_vm1, %v13612_v0  ;;  %596 = vst.msk [vmem:[#allocation2 + $0x98] sm:$0x3] %vm577_vm1, %v13612_v0  ;;  %8855 = vmatprep.subr.bf16.mxu0 %v13613_v1  ;;  %v10698_v11 = vld [vmem:[%s10691_s2] sm:$0xff]  ;;  %v10701_v12 = vld [vmem:[%s10691_s2 + $0x8] sm:$0xff]  ;;  %8002 = vmatpush3.bf16.msra.mxu1 %v9836_v9 }
  0x2b   : > { %v10704_v13 = vld [vmem:[%s10691_s2 + $0x10] sm:$0xff]  ;;  %v598_v14 = vld [vmem:[%s10680_s26] sm:$0x1]  ;;  %v7707_v15 = vmul.f32 -1.442695, %v10698_v11  ;;  %v10710_v17 = vld [vmem:[%s10691_s2 + $0x18] sm:$0xff]  ;;  %8003 = vmatprep.subr.bf16.mxu1 %v9837_v10 }
  0x2c   : > { %v7708_v16 = vmul.f32 -1.442695, %v10701_v12  ;;  %v10713_v18 = vld [vmem:[%s10691_s2 + $0x20] sm:$0xff]  ;;  %v7709_v19 = vmul.f32 -1.442695, %v10704_v13  ;;  %v10718_v21 = vld [vmem:[%s10691_s2 + $0x28] sm:$0xff] }
  0x2d   : > { %v7710_v20 = vmul.f32 -1.442695, %v10710_v17  ;;  %8857 = vmatpush3.bf16.msra.mxu0 %v8856_v8  ;;  %9995 = vpow2.f32 %v7707_v15  ;;  %v7711_v22 = vmul.f32 -1.442695, %v10713_v18  ;;  %v7712_v23 = vmul.f32 -1.442695, %v10718_v21 }
  0x2e   : > { %v10723_v24 = vld [vmem:[%s10691_s2 + $0x30] sm:$0xff]  ;;  %v10726_v25 = vld [vmem:[%s10691_s2 + $0x38] sm:$0xff]  ;;  %9997 = vpow2.f32 %v7708_v16  ;;  %8004 = vmatpush3.bf16.msra.mxu1 %v9838_v28  ;;  %v9843_v33 = vld [vmem:[%s13701_s20 + $0xc0] sm:$0xff]   ;;  %s10464_s18 = smov 72   ;;  %s10465_s30 = smov 8  }
  0x2f   : > { %v7713_v26 = vmul.f32 -1.442695, %v10723_v24  ;;  %v7714_v27 = vmul.f32 -1.442695, %v10726_v25  ;;  %9999 = vpow2.f32 %v7709_v19  ;;  %v9839_v29 = vld [vmem:[%s13701_s20 + $0x50] sm:$0xff]   ;;  %v9841_v31 = vld [vmem:[%s13701_s20 + $0x58] sm:$0xff]   ;;  %8041 = vmatprep.subr.bf16.mxu0 %v9843_v33 }
  0x30   : > { %8503 = vmatmul.mubr.msk.f32.vlgmr.msra.gmra.mrb[0].mxu0 %vm612_vm3, %v598_v14  ;;  %10001 = vpow2.f32 %v7710_v20  ;;  %v9840_v30 = vld [vmem:[%s13701_s20 + $0x10] sm:$0xff]   ;;  %8005 = vmatprep.subr.bf16.mxu1 %v9839_v29  ;;  %v9842_v32 = vld [vmem:[%s13701_s20 + $0x18] sm:$0xff]   ;;  %v9844_v34 = vld [vmem:[%s13701_s20 + $0x80] sm:$0xff]   ;;  %s10466_s23 = smov 16   ;;  %s10467_s24 = smov 24  }
  0x31   : > { %10003 = vpow2.f32 %v7711_v22  ;;  %8042 = vmatpush3.bf16.msra.mxu0 %v9844_v34  ;;  %v9845_v48 = vld [vmem:[%s13701_s20 + $0x60] sm:$0xff]   ;;  %v9847_v52 = vld [vmem:[%s13701_s20 + $0xc8] sm:$0xff]   ;;  %v9851_v57 = vld [vmem:[%s13701_s20 + $0xd0] sm:$0xff]   ;;  %s10468_s25 = smov 32   ;;  %s10471_s19 = smov 56  }
  0x32   : > { %10005 = vpow2.f32 %v7712_v23  ;;  %8006 = vmatpush3.bf16.msra.mxu1 %v9840_v30  ;;  %v9846_v51 = vld [vmem:[%s13701_s20 + $0x20] sm:$0xff]   ;;  %v9848_v54 = vld [vmem:[%s13701_s20 + $0x88] sm:$0xff]   ;;  %8043 = vmatprep.subr.bf16.mxu0 %v9847_v52  ;;  %v9852_v58 = vld [vmem:[%s13701_s20 + $0x90] sm:$0xff]  }
  0x33   : > { %10007 = vpow2.f32 %v7713_v26  ;;  %8007 = vmatprep.subr.bf16.mxu1 %v9841_v31  ;;  %v9849_v55 = vld [vmem:[%s13701_s20 + $0x68] sm:$0xff]   ;;  %v9853_v62 = vld [vmem:[%s13701_s20 + $0x70] sm:$0xff]   ;;  %v9855_v4 = vld [vmem:[%s13701_s20 + $0xd8] sm:$0xff]  }
  0x34   : > { %10009 = vpow2.f32 %v7714_v27  ;;  %v9850_v56 = vld [vmem:[%s13701_s20 + $0x28] sm:$0xff]   ;;  %v9854_v3 = vld [vmem:[%s13701_s20 + $0x30] sm:$0xff]   ;;  %v9856_v7 = vld [vmem:[%s13701_s20 + $0x98] sm:$0xff]  }
  0x35   : > { %8044 = vmatpush3.bf16.msra.mxu0 %v9848_v54  ;;  %v9858_v15 = vld [vmem:[%s13701_s20 + $0x38] sm:$0xff]   ;;  %v9859_v16 = vld [vmem:[%s13701_s20 + $0xe0] sm:$0xff]  }
  0x36   : > { %8008 = vmatpush3.bf16.msra.mxu1 %v9842_v32  ;;  %8045 = vmatprep.subr.bf16.mxu0 %v9851_v57  ;;  %v9860_v19 = vld [vmem:[%s13701_s20 + $0xa0] sm:$0xff]   ;;  %v9868_v52 = vld [vmem:[%s13701_s20 + $0xb8] sm:$0xff]  }
  0x37   : > { %v9996_v35 = vpop.eup %9995  ;;  %8009 = vmatprep.subr.bf16.mxu1 %v9845_v48  ;;  %v759_v23 = vld [vmem:[#allocation2 + $0x1] sm:$0xff] }
  0x38   : > { %v9998_v36 = vpop.eup %9997  ;;  %v710_v37 = vadd.f32 1.0, %v9996_v35 }
  0x39   : > { %v10000_v38 = vpop.eup %9999  ;;  %v711_v39 = vadd.f32 1.0, %v9998_v36  ;;  %8046 = vmatpush3.bf16.msra.mxu0 %v9852_v58 }
  0x3a   : > { %v10002_v40 = vpop.eup %10001  ;;  %10011 = vrcp.f32 %v710_v37  ;;  %v712_v41 = vadd.f32 1.0, %v10000_v38  ;;  %8010 = vmatpush3.bf16.msra.mxu1 %v9846_v51  ;;  %8047 = vmatprep.subr.bf16.mxu0 %v9855_v4 }
  0x3b   : > { %v10004_v42 = vpop.eup %10003  ;;  %10013 = vrcp.f32 %v711_v39  ;;  %v713_v43 = vadd.f32 1.0, %v10002_v40  ;;  %8011 = vmatprep.subr.bf16.mxu1 %v9849_v55  ;;  %v9862_v39 = vld [vmem:[%s13701_s20 + $0xe8] sm:$0xff]  }
  0x3c   : > { %v10006_v44 = vpop.eup %10005  ;;  %10015 = vrcp.f32 %v712_v41  ;;  %v714_v45 = vadd.f32 1.0, %v10004_v42  ;;  %v9863_v40 = vld [vmem:[%s13701_s20 + $0xa8] sm:$0xff]   ;;  %v9864_v41 = vld [vmem:[%s13701_s20 + $0xf0] sm:$0xff]  }
  0x3d   : > { %v10008_v46 = vpop.eup %10007  ;;  %10017 = vrcp.f32 %v713_v43  ;;  %v715_v47 = vadd.f32 1.0, %v10006_v44  ;;  %8048 = vmatpush3.bf16.msra.mxu0 %v9856_v7 }
  0x3e   : > { %v10010_v49 = vpop.eup %10009  ;;  %10019 = vrcp.f32 %v714_v45  ;;  %v716_v50 = vadd.f32 1.0, %v10008_v46  ;;  %8012 = vmatpush3.bf16.msra.mxu1 %v9850_v56  ;;  %8049 = vmatprep.subr.bf16.mxu0 %v9859_v16  ;;  %v9865_v45 = vld [vmem:[%s13701_s20 + $0xb0] sm:$0xff]  }
  0x3f   : > { %10021 = vrcp.f32 %v715_v47  ;;  %v717_v53 = vadd.f32 1.0, %v10010_v49  ;;  %8013 = vmatprep.subr.bf16.mxu1 %v9853_v62  ;;  %v9867_v47 = vld [vmem:[%s13701_s20 + $0xf8] sm:$0xff]   ;;  %v10882_v49 = vld [vmem:[%s13701_s20 + $0x100] sm:$0xff]  }
  0x40   : > { %10023 = vrcp.f32 %v716_v50 }
  0x41   : > { %10025 = vrcp.f32 %v717_v53  ;;  %8050 = vmatpush3.bf16.msra.mxu0 %v9860_v19 }
  0x42   : > { %8014 = vmatpush3.bf16.msra.mxu1 %v9854_v3  ;;  %8051 = vmatprep.subr.bf16.mxu0 %v9862_v39 }
  0x44   : > { %v10012_v59 = vpop.eup %10011 }
  0x45   : > { %v10014_v60 = vpop.eup %10013  ;;  %v734_v61 = vmul.f32 %v10012_v59, %v10698_v11  ;;  %8052 = vmatpush3.bf16.msra.mxu0 %v9863_v40 }
  0x46   : > { %v10016_v63 = vpop.eup %10015  ;;  %v735_v2 = vmul.f32 %v10014_v60, %v10701_v12  ;;  %v9857_v12 = vld [vmem:[%s13701_s20 + $0x78] sm:$0xff]   ;;  %8053 = vmatprep.subr.bf16.mxu0 %v9864_v41 }
  0x47   : > { %v10018_v5 = vpop.eup %10017  ;;  %743 = vst.msk [vmem:[#allocation2 + $0x11] sm:$0xff] %vm575_vm0, %v734_v61  ;;  %v736_v6 = vmul.f32 %v10016_v63, %v10704_v13  ;;  %8015 = vmatprep.subr.bf16.mxu1 %v9857_v12  ;;  %v959_v61 = vld [vmem:[#allocation2 + $0x91] sm:$0xff]  ;;  %v2448_v12 = vld [vmem:[%s13592_s9] sm:$0x3] }
  0x48   : > { %v10020_v8 = vpop.eup %10019  ;;  %744 = vst.msk [vmem:[#allocation2 + $0x21] sm:$0xff] %vm575_vm0, %v735_v2  ;;  %v737_v9 = vmul.f32 %v10018_v5, %v10710_v17  ;;  %8016 = vmatpush3.bf16.msra.mxu1 %v9858_v15  ;;  %v815_v15 = vld [vmem:[#allocation2 + $0x2] sm:$0xff] }
  0x49   : > { %v10022_v10 = vpop.eup %10021  ;;  %745 = vst.msk [vmem:[#allocation2 + $0x31] sm:$0xff] %vm575_vm0, %v736_v6  ;;  %v738_v11 = vmul.f32 %v10020_v8, %v10713_v18  ;;  %8505 = vmatprep.subr.bf16.mxu1 %v10882_v49  ;;  %8054 = vmatpush3.bf16.msra.mxu0 %v9865_v45  ;;  %v1015_v8 = vld [vmem:[#allocation2 + $0x92] sm:$0xff] }
  0x4a   : > { %v10024_v13 = vpop.eup %10023  ;;  %746 = vst.msk [vmem:[#allocation2 + $0x41] sm:$0xff] %vm575_vm0, %v737_v9  ;;  %v739_v14 = vmul.f32 %v10022_v10, %v10718_v21  ;;  %8055 = vmatprep.subr.bf16.mxu0 %v9867_v47  ;;  %v1546_v10 = vlaneseq }
  0x4b   : > { %v10026_v17 = vpop.eup %10025  ;;  %747 = vst.msk [vmem:[#allocation2 + $0x51] sm:$0xff] %vm575_vm0, %v738_v11  ;;  %v740_v18 = vmul.f32 %v10024_v13, %v10723_v24 }
  0x4c   : > { %748 = vst.msk [vmem:[#allocation2 + $0x61] sm:$0xff] %vm575_vm0, %v739_v14  ;;  %v741_v20 = vmul.f32 %v10026_v17, %v10726_v25  ;;  %v10924_v11 = vshrl.u32 %v1546_v10, 7 }
  0x4d   : > { %749 = vst.msk [vmem:[#allocation2 + $0x71] sm:$0xff] %vm575_vm0, %v740_v18  ;;  %8056 = vmatpush3.bf16.msra.mxu0 %v9868_v52 }
  0x4e   : > { %v10815_v21 = vld [vmem:[#allocation2 + $0x10] sm:$0xff]  ;;  %750 = vst.msk [vmem:[#allocation2 + $0x81] sm:$0xff] %vm575_vm0, %v741_v20  ;;  %v2456_v13 = vsub.s32 1, %v10924_v11 }
  0x4f   : > { %v10818_v22 = vld [vmem:[#allocation2 + $0x20] sm:$0xff]  ;;  %v10820_v24 = vld [vmem:[#allocation2 + $0x11] sm:$0xff] }
  0x50   : > { %v8955_v26 = vpack.i.bf16 %v10818_v22, %v10815_v21  ;;  %v10824_v27 = vld [vmem:[#allocation2 + $0x30] sm:$0xff]  ;;  %v10828_v28 = vld [vmem:[#allocation2 + $0x21] sm:$0xff]  ;;  %v8960_v31 = vpack.i.bf16 %v10820_v24, %v759_v23  ;;  %v10930_v14 = vrot.slane %v2448_v12, %v2456_v13 }
  0x51   : > { %v10826_v25 = vld [vmem:[#allocation2 + $0x40] sm:$0xff]  ;;  %v10830_v29 = vld [vmem:[#allocation2 + $0x31] sm:$0xff] }
  0x52   : > { %8956 = vrot.lane.b32.xlu0 %v8955_v26, %s10456_s27  ;;  %v8965_v30 = vpack.i.bf16 %v10826_v25, %v10824_v27  ;;  %v10836_v32 = vld [vmem:[#allocation2 + $0x50] sm:$0xff]  ;;  %v8970_v34 = vpack.i.bf16 %v10830_v29, %v10828_v28  ;;  %v10843_v35 = vld [vmem:[#allocation2 + $0x41] sm:$0xff] }
  0x53   : > { %v10838_v33 = vld [vmem:[#allocation2 + $0x60] sm:$0xff]  ;;  %v10845_v36 = vld [vmem:[#allocation2 + $0x51] sm:$0xff] }
  0x54   : > { %8966 = vrot.lane.b32.xlu1 %v8965_v30, %s10456_s27  ;;  %v10847_v37 = vld [vmem:[#allocation2 + $0x70] sm:$0xff]  ;;  %v8975_v38 = vpack.i.bf16 %v10838_v33, %v10836_v32  ;;  %v10863_v43 = vld [vmem:[#allocation2 + $0x61] sm:$0xff]  ;;  %v8980_v46 = vpack.i.bf16 %v10845_v36, %v10843_v35 }
  0x55   : > { %v10861_v42 = vld [vmem:[#allocation2 + $0x80] sm:$0xff]  ;;  %v10865_v44 = vld [vmem:[#allocation2 + $0x71] sm:$0xff] }
  0x56   : > { %8961 = vrot.lane.b32.xlu0 %v8960_v31, %s10456_s27  ;;  %v8985_v48 = vpack.i.bf16 %v10861_v42, %v10847_v37  ;;  %v887_v50 = vld [vmem:[#allocation2 + $0x12] sm:$0xff]  ;;  %v888_v51 = vld [vmem:[#allocation2 + $0x22] sm:$0xff]  ;;  %v8990_v53 = vpack.i.bf16 %v10865_v44, %v10863_v43 }
  0x57   : > { %v889_v54 = vld [vmem:[#allocation2 + $0x32] sm:$0xff]  ;;  %v10892_v55 = vld [vmem:[#allocation2 + $0x42] sm:$0xff]  ;;  %v9000_v56 = vpack.i.bf16 %v888_v51, %v887_v50 }
  0x58   : > { %8971 = vrot.lane.b32.xlu1 %v8970_v34, %s10456_s27  ;;  %v10896_v57 = vld [vmem:[#allocation2 + $0x52] sm:$0xff]  ;;  %v9010_v58 = vpack.i.bf16 %v10892_v55, %v889_v54  ;;  %v10900_v59 = vld [vmem:[#allocation2 + $0x62] sm:$0xff]  ;;  %v1016_v60 = vpack.c.bf16 %v889_v54, %v888_v51 }
  0x59   : > { %v1017_v62 = vpack.c.bf16 %v10896_v57, %v10892_v55  ;;  %v10905_v63 = vld [vmem:[#allocation2 + $0x81] sm:$0xff]  ;;  %v10908_v2 = vld [vmem:[#allocation2 + $0x72] sm:$0xff]  ;;  %v9020_v4 = vpack.i.bf16 %v10900_v59, %v10896_v57 }
  0x5a   : > { %8976 = vrot.lane.b32.xlu0 %v8975_v38, %s10456_s27  ;;  %1020 = vst.msk [vmem:[#allocation3 + $0x20] sm:$0xff] %vm575_vm0, %v1016_v60  ;;  %v894_v3 = vld [vmem:[#allocation2 + $0x82] sm:$0xff]  ;;  %v9025_v5 = vpack.i.bf16 %v959_v61, %v10905_v63  ;;  %v1018_v7 = vpack.c.bf16 %v10908_v2, %v10900_v59 }
  0x5b   : > { %1021 = vst.msk [vmem:[#allocation3 + $0x48] sm:$0xff] %vm575_vm0, %v1017_v62  ;;  %v9030_v6 = vpack.i.bf16 %v894_v3, %v10908_v2  ;;  %v1019_v9 = vpack.c.bf16 %v1015_v8, %v894_v3 }
  0x5c   : > { %8981 = vrot.lane.b32.xlu1 %v8980_v46, %s10456_s27  ;;  %1022 = vst.msk [vmem:[#allocation3 + $0x70] sm:$0xff] %vm575_vm0, %v1018_v7 }
  0x5d   : > { %1023 = vst.msk [vmem:[#allocation3 + $0x98] sm:$0xff] %vm575_vm0, %v1019_v9 }
  0x5e   : > { %8986 = vrot.lane.b32.xlu0 %v8985_v48, %s10456_s27 }
  0x60   : > { %8991 = vrot.lane.b32.xlu1 %v8990_v53, %s10456_s27 }
  0x62   : > { %8996 = vrot.lane.b32.xlu0 %v8970_v34, %s10456_s27  ;;  %v751_v34 = vld [vmem:[#allocation2] sm:$0xff] }
  0x64   : > { %9001 = vrot.lane.b32.xlu1 %v9000_v56, %s10456_s27 }
  0x66   : > { %9006 = vrot.lane.b32.xlu0 %v8980_v46, %s10456_s27 }
  0x68   : > { %9011 = vrot.lane.b32.xlu1 %v9010_v58, %s10456_s27 }
  0x6a   : > { %9016 = vrot.lane.b32.xlu0 %v8990_v53, %s10456_s27 }
  0x6c   : > { %9021 = vrot.lane.b32.xlu1 %v9020_v4, %s10456_s27 }
  0x6e   : > { %9026 = vrot.lane.b32.xlu0 %v9025_v5, %s10456_s27 }
  0x70   : > { %9031 = vrot.lane.b32.xlu1 %v9030_v6, %s10456_s27  ;;  %v9869_v6 = vld [vmem:[%s13701_s20 + $0x110] sm:$0xff]  }
  0xc4   : > { %v8957_v16 = vpop.permute.xlu0 %8956 }
  0xc5   : > { %v8959_v17 = vunpack.i.h.bf16 %v8957_v16  ;;  %v8958_v18 = vunpack.i.l.bf16 %v8957_v16 }
  0xc6   : > { %v8967_v19 = vpop.permute.xlu1 %8966 }
  0xc7   : > { %v863_v20 = vsel %vm575_vm0, %v815_v15, %v8958_v18  ;;  %v864_v23 = vsel %vm575_vm0, %v887_v50, %v8959_v17  ;;  %v8969_v26 = vunpack.i.h.bf16 %v8967_v19  ;;  %v8968_v30 = vunpack.i.l.bf16 %v8967_v19 }
  0xc8   : > { %v871_v31 = vpack.c.bf16 %v864_v23, %v863_v20  ;;  %v8962_v38 = vpop.permute.xlu0 %8961 }
  0xc9   : > { %v865_v39 = vsel %vm575_vm0, %v888_v51, %v8968_v30  ;;  %v866_v40 = vsel %vm575_vm0, %v889_v54, %v8969_v26  ;;  %v8964_v41 = vunpack.i.h.bf16 %v8962_v38  ;;  %v8963_v45 = vunpack.i.l.bf16 %v8962_v38  ;;  %v9866_v51 = vld [vmem:[%s13701_s20 + $0x108] sm:$0xff]  }
  0xca   : > { %v872_v46 = vpack.c.bf16 %v866_v40, %v865_v39  ;;  %v8972_v47 = vpop.permute.xlu1 %8971  ;;  %1383 = vmatprep.mubr.bf16.mxu1 %v871_v31 }
  0xcb   : > { %v799_v48 = vsel %vm575_vm0, %v751_v34, %v8963_v45  ;;  %v800_v52 = vsel %vm575_vm0, %v10815_v21, %v8964_v41  ;;  %v8974_v50 = vunpack.i.h.bf16 %v8972_v47  ;;  %v8973_v53 = vunpack.i.l.bf16 %v8972_v47 }
  0xcc   : > { %v807_v56 = vpack.c.bf16 %v800_v52, %v799_v48  ;;  %v8977_v58 = vpop.permute.xlu0 %8976 }
  0xcd   : > { %v8979_v60 = vunpack.i.h.bf16 %v8977_v58  ;;  %v8978_v54 = vunpack.i.l.bf16 %v8977_v58  ;;  %v802_v62 = vsel %vm575_vm0, %v10824_v27, %v8974_v50  ;;  %v801_v3 = vsel %vm575_vm0, %v10818_v22, %v8973_v53 }
  0xce   : > { %v8982_v61 = vpop.permute.xlu1 %8981  ;;  %1384 = vmatmul.mubr.bf16.vlgmr.msra.gmra.mrb[0].mxu1 %v807_v56  ;;  %v808_v9 = vpack.c.bf16 %v802_v62, %v801_v3 }
  0xcf   : > { %8506 = vmatpush3.bf16.msra.mxu1 %v10882_v49  ;;  %1391 = vmatprep.mubr.bf16.mxu1 %v872_v46  ;;  %v868_v21 = vsel %vm575_vm0, %v10896_v57, %v8979_v60  ;;  %v867_v4 = vsel %vm575_vm0, %v10892_v55, %v8978_v54  ;;  %v8984_v7 = vunpack.i.h.bf16 %v8982_v61  ;;  %v8983_v8 = vunpack.i.l.bf16 %v8982_v61  ;;  %v9870_v55 = vld [vmem:[%s13701_s20 + $0x118] sm:$0xff]  }
  0xd0   : > { %v8987_v5 = vpop.permute.xlu0 %8986  ;;  %8507 = vmatprep.subr.bf16.mxu1 %v9866_v51  ;;  %v873_v49 = vpack.c.bf16 %v868_v21, %v867_v4 }
  0xd1   : > { %v8989_v10 = vunpack.i.h.bf16 %v8987_v5  ;;  %v8988_v12 = vunpack.i.l.bf16 %v8987_v5  ;;  %v804_v57 = vsel %vm575_vm0, %v10836_v32, %v8984_v7  ;;  %v803_v16 = vsel %vm575_vm0, %v10826_v25, %v8983_v8 }
  0xd2   : > { %v8992_v13 = vpop.permute.xlu1 %8991  ;;  %v809_v38 = vpack.c.bf16 %v804_v57, %v803_v16 }
  0xd3   : > { %8508 = vmatpush3.bf16.msra.mxu1 %v9866_v51  ;;  %v870_v19 = vsel %vm575_vm0, %v10908_v2, %v8989_v10  ;;  %v869_v20 = vsel %vm575_vm0, %v10900_v59, %v8988_v12  ;;  %v8994_v46 = vunpack.i.h.bf16 %v8992_v13  ;;  %v8993_v47 = vunpack.i.l.bf16 %v8992_v13  ;;  %v1028_v10 = vld [vmem:[#allocation3 + $0x20] sm:$0xff] }
  0xd4   : > { %v8997_v15 = vpop.permute.xlu0 %8996  ;;  %8509 = vmatprep.subr.bf16.mxu1 %v9869_v6 }
  0xd5   : > { %v8999_v17 = vunpack.i.h.bf16 %v8997_v15  ;;  %v8998_v18 = vunpack.i.l.bf16 %v8997_v15 }
  0xd6   : > { %v9002_v23 = vpop.permute.xlu1 %9001  ;;  %1392 = vmatmul.mubr.bf16.gmra.mrb[4].mxu1 %v808_v9  ;;  %v951_v9 = vld [vmem:[#allocation2 + $0x90] sm:$0xff] }
  0xd7   : > { %v993_v26 = vsel %vm575_vm0, %v10824_v27, %v8999_v17  ;;  %v992_v30 = vsel %vm575_vm0, %v10818_v22, %v8998_v18  ;;  %v9004_v31 = vunpack.i.h.bf16 %v9002_v23  ;;  %v9003_v34 = vunpack.i.l.bf16 %v9002_v23  ;;  %1399 = vmatprep.mubr.bf16.mxu1 %v873_v49  ;;  %8510 = vmatpush3.bf16.msra.mxu1 %v9869_v6  ;;  %v1033_v17 = vld [vmem:[#allocation3 + $0x48] sm:$0xff] }
  0xd8   : > { %v1000_v39 = vpack.c.bf16 %v993_v26, %v992_v30  ;;  %v9007_v40 = vpop.permute.xlu0 %9006  ;;  %8511 = vmatprep.subr.bf16.mxu1 %v9870_v55  ;;  %v874_v27 = vpack.c.bf16 %v870_v19, %v869_v20  ;;  %v1043_v19 = vld [vmem:[#allocation3 + $0x98] sm:$0xff]  ;;  %v611_v20 = vld [vmem:[%s13590_s7] sm:$0x1]  ;;  %v11008_v23 = vsub.s32 0, %v10924_v11  ;;  %v9873_v11 = vld [vmem:[%s13587_s4 + $0x48] sm:$0xff]  }
  0xd9   : > { %v928_v2 = vsel %vm575_vm0, %v10828_v28, %v9004_v31  ;;  %v927_v59 = vsel %vm575_vm0, %v10820_v24, %v9003_v34  ;;  %v9009_v41 = vunpack.i.h.bf16 %v9007_v40  ;;  %v9008_v45 = vunpack.i.l.bf16 %v9007_v40  ;;  %v9871_v31 = vld [vmem:[%s13587_s4 + $0x40] sm:$0xff]   ;;  %v9876_v40 = vld [vmem:[%s13587_s4 + $0x10] sm:$0xff]  }
  0xda   : > { %v935_v22 = vpack.c.bf16 %v928_v2, %v927_v59  ;;  %v9012_v48 = vpop.permute.xlu1 %9011  ;;  %1448 = vmatprep.mubr.bf16.mxu0 %v1000_v39  ;;  %13703 = vst [vmem:[#allocation14_spill] sm:$0xff] %v11008_v23  ;;  %v9872_v34 = vld [vmem:[%s13587_s4] sm:$0xff]   ;;  %8089 = vmatprep.subr.bf16.mxu0 %v9871_v31  ;;  %v9875_v39 = vld [vmem:[%s13587_s4 + $0x50] sm:$0xff]   ;;  %v9877_v2 = vld [vmem:[%s13587_s4 + $0x58] sm:$0xff]  }
  0xdb   : > { %v995_v52 = vsel %vm575_vm0, %v10836_v32, %v9009_v41  ;;  %v994_v50 = vsel %vm575_vm0, %v10826_v25, %v9008_v45  ;;  %v9014_v53 = vunpack.i.h.bf16 %v9012_v48  ;;  %v9013_v56 = vunpack.i.l.bf16 %v9012_v48  ;;  %8512 = vmatpush3.bf16.msra.mxu1 %v9870_v55  ;;  %v9878_v59 = vld [vmem:[%s13587_s4 + $0x18] sm:$0xff]  }
  0xdc   : > { %v1001_v28 = vpack.c.bf16 %v995_v52, %v994_v50  ;;  %1449 = vmatmul.mubr.bf16.vlgmr.msra.gmra.mrb[4].mxu0 %v935_v22  ;;  %v9017_v24 = vpop.permute.xlu0 %9016  ;;  %v806_v25 = vsel %vm575_vm0, %v10847_v37, %v8994_v46  ;;  %v805_v32 = vsel %vm575_vm0, %v10838_v33, %v8993_v47 }
  0xdd   : > { %v930_v58 = vsel %vm575_vm0, %v10843_v35, %v9014_v53  ;;  %v929_v51 = vsel %vm575_vm0, %v10830_v29, %v9013_v56  ;;  %v9019_v60 = vunpack.i.h.bf16 %v9017_v24  ;;  %v9018_v54 = vunpack.i.l.bf16 %v9017_v24  ;;  %8090 = vmatpush3.bf16.msra.mxu0 %v9872_v34  ;;  %v11042_v24 = vld [vmem:[%s13586_s3] ss:$0 sm:$0xff] }
  0xde   : > { %v9022_v61 = vpop.permute.xlu1 %9021  ;;  %1400 = vmatmul.mubr.bf16.gmra.mrb[8].mxu1 %v809_v38  ;;  %1456 = vmatprep.mubr.bf16.mxu0 %v1001_v28  ;;  %v936_v3 = vpack.c.bf16 %v930_v58, %v929_v51  ;;  %v810_v6 = vpack.c.bf16 %v806_v25, %v805_v32  ;;  %v9874_v38 = vld [vmem:[%s13587_s4 + $0x8] sm:$0xff]  }
  0xdf   : > { %v997_v62 = vsel %vm575_vm0, %v10847_v37, %v9019_v60  ;;  %v996_v35 = vsel %vm575_vm0, %v10838_v33, %v9018_v54  ;;  %1407 = vmatprep.mubr.bf16.mxu1 %v874_v27  ;;  %v9024_v4 = vunpack.i.h.bf16 %v9022_v61  ;;  %v9023_v5 = vunpack.i.l.bf16 %v9022_v61  ;;  %8091 = vmatprep.subr.bf16.mxu0 %v9873_v11 }
  0xe0   : > { %v9027_v29 = vpop.permute.xlu0 %9026  ;;  %v1002_v21 = vpack.c.bf16 %v997_v62, %v996_v35 }
  0xe1   : > { %v9029_v7 = vunpack.i.h.bf16 %v9027_v29  ;;  %v9028_v8 = vunpack.i.l.bf16 %v9027_v29  ;;  %v932_v12 = vsel %vm575_vm0, %v10863_v43, %v9024_v4  ;;  %v931_v37 = vsel %vm575_vm0, %v10845_v36, %v9023_v5  ;;  %v1038_v43 = vld [vmem:[#allocation3 + $0x70] sm:$0xff]  ;;  %8092 = vmatpush3.bf16.msra.mxu0 %v9874_v38 }
  0xe2   : > { %v9032_v49 = vpop.permute.xlu1 %9031  ;;  %v937_v15 = vpack.c.bf16 %v932_v12, %v931_v37  ;;  %8093 = vmatprep.subr.bf16.mxu0 %v9875_v39 }
  0xe3   : > { %v999_v33 = vsel %vm575_vm0, %v951_v9, %v9029_v7  ;;  %v998_v13 = vsel %vm575_vm0, %v10861_v42, %v9028_v8  ;;  %v9034_v57 = vunpack.i.h.bf16 %v9032_v49  ;;  %v9033_v16 = vunpack.i.l.bf16 %v9032_v49 }
  0xe4   : > { %1457 = vmatmul.mubr.bf16.gmra.mrb[8].mxu0 %v936_v3  ;;  %v1003_v55 = vpack.c.bf16 %v999_v33, %v998_v13 }
  0xe5   : > { %1464 = vmatprep.mubr.bf16.mxu0 %v1002_v21  ;;  %v934_v36 = vsel %vm575_vm0, %v10905_v63, %v9034_v57  ;;  %v933_v18 = vsel %vm575_vm0, %v10865_v44, %v9033_v16  ;;  %8094 = vmatpush3.bf16.msra.mxu0 %v9876_v40 }
  0xe6   : > { %1408 = vmatmul.mubr.bf16.gmra.mrb[12].mxu1 %v810_v6  ;;  %v938_v42 = vpack.c.bf16 %v934_v36, %v933_v18  ;;  %8095 = vmatprep.subr.bf16.mxu0 %v9877_v2 }
  0xe7   : > { %8513 = vmatprep.mubr.msk.bf16.mxu1 %vm575_vm0, %v1028_v10 }
  0xe9   : > { %8096 = vmatpush3.bf16.msra.mxu0 %v9878_v59 }
  0xec   : > { %1465 = vmatmul.mubr.bf16.gmra.mrb[12].mxu0 %v937_v15 }
  0xed   : > { %1472 = vmatprep.mubr.bf16.mxu0 %v1003_v55 }
  0xee   : > { %8514 = vmatmul.mubr.msk.bf16.vlgmr.msra.gmra.mrb[16].mxu1 %vm575_vm0, %v1033_v17 }
  0xef   : > { %8517 = vmatprep.mubr.msk.bf16.mxu1 %vm575_vm0, %v1038_v43 }
  0xf4   : > { %1473 = vmatmul.mubr.bf16.gmra.mrb[16].mxu0 %v938_v42 }
  0xf6   : > { %8518 = vmatmul.mubr.msk.bf16.gmra.mrb[20].mxu1 %vm575_vm0, %v1043_v19 }
 0x103   : > { %v682_v63 = vpop.f32.mrb[0].mxu0 }
 0x104   : > { %v683_v26 = vadd.f32 %v682_v63, %v611_v20  ;;  %v8504_v44 = vpop.f32.mrb[1].mxu0 }
 0x106   : > { %v11011_v30 = vrot.slane %v683_v26, %v11008_v23 }
 0x108   : > { %1559 = vrot.lane.b32.xlu0 %v11011_v30, %s10456_s27 }
 0x17a   : > { %v1560_v59 = vpop.permute.xlu0 %1559 }
 0x1a1   : > { %v8017_v41 = vpop.f32.mrb[0].mxu1 }
 0x1a2   : > { %v8018_v45 = vpop.f32.mrb[1].mxu1 }
 0x1a3   : > { %v8019_v27 = vadd.f32 %v8018_v45, %v8017_v41  ;;  %v8020_v46 = vpop.f32.mrb[2].mxu1 }
 0x1a4   : > { %v8021_v47 = vpop.f32.mrb[3].mxu1 }
 0x1a5   : > { %v8022_v22 = vadd.f32 %v8021_v47, %v8020_v46  ;;  %v1386_v60 = vadd.f32 %v8019_v27, %v11042_v24 }
 0x1a7   : > { %v1389_v35 = vadd.f32 %v8022_v22, %v11042_v24 }
 0x1a9   : > { %v8023_v48 = vpop.f32.mrb[4].mxu1 }
 0x1aa   : > { %v8024_v52 = vpop.f32.mrb[5].mxu1 }
 0x1ab   : > { %v8025_v50 = vadd.f32 %v8024_v52, %v8023_v48  ;;  %v8026_v53 = vpop.f32.mrb[6].mxu1 }
 0x1ac   : > { %v8027_v56 = vpop.f32.mrb[7].mxu1 }
 0x1ad   : > { %v8028_v28 = vadd.f32 %v8027_v56, %v8026_v53  ;;  %v1394_v10 = vadd.f32 %v8025_v50, %v11042_v24 }
 0x1af   : > { %v8057_v58 = vpop.f32.mrb[4].mxu0  ;;  %v1397_v15 = vadd.f32 %v8028_v28, %v11042_v24 }
 0x1b0   : > { %v8058_v51 = vpop.f32.mrb[5].mxu0 }
 0x1b1   : > { %v8059_v54 = vadd.f32 %v8058_v51, %v8057_v58  ;;  %v8060_v61 = vpop.f32.mrb[6].mxu0  ;;  %v8029_v25 = vpop.f32.mrb[8].mxu1 }
 0x1b2   : > { %v8061_v32 = vpop.f32.mrb[7].mxu0  ;;  %v8030_v62 = vpop.f32.mrb[9].mxu1 }
 0x1b3   : > { %v8062_v3 = vadd.f32 %v8061_v32, %v8060_v61  ;;  %v8031_v29 = vadd.f32 %v8030_v62, %v8029_v25  ;;  %v8032_v21 = vpop.f32.mrb[10].mxu1  ;;  %v1451_v4 = vadd.f32 %v8059_v54, %v1386_v60 }
 0x1b4   : > { %v8033_v5 = vpop.f32.mrb[11].mxu1 }
 0x1b5   : > { %v8034_v6 = vadd.f32 %v8033_v5, %v8032_v21  ;;  %v1454_v7 = vadd.f32 %v8062_v3, %v1389_v35  ;;  %v1402_v20 = vadd.f32 %v8031_v29, %v11042_v24 }
 0x1b7   : > { %v8063_v8 = vpop.f32.mrb[8].mxu0  ;;  %v1405_v38 = vadd.f32 %v8034_v6, %v11042_v24 }
 0x1b8   : > { %v8064_v9 = vpop.f32.mrb[9].mxu0 }
 0x1b9   : > { %v8065_v12 = vadd.f32 %v8064_v9, %v8063_v8  ;;  %v8066_v37 = vpop.f32.mrb[10].mxu0  ;;  %v8035_v33 = vpop.f32.mrb[12].mxu1 }
 0x1ba   : > { %v8067_v13 = vpop.f32.mrb[11].mxu0  ;;  %v8036_v49 = vpop.f32.mrb[13].mxu1 }
 0x1bb   : > { %v8068_v55 = vadd.f32 %v8067_v13, %v8066_v37  ;;  %v8037_v57 = vadd.f32 %v8036_v49, %v8035_v33  ;;  %v8038_v16 = vpop.f32.mrb[14].mxu1  ;;  %v1459_v17 = vadd.f32 %v8065_v12, %v1394_v10 }
 0x1bc   : > { %v8039_v43 = vpop.f32.mrb[15].mxu1 }
 0x1bd   : > { %v8040_v36 = vadd.f32 %v8039_v43, %v8038_v16  ;;  %v1462_v18 = vadd.f32 %v8068_v55, %v1397_v15  ;;  %v1410_v54 = vadd.f32 %v8037_v57, %v11042_v24 }
 0x1bf   : > { %v8069_v42 = vpop.f32.mrb[12].mxu0  ;;  %v1413_v3 = vadd.f32 %v8040_v36, %v11042_v24 }
 0x1c0   : > { %v8070_v19 = vpop.f32.mrb[13].mxu0 }
 0x1c1   : > { %v8071_v63 = vadd.f32 %v8070_v19, %v8069_v42  ;;  %v8072_v26 = vpop.f32.mrb[14].mxu0  ;;  %v8515_v44 = vpop.f32.mrb[16].mxu1 }
 0x1c2   : > { %v8073_v31 = vpop.f32.mrb[15].mxu0  ;;  %v1524_v34 = vadd.f32 %v8515_v44, %v1459_v17  ;;  %v1515_v11 = vpop.f32.mrb[17].mxu1 }
 0x1c3   : > { %v8074_v39 = vadd.f32 %v8073_v31, %v8072_v26  ;;  %v1516_v40 = vadd.f32 %v1515_v11, %v1451_v4  ;;  %v8516_v2 = vpop.f32.mrb[18].mxu1  ;;  %v1467_v41 = vadd.f32 %v8071_v63, %v1402_v20 }
 0x1c4   : > { %v1552_v45 = vmul.f32 %v11011_v30, %v1524_v34  ;;  %v1527_v27 = vadd.f32 %v8516_v2, %v1462_v18  ;;  %v1518_v46 = vpop.f32.mrb[19].mxu1  ;;  %v9881_v2 = vld [vmem:[%s13587_s4 + $0x20] sm:$0xff]  }
 0x1c5   : > { %v1550_v47 = vmul.f32 %v11011_v30, %v1516_v40  ;;  %v1519_v22 = vadd.f32 %v1518_v46, %v1454_v7  ;;  %v1470_v48 = vadd.f32 %v8074_v39, %v1405_v38  ;;  %v9879_v38 = vld [vmem:[%s13587_s4 + $0x60] sm:$0xff]  }
 0x1c6   : > { %v1553_v52 = vmul.f32 %v11011_v30, %v1527_v27  ;;  %v11053_v50 = vadd.f32 %v1560_v59, %v1552_v45  ;;  %v9880_v39 = vld [vmem:[%s13587_s4 + $0xc0] sm:$0xff]   ;;  %8097 = vmatprep.subr.bf16.mxu0 %v9879_v38 }
 0x1c7   : > { %v1551_v53 = vmul.f32 %v11011_v30, %v1519_v22  ;;  %v11056_v56 = vadd.f32 %v1560_v59, %v1550_v47  ;;  %v8075_v28 = vpop.f32.mrb[16].mxu0  ;;  %8129 = vmatprep.subr.bf16.mxu1 %v9880_v39  ;;  %8098 = vmatpush3.bf16.msra.mxu0 %v9881_v2 }
 0x1c8   : > { %v11058_v58 = vadd.f32 %v1560_v59, %v1553_v52  ;;  %v7758_v51 = vmul.f32 -1.442695, %v11053_v50  ;;  %v8076_v60 = vpop.f32.mrb[17].mxu0  ;;  %v9884_v52 = vld [vmem:[%s13587_s4 + $0xc8] sm:$0xff]  }
 0x1c9   : > { %v11062_v61 = vadd.f32 %v1560_v59, %v1551_v53  ;;  %v7756_v25 = vmul.f32 -1.442695, %v11056_v56  ;;  %v8077_v32 = vadd.f32 %v8076_v60, %v8075_v28  ;;  %v8078_v62 = vpop.f32.mrb[18].mxu0  ;;  %v8519_v35 = vpop.f32.mrb[20].mxu1  ;;  %v9886_v60 = vld [vmem:[%s13587_s4 + $0x88] sm:$0xff]  }
 0x1ca   : > { %10027 = vpow2.f32 %v7758_v51  ;;  %v7759_v29 = vmul.f32 -1.442695, %v11058_v58  ;;  %v8079_v21 = vpop.f32.mrb[19].mxu0  ;;  %v1531_v4 = vpop.f32.mrb[21].mxu1  ;;  %v9885_v51 = vld [vmem:[%s13587_s4 + $0x28] sm:$0xff]  }
 0x1cb   : > { %10029 = vpow2.f32 %v7756_v25  ;;  %v7757_v5 = vmul.f32 -1.442695, %v11062_v61  ;;  %v8080_v6 = vadd.f32 %v8079_v21, %v8078_v62  ;;  %v1475_v7 = vadd.f32 %v8077_v32, %v1410_v54  ;;  %v8520_v8 = vpop.f32.mrb[22].mxu1  ;;  %v9891_v21 = vld [vmem:[%s13587_s4 + $0x78] sm:$0xff]  }
 0x1cc   : > { %10031 = vpow2.f32 %v7759_v29  ;;  %v1532_v9 = vadd.f32 %v1531_v4, %v1467_v41  ;;  %v1534_v10 = vpop.f32.mrb[23].mxu1  ;;  %v9889_v29 = vld [vmem:[%s13587_s4 + $0x30] sm:$0xff]   ;;  %v9892_v4 = vld [vmem:[%s13587_s4 + $0xd8] sm:$0xff]  }
 0x1cd   : > { %10033 = vpow2.f32 %v7757_v5  ;;  %v1540_v12 = vadd.f32 %v8519_v35, %v1475_v7  ;;  %v1478_v37 = vadd.f32 %v8080_v6, %v1413_v3  ;;  %v1535_v33 = vadd.f32 %v1534_v10, %v1470_v48  ;;  %v9883_v48 = vld [vmem:[%s13587_s4 + $0x68] sm:$0xff]   ;;  %v9887_v3 = vld [vmem:[%s13587_s4 + $0x70] sm:$0xff]   ;;  %v9893_v6 = vld [vmem:[%s13587_s4 + $0x38] sm:$0xff]  }
 0x1ce   : > { %v1554_v24 = vmul.f32 %v11011_v30, %v1532_v9  ;;  %8099 = vmatprep.subr.bf16.mxu0 %v9883_v48  ;;  %v1642_v5 = vld [vmem:[#allocation2 + $0x1] sm:$0xff]  ;;  %v9894_v7 = vld [vmem:[%s13587_s4 + $0x98] sm:$0xff]  }
 0x1cf   : > { %v1556_v13 = vmul.f32 %v11011_v30, %v1540_v12  ;;  %v1543_v49 = vadd.f32 %v8520_v8, %v1478_v37  ;;  %v1555_v15 = vmul.f32 %v11011_v30, %v1535_v33  ;;  %8100 = vmatpush3.bf16.msra.mxu0 %v9885_v51 }
 0x1d0   : > { %v11071_v55 = vadd.f32 %v1560_v59, %v1554_v24  ;;  %8101 = vmatprep.subr.bf16.mxu0 %v9887_v3 }
 0x1d1   : > { %v11073_v57 = vadd.f32 %v1560_v59, %v1556_v13  ;;  %v1557_v16 = vmul.f32 %v11011_v30, %v1543_v49  ;;  %v11076_v17 = vadd.f32 %v1560_v59, %v1555_v15 }
 0x1d2   : > { %v7760_v43 = vmul.f32 -1.442695, %v11071_v55 }
 0x1d3   : > { %v7762_v36 = vmul.f32 -1.442695, %v11073_v57  ;;  %v11080_v18 = vadd.f32 %v1560_v59, %v1557_v16  ;;  %v7761_v42 = vmul.f32 -1.442695, %v11076_v17  ;;  %v9882_v59 = vld [vmem:[%s13587_s4 + $0x80] sm:$0xff]   ;;  %8102 = vmatpush3.bf16.msra.mxu0 %v9889_v29 }
 0x1d4   : > { %v10028_v19 = vpop.eup %10027  ;;  %10035 = vpow2.f32 %v7760_v43  ;;  %8130 = vmatpush3.bf16.msra.mxu1 %v9882_v59  ;;  %8103 = vmatprep.subr.bf16.mxu0 %v9891_v21 }
 0x1d5   : > { %v10030_v20 = vpop.eup %10029  ;;  %v1596_v63 = vadd.f32 1.0, %v10028_v19  ;;  %10037 = vpow2.f32 %v7762_v36  ;;  %v7763_v34 = vmul.f32 -1.442695, %v11080_v18  ;;  %8131 = vmatprep.subr.bf16.mxu1 %v9884_v52  ;;  %v9895_v36 = vld [vmem:[%s13587_s4 + $0xe0] sm:$0xff]  }
 0x1d6   : > { %v10032_v26 = vpop.eup %10031  ;;  %v1594_v44 = vadd.f32 1.0, %v10030_v20  ;;  %10039 = vpow2.f32 %v7761_v42  ;;  %v11222_v52 = vld [vmem:[%s13587_s4 + $0x100] sm:$0xff]  }
 0x1d7   : > { %v10034_v31 = vpop.eup %10033  ;;  %v1597_v30 = vadd.f32 1.0, %v10032_v26  ;;  %10041 = vrcp.f32 %v1596_v63  ;;  %8104 = vmatpush3.bf16.msra.mxu0 %v9893_v6  ;;  %v9898_v26 = vld [vmem:[%s13587_s4 + $0xe8] sm:$0xff]   ;;  %v1841_v6 = vld [vmem:[#allocation2 + $0x91] sm:$0xff] }
 0x1d8   : > { %v1595_v11 = vadd.f32 1.0, %v10034_v31  ;;  %10043 = vrcp.f32 %v1594_v44  ;;  %8132 = vmatpush3.bf16.msra.mxu1 %v9886_v60  ;;  %v9903_v60 = vld [vmem:[%s13587_s4 + $0xf8] sm:$0xff]   ;;  %8521 = vmatprep.subr.bf16.mxu0 %v11222_v52 }
 0x1d9   : > { %10045 = vrcp.f32 %v1597_v30  ;;  %v9899_v30 = vld [vmem:[%s13587_s4 + $0xa8] sm:$0xff]  }
 0x1da   : > { %10047 = vrcp.f32 %v1595_v11 }
 0x1db   : > { %10049 = vpow2.f32 %v7763_v34 }
 0x1de   : > { %v10036_v40 = vpop.eup %10035 }
 0x1df   : > { %v10038_v41 = vpop.eup %10037  ;;  %v1598_v45 = vadd.f32 1.0, %v10036_v40 }
 0x1e0   : > { %v10040_v27 = vpop.eup %10039  ;;  %v1600_v46 = vadd.f32 1.0, %v10038_v41 }
 0x1e1   : > { %v10042_v47 = vpop.eup %10041  ;;  %10051 = vrcp.f32 %v1598_v45  ;;  %v1599_v22 = vadd.f32 1.0, %v10040_v27 }
 0x1e2   : > { %v10044_v53 = vpop.eup %10043  ;;  %v1620_v28 = vmul.f32 %v10042_v47, %v11053_v50  ;;  %10053 = vrcp.f32 %v1600_v46 }
 0x1e3   : > { %v10046_v54 = vpop.eup %10045  ;;  %v1618_v25 = vmul.f32 %v10044_v53, %v11056_v56  ;;  %10055 = vrcp.f32 %v1599_v22  ;;  %v9888_v56 = vld [vmem:[%s13587_s4 + $0xd0] sm:$0xff]  }
 0x1e4   : > { %v10048_v32 = vpop.eup %10047  ;;  %v1621_v62 = vmul.f32 %v10046_v54, %v11058_v58  ;;  %1628 = vst.msk [vmem:[#allocation2 + $0x31] sm:$0xff] %vm575_vm0, %v1620_v28  ;;  %8133 = vmatprep.subr.bf16.mxu1 %v9888_v56  ;;  %v9900_v53 = vld [vmem:[%s13587_s4 + $0xf0] sm:$0xff]  }
 0x1e5   : > { %v10050_v50 = vpop.eup %10049  ;;  %v1619_v35 = vmul.f32 %v10048_v32, %v11062_v61  ;;  %1626 = vst.msk [vmem:[#allocation2 + $0x11] sm:$0xff] %vm575_vm0, %v1618_v25  ;;  %v9890_v61 = vld [vmem:[%s13587_s4 + $0x90] sm:$0xff]  }
 0x1e6   : > { %1629 = vst.msk [vmem:[#allocation2 + $0x41] sm:$0xff] %vm575_vm0, %v1621_v62  ;;  %v1601_v58 = vadd.f32 1.0, %v10050_v50  ;;  %8134 = vmatpush3.bf16.msra.mxu1 %v9890_v61  ;;  %v9902_v28 = vld [vmem:[%s13587_s4 + $0xb0] sm:$0xff]  }
 0x1e7   : > { %1627 = vst.msk [vmem:[#allocation2 + $0x21] sm:$0xff] %vm575_vm0, %v1619_v35  ;;  %8135 = vmatprep.subr.bf16.mxu1 %v9892_v4  ;;  %v1897_v25 = vld [vmem:[#allocation2 + $0x92] sm:$0xff] }
 0x1e8   : > { %10057 = vrcp.f32 %v1601_v58  ;;  %v9904_v35 = vld [vmem:[%s13587_s4 + $0xb8] sm:$0xff]  }
 0x1ea   : > { %8136 = vmatpush3.bf16.msra.mxu1 %v9894_v7 }
 0x1eb   : > { %v10052_v8 = vpop.eup %10051  ;;  %v11147_v49 = vld [vmem:[#allocation2 + $0x32] sm:$0xff]  ;;  %8137 = vmatprep.subr.bf16.mxu1 %v9895_v36 }
 0x1ec   : > { %v10054_v9 = vpop.eup %10053  ;;  %v1622_v10 = vmul.f32 %v10052_v8, %v11071_v55  ;;  %v11141_v12 = vld [vmem:[#allocation2 + $0x11] sm:$0xff] }
 0x1ed   : > { %v10056_v37 = vpop.eup %10055  ;;  %v1624_v33 = vmul.f32 %v10054_v9, %v11073_v57  ;;  %v9040_v24 = vpack.i.bf16 %v11141_v12, %v1642_v5  ;;  %v11145_v13 = vld [vmem:[#allocation2 + $0x10] sm:$0xff]  ;;  %v11172_v20 = vld [vmem:[#allocation2 + $0x40] sm:$0xff] }
 0x1ee   : > { %1630 = vst.msk [vmem:[#allocation2 + $0x51] sm:$0xff] %vm575_vm0, %v1622_v10  ;;  %v1623_v15 = vmul.f32 %v10056_v37, %v11076_v17  ;;  %v11151_v16 = vld [vmem:[#allocation2 + $0x20] sm:$0xff]  ;;  %v11170_v19 = vld [vmem:[#allocation2 + $0x31] sm:$0xff] }
 0x1ef   : > { %v11153_v55 = vld [vmem:[#allocation2 + $0x21] sm:$0xff]  ;;  %1632 = vst.msk [vmem:[#allocation2 + $0x71] sm:$0xff] %vm575_vm0, %v1624_v33  ;;  %9041 = vrot.lane.b32.xlu0 %v9040_v24, %s10456_s27  ;;  %v9035_v57 = vpack.i.bf16 %v11151_v16, %v11145_v13  ;;  %v11181_v31 = vld [vmem:[#allocation2 + $0x30] sm:$0xff] }
 0x1f0   : > { %v11155_v43 = vld [vmem:[#allocation2 + $0x22] sm:$0xff]  ;;  %1631 = vst.msk [vmem:[#allocation2 + $0x61] sm:$0xff] %vm575_vm0, %v1623_v15  ;;  %v9050_v63 = vpack.i.bf16 %v11170_v19, %v11153_v55  ;;  %v9045_v11 = vpack.i.bf16 %v11172_v20, %v11181_v31  ;;  %v1770_v56 = vld [vmem:[#allocation2 + $0x12] sm:$0xff] }
 0x1f1   : > { %v9897_v17 = vld [vmem:[%s13587_s4 + $0xa0] sm:$0xff]   ;;  %v1898_v42 = vpack.c.bf16 %v11147_v49, %v11155_v43  ;;  %9036 = vrot.lane.b32.xlu1 %v9035_v57, %s10456_s27  ;;  %v9080_v29 = vpack.i.bf16 %v11155_v43, %v1770_v56 }
 0x1f2   : > { %v10058_v44 = vpop.eup %10057  ;;  %8138 = vmatpush3.bf16.msra.mxu1 %v9897_v17  ;;  %v11190_v38 = vld [vmem:[#allocation2 + $0x41] sm:$0xff] }
 0x1f3   : > { %1902 = vst.msk [vmem:[#allocation3 + $0x20] sm:$0xff] %vm575_vm0, %v1898_v42  ;;  %v1625_v34 = vmul.f32 %v10058_v44, %v11080_v18  ;;  %9051 = vrot.lane.b32.xlu0 %v9050_v63, %s10456_s27  ;;  %8139 = vmatprep.subr.bf16.mxu1 %v9898_v26  ;;  %v11196_v40 = vld [vmem:[#allocation2 + $0x42] sm:$0xff] }
 0x1f4   : > { %v9090_v61 = vpack.i.bf16 %v11196_v40, %v11147_v49  ;;  %v1634_v9 = vld [vmem:[#allocation2] sm:$0xff] }
 0x1f5   : > { %1633 = vst.msk [vmem:[#allocation2 + $0x81] sm:$0xff] %vm575_vm0, %v1625_v34  ;;  %9046 = vrot.lane.b32.xlu1 %v9045_v11, %s10456_s27  ;;  %v11194_v39 = vld [vmem:[#allocation2 + $0x51] sm:$0xff]  ;;  %v1698_v33 = vld [vmem:[#allocation2 + $0x2] sm:$0xff] }
 0x1f6   : > { %v11198_v2 = vld [vmem:[#allocation2 + $0x52] sm:$0xff]  ;;  %v9060_v18 = vpack.i.bf16 %v11194_v39, %v11190_v38  ;;  %8140 = vmatpush3.bf16.msra.mxu1 %v9899_v30 }
 0x1f7   : > { %v11202_v59 = vld [vmem:[#allocation2 + $0x50] sm:$0xff]  ;;  %v1899_v27 = vpack.c.bf16 %v11198_v2, %v11196_v40  ;;  %v11210_v46 = vld [vmem:[#allocation2 + $0x60] sm:$0xff]  ;;  %8141 = vmatprep.subr.bf16.mxu1 %v9900_v53 }
 0x1f8   : > { %v11204_v41 = vld [vmem:[#allocation2 + $0x71] sm:$0xff]  ;;  %v11212_v47 = vld [vmem:[#allocation2 + $0x61] sm:$0xff]  ;;  %9061 = vrot.lane.b32.xlu0 %v9060_v18, %s10456_s27  ;;  %v9055_v48 = vpack.i.bf16 %v11210_v46, %v11202_v59 }
 0x1f9   : > { %v11206_v45 = vld [vmem:[#allocation2 + $0x72] sm:$0xff]  ;;  %v11214_v22 = vld [vmem:[#allocation2 + $0x62] sm:$0xff]  ;;  %1903 = vst.msk [vmem:[#allocation3 + $0x48] sm:$0xff] %vm575_vm0, %v1899_v27  ;;  %v9075_v54 = vpack.i.bf16 %v11204_v41, %v11212_v47 }
 0x1fa   : > { %v1900_v51 = vpack.c.bf16 %v11206_v45, %v11214_v22  ;;  %9056 = vrot.lane.b32.xlu1 %v9055_v48, %s10456_s27  ;;  %v11241_v32 = vld [vmem:[#allocation2 + $0x70] sm:$0xff]  ;;  %8142 = vmatpush3.bf16.msra.mxu1 %v9902_v28  ;;  %v9100_v21 = vpack.i.bf16 %v11214_v22, %v11198_v2  ;;  %v9901_v27 = vld [vmem:[%s13587_s4 + $0x108] sm:$0xff]  }
 0x1fb   : > { %8143 = vmatprep.subr.bf16.mxu1 %v9903_v60 }
 0x1fc   : > { %1904 = vst.msk [vmem:[#allocation3 + $0x70] sm:$0xff] %vm575_vm0, %v1900_v51  ;;  %9076 = vrot.lane.b32.xlu0 %v9075_v54, %s10456_s27  ;;  %v11244_v62 = vld [vmem:[#allocation2 + $0x80] sm:$0xff] }
 0x1fd   : > { %v1777_v50 = vld [vmem:[#allocation2 + $0x82] sm:$0xff]  ;;  %v9065_v3 = vpack.i.bf16 %v11244_v62, %v11241_v32 }
 0x1fe   : > { %v1901_v58 = vpack.c.bf16 %v1897_v25, %v1777_v50  ;;  %8144 = vmatpush3.bf16.msra.mxu1 %v9904_v35  ;;  %v9110_v4 = vpack.i.bf16 %v1777_v50, %v11206_v45  ;;  %v11264_v5 = vld [vmem:[#allocation2 + $0x81] sm:$0xff]  ;;  %v9905_v25 = vld [vmem:[%s13587_s4 + $0x110] sm:$0xff]  }
 0x1ff   : > { %9066 = vrot.lane.b32.xlu1 %v9065_v3, %s10456_s27  ;;  %v9105_v7 = vpack.i.bf16 %v1841_v6, %v11264_v5 }
 0x200   : > { %1905 = vst.msk [vmem:[#allocation3 + $0x98] sm:$0xff] %vm575_vm0, %v1901_v58  ;;  %9081 = vrot.lane.b32.xlu0 %v9080_v29, %s10456_s27  ;;  %v9906_v29 = vld [vmem:[%s13587_s4 + $0x118] sm:$0xff]  }
 0x203   : > { %9071 = vrot.lane.b32.xlu1 %v9050_v63, %s10456_s27 }
 0x204   : > { %9091 = vrot.lane.b32.xlu0 %v9090_v61, %s10456_s27 }
 0x207   : > { %9086 = vrot.lane.b32.xlu1 %v9060_v18, %s10456_s27 }
 0x208   : > { %9101 = vrot.lane.b32.xlu0 %v9100_v21, %s10456_s27 }
 0x20b   : > { %9096 = vrot.lane.b32.xlu1 %v9075_v54, %s10456_s27 }
 0x20c   : > { %9111 = vrot.lane.b32.xlu0 %v9110_v4, %s10456_s27 }
 0x20f   : > { %9106 = vrot.lane.b32.xlu1 %v9105_v7, %s10456_s27 }
 0x261   : > { %v9042_v8 = vpop.permute.xlu0 %9041 }
 0x262   : > { %v9044_v10 = vunpack.i.h.bf16 %v9042_v8  ;;  %v9043_v37 = vunpack.i.l.bf16 %v9042_v8 }
 0x263   : > { %v9037_v24 = vpop.permute.xlu1 %9036 }
 0x264   : > { %v9039_v15 = vunpack.i.h.bf16 %v9037_v24  ;;  %v9038_v57 = vunpack.i.l.bf16 %v9037_v24  ;;  %v1682_v36 = vsel %vm575_vm0, %v1634_v9, %v9043_v37  ;;  %v1683_v17 = vsel %vm575_vm0, %v11145_v13, %v9044_v10 }
 0x265   : > { %v9052_v42 = vpop.permute.xlu0 %9051  ;;  %v1690_v34 = vpack.c.bf16 %v1683_v17, %v1682_v36 }
 0x266   : > { %v1746_v63 = vsel %vm575_vm0, %v1698_v33, %v9038_v57  ;;  %v1747_v26 = vsel %vm575_vm0, %v1770_v56, %v9039_v15  ;;  %v9054_v48 = vunpack.i.h.bf16 %v9052_v42  ;;  %v9053_v53 = vunpack.i.l.bf16 %v9052_v42 }
 0x267   : > { %v1754_v44 = vpack.c.bf16 %v1747_v26, %v1746_v63  ;;  %v9047_v30 = vpop.permute.xlu1 %9046 }
 0x268   : > { %v9049_v11 = vunpack.i.h.bf16 %v9047_v30  ;;  %v9048_v18 = vunpack.i.l.bf16 %v9047_v30  ;;  %v1685_v50 = vsel %vm575_vm0, %v11181_v31, %v9054_v48 }
 0x269   : > { %2265 = vmatprep.mubr.bf16.mxu0 %v1754_v44 }
 0x26a   : > { %v1749_v13 = vsel %vm575_vm0, %v11147_v49, %v9049_v11  ;;  %v1748_v28 = vsel %vm575_vm0, %v11155_v43, %v9048_v18  ;;  %v9062_v51 = vpop.permute.xlu0 %9061  ;;  %2266 = vmatmul.mubr.bf16.vlgmr.msra.gmra.mrb[20].mxu0 %v1690_v34  ;;  %v1684_v49 = vsel %vm575_vm0, %v11151_v16, %v9053_v53 }
 0x26b   : > { %v1755_v60 = vpack.c.bf16 %v1749_v13, %v1748_v28  ;;  %8522 = vmatpush3.bf16.msra.mxu0 %v11222_v52  ;;  %v1691_v58 = vpack.c.bf16 %v1685_v50, %v1684_v49  ;;  %v9064_v61 = vunpack.i.h.bf16 %v9062_v51  ;;  %v9063_v21 = vunpack.i.l.bf16 %v9062_v51 }
 0x26c   : > { %v9057_v54 = vpop.permute.xlu1 %9056  ;;  %8523 = vmatprep.subr.bf16.mxu0 %v9901_v27 }
 0x26d   : > { %v9059_v35 = vunpack.i.h.bf16 %v9057_v54  ;;  %v9058_v3 = vunpack.i.l.bf16 %v9057_v54  ;;  %2273 = vmatprep.mubr.bf16.mxu0 %v1755_v60  ;;  %v1686_v37 = vsel %vm575_vm0, %v11172_v20, %v9063_v21  ;;  %v1833_v21 = vld [vmem:[#allocation2 + $0x90] sm:$0xff] }
 0x26e   : > { %v9077_v43 = vpop.permute.xlu0 %9076 }
 0x26f   : > { %v1751_v56 = vsel %vm575_vm0, %v11198_v2, %v9059_v35  ;;  %v1750_v52 = vsel %vm575_vm0, %v11196_v40, %v9058_v3  ;;  %8524 = vmatpush3.bf16.msra.mxu0 %v9901_v27  ;;  %v1687_v40 = vsel %vm575_vm0, %v11202_v59, %v9064_v61  ;;  %v9079_v30 = vunpack.i.h.bf16 %v9077_v43 }
 0x270   : > { %8525 = vmatprep.subr.bf16.mxu0 %v9905_v25  ;;  %v1756_v4 = vpack.c.bf16 %v1751_v56, %v1750_v52  ;;  %v1692_v63 = vpack.c.bf16 %v1687_v40, %v1686_v37  ;;  %v9078_v34 = vunpack.i.l.bf16 %v9077_v43  ;;  %v1910_v52 = vld [vmem:[#allocation3 + $0x20] sm:$0xff] }
 0x271   : > { %v9067_v6 = vpop.permute.xlu1 %9066  ;;  %v1689_v13 = vsel %vm575_vm0, %v11241_v32, %v9079_v30 }
 0x272   : > { %v9069_v7 = vunpack.i.h.bf16 %v9067_v6  ;;  %v9068_v8 = vunpack.i.l.bf16 %v9067_v6  ;;  %v9082_v9 = vpop.permute.xlu0 %9081  ;;  %2274 = vmatmul.mubr.bf16.gmra.mrb[24].mxu0 %v1691_v58  ;;  %v1688_v28 = vsel %vm575_vm0, %v11210_v46, %v9078_v34 }
 0x273   : > { %v9084_v10 = vunpack.i.h.bf16 %v9082_v9  ;;  %v9083_v2 = vunpack.i.l.bf16 %v9082_v9  ;;  %2281 = vmatprep.mubr.bf16.mxu0 %v1756_v4  ;;  %8526 = vmatpush3.bf16.msra.mxu0 %v9905_v25  ;;  %v1693_v49 = vpack.c.bf16 %v1689_v13, %v1688_v28 }
 0x274   : > { %8527 = vmatprep.subr.bf16.mxu0 %v9906_v29  ;;  %v1753_v24 = vsel %vm575_vm0, %v11206_v45, %v9069_v7  ;;  %v1752_v15 = vsel %vm575_vm0, %v11214_v22, %v9068_v8  ;;  %v1915_v8 = vld [vmem:[#allocation3 + $0x48] sm:$0xff] }
 0x275   : > { %v9072_v33 = vpop.permute.xlu1 %9071  ;;  %v1811_v17 = vsel %vm575_vm0, %v11153_v55, %v9084_v10  ;;  %v1810_v42 = vsel %vm575_vm0, %v11141_v12, %v9083_v2  ;;  %v1757_v22 = vpack.c.bf16 %v1753_v24, %v1752_v15  ;;  %v1920_v10 = vld [vmem:[#allocation3 + $0x70] sm:$0xff]  ;;  %v9907_v24 = vld [vmem:[%s13591_s8] ss:$8 sps:$4 sm:$0xff]   ;;  %v9909_v15 = vld [vmem:[%s13591_s8 + $0x4] ss:$8 sps:$4 sm:$0xff]  }
 0x276   : > { %v9074_v57 = vunpack.i.h.bf16 %v9072_v33  ;;  %v9073_v36 = vunpack.i.l.bf16 %v9072_v33  ;;  %v9092_v45 = vpop.permute.xlu0 %9091  ;;  %v1818_v27 = vpack.c.bf16 %v1811_v17, %v1810_v42  ;;  %v1925_v33 = vld [vmem:[#allocation3 + $0x98] sm:$0xff] }
 0x277   : > { %8528 = vmatpush3.bf16.msra.mxu0 %v9906_v29  ;;  %v9094_v53 = vunpack.i.h.bf16 %v9092_v45  ;;  %v9093_v12 = vunpack.i.l.bf16 %v9092_v45  ;;  %v9916_v17 = vld [vmem:[%s13591_s8 + $0x30] ss:$8 sps:$4 sm:$0xff]   ;;  %v9918_v42 = vld [vmem:[%s13591_s8 + $0x34] ss:$8 sps:$4 sm:$0xff]  }
 0x278   : > { %v1875_v26 = vsel %vm575_vm0, %v11181_v31, %v9074_v57  ;;  %v1874_v44 = vsel %vm575_vm0, %v11151_v16, %v9073_v36  ;;  %2512 = vmatprep.subr.bf16.mxu0 %v9909_v15  ;;  %v9915_v57 = vld [vmem:[%s13591_s8 + $0x24] ss:$8 sps:$4 sm:$0xff]   ;;  %v9913_v36 = vld [vmem:[%s13591_s8 + $0x20] ss:$8 sps:$4 sm:$0xff]  }
 0x279   : > { %v1882_v11 = vpack.c.bf16 %v1875_v26, %v1874_v44  ;;  %v9087_v18 = vpop.permute.xlu1 %9086  ;;  %v1813_v50 = vsel %vm575_vm0, %v11190_v38, %v9094_v53 }
 0x27a   : > { %v9089_v48 = vunpack.i.h.bf16 %v9087_v18  ;;  %v9088_v55 = vunpack.i.l.bf16 %v9087_v18  ;;  %2282 = vmatmul.mubr.bf16.gmra.mrb[28].mxu0 %v1692_v63  ;;  %v10457_v63 = vmov 0  }
 0x27b   : > { %2330 = vmatprep.mubr.bf16.mxu1 %v1882_v11  ;;  %2289 = vmatprep.mubr.bf16.mxu0 %v1757_v22 }
 0x27c   : > { %v1877_v31 = vsel %vm575_vm0, %v11202_v59, %v9089_v48  ;;  %v1876_v16 = vsel %vm575_vm0, %v11172_v20, %v9088_v55  ;;  %2331 = vmatmul.mubr.bf16.vlgmr.msra.gmra.mrb[24].mxu1 %v1818_v27  ;;  %v1812_v59 = vsel %vm575_vm0, %v11170_v19, %v9093_v12  ;;  %v9102_v20 = vpop.permute.xlu0 %9101 }
 0x27d   : > { %v1883_v51 = vpack.c.bf16 %v1877_v31, %v1876_v16  ;;  %v9097_v60 = vpop.permute.xlu1 %9096  ;;  %v1819_v56 = vpack.c.bf16 %v1813_v50, %v1812_v59  ;;  %v9104_v58 = vunpack.i.h.bf16 %v9102_v20  ;;  %v9103_v29 = vunpack.i.l.bf16 %v9102_v20  ;;  %v11372_v31 = vld [vmem:[%s13588_s5] ss:$0 sm:$0xff] }
 0x27e   : > { %v9099_v54 = vunpack.i.h.bf16 %v9097_v60  ;;  %v9098_v25 = vunpack.i.l.bf16 %v9097_v60 }
 0x27f   : > { %2338 = vmatprep.mubr.bf16.mxu1 %v1883_v51 }
 0x280   : > { %v1879_v35 = vsel %vm575_vm0, %v11241_v32, %v9099_v54  ;;  %v1878_v3 = vsel %vm575_vm0, %v11210_v46, %v9098_v25  ;;  %v1815_v32 = vsel %vm575_vm0, %v11212_v47, %v9104_v58  ;;  %v1814_v46 = vsel %vm575_vm0, %v11194_v39, %v9103_v29  ;;  %v9112_v4 = vpop.permute.xlu0 %9111 }
 0x281   : > { %v9107_v43 = vpop.permute.xlu1 %9106  ;;  %v1884_v61 = vpack.c.bf16 %v1879_v35, %v1878_v3  ;;  %v1820_v9 = vpack.c.bf16 %v1815_v32, %v1814_v46  ;;  %v9114_v2 = vunpack.i.h.bf16 %v9112_v4  ;;  %v9113_v40 = vunpack.i.l.bf16 %v9112_v4 }
 0x282   : > { %2290 = vmatmul.mubr.bf16.gmra.mrb[32].mxu0 %v1693_v49  ;;  %v9109_v38 = vunpack.i.h.bf16 %v9107_v43  ;;  %v9108_v19 = vunpack.i.l.bf16 %v9107_v43 }
 0x283   : > { %8529 = vmatprep.mubr.msk.bf16.mxu0 %vm575_vm0, %v1910_v52  ;;  %v1817_v39 = vsel %vm575_vm0, %v11264_v5, %v9114_v2  ;;  %v1816_v47 = vsel %vm575_vm0, %v11204_v41, %v9113_v40  ;;  %v9912_v5 = vld [vmem:[%s13591_s8 + $0x14] ss:$8 sps:$4 sm:$0xff]   ;;  %v9910_v41 = vld [vmem:[%s13591_s8 + $0x10] ss:$8 sps:$4 sm:$0xff]  }
 0x284   : > { %2339 = vmatmul.mubr.bf16.gmra.mrb[28].mxu1 %v1819_v56  ;;  %v1881_v6 = vsel %vm575_vm0, %v1833_v21, %v9109_v38  ;;  %v1880_v7 = vsel %vm575_vm0, %v11244_v62, %v9108_v19  ;;  %v1821_v62 = vpack.c.bf16 %v1817_v39, %v1816_v47 }
 0x285   : > { %2346 = vmatprep.mubr.bf16.mxu1 %v1884_v61  ;;  %v1885_v37 = vpack.c.bf16 %v1881_v6, %v1880_v7 }
 0x28a   : > { %8530 = vmatmul.mubr.msk.bf16.vlgmr.msra.gmra.mrb[36].mxu0 %vm575_vm0, %v1915_v8 }
 0x28b   : > { %8533 = vmatprep.mubr.msk.bf16.mxu0 %vm575_vm0, %v1920_v10  ;;  %2513 = vmatpush1.bf16.msra.mxu0 %v9907_v24 }
 0x28c   : > { %2347 = vmatmul.mubr.bf16.gmra.mrb[32].mxu1 %v1820_v9  ;;  %2514 = vmatprep.subr.bf16.mxu0 %v9912_v5 }
 0x28d   : > { %2354 = vmatprep.mubr.bf16.mxu1 %v1885_v37 }
 0x28f   : > { %2515 = vmatpush1.bf16.msra.mxu0 %v9910_v41 }
 0x290   : > { %2516 = vmatprep.subr.bf16.mxu0 %v9915_v57 }
 0x292   : > { %8534 = vmatmul.mubr.msk.bf16.gmra.mrb[40].mxu0 %vm575_vm0, %v1925_v33 }
 0x293   : > { %2517 = vmatpush1.bf16.msra.mxu0 %v9913_v36  ;;  %2544 = vmatprep.mubr.bf16.mxu0 %v10457_v63 }
 0x294   : > { %2355 = vmatmul.mubr.bf16.gmra.mrb[36].mxu1 %v1821_v62  ;;  %2518 = vmatprep.subr.bf16.mxu0 %v9918_v42 }
 0x297   : > { %2519 = vmatpush1.bf16.msra.mxu0 %v9916_v17 }
 0x33d   : > { %v8105_v26 = vpop.f32.mrb[20].mxu0 }
 0x33e   : > { %v8106_v44 = vpop.f32.mrb[21].mxu0 }
 0x33f   : > { %v8107_v45 = vadd.f32 %v8106_v44, %v8105_v26  ;;  %v8108_v30 = vpop.f32.mrb[22].mxu0  ;;  %v10379_v44 = vld [vmem:[%s10691_s2] sm:$0xff] }
 0x340   : > { %v8109_v34 = vpop.f32.mrb[23].mxu0 }
 0x341   : > { %v8110_v22 = vadd.f32 %v8109_v34, %v8108_v30  ;;  %v2268_v25 = vadd.f32 %v8107_v45, %v11372_v31  ;;  %v10380_v34 = vld [vmem:[%s10691_s2 + $0x8] sm:$0xff] }
 0x343   : > { %v2271_v35 = vadd.f32 %v8110_v22, %v11372_v31 }
 0x345   : > { %v8111_v11 = vpop.f32.mrb[24].mxu0 }
 0x346   : > { %v8112_v18 = vpop.f32.mrb[25].mxu0 }
 0x347   : > { %v8113_v27 = vadd.f32 %v8112_v18, %v8111_v11  ;;  %v8114_v48 = vpop.f32.mrb[26].mxu0 }
 0x348   : > { %v8115_v55 = vpop.f32.mrb[27].mxu0 }
 0x349   : > { %v8116_v53 = vadd.f32 %v8115_v55, %v8114_v48  ;;  %v2276_v32 = vadd.f32 %v8113_v27, %v11372_v31 }
 0x34b   : > { %v2279_v8 = vadd.f32 %v8116_v53, %v11372_v31 }
 0x34d   : > { %v8117_v12 = vpop.f32.mrb[28].mxu0 }
 0x34e   : > { %v8118_v16 = vpop.f32.mrb[29].mxu0 }
 0x34f   : > { %v8145_v13 = vpop.f32.mrb[24].mxu1  ;;  %v8119_v28 = vadd.f32 %v8118_v16, %v8117_v12  ;;  %v8120_v51 = vpop.f32.mrb[30].mxu0 }
 0x350   : > { %v8146_v60 = vpop.f32.mrb[25].mxu1  ;;  %v8121_v54 = vpop.f32.mrb[31].mxu0 }
 0x351   : > { %v8147_v50 = vadd.f32 %v8146_v60, %v8145_v13  ;;  %v8148_v59 = vpop.f32.mrb[26].mxu1  ;;  %v8122_v49 = vadd.f32 %v8121_v54, %v8120_v51  ;;  %v2284_v41 = vadd.f32 %v8119_v28, %v11372_v31  ;;  %v10381_v60 = vld [vmem:[%s10691_s2 + $0x18] sm:$0xff] }
 0x352   : > { %v8149_v20 = vpop.f32.mrb[27].mxu1 }
 0x353   : > { %v8150_v3 = vadd.f32 %v8149_v20, %v8148_v59  ;;  %v2333_v43 = vadd.f32 %v8147_v50, %v2268_v25  ;;  %v2287_v42 = vadd.f32 %v8122_v49, %v11372_v31 }
 0x355   : > { %v8123_v56 = vpop.f32.mrb[32].mxu0  ;;  %v2336_v52 = vadd.f32 %v8150_v3, %v2271_v35  ;;  %v10382_v35 = vld [vmem:[%s10691_s2 + $0x10] sm:$0xff] }
 0x356   : > { %v8124_v58 = vpop.f32.mrb[33].mxu0 }
 0x357   : > { %v8151_v29 = vpop.f32.mrb[28].mxu1  ;;  %v8125_v61 = vadd.f32 %v8124_v58, %v8123_v56  ;;  %v8126_v38 = vpop.f32.mrb[34].mxu0 }
 0x358   : > { %v8152_v19 = vpop.f32.mrb[29].mxu1  ;;  %v8127_v21 = vpop.f32.mrb[35].mxu0 }
 0x359   : > { %v8153_v46 = vadd.f32 %v8152_v19, %v8151_v29  ;;  %v8154_v4 = vpop.f32.mrb[30].mxu1  ;;  %v8128_v6 = vadd.f32 %v8127_v21, %v8126_v38  ;;  %v2292_v51 = vadd.f32 %v8125_v61, %v11372_v31  ;;  %v10383_v38 = vld [vmem:[%s10691_s2 + $0x28] sm:$0xff] }
 0x35a   : > { %v8155_v7 = vpop.f32.mrb[31].mxu1 }
 0x35b   : > { %v8156_v9 = vadd.f32 %v8155_v7, %v8154_v4  ;;  %v2341_v10 = vadd.f32 %v8153_v46, %v2276_v32  ;;  %v2295_v20 = vadd.f32 %v8128_v6, %v11372_v31  ;;  %v10384_v31 = vld [vmem:[%s10691_s2 + $0x20] sm:$0xff]  ;;  %v10385_v46 = vld [vmem:[%s10691_s2 + $0x38] sm:$0xff]  ;;  %v10386_v6 = vld [vmem:[%s10691_s2 + $0x30] sm:$0xff]  ;;  %s10458_s2 = smov 120  }
 0x35d   : > { %v8531_v2 = vpop.f32.mrb[36].mxu0  ;;  %v2344_v40 = vadd.f32 %v8156_v9, %v2279_v8  ;;  %v10387_v9 = vld [vmem:[%s13592_s9] sm:$0x3] }
 0x35e   : > { %v2406_v37 = vadd.f32 %v8531_v2, %v2341_v10  ;;  %v2397_v39 = vpop.f32.mrb[37].mxu0  ;;  %v2453_v10 = vrot.slane %v10387_v9, %v11008_v23 }
 0x35f   : > { %v8157_v47 = vpop.f32.mrb[32].mxu1  ;;  %v2398_v33 = vadd.f32 %v2397_v39, %v2333_v43  ;;  %v8532_v62 = vpop.f32.mrb[38].mxu0 }
 0x360   : > { %v8158_v24 = vpop.f32.mrb[33].mxu1  ;;  %v2409_v15 = vadd.f32 %v8532_v62, %v2344_v40  ;;  %v2400_v5 = vpop.f32.mrb[39].mxu0  ;;  %v11396_v3 = vadd.f32 %v10382_v35, %v2406_v37 }
 0x361   : > { %v8159_v57 = vadd.f32 %v8158_v24, %v8157_v47  ;;  %v8160_v36 = vpop.f32.mrb[34].mxu1  ;;  %v2401_v17 = vadd.f32 %v2400_v5, %v2336_v52  ;;  %v11381_v45 = vadd.f32 %v10379_v44, %v2398_v33 }
 0x362   : > { %v8161_v26 = vpop.f32.mrb[35].mxu1  ;;  %v11392_v54 = vadd.f32 %v10381_v60, %v2409_v15  ;;  %13707 = vst [vmem:[#allocation18_spill] sm:$0xff] %v11396_v3 }
 0x363   : > { %13704 = vst [vmem:[#allocation15_spill] sm:$0xff] %v11381_v45  ;;  %v8162_v30 = vadd.f32 %v8161_v26, %v8160_v36  ;;  %v11384_v22 = vadd.f32 %v10380_v34, %v2401_v17  ;;  %v2349_v11 = vadd.f32 %v8159_v57, %v2284_v41 }
 0x364   : > { %13706 = vst [vmem:[#allocation17_spill] sm:$0xff] %v11392_v54  ;;  %v2437_v52 = vpack.c.bf16 %v11392_v54, %v11396_v3 }
 0x365   : > { %13705 = vst [vmem:[#allocation16_spill] sm:$0xff] %v11384_v22  ;;  %v2436_v18 = vpack.c.bf16 %v11384_v22, %v11381_v45  ;;  %v8535_v27 = vpop.f32.mrb[40].mxu0  ;;  %v2352_v48 = vadd.f32 %v8162_v30, %v2287_v42 }
 0x366   : > { %v2413_v55 = vpop.f32.mrb[41].mxu0 }
 0x367   : > { %v8163_v53 = vpop.f32.mrb[36].mxu1  ;;  %v2414_v12 = vadd.f32 %v2413_v55, %v2349_v11  ;;  %v8536_v16 = vpop.f32.mrb[42].mxu0  ;;  %7813 = vmatmul.mubr.msk.bf16.vlgmr.msra.gmra.mrb[44].mxu0 %vm575_vm0, %v2436_v18 }
 0x368   : > { %v8164_v13 = vpop.f32.mrb[37].mxu1  ;;  %v2416_v28 = vpop.f32.mrb[43].mxu0  ;;  %2554 = vmatprep.mubr.bf16.mxu0 %v10457_v63 }
 0x369   : > { %v8165_v25 = vadd.f32 %v8164_v13, %v8163_v53  ;;  %v8166_v50 = vpop.f32.mrb[38].mxu1  ;;  %v2417_v59 = vadd.f32 %v2416_v28, %v2352_v48  ;;  %v11406_v21 = vadd.f32 %v10384_v31, %v2414_v12 }
 0x36a   : > { %v8167_v49 = vpop.f32.mrb[39].mxu1 }
 0x36b   : > { %v2357_v43 = vadd.f32 %v8165_v25, %v2292_v51  ;;  %v8168_v56 = vadd.f32 %v8167_v49, %v8166_v50  ;;  %v11403_v19 = vadd.f32 %v10383_v38, %v2417_v59  ;;  %13709 = vst [vmem:[#allocation20_spill] sm:$0xff] %v11406_v21 }
 0x36d   : > { %v2422_v58 = vadd.f32 %v8535_v27, %v2357_v43  ;;  %v2360_v29 = vadd.f32 %v8168_v56, %v2295_v20  ;;  %13708 = vst [vmem:[#allocation19_spill] sm:$0xff] %v11403_v19  ;;  %v2438_v32 = vpack.c.bf16 %v11403_v19, %v11406_v21 }
 0x36f   : > { %v2425_v61 = vadd.f32 %v8536_v16, %v2360_v29  ;;  %7814 = vmatmul.mubr.msk.bf16.gmra.mrb[48].mxu0 %vm575_vm0, %v2437_v52  ;;  %v11416_v7 = vadd.f32 %v10386_v6, %v2422_v58 }
 0x370   : > { %2564 = vmatprep.mubr.bf16.mxu0 %v10457_v63 }
 0x371   : > { %v11413_v4 = vadd.f32 %v10385_v46, %v2425_v61  ;;  %13711 = vst [vmem:[#allocation22_spill] sm:$0xff] %v11416_v7 }
 0x373   : > { %13710 = vst [vmem:[#allocation21_spill] sm:$0xff] %v11413_v4  ;;  %v2439_v8 = vpack.c.bf16 %v11413_v4, %v11416_v7 }
 0x377   : > { %7815 = vmatmul.mubr.msk.bf16.gmra.mrb[52].mxu0 %vm575_vm0, %v2438_v32 }
 0x378   : > { %2574 = vmatprep.mubr.bf16.mxu0 %v10457_v63 }
 0x37f   : > { %7816 = vmatmul.mubr.msk.bf16.gmra.mrb[56].mxu0 %vm575_vm0, %v2439_v8 }
 0x43a   : > { %v2546_v2 = vpop.f32.mrb[44].mxu0 }
 0x43b   : > { %v11425_v40 = vadd.f32 %v2546_v2, %v2453_v10  ;;  %v2548_v63 = vpop.f32.mrb[45].mxu0 }
 0x43c   : > { %v2549_v37 = vadd.f32 %v2548_v63, %v10930_v14  ;;  %v2550_v39 = vpop.f32.mrb[46].mxu0 }
 0x43d   : > { %v11428_v47 = vadd.f32 %v2550_v39, %v2453_v10  ;;  %v2552_v33 = vpop.f32.mrb[47].mxu0  ;;  %v2585_v24 = vmul.f32 0.35355338, %v11425_v40 }
 0x43e   : > { %v2553_v62 = vadd.f32 %v2552_v33, %v10930_v14 }
 0x43f   : > { %v11434_v15 = vpack.i.bf16 %v11428_v47, %v11425_v40  ;;  %v2586_v5 = vmul.f32 0.35355338, %v11428_v47  ;;  %v2977_v41 = vpack.c.bf16 %v11428_v47, %v11425_v40 }
 0x440   : > { %v11446_v44 = vpack.i.bf16 %v2553_v62, %v2549_v37  ;;  %v11455_v55 = vpack.c.bf16 %v2553_v62, %v2549_v37 }
 0x441   : > { %9116 = vrot.lane.b32.xlu1 %v11434_v15, %s10458_s2  ;;  %v2769_v57 = vpack.c.bf16 %v2586_v5, %v2585_v24  ;;  %v11441_v36 = vpack.i.bf16 %v2586_v5, %v2585_v24 }
 0x442   : > { %v2556_v17 = vpop.f32.mrb[48].mxu0 }
 0x443   : > { %v11443_v42 = vadd.f32 %v2556_v17, %v2453_v10  ;;  %v2558_v26 = vpop.f32.mrb[49].mxu0  ;;  %8545 = vmatprep.mubr.msk.bf16.mxu1 %vm3229_vm4, %v2769_v57 }
 0x444   : > { %v2559_v30 = vadd.f32 %v2558_v26, %v10930_v14  ;;  %v2560_v34 = vpop.f32.mrb[50].mxu0 }
 0x445   : > { %v2561_v11 = vadd.f32 %v2560_v34, %v2453_v10  ;;  %v2562_v18 = vpop.f32.mrb[51].mxu0  ;;  %9126 = vrot.lane.b32.xlu1 %v11434_v15, %s10459_s21  ;;  %v11453_v48 = vmul.f32 0.35355338, %v11443_v42 }
 0x446   : > { %v2563_v27 = vadd.f32 %v2562_v18, %v10930_v14 }
 0x447   : > { %v11458_v53 = vpack.i.bf16 %v2561_v11, %v11443_v42  ;;  %v2978_v12 = vpack.c.bf16 %v2561_v11, %v11443_v42  ;;  %v11461_v16 = vmul.f32 0.35355338, %v2561_v11 }
 0x448   : > { %v11465_v13 = vpack.i.bf16 %v2563_v27, %v2559_v30  ;;  %v11477_v52 = vpack.c.bf16 %v2563_v27, %v2559_v30 }
 0x449   : > { %9121 = vrot.lane.b32.xlu0 %v11458_v53, %s10458_s2  ;;  %v11469_v51 = vpack.i.bf16 %v11461_v16, %v11453_v48  ;;  %v2770_v60 = vpack.c.bf16 %v11461_v16, %v11453_v48 }
 0x44a   : > { %v2566_v28 = vpop.f32.mrb[52].mxu0 }
 0x44b   : > { %v2567_v25 = vadd.f32 %v2566_v28, %v2453_v10  ;;  %v2568_v50 = vpop.f32.mrb[53].mxu0 }
 0x44c   : > { %v2569_v59 = vadd.f32 %v2568_v50, %v10930_v14  ;;  %v2570_v49 = vpop.f32.mrb[54].mxu0 }
 0x44d   : > { %v2571_v20 = vadd.f32 %v2570_v49, %v2453_v10  ;;  %v2572_v35 = vpop.f32.mrb[55].mxu0  ;;  %v11475_v56 = vmul.f32 0.35355338, %v2567_v25 }
 0x44e   : > { %v2573_v43 = vadd.f32 %v2572_v35, %v10930_v14 }
 0x44f   : > { %v11479_v58 = vpack.i.bf16 %v2571_v20, %v2567_v25  ;;  %v2979_v29 = vpack.c.bf16 %v2571_v20, %v2567_v25  ;;  %v11481_v61 = vmul.f32 0.35355338, %v2571_v20 }
 0x450   : > { %v11485_v38 = vpack.i.bf16 %v2573_v43, %v2569_v59  ;;  %v11499_v62 = vpack.c.bf16 %v2573_v43, %v2569_v59 }
 0x451   : > { %9131 = vrot.lane.b32.xlu1 %v11479_v58, %s10458_s2  ;;  %v11489_v32 = vpack.i.bf16 %v11481_v61, %v11475_v56  ;;  %v2771_v46 = vpack.c.bf16 %v11481_v61, %v11475_v56 }
 0x452   : > { %v2576_v31 = vpop.f32.mrb[56].mxu0 }
 0x453   : > { %v2577_v6 = vadd.f32 %v2576_v31, %v2453_v10  ;;  %v2578_v8 = vpop.f32.mrb[57].mxu0 }
 0x454   : > { %v2579_v9 = vadd.f32 %v2578_v8, %v10930_v14  ;;  %v2580_v2 = vpop.f32.mrb[58].mxu0 }
 0x455   : > { %v2581_v63 = vadd.f32 %v2580_v2, %v2453_v10  ;;  %v2582_v37 = vpop.f32.mrb[59].mxu0  ;;  %9146 = vrot.lane.b32.xlu1 %v11458_v53, %s10459_s21  ;;  %v11497_v33 = vmul.f32 0.35355338, %v2577_v6 }
 0x456   : > { %v2583_v39 = vadd.f32 %v2582_v37, %v10930_v14 }
 0x457   : > { %v11501_v24 = vpack.i.bf16 %v2581_v63, %v2577_v6  ;;  %v2980_v5 = vpack.c.bf16 %v2581_v63, %v2577_v6  ;;  %v11503_v57 = vmul.f32 0.35355338, %v2581_v63 }
 0x458   : > { %v11509_v10 = vpack.i.bf16 %v2583_v39, %v2579_v9  ;;  %v11517_v42 = vpack.c.bf16 %v2583_v39, %v2579_v9 }
 0x459   : > { %9136 = vrot.lane.b32.xlu0 %v11501_v24, %s10458_s2  ;;  %9156 = vrot.lane.b32.xlu1 %v11479_v58, %s10459_s21  ;;  %v11513_v14 = vpack.i.bf16 %v11503_v57, %v11497_v33  ;;  %v2772_v17 = vpack.c.bf16 %v11503_v57, %v11497_v33 }
 0x45a   : > { %13712 = vst [vmem:[#allocation23_spill] sm:$0xff] %v11509_v10 }
 0x45d   : > { %9141 = vrot.lane.b32.xlu0 %v11434_v15, %s10460_s29  ;;  %3221 = vrot.lane.b32.xlu1 %v2977_v41, %s10456_s27 }
 0x461   : > { %9151 = vrot.lane.b32.xlu0 %v11458_v53, %s10460_s29  ;;  %9166 = vrot.lane.b32.xlu1 %v11434_v15, %s10461_s1 }
 0x465   : > { %9161 = vrot.lane.b32.xlu0 %v11479_v58, %s10460_s29  ;;  %3223 = vrot.lane.b32.xlu1 %v2978_v12, %s10456_s27 }
 0x469   : > { %9171 = vrot.lane.b32.xlu0 %v11434_v15, %s10462_s22  ;;  %9176 = vrot.lane.b32.xlu1 %v11458_v53, %s10461_s1 }
 0x46d   : > { %9181 = vrot.lane.b32.xlu0 %v11458_v53, %s10462_s22  ;;  %3225 = vrot.lane.b32.xlu1 %v2979_v29, %s10456_s27 }
 0x471   : > { %9191 = vrot.lane.b32.xlu0 %v11479_v58, %s10462_s22  ;;  %9186 = vrot.lane.b32.xlu1 %v11479_v58, %s10461_s1 }
 0x475   : > { %9206 = vrot.lane.b32.xlu0 %v11501_v24, %s10460_s29  ;;  %9196 = vrot.lane.b32.xlu1 %v11501_v24, %s10459_s21 }
 0x479   : > { %9216 = vrot.lane.b32.xlu0 %v11501_v24, %s10462_s22  ;;  %9201 = vrot.lane.b32.xlu1 %v11441_v36, %s10458_s2 }
 0x47d   : > { %9211 = vrot.lane.b32.xlu1 %v11501_v24, %s10461_s1 }
 0x481   : > { %3227 = vrot.lane.b32.xlu1 %v2980_v5, %s10456_s27 }
 0x4b3   : > { %v9117_v40 = vpop.permute.xlu1 %9116 }
 0x4b4   : > { %v9119_v47 = vunpack.i.h.bf16 %v9117_v40  ;;  %v9118_v41 = vunpack.i.l.bf16 %v9117_v40 }
 0x4b6   : > { %v2981_v26 = vpack.c.bf16 %v9119_v47, %v9118_v41 }
 0x4b7   : > { %v9127_v30 = vpop.permute.xlu1 %9126 }
 0x4b8   : > { %v9129_v34 = vunpack.i.h.bf16 %v9127_v30  ;;  %v9128_v11 = vunpack.i.l.bf16 %v9127_v30  ;;  %3323 = vrot.lane.b32.xlu0 %v2981_v26, %s10456_s27 }
 0x4ba   : > { %v2985_v18 = vpack.c.bf16 %v9129_v34, %v9128_v11 }
 0x4bb   : > { %v9122_v27 = vpop.permute.xlu0 %9121 }
 0x4bc   : > { %v9124_v12 = vunpack.i.h.bf16 %v9122_v27  ;;  %v9123_v28 = vunpack.i.l.bf16 %v9122_v27  ;;  %9221 = vrot.lane.b32.xlu0 %v11469_v51, %s10458_s2  ;;  %3424 = vrot.lane.b32.xlu1 %v2985_v18, %s10456_s27 }
 0x4be   : > { %v2982_v25 = vpack.c.bf16 %v9124_v12, %v9123_v28 }
 0x4c0   : > { %3325 = vrot.lane.b32.xlu0 %v2982_v25, %s10456_s27  ;;  %9226 = vrot.lane.b32.xlu1 %v11434_v15, %s10463_s6 }
 0x4c3   : > { %v9132_v50 = vpop.permute.xlu1 %9131 }
 0x4c4   : > { %v9134_v39 = vunpack.i.h.bf16 %v9132_v50  ;;  %v9133_v5 = vunpack.i.l.bf16 %v9132_v50 }
 0x4c6   : > { %v2983_v26 = vpack.c.bf16 %v9134_v39, %v9133_v5 }
 0x4c7   : > { %v9147_v59 = vpop.permute.xlu1 %9146 }
 0x4c8   : > { %v9149_v49 = vunpack.i.h.bf16 %v9147_v59  ;;  %v9148_v20 = vunpack.i.l.bf16 %v9147_v59 }
 0x4ca   : > { %v2986_v35 = vpack.c.bf16 %v9149_v49, %v9148_v20 }
 0x4cb   : > { %v9137_v43 = vpop.permute.xlu0 %9136  ;;  %v9157_v29 = vpop.permute.xlu1 %9156 }
 0x4cc   : > { %3426 = vrot.lane.b32.xlu1 %v2986_v35, %s10456_s27  ;;  %v9159_v31 = vunpack.i.h.bf16 %v9157_v29  ;;  %v9158_v6 = vunpack.i.l.bf16 %v9157_v29  ;;  %v9139_v18 = vunpack.i.h.bf16 %v9137_v43  ;;  %v9138_v27 = vunpack.i.l.bf16 %v9137_v43 }
 0x4ce   : > { %v2987_v47 = vpack.c.bf16 %v9159_v31, %v9158_v6  ;;  %v2984_v50 = vpack.c.bf16 %v9139_v18, %v9138_v27 }
 0x4cf   : > { %v9142_v8 = vpop.permute.xlu0 %9141  ;;  %v3222_v9 = vpop.permute.xlu1 %3221 }
 0x4d0   : > { %v9144_v2 = vunpack.i.h.bf16 %v9142_v8  ;;  %v9143_v63 = vunpack.i.l.bf16 %v9142_v8  ;;  %8864 = vmatprep.subr.msk.bf16.mxu1 %vm3229_vm4, %v3222_v9  ;;  %9236 = vrot.lane.b32.xlu1 %v11458_v53, %s10463_s6  ;;  %v3243_v37 = vsel %vm3229_vm4, %v3222_v9, 0 }
 0x4d1   : > { %8538 = vmatpush3.bf16.xpose.msra.mxu1 %v3243_v37 }
 0x4d2   : > { %v2989_v40 = vpack.c.bf16 %v9144_v2, %v9143_v63 }
 0x4d3   : > { %v9167_v41 = vpop.permute.xlu1 %9166  ;;  %v9152_v11 = vpop.permute.xlu0 %9151 }
 0x4d4   : > { %3525 = vrot.lane.b32.xlu0 %v2989_v40, %s10456_s27  ;;  %3428 = vrot.lane.b32.xlu1 %v2987_v47, %s10456_s27  ;;  %v9154_v28 = vunpack.i.h.bf16 %v9152_v11  ;;  %v9153_v25 = vunpack.i.l.bf16 %v9152_v11  ;;  %v9169_v37 = vunpack.i.h.bf16 %v9167_v41  ;;  %v9168_v39 = vunpack.i.l.bf16 %v9167_v41 }
 0x4d6   : > { %v2990_v35 = vpack.c.bf16 %v9154_v28, %v9153_v25 }
 0x4d7   : > { %v3224_v30 = vpop.permute.xlu1 %3223  ;;  %v9162_v59 = vpop.permute.xlu0 %9161 }
 0x4d8   : > { %3327 = vrot.lane.b32.xlu0 %v2983_v26, %s10456_s27  ;;  %8865 = vmatprep.subr.msk.bf16.mxu1 %vm3229_vm4, %v3224_v30  ;;  %v3246_v34 = vsel %vm3229_vm4, %v3224_v30, 0  ;;  %v9164_v29 = vunpack.i.h.bf16 %v9162_v59  ;;  %v9163_v31 = vunpack.i.l.bf16 %v9162_v59 }
 0x4d9   : > { %9246 = vrot.lane.b32.xlu1 %v11479_v58, %s10463_s6  ;;  %8540 = vmatpush3.bf16.xpose.msra.mxu1 %v3246_v34 }
 0x4da   : > { %v2991_v2 = vpack.c.bf16 %v9164_v29, %v9163_v31 }
 0x4db   : > { %v9177_v12 = vpop.permute.xlu1 %9176  ;;  %v9172_v43 = vpop.permute.xlu0 %9171 }
 0x4dc   : > { %9231 = vrot.lane.b32.xlu0 %v11434_v15, %s10464_s18  ;;  %v9179_v34 = vunpack.i.h.bf16 %v9177_v12  ;;  %v9178_v11 = vunpack.i.l.bf16 %v9177_v12 }
 0x4dd   : > { %9256 = vrot.lane.b32.xlu1 %v11489_v32, %s10458_s2 }
 0x4df   : > { %v3226_v49 = vpop.permute.xlu1 %3225  ;;  %v9182_v5 = vpop.permute.xlu0 %9181 }
 0x4e0   : > { %3329 = vrot.lane.b32.xlu0 %v2984_v50, %s10456_s27  ;;  %8866 = vmatprep.subr.msk.bf16.mxu1 %vm3229_vm4, %v3226_v49  ;;  %v3249_v20 = vsel %vm3229_vm4, %v3226_v49, 0  ;;  %v2994_v50 = vpack.c.bf16 %v9179_v34, %v9178_v11  ;;  %v9184_v48 = vunpack.i.h.bf16 %v9182_v5  ;;  %v9183_v16 = vunpack.i.l.bf16 %v9182_v5 }
 0x4e1   : > { %9266 = vrot.lane.b32.xlu1 %v11501_v24, %s10463_s6  ;;  %8542 = vmatpush3.bf16.xpose.msra.mxu1 %v3249_v20 }
 0x4e2   : > { %v2998_v29 = vpack.c.bf16 %v9184_v48, %v9183_v16 }
 0x4e3   : > { %v9187_v15 = vpop.permute.xlu1 %9186  ;;  %v9192_v27 = vpop.permute.xlu0 %9191 }
 0x4e4   : > { %3527 = vrot.lane.b32.xlu0 %v2990_v35, %s10456_s27  ;;  %v9189_v41 = vunpack.i.h.bf16 %v9187_v15  ;;  %v9188_v28 = vunpack.i.l.bf16 %v9187_v15  ;;  %v9174_v35 = vunpack.i.h.bf16 %v9172_v43  ;;  %v9173_v15 = vunpack.i.l.bf16 %v9172_v43 }
 0x4e5   : > { %9276 = vrot.lane.b32.xlu1 %v11441_v36, %s10459_s21  ;;  %v9193_v43 = vunpack.i.l.bf16 %v9192_v27 }
 0x4e6   : > { %v2995_v59 = vpack.c.bf16 %v9189_v41, %v9188_v28 }
 0x4e7   : > { %v9197_v6 = vpop.permute.xlu1 %9196 }
 0x4e8   : > { %v9199_v8 = vunpack.i.h.bf16 %v9197_v6  ;;  %v9198_v9 = vunpack.i.l.bf16 %v9197_v6  ;;  %9241 = vrot.lane.b32.xlu0 %v11458_v53, %s10464_s18  ;;  %v2993_v53 = vpack.c.bf16 %v9169_v37, %v9168_v39 }
 0x4e9   : > { %9286 = vrot.lane.b32.xlu1 %v11441_v36, %s10460_s29 }
 0x4ea   : > { %v2988_v63 = vpack.c.bf16 %v9199_v8, %v9198_v9 }
 0x4eb   : > { %v9202_v40 = vpop.permute.xlu1 %9201 }
 0x4ec   : > { %v9204_v47 = vunpack.i.h.bf16 %v9202_v40  ;;  %v9203_v26 = vunpack.i.l.bf16 %v9202_v40  ;;  %3529 = vrot.lane.b32.xlu0 %v2991_v2, %s10456_s27 }
 0x4ed   : > { %3430 = vrot.lane.b32.xlu1 %v2988_v63, %s10456_s27 }
 0x4ee   : > { %v2773_v30 = vpack.c.bf16 %v9204_v47, %v9203_v26 }
 0x4ef   : > { %v9212_v18 = vpop.permute.xlu1 %9211 }
 0x4f0   : > { %9251 = vrot.lane.b32.xlu0 %v11479_v58, %s10464_s18  ;;  %8561 = vmatprep.mubr.msk.bf16.mxu0 %vm3229_vm4, %v2773_v30  ;;  %v9207_v58 = vpop.permute.xlu0 %9206  ;;  %v9214_v56 = vunpack.i.h.bf16 %v9212_v18  ;;  %v9213_v61 = vunpack.i.l.bf16 %v9212_v18 }
 0x4f1   : > { %3626 = vrot.lane.b32.xlu1 %v2993_v53, %s10456_s27  ;;  %v9209_v49 = vunpack.i.h.bf16 %v9207_v58  ;;  %v9208_v20 = vunpack.i.l.bf16 %v9207_v58 }
 0x4f2   : > { %v2996_v31 = vpack.c.bf16 %v9214_v56, %v9213_v61 }
 0x4f3   : > { %v3228_v25 = vpop.permute.xlu1 %3227 }
 0x4f4   : > { %9261 = vrot.lane.b32.xlu0 %v11513_v14, %s10458_s2  ;;  %8867 = vmatprep.subr.msk.bf16.mxu1 %vm3229_vm4, %v3228_v25  ;;  %v3252_v12 = vsel %vm3229_vm4, %v3228_v25, 0  ;;  %v9217_v57 = vpop.permute.xlu0 %9216 }
 0x4f5   : > { %3628 = vrot.lane.b32.xlu1 %v2994_v50, %s10456_s27  ;;  %8544 = vmatpush3.bf16.xpose.msra.mxu1 %v3252_v12  ;;  %v9218_v6 = vunpack.i.l.bf16 %v9217_v57 }
 0x4f8   : > { %9271 = vrot.lane.b32.xlu0 %v11501_v24, %s10464_s18  ;;  %v2992_v24 = vpack.c.bf16 %v9209_v49, %v9208_v20 }
 0x4f9   : > { %3630 = vrot.lane.b32.xlu1 %v2995_v59, %s10456_s27 }
 0x4fc   : > { %9281 = vrot.lane.b32.xlu0 %v11469_v51, %s10459_s21  ;;  %8546 = vmatmul.mubr.msk.bf16.vlgmr.msra.gmra.mrb[40].mxu1 %vm3229_vm4, %v2770_v60  ;;  %v2997_v60 = vpack.c.bf16 %v9174_v35, %v9173_v15 }
 0x4fd   : > { %9296 = vrot.lane.b32.xlu1 %v11489_v32, %s10459_s21  ;;  %8549 = vmatprep.mubr.msk.bf16.mxu1 %vm3229_vm4, %v2771_v46  ;;  %v9194_v46 = vunpack.i.h.bf16 %v9192_v27 }
 0x4ff   : > { %v2999_v33 = vpack.c.bf16 %v9194_v46, %v9193_v43 }
 0x500   : > { %3531 = vrot.lane.b32.xlu0 %v2992_v24, %s10456_s27 }
 0x501   : > { %9306 = vrot.lane.b32.xlu1 %v11489_v32, %s10460_s29 }
 0x504   : > { %9291 = vrot.lane.b32.xlu0 %v11469_v51, %s10460_s29  ;;  %8550 = vmatmul.mubr.msk.bf16.gmra.mrb[44].mxu1 %vm3229_vm4, %v2772_v17  ;;  %v9219_v17 = vunpack.i.h.bf16 %v9217_v57 }
 0x505   : > { %9316 = vrot.lane.b32.xlu1 %v11441_v36, %s10461_s1 }
 0x506   : > { %v3000_v8 = vpack.c.bf16 %v9219_v17, %v9218_v6 }
 0x508   : > { %3727 = vrot.lane.b32.xlu0 %v2997_v60, %s10456_s27 }
 0x509   : > { %9326 = vrot.lane.b32.xlu1 %v11441_v36, %s10462_s22 }
 0x50c   : > { %3729 = vrot.lane.b32.xlu0 %v2998_v29, %s10456_s27 }
 0x50d   : > { %3632 = vrot.lane.b32.xlu1 %v2996_v31, %s10456_s27 }
 0x510   : > { %3731 = vrot.lane.b32.xlu0 %v2999_v33, %s10456_s27 }
 0x514   : > { %9301 = vrot.lane.b32.xlu0 %v11513_v14, %s10459_s21 }
 0x518   : > { %9311 = vrot.lane.b32.xlu0 %v11513_v14, %s10460_s29 }
 0x51c   : > { %9321 = vrot.lane.b32.xlu0 %v11469_v51, %s10461_s1 }
 0x520   : > { %3733 = vrot.lane.b32.xlu0 %v3000_v8, %s10456_s27 }
 0x524   : > { %9331 = vrot.lane.b32.xlu0 %v11469_v51, %s10462_s22 }
 0x52a   : > { %v3324_v9 = vpop.permute.xlu0 %3323 }
 0x52b   : > { %8868 = vmatprep.subr.msk.bf16.mxu0 %vm3229_vm4, %v3324_v9  ;;  %v3344_v2 = vsel %vm3229_vm4, %v3324_v9, 0 }
 0x52c   : > { %8554 = vmatpush3.bf16.xpose.msra.mxu0 %v3344_v2 }
 0x52e   : > { %v9222_v63 = vpop.permute.xlu0 %9221  ;;  %v3425_v37 = vpop.permute.xlu1 %3424 }
 0x52f   : > { %8872 = vmatprep.subr.msk.bf16.mxu1 %vm3229_vm4, %v3425_v37  ;;  %v3445_v39 = vsel %vm3229_vm4, %v3425_v37, 0  ;;  %v9224_v29 = vunpack.i.h.bf16 %v9222_v63  ;;  %v9223_v31 = vunpack.i.l.bf16 %v9222_v63 }
 0x530   : > { %8570 = vmatpush3.bf16.xpose.msra.mxu1 %v3445_v39 }
 0x531   : > { %v2774_v2 = vpack.c.bf16 %v9224_v29, %v9223_v31 }
 0x532   : > { %v3326_v5 = vpop.permute.xlu0 %3325  ;;  %v9227_v40 = vpop.permute.xlu1 %9226 }
 0x533   : > { %v9229_v47 = vunpack.i.h.bf16 %v9227_v40  ;;  %v9228_v26 = vunpack.i.l.bf16 %v9227_v40  ;;  %8869 = vmatprep.subr.msk.bf16.mxu0 %vm3229_vm4, %v3326_v5  ;;  %v3347_v30 = vsel %vm3229_vm4, %v3326_v5, 0 }
 0x534   : > { %8556 = vmatpush3.bf16.xpose.msra.mxu0 %v3347_v30 }
 0x535   : > { %v3001_v34 = vpack.c.bf16 %v9229_v47, %v9228_v26 }
 0x537   : > { %3828 = vrot.lane.b32.xlu1 %v3001_v34, %s10456_s27 }
 0x53e   : > { %v3427_v11 = vpop.permute.xlu1 %3426 }
 0x53f   : > { %8873 = vmatprep.subr.msk.bf16.mxu1 %vm3229_vm4, %v3427_v11  ;;  %v3448_v18 = vsel %vm3229_vm4, %v3427_v11, 0 }
 0x540   : > { %8572 = vmatpush3.bf16.xpose.msra.mxu1 %v3448_v18 }
 0x542   : > { %v9237_v53 = vpop.permute.xlu1 %9236 }
 0x543   : > { %v9239_v27 = vunpack.i.h.bf16 %v9237_v53  ;;  %v9238_v41 = vunpack.i.l.bf16 %v9237_v53 }
 0x545   : > { %v3002_v28 = vpack.c.bf16 %v9239_v27, %v9238_v41 }
 0x546   : > { %v3526_v25 = vpop.permute.xlu0 %3525  ;;  %v3429_v50 = vpop.permute.xlu1 %3428 }
 0x547   : > { %3830 = vrot.lane.b32.xlu1 %v3002_v28, %s10456_s27  ;;  %8874 = vmatprep.subr.msk.bf16.mxu1 %vm3229_vm4, %v3429_v50  ;;  %v3451_v12 = vsel %vm3229_vm4, %v3429_v50, 0  ;;  %v3546_v34 = vsel %vm3229_vm4, %v3526_v25, 0 }
 0x548   : > { %8574 = vmatpush3.bf16.xpose.msra.mxu1 %v3451_v12 }
 0x54a   : > { %v3328_v58 = vpop.permute.xlu0 %3327 }
 0x54b   : > { %v9247_v59 = vpop.permute.xlu1 %9246  ;;  %8870 = vmatprep.subr.msk.bf16.mxu0 %vm3229_vm4, %v3328_v58  ;;  %v3350_v49 = vsel %vm3229_vm4, %v3328_v58, 0 }
 0x54c   : > { %v9249_v20 = vunpack.i.h.bf16 %v9247_v59  ;;  %v9248_v24 = vunpack.i.l.bf16 %v9247_v59  ;;  %8558 = vmatpush3.bf16.xpose.msra.mxu0 %v3350_v49 }
 0x54e   : > { %v3003_v35 = vpack.c.bf16 %v9249_v20, %v9248_v24  ;;  %v9232_v15 = vpop.permute.xlu0 %9231 }
 0x54f   : > { %v9234_v48 = vunpack.i.h.bf16 %v9232_v15  ;;  %v9233_v16 = vunpack.i.l.bf16 %v9232_v15  ;;  %v9257_v60 = vpop.permute.xlu1 %9256 }
 0x550   : > { %3832 = vrot.lane.b32.xlu1 %v3003_v35, %s10456_s27  ;;  %v9259_v57 = vunpack.i.h.bf16 %v9257_v60  ;;  %v9258_v17 = vunpack.i.l.bf16 %v9257_v60 }
 0x551   : > { %v3005_v56 = vpack.c.bf16 %v9234_v48, %v9233_v16 }
 0x552   : > { %v3330_v61 = vpop.permute.xlu0 %3329  ;;  %v2775_v47 = vpack.c.bf16 %v9259_v57, %v9258_v17 }
 0x553   : > { %v9267_v46 = vpop.permute.xlu1 %9266  ;;  %8871 = vmatprep.subr.msk.bf16.mxu0 %vm3229_vm4, %v3330_v61  ;;  %3929 = vrot.lane.b32.xlu0 %v3005_v56, %s10456_s27  ;;  %v3353_v43 = vsel %vm3229_vm4, %v3330_v61, 0 }
 0x554   : > { %9336 = vrot.lane.b32.xlu1 %v11489_v32, %s10461_s1  ;;  %8560 = vmatpush3.bf16.xpose.msra.mxu0 %v3353_v43  ;;  %v9269_v37 = vunpack.i.h.bf16 %v9267_v46  ;;  %v9268_v39 = vunpack.i.l.bf16 %v9267_v46 }
 0x555   : > { %8876 = vmatprep.subr.msk.bf16.mxu0 %vm3229_vm4, %v3526_v25 }
 0x556   : > { %v3528_v33 = vpop.permute.xlu0 %3527  ;;  %v3004_v18 = vpack.c.bf16 %v9269_v37, %v9268_v39 }
 0x557   : > { %v9277_v6 = vpop.permute.xlu1 %9276  ;;  %v3549_v58 = vsel %vm3229_vm4, %v3528_v33, 0 }
 0x558   : > { %v9279_v8 = vunpack.i.h.bf16 %v9277_v6  ;;  %v9278_v9 = vunpack.i.l.bf16 %v9277_v6  ;;  %9346 = vrot.lane.b32.xlu1 %v11489_v32, %s10462_s22 }
 0x55a   : > { %v2777_v5 = vpack.c.bf16 %v9279_v8, %v9278_v9  ;;  %v9242_v40 = vpop.permute.xlu0 %9241 }
 0x55b   : > { %v9244_v26 = vunpack.i.h.bf16 %v9242_v40  ;;  %v9243_v30 = vunpack.i.l.bf16 %v9242_v40  ;;  %v9287_v63 = vpop.permute.xlu1 %9286  ;;  %8562 = vmatmul.mubr.msk.bf16.vlgmr.msra.gmra.mrb[60].mxu0 %vm3229_vm4, %v2774_v2 }
 0x55c   : > { %9356 = vrot.lane.b32.xlu1 %v11441_v36, %s10463_s6  ;;  %8577 = vmatprep.mubr.msk.bf16.mxu1 %vm3229_vm4, %v2777_v5  ;;  %v9289_v49 = vunpack.i.h.bf16 %v9287_v63  ;;  %v9288_v20 = vunpack.i.l.bf16 %v9287_v63 }
 0x55d   : > { %v3006_v11 = vpack.c.bf16 %v9244_v26, %v9243_v30  ;;  %8565 = vmatprep.mubr.msk.bf16.mxu0 %vm3229_vm4, %v2775_v47  ;;  %8586 = vmatpush3.bf16.xpose.msra.mxu0 %v3546_v34 }
 0x55e   : > { %8877 = vmatprep.subr.msk.bf16.mxu0 %vm3229_vm4, %v3528_v33  ;;  %v3530_v53 = vpop.permute.xlu0 %3529  ;;  %v2781_v16 = vpack.c.bf16 %v9289_v49, %v9288_v20 }
 0x55f   : > { %v3431_v27 = vpop.permute.xlu1 %3430  ;;  %3931 = vrot.lane.b32.xlu0 %v3006_v11, %s10456_s27  ;;  %v3552_v61 = vsel %vm3229_vm4, %v3530_v53, 0 }
 0x560   : > { %3834 = vrot.lane.b32.xlu1 %v3004_v18, %s10456_s27  ;;  %8875 = vmatprep.subr.msk.bf16.mxu1 %vm3229_vm4, %v3431_v27  ;;  %v3454_v41 = vsel %vm3229_vm4, %v3431_v27, 0 }
 0x561   : > { %8576 = vmatpush3.bf16.xpose.msra.mxu1 %v3454_v41 }
 0x562   : > { %v9252_v28 = vpop.permute.xlu0 %9251 }
 0x563   : > { %v9254_v25 = vunpack.i.h.bf16 %v9252_v28  ;;  %v9253_v50 = vunpack.i.l.bf16 %v9252_v28  ;;  %v3627_v12 = vpop.permute.xlu1 %3626 }
 0x564   : > { %9366 = vrot.lane.b32.xlu1 %v11441_v36, %s10464_s18  ;;  %8880 = vmatprep.subr.msk.bf16.mxu1 %vm3229_vm4, %v3627_v12  ;;  %v3647_v5 = vsel %vm3229_vm4, %v3627_v12, 0 }
 0x565   : > { %v3007_v59 = vpack.c.bf16 %v9254_v25, %v9253_v50  ;;  %8588 = vmatpush3.bf16.xpose.msra.mxu0 %v3549_v58 }
 0x566   : > { %8878 = vmatprep.subr.msk.bf16.mxu0 %vm3229_vm4, %v3530_v53  ;;  %v9262_v24 = vpop.permute.xlu0 %9261 }
 0x567   : > { %v9264_v35 = vunpack.i.h.bf16 %v9262_v24  ;;  %v9263_v15 = vunpack.i.l.bf16 %v9262_v24  ;;  %v3629_v48 = vpop.permute.xlu1 %3628  ;;  %3933 = vrot.lane.b32.xlu0 %v3007_v59, %s10456_s27 }
 0x568   : > { %9376 = vrot.lane.b32.xlu1 %v11489_v32, %s10463_s6  ;;  %v3650_v27 = vsel %vm3229_vm4, %v3629_v48, 0 }
 0x569   : > { %v2776_v36 = vpack.c.bf16 %v9264_v35, %v9263_v15 }
 0x56a   : > { %v9272_v60 = vpop.permute.xlu0 %9271 }
 0x56b   : > { %v3631_v56 = vpop.permute.xlu1 %3630  ;;  %9341 = vrot.lane.b32.xlu0 %v11513_v14, %s10461_s1  ;;  %8566 = vmatmul.mubr.msk.bf16.gmra.mrb[64].mxu0 %vm3229_vm4, %v2776_v36  ;;  %v9274_v46 = vunpack.i.h.bf16 %v9272_v60  ;;  %v9273_v43 = vunpack.i.l.bf16 %v9272_v60 }
 0x56c   : > { %9386 = vrot.lane.b32.xlu1 %v11489_v32, %s10464_s18  ;;  %8593 = vmatprep.mubr.msk.bf16.mxu0 %vm3229_vm4, %v2781_v16  ;;  %v3653_v50 = vsel %vm3229_vm4, %v3631_v56, 0 }
 0x56d   : > { %8590 = vmatpush3.bf16.xpose.msra.mxu0 %v3552_v61  ;;  %v3008_v32 = vpack.c.bf16 %v9274_v46, %v9273_v43 }
 0x56e   : > { %v9282_v29 = vpop.permute.xlu0 %9281 }
 0x56f   : > { %v9284_v31 = vunpack.i.h.bf16 %v9282_v29  ;;  %v9283_v33 = vunpack.i.l.bf16 %v9282_v29  ;;  %v9297_v57 = vpop.permute.xlu1 %9296  ;;  %9351 = vrot.lane.b32.xlu0 %v11513_v14, %s10462_s22 }
 0x570   : > { %v9299_v17 = vunpack.i.h.bf16 %v9297_v57  ;;  %v9298_v6 = vunpack.i.l.bf16 %v9297_v57  ;;  %9401 = vrot.lane.b32.xlu1 %v11465_v13, %s10458_s2 }
 0x571   : > { %v2778_v8 = vpack.c.bf16 %v9284_v31, %v9283_v33 }
 0x572   : > { %v2779_v9 = vpack.c.bf16 %v9299_v17, %v9298_v6  ;;  %v3532_v2 = vpop.permute.xlu0 %3531 }
 0x573   : > { %v9307_v37 = vpop.permute.xlu1 %9306  ;;  %3935 = vrot.lane.b32.xlu0 %v3008_v32, %s10456_s27  ;;  %8578 = vmatmul.mubr.msk.bf16.vlgmr.msra.gmra.mrb[48].mxu1 %vm3229_vm4, %v2778_v8  ;;  %v3555_v39 = vsel %vm3229_vm4, %v3532_v2, 0 }
 0x574   : > { %9411 = vrot.lane.b32.xlu1 %v11509_v10, %s10458_s2  ;;  %8879 = vmatprep.subr.msk.bf16.mxu0 %vm3229_vm4, %v3532_v2  ;;  %v9309_v30 = vunpack.i.h.bf16 %v9307_v37  ;;  %v9308_v63 = vunpack.i.l.bf16 %v9307_v37 }
 0x575   : > { %8602 = vmatpush3.bf16.xpose.msra.mxu1 %v3647_v5  ;;  %8581 = vmatprep.mubr.msk.bf16.mxu1 %vm3229_vm4, %v2779_v9 }
 0x576   : > { %8592 = vmatpush3.bf16.xpose.msra.mxu0 %v3555_v39  ;;  %8881 = vmatprep.subr.msk.bf16.mxu1 %vm3229_vm4, %v3629_v48  ;;  %v9292_v40 = vpop.permute.xlu0 %9291  ;;  %v2783_v53 = vpack.c.bf16 %v9309_v30, %v9308_v63 }
 0x577   : > { %v9294_v47 = vunpack.i.h.bf16 %v9292_v40  ;;  %v9293_v26 = vunpack.i.l.bf16 %v9292_v40  ;;  %9361 = vrot.lane.b32.xlu0 %v11469_v51, %s10463_s6  ;;  %v9317_v11 = vpop.permute.xlu1 %9316 }
 0x578   : > { %9421 = vrot.lane.b32.xlu1 %v11446_v44, %s10460_s29  ;;  %v9319_v58 = vunpack.i.h.bf16 %v9317_v11  ;;  %v9318_v59 = vunpack.i.l.bf16 %v9317_v11 }
 0x579   : > { %v2782_v34 = vpack.c.bf16 %v9294_v47, %v9293_v26 }
 0x57a   : > { %v3728_v18 = vpop.permute.xlu0 %3727  ;;  %v2785_v15 = vpack.c.bf16 %v9319_v58, %v9318_v59 }
 0x57b   : > { %9371 = vrot.lane.b32.xlu0 %v11469_v51, %s10464_s18  ;;  %8884 = vmatprep.subr.msk.bf16.mxu0 %vm3229_vm4, %v3728_v18  ;;  %v3748_v41 = vsel %vm3229_vm4, %v3728_v18, 0  ;;  %v9327_v25 = vpop.permute.xlu1 %9326 }
 0x57c   : > { %9426 = vrot.lane.b32.xlu1 %v11465_v13, %s10459_s21  ;;  %v9329_v36 = vunpack.i.h.bf16 %v9327_v25  ;;  %v9328_v16 = vunpack.i.l.bf16 %v9327_v25 }
 0x57d   : > { %8594 = vmatmul.mubr.msk.bf16.vlgmr.msra.gmra.mrb[68].mxu0 %vm3229_vm4, %v2782_v34  ;;  %8604 = vmatpush3.bf16.xpose.msra.mxu1 %v3650_v27 }
 0x57e   : > { %8597 = vmatprep.mubr.msk.bf16.mxu0 %vm3229_vm4, %v2783_v53  ;;  %8882 = vmatprep.subr.msk.bf16.mxu1 %vm3229_vm4, %v3631_v56  ;;  %v3730_v28 = vpop.permute.xlu0 %3729  ;;  %v2789_v31 = vpack.c.bf16 %v9329_v36, %v9328_v16 }
 0x57f   : > { %8618 = vmatpush3.bf16.xpose.msra.mxu0 %v3748_v41  ;;  %9381 = vrot.lane.b32.xlu0 %v11513_v14, %s10463_s6  ;;  %v3633_v12 = vpop.permute.xlu1 %3632  ;;  %v3751_v49 = vsel %vm3229_vm4, %v3730_v28, 0 }
 0x580   : > { %9436 = vrot.lane.b32.xlu1 %v11485_v38, %s10459_s21  ;;  %8885 = vmatprep.subr.msk.bf16.mxu0 %vm3229_vm4, %v3730_v28  ;;  %v3656_v61 = vsel %vm3229_vm4, %v3633_v12, 0 }
 0x582   : > { %v3732_v51 = vpop.permute.xlu0 %3731 }
 0x583   : > { %9391 = vrot.lane.b32.xlu0 %v11513_v14, %s10464_s18  ;;  %v3754_v43 = vsel %vm3229_vm4, %v3732_v51, 0 }
 0x584   : > { %9441 = vrot.lane.b32.xlu1 %v11485_v38, %s10460_s29 }
 0x585   : > { %8606 = vmatpush3.bf16.xpose.msra.mxu1 %v3653_v50 }
 0x586   : > { %8883 = vmatprep.subr.msk.bf16.mxu1 %vm3229_vm4, %v3633_v12  ;;  %v9302_v20 = vpop.permute.xlu0 %9301 }
 0x587   : > { %8620 = vmatpush3.bf16.xpose.msra.mxu0 %v3751_v49  ;;  %v9304_v24 = vunpack.i.h.bf16 %v9302_v20  ;;  %v9303_v35 = vunpack.i.l.bf16 %v9302_v20  ;;  %9396 = vrot.lane.b32.xlu0 %v11446_v44, %s10458_s2 }
 0x588   : > { %8886 = vmatprep.subr.msk.bf16.mxu0 %vm3229_vm4, %v3732_v51  ;;  %9446 = vrot.lane.b32.xlu1 %v11509_v10, %s10459_s21 }
 0x589   : > { %v2780_v14 = vpack.c.bf16 %v9304_v24, %v9303_v35 }
 0x58a   : > { %v9312_v48 = vpop.permute.xlu0 %9311 }
 0x58b   : > { %v9314_v60 = vunpack.i.h.bf16 %v9312_v48  ;;  %v9313_v56 = vunpack.i.l.bf16 %v9312_v48  ;;  %9406 = vrot.lane.b32.xlu0 %v11485_v38, %s10458_s2  ;;  %8582 = vmatmul.mubr.msk.bf16.gmra.mrb[52].mxu1 %vm3229_vm4, %v2780_v14 }
 0x58c   : > { %9456 = vrot.lane.b32.xlu1 %v11446_v44, %s10461_s1  ;;  %8609 = vmatprep.mubr.msk.bf16.mxu1 %vm3229_vm4, %v2785_v15 }
 0x58d   : > { %v2784_v46 = vpack.c.bf16 %v9314_v60, %v9313_v56  ;;  %8608 = vmatpush3.bf16.xpose.msra.mxu1 %v3656_v61 }
 0x58e   : > { %v9322_v29 = vpop.permute.xlu0 %9321 }
 0x58f   : > { %8622 = vmatpush3.bf16.xpose.msra.mxu0 %v3754_v43  ;;  %v9324_v33 = vunpack.i.h.bf16 %v9322_v29  ;;  %v9323_v57 = vunpack.i.l.bf16 %v9322_v29  ;;  %9416 = vrot.lane.b32.xlu0 %v11446_v44, %s10459_s21  ;;  %s10472_s21 = smov [#allocation4]  }
 0x590   : > { %9466 = vrot.lane.b32.xlu1 %v11465_v13, %s10461_s1  ;;  %8598 = vmatmul.mubr.msk.bf16.gmra.mrb[72].mxu0 %vm3229_vm4, %v2784_v46 }
 0x591   : > { %v2786_v17 = vpack.c.bf16 %v9324_v33, %v9323_v57  ;;  %8625 = vmatprep.mubr.msk.bf16.mxu0 %vm3229_vm4, %v2789_v31 }
 0x592   : > { %v3734_v6 = vpop.permute.xlu0 %3733 }
 0x593   : > { %9431 = vrot.lane.b32.xlu0 %v11465_v13, %s10460_s29  ;;  %8887 = vmatprep.subr.msk.bf16.mxu0 %vm3229_vm4, %v3734_v6  ;;  %v3757_v32 = vsel %vm3229_vm4, %v3734_v6, 0 }
 0x594   : > { %9481 = vrot.lane.b32.xlu1 %v11485_v38, %s10462_s22  ;;  %8610 = vmatmul.mubr.msk.bf16.vlgmr.msra.gmra.mrb[56].mxu1 %vm3229_vm4, %v2786_v17 }
 0x596   : > { %v9332_v8 = vpop.permute.xlu0 %9331 }
 0x597   : > { %8624 = vmatpush3.bf16.xpose.msra.mxu0 %v3757_v32  ;;  %v9334_v9 = vunpack.i.h.bf16 %v9332_v8  ;;  %v9333_v2 = vunpack.i.l.bf16 %v9332_v8  ;;  %9451 = vrot.lane.b32.xlu0 %v11509_v10, %s10460_s29  ;;  %s10393_s29 = sshll.u32 %s10472_s21, 4  ;;  %s10394_s29 = int_to_ptr.vmem [resolvable:$false] %s10393_s29 }
 0x598   : > { %9506 = vrot.lane.b32.xlu1 %v11465_v13, %s10463_s6 }
 0x599   : > { %v2790_v37 = vpack.c.bf16 %v9334_v9, %v9333_v2 }
 0x59b   : > { %9461 = vrot.lane.b32.xlu0 %v11446_v44, %s10462_s22 }
 0x59c   : > { %9516 = vrot.lane.b32.xlu1 %v11485_v38, %s10463_s6 }
 0x59e   : > { %8626 = vmatmul.mubr.msk.bf16.vlgmr.msra.gmra.mrb[76].mxu0 %vm3229_vm4, %v2790_v37 }
 0x59f   : > { %9471 = vrot.lane.b32.xlu0 %v11465_v13, %s10462_s22 }
 0x5a0   : > { %9521 = vrot.lane.b32.xlu1 %v11485_v38, %s10464_s18 }
 0x5a3   : > { %9476 = vrot.lane.b32.xlu0 %v11485_v38, %s10461_s1 }
 0x5a7   : > { %9486 = vrot.lane.b32.xlu0 %v11509_v10, %s10461_s1  ;;  %s10469_s1 = smov 40  }
 0x5a9   : > { %v3829_v39 = vpop.permute.xlu1 %3828 }
 0x5aa   : > { %8888 = vmatprep.subr.msk.bf16.mxu1 %vm3229_vm4, %v3829_v39  ;;  %v3849_v5 = vsel %vm3229_vm4, %v3829_v39, 0 }
 0x5ab   : > { %9491 = vrot.lane.b32.xlu0 %v11509_v10, %s10462_s22  ;;  %8634 = vmatpush3.bf16.xpose.msra.mxu1 %v3849_v5 }
 0x5af   : > { %9496 = vrot.lane.b32.xlu0 %v11446_v44, %s10463_s6 }
 0x5b3   : > { %9501 = vrot.lane.b32.xlu0 %v11446_v44, %s10464_s18 }
 0x5b7   : > { %9511 = vrot.lane.b32.xlu0 %v11465_v13, %s10464_s18 }
 0x5b9   : > { %v3831_v38 = vpop.permute.xlu1 %3830 }
 0x5ba   : > { %8889 = vmatprep.subr.msk.bf16.mxu1 %vm3229_vm4, %v3831_v38  ;;  %v3852_v40 = vsel %vm3229_vm4, %v3831_v38, 0 }
 0x5bb   : > { %8636 = vmatpush3.bf16.xpose.msra.mxu1 %v3852_v40 }
 0x5c2   : > { %v3833_v47 = vpop.permute.xlu1 %3832 }
 0x5c3   : > { %8890 = vmatprep.subr.msk.bf16.mxu1 %vm3229_vm4, %v3833_v47  ;;  %v3855_v26 = vsel %vm3229_vm4, %v3833_v47, 0 }
 0x5c4   : > { %8638 = vmatpush3.bf16.xpose.msra.mxu1 %v3855_v26 }
 0x5c5   : > { %v3930_v30 = vpop.permute.xlu0 %3929 }
 0x5c6   : > { %v9337_v63 = vpop.permute.xlu1 %9336  ;;  %8892 = vmatprep.subr.msk.bf16.mxu0 %vm3229_vm4, %v3930_v30  ;;  %v3950_v44 = vsel %vm3229_vm4, %v3930_v30, 0 }
 0x5c7   : > { %v9339_v34 = vunpack.i.h.bf16 %v9337_v63  ;;  %v9338_v13 = vunpack.i.l.bf16 %v9337_v63  ;;  %8650 = vmatpush3.bf16.xpose.msra.mxu0 %v3950_v44 }
 0x5c9   : > { %v2787_v11 = vpack.c.bf16 %v9339_v34, %v9338_v13 }
 0x5ca   : > { %v9347_v18 = vpop.permute.xlu1 %9346 }
 0x5cb   : > { %v9349_v53 = vunpack.i.h.bf16 %v9347_v18  ;;  %v9348_v27 = vunpack.i.l.bf16 %v9347_v18  ;;  %8613 = vmatprep.mubr.msk.bf16.mxu1 %vm3229_vm4, %v2787_v11 }
 0x5cd   : > { %v2791_v41 = vpack.c.bf16 %v9349_v53, %v9348_v27 }
 0x5ce   : > { %v9357_v28 = vpop.permute.xlu1 %9356 }
 0x5cf   : > { %8629 = vmatprep.mubr.msk.bf16.mxu0 %vm3229_vm4, %v2791_v41  ;;  %v11790_v25 = vpop.f32.mrb[40].mxu1  ;;  %v9359_v31 = vunpack.i.h.bf16 %v9357_v28  ;;  %v9358_v33 = vunpack.i.l.bf16 %v9357_v28 }
 0x5d0   : > { %v11792_v51 = vpop.f32.mrb[41].mxu1  ;;  %v4032_v35 = vsel %vm575_vm0, %v11790_v25, -inf }
 0x5d1   : > { %v3932_v50 = vpop.permute.xlu0 %3931  ;;  %v11794_v12 = vpop.f32.mrb[42].mxu1  ;;  %v4026_v58 = vsel %vm575_vm0, %v11792_v51, -inf  ;;  %v2793_v37 = vpack.c.bf16 %v9359_v31, %v9358_v33 }
 0x5d2   : > { %v3835_v59 = vpop.permute.xlu1 %3834  ;;  %8893 = vmatprep.subr.msk.bf16.mxu0 %vm3229_vm4, %v3932_v50  ;;  %4027 = vmax.xlane.f32.xlu1 %v4026_v58  ;;  %v11799_v49 = vpop.f32.mrb[43].mxu1  ;;  %v3953_v20 = vsel %vm3229_vm4, %v3932_v50, 0  ;;  %v4035_v14 = vsel %vm575_vm0, %v11794_v12, -inf }
 0x5d3   : > { %8891 = vmatprep.subr.msk.bf16.mxu1 %vm3229_vm4, %v3835_v59  ;;  %v3858_v24 = vsel %vm3229_vm4, %v3835_v59, 0  ;;  %8652 = vmatpush3.bf16.xpose.msra.mxu0 %v3953_v20  ;;  %v4029_v56 = vsel %vm575_vm0, %v11799_v49, -inf }
 0x5d4   : > { %8640 = vmatpush3.bf16.xpose.msra.mxu1 %v3858_v24 }
 0x5d5   : > { %8665 = vmatprep.subr.bf16.mxu1 %v11455_v55 }
 0x5d6   : > { %v9367_v15 = vpop.permute.xlu1 %9366  ;;  %4033 = vmax.xlane.f32.xlu0 %v4032_v35  ;;  %4036 = vmax.xlane.f32.xlu1 %v4035_v14 }
 0x5d7   : > { %v11809_v48 = vpop.f32.mrb[44].mxu1  ;;  %v9369_v39 = vunpack.i.h.bf16 %v9367_v15  ;;  %v9368_v5 = vunpack.i.l.bf16 %v9367_v15 }
 0x5d8   : > { %v11811_v36 = vpop.f32.mrb[45].mxu1  ;;  %v4044_v17 = vsel %vm575_vm0, %v11809_v48, -inf }
 0x5d9   : > { %v3934_v16 = vpop.permute.xlu0 %3933  ;;  %v11813_v60 = vpop.f32.mrb[46].mxu1  ;;  %v4038_v40 = vsel %vm575_vm0, %v11811_v36, -inf  ;;  %v2797_v44 = vpack.c.bf16 %v9369_v39, %v9368_v5 }
 0x5da   : > { %v9377_v61 = vpop.permute.xlu1 %9376  ;;  %8894 = vmatprep.subr.msk.bf16.mxu0 %vm3229_vm4, %v3934_v16  ;;  %4030 = vmax.xlane.f32.xlu0 %v4029_v56  ;;  %v11818_v46 = vpop.f32.mrb[47].mxu1  ;;  %v3956_v43 = vsel %vm3229_vm4, %v3934_v16, 0  ;;  %v4047_v29 = vsel %vm575_vm0, %v11813_v60, -inf }
 0x5db   : > { %8654 = vmatpush3.bf16.xpose.msra.mxu0 %v3956_v43  ;;  %4048 = vmax.xlane.f32.xlu1 %v4047_v29  ;;  %v4041_v9 = vsel %vm575_vm0, %v11818_v46, -inf  ;;  %v9379_v18 = vunpack.i.h.bf16 %v9377_v61  ;;  %v9378_v53 = vunpack.i.l.bf16 %v9377_v61 }
 0x5dd   : > { %v9342_v57 = vpop.permute.xlu0 %9341  ;;  %v2795_v58 = vpack.c.bf16 %v9379_v18, %v9378_v53 }
 0x5de   : > { %v9344_v6 = vunpack.i.h.bf16 %v9342_v57  ;;  %v9343_v32 = vunpack.i.l.bf16 %v9342_v57  ;;  %v9387_v8 = vpop.permute.xlu1 %9386  ;;  %4045 = vmax.xlane.f32.xlu0 %v4044_v17 }
 0x5df   : > { %4042 = vmax.xlane.f32.xlu1 %v4041_v9  ;;  %v9389_v59 = vunpack.i.h.bf16 %v9387_v8  ;;  %v9388_v20 = vunpack.i.l.bf16 %v9387_v8 }
 0x5e0   : > { %v2788_v2 = vpack.c.bf16 %v9344_v6, %v9343_v32 }
 0x5e1   : > { %v9352_v38 = vpop.permute.xlu0 %9351  ;;  %v2799_v56 = vpack.c.bf16 %v9389_v59, %v9388_v20 }
 0x5e2   : > { %v9354_v47 = vunpack.i.h.bf16 %v9352_v38  ;;  %v9353_v26 = vunpack.i.l.bf16 %v9352_v38  ;;  %v11829_v30 = vpop.permute.xlu1 %9401  ;;  %8614 = vmatmul.mubr.msk.bf16.gmra.mrb[60].mxu1 %vm3229_vm4, %v2788_v2  ;;  %4039 = vmax.xlane.f32.xlu0 %v4038_v40 }
 0x5e3   : > { %13713 = vst [vmem:[#allocation24_spill] sm:$0xff] %v11829_v30  ;;  %8641 = vmatprep.mubr.msk.bf16.mxu1 %vm3229_vm4, %v2793_v37 }
 0x5e4   : > { %v2792_v63 = vpack.c.bf16 %v9354_v47, %v9353_v26 }
 0x5e5   : > { %v3936_v34 = vpop.permute.xlu0 %3935 }
 0x5e6   : > { %8630 = vmatmul.mubr.msk.bf16.gmra.mrb[80].mxu0 %vm3229_vm4, %v2792_v63  ;;  %8895 = vmatprep.subr.msk.bf16.mxu0 %vm3229_vm4, %v3936_v34  ;;  %v3959_v13 = vsel %vm3229_vm4, %v3936_v34, 0  ;;  %v11836_v11 = vpop.permute.xlu1 %9411 }
 0x5e7   : > { %13714 = vst [vmem:[#allocation25_spill] sm:$0xff] %v11836_v11  ;;  %8656 = vmatpush3.bf16.xpose.msra.mxu0 %v3959_v13  ;;  %8657 = vmatprep.mubr.msk.bf16.mxu0 %vm3229_vm4, %v2797_v44 }
 0x5e9   : > { %v9362_v27 = vpop.permute.xlu0 %9361 }
 0x5ea   : > { %v9364_v41 = vunpack.i.h.bf16 %v9362_v27  ;;  %v9363_v28 = vunpack.i.l.bf16 %v9362_v27  ;;  %v11839_v24 = vpop.permute.xlu1 %9421 }
 0x5eb   : > { %13715 = vst [vmem:[#allocation26_spill] sm:$0xff] %v11839_v24 }
 0x5ec   : > { %v2794_v50 = vpack.c.bf16 %v9364_v41, %v9363_v28 }
 0x5ed   : > { %v9372_v35 = vpop.permute.xlu0 %9371 }
 0x5ee   : > { %v9374_v14 = vunpack.i.h.bf16 %v9372_v35  ;;  %v9373_v15 = vunpack.i.l.bf16 %v9372_v35  ;;  %8642 = vmatmul.mubr.msk.bf16.vlgmr.msra.gmra.mrb[64].mxu1 %vm3229_vm4, %v2794_v50  ;;  %v9427_v31 = vpop.permute.xlu1 %9426 }
 0x5ef   : > { %8666 = vmatpush3.bf16.msra.mxu1 %v11455_v55  ;;  %8645 = vmatprep.mubr.msk.bf16.mxu1 %vm3229_vm4, %v2795_v58  ;;  %v9429_v5 = vunpack.i.h.bf16 %v9427_v31  ;;  %v9428_v38 = vunpack.i.l.bf16 %v9427_v31 }
 0x5f0   : > { %v2798_v16 = vpack.c.bf16 %v9374_v14, %v9373_v15  ;;  %8667 = vmatprep.subr.bf16.mxu1 %v11477_v52 }
 0x5f1   : > { %v9382_v61 = vpop.permute.xlu0 %9381  ;;  %v3194_v13 = vpack.c.bf16 %v9429_v5, %v9428_v38 }
 0x5f2   : > { %v9384_v43 = vunpack.i.h.bf16 %v9382_v61  ;;  %v9383_v29 = vunpack.i.l.bf16 %v9382_v61  ;;  %8658 = vmatmul.mubr.msk.bf16.vlgmr.msra.gmra.mrb[84].mxu0 %vm3229_vm4, %v2798_v16  ;;  %v9437_v32 = vpop.permute.xlu1 %9436 }
 0x5f3   : > { %8668 = vmatpush3.bf16.msra.mxu1 %v11477_v52  ;;  %8661 = vmatprep.mubr.msk.bf16.mxu0 %vm3229_vm4, %v2799_v56  ;;  %v9439_v44 = vunpack.i.h.bf16 %v9437_v32  ;;  %v9438_v34 = vunpack.i.l.bf16 %v9437_v32 }
 0x5f4   : > { %v2796_v33 = vpack.c.bf16 %v9384_v43, %v9383_v29  ;;  %8669 = vmatprep.subr.bf16.mxu1 %v11499_v62 }
 0x5f5   : > { %v9392_v55 = vpop.permute.xlu0 %9391  ;;  %v3195_v53 = vpack.c.bf16 %v9439_v44, %v9438_v34 }
 0x5f6   : > { %v9394_v57 = vunpack.i.h.bf16 %v9392_v55  ;;  %v9393_v17 = vunpack.i.l.bf16 %v9392_v55  ;;  %8646 = vmatmul.mubr.msk.bf16.gmra.mrb[68].mxu1 %vm3229_vm4, %v2796_v33  ;;  %v11859_v39 = vpop.permute.xlu1 %9441 }
 0x5f7   : > { %8670 = vmatpush3.bf16.msra.mxu1 %v11499_v62  ;;  %13718 = vst [vmem:[#allocation29_spill] sm:$0xff] %v11859_v39 }
 0x5f8   : > { %v2800_v6 = vpack.c.bf16 %v9394_v57, %v9393_v17  ;;  %8671 = vmatprep.subr.bf16.mxu1 %v11517_v42 }
 0x5f9   : > { %v9397_v8 = vpop.permute.xlu0 %9396 }
 0x5fa   : > { %v9399_v9 = vunpack.i.h.bf16 %v9397_v8  ;;  %v9398_v2 = vunpack.i.l.bf16 %v9397_v8  ;;  %8662 = vmatmul.mubr.msk.bf16.gmra.mrb[88].mxu0 %vm3229_vm4, %v2800_v6  ;;  %v9447_v63 = vpop.permute.xlu1 %9446 }
 0x5fb   : > { %8672 = vmatpush3.bf16.msra.mxu1 %v11517_v42  ;;  %v9449_v42 = vunpack.i.h.bf16 %v9447_v63  ;;  %v9448_v18 = vunpack.i.l.bf16 %v9447_v63 }
 0x5fc   : > { %v11854_v52 = vpack.c.bf16 %v9399_v9, %v9398_v2 }
 0x5fd   : > { %v11856_v37 = vpop.permute.xlu0 %9406  ;;  %v3196_v50 = vpack.c.bf16 %v9449_v42, %v9448_v18 }
 0x5fe   : > { %13716 = vst [vmem:[#allocation27_spill] sm:$0xff] %v11854_v52  ;;  %13717 = vst [vmem:[#allocation28_spill] sm:$0xff] %v11856_v37  ;;  %8681 = vmatprep.subr.bf16.mxu1 %v11854_v52  ;;  %v9457_v27 = vpop.permute.xlu1 %9456 }
 0x5ff   : > { %v9459_v41 = vunpack.i.h.bf16 %v9457_v27  ;;  %v9458_v28 = vunpack.i.l.bf16 %v9457_v27 }
 0x601   : > { %v9417_v62 = vpop.permute.xlu0 %9416  ;;  %v11861_v58 = vpack.c.bf16 %v9459_v41, %v9458_v28 }
 0x602   : > { %v9419_v40 = vunpack.i.h.bf16 %v9417_v62  ;;  %v9418_v47 = vunpack.i.l.bf16 %v9417_v62  ;;  %v11992_v21 = vpop.permute.xlu1 %9466 }
 0x603   : > { %13719 = vst [vmem:[#allocation30_spill] sm:$0xff] %v11861_v58  ;;  %13728 = vst [vmem:[#allocation39_spill] sm:$0xff] %v11992_v21 }
 0x604   : > { %v3193_v26 = vpack.c.bf16 %v9419_v40, %v9418_v47 }
 0x606   : > { %8697 = vmatprep.subr.bf16.mxu0 %v3193_v26  ;;  %v11996_v7 = vpop.permute.xlu1 %9481 }
 0x607   : > { %8698 = vmatpush3.bf16.msra.mxu0 %v3193_v26  ;;  %13730 = vst [vmem:[#allocation41_spill] sm:$0xff] %v11996_v7 }
 0x608   : > { %8699 = vmatprep.subr.bf16.mxu0 %v3194_v13 }
 0x60a   : > { %v12000_v22 = vpop.permute.xlu1 %9506 }
 0x60b   : > { %8700 = vmatpush3.bf16.msra.mxu0 %v3194_v13  ;;  %13732 = vst [vmem:[#allocation43_spill] sm:$0xff] %v12000_v22 }
 0x60c   : > { %8701 = vmatprep.subr.bf16.mxu0 %v3195_v53 }
 0x60f   : > { %8702 = vmatpush3.bf16.msra.mxu0 %v3195_v53 }
 0x610   : > { %8703 = vmatprep.subr.bf16.mxu0 %v3196_v50 }
 0x613   : > { %8704 = vmatpush3.bf16.msra.mxu0 %v3196_v50 }
 0x614   : > { %8729 = vmatprep.subr.bf16.mxu0 %v11861_v58 }
 0x62e   : > { %v11864_v59 = vpop.f32.mrb[60].mxu0 }
 0x62f   : > { %v11866_v20 = vpop.f32.mrb[61].mxu0  ;;  %v4056_v35 = vsel %vm575_vm0, %v11864_v59, -inf }
 0x630   : > { %v11870_v14 = vpop.f32.mrb[62].mxu0  ;;  %4057 = vmax.xlane.f32.xlu0 %v4056_v35  ;;  %v4050_v32 = vsel %vm575_vm0, %v11866_v20, -inf }
 0x631   : > { %v11872_v15 = vpop.f32.mrb[63].mxu0  ;;  %v4059_v16 = vsel %vm575_vm0, %v11870_v14, -inf }
 0x632   : > { %4060 = vmax.xlane.f32.xlu1 %v4059_v16  ;;  %v4053_v8 = vsel %vm575_vm0, %v11872_v15, -inf }
 0x63e   : > { %v11876_v56 = vpop.f32.mrb[64].mxu0 }
 0x63f   : > { %v11878_v61 = vpop.f32.mrb[65].mxu0  ;;  %v4068_v47 = vsel %vm575_vm0, %v11876_v56, -inf }
 0x640   : > { %v11880_v43 = vpop.f32.mrb[66].mxu0  ;;  %v4062_v27 = vsel %vm575_vm0, %v11878_v61, -inf }
 0x641   : > { %v11882_v29 = vpop.f32.mrb[67].mxu0  ;;  %v4071_v26 = vsel %vm575_vm0, %v11880_v43, -inf }
 0x642   : > { %v4065_v50 = vsel %vm575_vm0, %v11882_v29, -inf }
 0x646   : > { %v11884_v31 = vpop.f32.mrb[48].mxu1 }
 0x647   : > { %v11886_v33 = vpop.f32.mrb[49].mxu1  ;;  %v4080_v55 = vsel %vm575_vm0, %v11884_v31, -inf }
 0x648   : > { %4081 = vmax.xlane.f32.xlu0 %v4080_v55  ;;  %v11890_v57 = vpop.f32.mrb[50].mxu1  ;;  %v4074_v9 = vsel %vm575_vm0, %v11886_v33, -inf }
 0x649   : > { %v11892_v17 = vpop.f32.mrb[51].mxu1  ;;  %v4083_v6 = vsel %vm575_vm0, %v11890_v57, -inf }
 0x64a   : > { %4084 = vmax.xlane.f32.xlu1 %v4083_v6  ;;  %v4077_v5 = vsel %vm575_vm0, %v11892_v17, -inf }
 0x64c   : > { %4051 = vmax.xlane.f32.xlu0 %v4050_v32 }
 0x64e   : > { %4054 = vmax.xlane.f32.xlu1 %v4053_v8 }
 0x650   : > { %v11902_v2 = vpop.f32.mrb[68].mxu0  ;;  %4075 = vmax.xlane.f32.xlu0 %v4074_v9  ;;  %v11950_v9 = vpop.permute.xlu0 %9431 }
 0x651   : > { %v11904_v62 = vpop.f32.mrb[69].mxu0  ;;  %13720 = vst [vmem:[#allocation31_spill] sm:$0xff] %v11950_v9 }
 0x652   : > { %v11908_v38 = vpop.f32.mrb[70].mxu0  ;;  %4078 = vmax.xlane.f32.xlu1 %v4077_v5 }
 0x653   : > { %v11910_v40 = vpop.f32.mrb[71].mxu0 }
 0x654   : > { %4069 = vmax.xlane.f32.xlu0 %v4068_v47  ;;  %v4104_v47 = vsel %vm575_vm0, %v11902_v2, -inf  ;;  %v4101_v0 = vsel %vm575_vm0, %v11910_v40, -inf }
 0x656   : > { %4072 = vmax.xlane.f32.xlu1 %v4071_v26  ;;  %v4107_v26 = vsel %vm575_vm0, %v11908_v38, -inf }
 0x65e   : > { %v11916_v63 = vpop.f32.mrb[52].mxu1 }
 0x65f   : > { %v11918_v44 = vpop.f32.mrb[53].mxu1  ;;  %v4092_v34 = vsel %vm575_vm0, %v11916_v63, -inf }
 0x660   : > { %4093 = vmax.xlane.f32.xlu0 %v4092_v34  ;;  %v11922_v13 = vpop.f32.mrb[54].mxu1  ;;  %v4086_v55 = vsel %vm575_vm0, %v11918_v44, -inf }
 0x661   : > { %v11924_v42 = vpop.f32.mrb[55].mxu1  ;;  %v4095_v18 = vsel %vm575_vm0, %v11922_v13, -inf }
 0x662   : > { %4096 = vmax.xlane.f32.xlu1 %v4095_v18  ;;  %v4089_v8 = vsel %vm575_vm0, %v11924_v42, -inf  ;;  %v11960_v18 = vpop.permute.xlu0 %9451 }
 0x663   : > { %v11928_v53 = vpop.f32.mrb[72].mxu0  ;;  %13721 = vst [vmem:[#allocation32_spill] sm:$0xff] %v11960_v18 }
 0x664   : > { %v11932_v41 = vpop.f32.mrb[73].mxu0  ;;  %4063 = vmax.xlane.f32.xlu0 %v4062_v27  ;;  %v4116_v23 = vsel %vm575_vm0, %v11928_v53, -inf }
 0x665   : > { %v11934_v28 = vpop.f32.mrb[74].mxu0 }
 0x666   : > { %v11938_v35 = vpop.f32.mrb[75].mxu0  ;;  %4066 = vmax.xlane.f32.xlu1 %v4065_v50 }
 0x667   : > { %v11940_v16 = vpop.f32.mrb[56].mxu1 }
 0x668   : > { %v11944_v6 = vpop.f32.mrb[57].mxu1  ;;  %4087 = vmax.xlane.f32.xlu0 %v4086_v55  ;;  %v4128_v34 = vsel %vm575_vm0, %v11940_v16, -inf }
 0x669   : > { %v11946_v32 = vpop.f32.mrb[58].mxu1  ;;  %v4122_v1 = vsel %vm575_vm0, %v11944_v6, -inf }
 0x66a   : > { %v11952_v5 = vpop.f32.mrb[59].mxu1  ;;  %4090 = vmax.xlane.f32.xlu1 %v4089_v8  ;;  %v4131_v50 = vsel %vm575_vm0, %v11946_v32, -inf }
 0x66c   : > { %4105 = vmax.xlane.f32.xlu0 %v4104_v47  ;;  %v4098_v47 = vsel %vm575_vm0, %v11904_v62, -inf }
 0x66e   : > { %4108 = vmax.xlane.f32.xlu1 %v4107_v26 }
 0x670   : > { %4129 = vmax.xlane.f32.xlu0 %v4128_v34  ;;  %v11976_v34 = vpop.permute.xlu0 %9461 }
 0x671   : > { %v11962_v27 = vpop.f32.mrb[76].mxu0  ;;  %13724 = vst [vmem:[#allocation35_spill] sm:$0xff] %v11976_v34 }
 0x672   : > { %v11966_v55 = vpop.f32.mrb[77].mxu0  ;;  %4132 = vmax.xlane.f32.xlu1 %v4131_v50  ;;  %v4125_v50 = vsel %vm575_vm0, %v11952_v5, -inf }
 0x673   : > { %v11968_v8 = vpop.f32.mrb[78].mxu0 }
 0x674   : > { %13722 = vst [vmem:[#allocation33_spill] sm:$0xff] %v11968_v8  ;;  %v11972_v26 = vpop.f32.mrb[79].mxu0  ;;  %4099 = vmax.xlane.f32.xlu0 %v4098_v47  ;;  %v11984_v19 = vpop.permute.xlu0 %9471  ;;  %v4119_v47 = vsel %vm575_vm0, %v11934_v28, -inf }
 0x675   : > { %13723 = vst [vmem:[#allocation34_spill] sm:$0xff] %v11972_v26  ;;  %13725 = vst [vmem:[#allocation36_spill] sm:$0xff] %v11984_v19 }
 0x676   : > { %4102 = vmax.xlane.f32.xlu1 %v4101_v0 }
 0x678   : > { %4123 = vmax.xlane.f32.xlu0 %v4122_v1  ;;  %v11988_v4 = vpop.permute.xlu0 %9476 }
 0x679   : > { %13726 = vst [vmem:[#allocation37_spill] sm:$0xff] %v11988_v4 }
 0x67a   : > { %4126 = vmax.xlane.f32.xlu1 %v4125_v50 }
 0x67c   : > { %4117 = vmax.xlane.f32.xlu0 %v4116_v23  ;;  %v11990_v0 = vpop.permute.xlu0 %9486  ;;  %v12004_v23 = vpop.permute.xlu1 %9516 }
 0x67d   : > { %13727 = vst [vmem:[#allocation38_spill] sm:$0xff] %v11990_v0  ;;  %13734 = vst [vmem:[#allocation45_spill] sm:$0xff] %v12004_v23 }
 0x67e   : > { %4120 = vmax.xlane.f32.xlu1 %v4119_v47 }
 0x680   : > { %v11994_v1 = vpop.permute.xlu0 %9491  ;;  %v12008_v47 = vpop.permute.xlu1 %9521 }
 0x681   : > { %13729 = vst [vmem:[#allocation40_spill] sm:$0xff] %v11994_v1  ;;  %13736 = vst [vmem:[#allocation47_spill] sm:$0xff] %v12008_v47 }
 0x684   : > { %v11998_v50 = vpop.permute.xlu0 %9496  ;;  %v4028_v19 = vpop.xlane.xlu1 %4027 }
 0x685   : > { %13731 = vst [vmem:[#allocation42_spill] sm:$0xff] %v11998_v50  ;;  %v4218_v50 = vsub.f32 %v11792_v51, %v4028_v19 }
 0x687   : > { %v4282_v18 = vmul.f32 1.442695, %v4218_v50 }
 0x688   : > { %v12002_v54 = vpop.permute.xlu0 %9501  ;;  %v4037_v34 = vpop.xlane.xlu1 %4036 }
 0x689   : > { %13733 = vst [vmem:[#allocation44_spill] sm:$0xff] %v12002_v54  ;;  %v4221_v7 = vsub.f32 %v11794_v12, %v4037_v34 }
 0x68b   : > { %v4288_v54 = vmul.f32 1.442695, %v4221_v7 }
 0x68c   : > { %v12006_v45 = vpop.permute.xlu0 %9511  ;;  %v4049_v4 = vpop.xlane.xlu1 %4048 }
 0x68d   : > { %13735 = vst [vmem:[#allocation46_spill] sm:$0xff] %v12006_v45  ;;  %v4225_v19 = vsub.f32 %v11813_v60, %v4049_v4  ;;  %v4110_v4 = vsel %vm575_vm0, %v11932_v41, -inf }
 0x68f   : > { %v4296_v60 = vmul.f32 1.442695, %v4225_v19 }
 0x690   : > { %v4034_v3 = vpop.xlane.xlu0 %4033  ;;  %v4043_v51 = vpop.xlane.xlu1 %4042 }
 0x691   : > { %v4220_v1 = vsub.f32 %v11790_v25, %v4034_v3  ;;  %v4223_v34 = vsub.f32 %v11818_v46, %v4043_v51 }
 0x693   : > { %v4286_v22 = vmul.f32 1.442695, %v4220_v1 }
 0x694   : > { %v4031_v0 = vpop.xlane.xlu0 %4030 }
 0x695   : > { %v4219_v23 = vsub.f32 %v11799_v49, %v4031_v0  ;;  %10059 = vpow2.f32 %v4286_v22 }
 0x696   : > { %10061 = vpow2.f32 %v4288_v54 }
 0x697   : > { %v4284_v25 = vmul.f32 1.442695, %v4219_v23  ;;  %10063 = vpow2.f32 %v4282_v18  ;;  %v4292_v23 = vmul.f32 1.442695, %v4223_v34 }
 0x698   : > { %v4046_v58 = vpop.xlane.xlu0 %4045 }
 0x699   : > { %v4224_v47 = vsub.f32 %v11809_v48, %v4046_v58  ;;  %10065 = vpow2.f32 %v4284_v25 }
 0x69b   : > { %v4294_v49 = vmul.f32 1.442695, %v4224_v47 }
 0x69c   : > { %v4040_v10 = vpop.xlane.xlu0 %4039 }
 0x69d   : > { %v4222_v48 = vsub.f32 %v11811_v36, %v4040_v10  ;;  %v4113_v10 = vsel %vm575_vm0, %v11938_v35, -inf  ;;  %10067 = vpow2.f32 %v4294_v49 }
 0x69e   : > { %10069 = vpow2.f32 %v4296_v60 }
 0x69f   : > { %v4290_v36 = vmul.f32 1.442695, %v4222_v48  ;;  %v12044_v50 = vpop.eup %10059 }
 0x6a0   : > { %13741 = vst [vmem:[#allocation52_spill] sm:$0xff] %v12044_v50  ;;  %v12048_v47 = vpop.eup %10061  ;;  %v4416_v19 = vsel %vm575_vm0, %v12044_v50, 0.0 }
 0x6a1   : > { %13742 = vst [vmem:[#allocation53_spill] sm:$0xff] %v12048_v47  ;;  %10071 = vpow2.f32 %v4290_v36  ;;  %v12056_v51 = vpop.eup %10063  ;;  %v4419_v48 = vsel %vm575_vm0, %v12048_v47, 0.0 }
 0x6a2   : > { %13745 = vst [vmem:[#allocation56_spill] sm:$0xff] %v12056_v51  ;;  %10073 = vpow2.f32 %v4292_v23 }
 0x6b5   : > { %v12015_v45 = vpop.f32.mrb[60].mxu1 }
 0x6b6   : > { %v12017_v21 = vpop.f32.mrb[61].mxu1  ;;  %v4140_v3 = vsel %vm575_vm0, %v12015_v45, -inf }
 0x6b7   : > { %4141 = vmax.xlane.f32.xlu0 %v4140_v3  ;;  %v12022_v7 = vpop.f32.mrb[62].mxu1  ;;  %v4134_v18 = vsel %vm575_vm0, %v12017_v21, -inf }
 0x6b8   : > { %v12024_v12 = vpop.f32.mrb[63].mxu1  ;;  %v4143_v22 = vsel %vm575_vm0, %v12022_v7, -inf }
 0x6b9   : > { %13737 = vst [vmem:[#allocation48_spill] sm:$0xff] %v12024_v12  ;;  %v12029_v58 = vpop.f32.mrb[80].mxu0  ;;  %4144 = vmax.xlane.f32.xlu1 %v4143_v22  ;;  %v4137_v46 = vsel %vm575_vm0, %v12024_v12, -inf }
 0x6ba   : > { %13738 = vst [vmem:[#allocation49_spill] sm:$0xff] %v12029_v58  ;;  %v12031_v54 = vpop.f32.mrb[81].mxu0 }
 0x6bb   : > { %13739 = vst [vmem:[#allocation50_spill] sm:$0xff] %v12031_v54  ;;  %v12036_v0 = vpop.f32.mrb[82].mxu0  ;;  %4111 = vmax.xlane.f32.xlu0 %v4110_v4  ;;  %v12064_v4 = vpop.eup %10065 }
 0x6bc   : > { %13740 = vst [vmem:[#allocation51_spill] sm:$0xff] %v12036_v0  ;;  %v12038_v1 = vpop.f32.mrb[83].mxu0  ;;  %13748 = vst [vmem:[#allocation59_spill] sm:$0xff] %v12064_v4  ;;  %v12072_v36 = vpop.eup %10067 }
 0x6bd   : > { %4114 = vmax.xlane.f32.xlu1 %v4113_v10  ;;  %v4410_v10 = vsel %vm575_vm0, %v12056_v51, 0.0  ;;  %13749 = vst [vmem:[#allocation60_spill] sm:$0xff] %v12072_v36  ;;  %v4428_v9 = vsel %vm575_vm0, %v12072_v36, 0.0  ;;  %v4058_v30 = vpop.xlane.xlu0 %4057 }
 0x6bf   : > { %4135 = vmax.xlane.f32.xlu0 %v4134_v18  ;;  %v4061_v47 = vpop.xlane.xlu1 %4060 }
 0x6c1   : > { %4138 = vmax.xlane.f32.xlu1 %v4137_v46  ;;  %v12050_v3 = vpop.f32.mrb[64].mxu1  ;;  %v4413_v46 = vsel %vm575_vm0, %v12064_v4, 0.0 }
 0x6c2   : > { %13743 = vst [vmem:[#allocation54_spill] sm:$0xff] %v12050_v3  ;;  %v12052_v25 = vpop.f32.mrb[65].mxu1 }
 0x6c3   : > { %13744 = vst [vmem:[#allocation55_spill] sm:$0xff] %v12052_v25  ;;  %4417 = vadd.xlane.f32.xlu0 %v4416_v19  ;;  %v12058_v22 = vpop.f32.mrb[66].mxu1  ;;  %v12080_v19 = vpop.eup %10069 }
 0x6c4   : > { %13746 = vst [vmem:[#allocation57_spill] sm:$0xff] %v12058_v22  ;;  %v12060_v49 = vpop.f32.mrb[67].mxu1  ;;  %13750 = vst [vmem:[#allocation61_spill] sm:$0xff] %v12080_v19  ;;  %v12088_v24 = vpop.eup %10071  ;;  %v4431_v52 = vsel %vm575_vm0, %v12080_v19, 0.0  ;;  %v4152_v19 = vsel %vm575_vm0, %v11962_v27, -inf  ;;  %v4179_v12 = vsel %vm575_vm0, %v12058_v22, -inf }
 0x6c5   : > { %13747 = vst [vmem:[#allocation58_spill] sm:$0xff] %v12060_v49  ;;  %v12066_v60 = vpop.f32.mrb[84].mxu0  ;;  %4420 = vadd.xlane.f32.xlu1 %v4419_v48  ;;  %13752 = vst [vmem:[#allocation63_spill] sm:$0xff] %v12088_v24  ;;  %v12096_v37 = vpop.eup %10073  ;;  %v4422_v36 = vsel %vm575_vm0, %v12088_v24, 0.0  ;;  %v4176_v24 = vsel %vm575_vm0, %v12050_v3, -inf }
 0x6c6   : > { %v12068_v34 = vpop.f32.mrb[85].mxu0  ;;  %13755 = vst [vmem:[#allocation66_spill] sm:$0xff] %v12096_v37  ;;  %v4425_v51 = vsel %vm575_vm0, %v12096_v37, 0.0  ;;  %v4146_v37 = vsel %vm575_vm0, %v11966_v55, -inf }
 0x6c7   : > { %v12074_v18 = vpop.f32.mrb[86].mxu0  ;;  %4411 = vadd.xlane.f32.xlu0 %v4410_v10 }
 0x6c8   : > { %v12076_v23 = vpop.f32.mrb[87].mxu0 }
 0x6c9   : > { %4414 = vadd.xlane.f32.xlu1 %v4413_v46  ;;  %v12082_v39 = vpop.f32.mrb[68].mxu1 }
 0x6ca   : > { %13751 = vst [vmem:[#allocation62_spill] sm:$0xff] %v12082_v39  ;;  %v12084_v48 = vpop.f32.mrb[69].mxu1 }
 0x6cb   : > { %4429 = vadd.xlane.f32.xlu0 %v4428_v9  ;;  %v12090_v11 = vpop.f32.mrb[70].mxu1 }
 0x6cc   : > { %13753 = vst [vmem:[#allocation64_spill] sm:$0xff] %v12090_v11  ;;  %v12092_v10 = vpop.f32.mrb[71].mxu1 }
 0x6cd   : > { %13754 = vst [vmem:[#allocation65_spill] sm:$0xff] %v12092_v10  ;;  %v12098_v46 = vpop.f32.mrb[88].mxu0  ;;  %4432 = vadd.xlane.f32.xlu1 %v4431_v52  ;;  %v4155_v52 = vsel %vm575_vm0, %v11968_v8, -inf }
 0x6ce   : > { %v12100_v50 = vpop.f32.mrb[89].mxu0 }
 0x6cf   : > { %v12104_v4 = vpop.f32.mrb[90].mxu0  ;;  %4423 = vadd.xlane.f32.xlu0 %v4422_v36 }
 0x6d0   : > { %v12106_v9 = vpop.f32.mrb[91].mxu0 }
 0x6d1   : > { %4426 = vadd.xlane.f32.xlu1 %v4425_v51 }
 0x6d3   : > { %4153 = vmax.xlane.f32.xlu0 %v4152_v19  ;;  %v4149_v19 = vsel %vm575_vm0, %v11972_v26, -inf  ;;  %v4191_v26 = vsel %vm575_vm0, %v12090_v11, -inf }
 0x6d5   : > { %4156 = vmax.xlane.f32.xlu1 %v4155_v52  ;;  %v4082_v36 = vpop.xlane.xlu0 %4081  ;;  %v4170_v52 = vsel %vm575_vm0, %v12052_v25, -inf }
 0x6d7   : > { %4177 = vmax.xlane.f32.xlu0 %v4176_v24  ;;  %v4085_v51 = vpop.xlane.xlu1 %4084  ;;  %v4173_v24 = vsel %vm575_vm0, %v12060_v49, -inf }
 0x6d9   : > { %4180 = vmax.xlane.f32.xlu1 %v4179_v12  ;;  %v4052_v8 = vpop.xlane.xlu0 %4051  ;;  %v4164_v12 = vsel %vm575_vm0, %v12029_v58, -inf }
 0x6db   : > { %4147 = vmax.xlane.f32.xlu0 %v4146_v37  ;;  %v12124_v3 = vpop.xlane.xlu1 %4054  ;;  %v4167_v37 = vsel %vm575_vm0, %v12036_v0, -inf  ;;  %v4228_v0 = vsub.f32 %v11864_v59, %v4058_v30  ;;  %v4200_v30 = vsel %vm575_vm0, %v12066_v60, -inf  ;;  %v4229_v59 = vsub.f32 %v11870_v14, %v4061_v47 }
 0x6dc   : > { %v4227_v47 = vsub.f32 %v11872_v15, %v12124_v3 }
 0x6dd   : > { %4150 = vmax.xlane.f32.xlu1 %v4149_v19  ;;  %v4076_v22 = vpop.xlane.xlu0 %4075 }
 0x6de   : > { %v4234_v11 = vsub.f32 %v11886_v33, %v4076_v22  ;;  %v4203_v33 = vsel %vm575_vm0, %v12074_v18, -inf  ;;  %v4300_v15 = vmul.f32 1.442695, %v4227_v47 }
 0x6df   : > { %4171 = vmax.xlane.f32.xlu0 %v4170_v52  ;;  %v12132_v19 = vpop.xlane.xlu1 %4078  ;;  %v4188_v52 = vsel %vm575_vm0, %v12082_v39, -inf  ;;  %v4236_v39 = vsub.f32 %v11884_v31, %v4082_v36  ;;  %v4194_v31 = vsel %vm575_vm0, %v12068_v34, -inf  ;;  %v4304_v36 = vmul.f32 1.442695, %v4229_v59 }
 0x6e0   : > { %v4206_v59 = vsel %vm575_vm0, %v12100_v50, -inf  ;;  %v4235_v3 = vsub.f32 %v11892_v17, %v12132_v19 }
 0x6e1   : > { %4174 = vmax.xlane.f32.xlu1 %v4173_v24  ;;  %v4070_v49 = vpop.xlane.xlu0 %4069  ;;  %v4158_v24 = vsel %vm575_vm0, %v12031_v54, -inf  ;;  %v4302_v54 = vmul.f32 1.442695, %v4228_v0  ;;  %v4318_v22 = vmul.f32 1.442695, %v4236_v39 }
 0x6e2   : > { %v4232_v39 = vsub.f32 %v11876_v56, %v4070_v49  ;;  %v4316_v17 = vmul.f32 1.442695, %v4235_v3 }
 0x6e3   : > { %4165 = vmax.xlane.f32.xlu0 %v4164_v12  ;;  %v12140_v12 = vpop.xlane.xlu1 %4072  ;;  %10075 = vpow2.f32 %v4302_v54 }
 0x6e5   : > { %4168 = vmax.xlane.f32.xlu1 %v4167_v37  ;;  %v4161_v37 = vsel %vm575_vm0, %v12038_v1, -inf }
 0x6e7   : > { %4189 = vmax.xlane.f32.xlu0 %v4188_v52  ;;  %v4182_v52 = vsel %vm575_vm0, %v12084_v48, -inf }
 0x6e9   : > { %4192 = vmax.xlane.f32.xlu1 %v4191_v26 }
 0x6eb   : > { %4159 = vmax.xlane.f32.xlu0 %v4158_v24  ;;  %v4185_v24 = vsel %vm575_vm0, %v12092_v10, -inf }
 0x6ed   : > { %v4094_v58 = vpop.xlane.xlu0 %4093  ;;  %4162 = vmax.xlane.f32.xlu1 %v4161_v37  ;;  %v4314_v37 = vmul.f32 1.442695, %v4234_v11  ;;  %v4197_v11 = vsel %vm575_vm0, %v12076_v23, -inf }
 0x6ee   : > { %v4240_v56 = vsub.f32 %v11916_v63, %v4094_v58 }
 0x6ef   : > { %4183 = vmax.xlane.f32.xlu0 %v4182_v52  ;;  %v12148_v26 = vpop.xlane.xlu1 %4096  ;;  %v4226_v52 = vsub.f32 %v11866_v20, %v4052_v8  ;;  %10077 = vpow2.f32 %v4314_v37  ;;  %v4212_v8 = vsel %vm575_vm0, %v12098_v46, -inf  ;;  %v12180_v37 = vpop.eup %10075 }
 0x6f0   : > { %10079 = vpow2.f32 %v4318_v22  ;;  %v4326_v63 = vmul.f32 1.442695, %v4240_v56 }
 0x6f1   : > { %v4064_v25 = vpop.xlane.xlu0 %4063  ;;  %4186 = vmax.xlane.f32.xlu1 %v4185_v24  ;;  %v4237_v24 = vsub.f32 %v11890_v57, %v4085_v51  ;;  %v4298_v14 = vmul.f32 1.442695, %v4226_v52  ;;  %10081 = vpow2.f32 %v4304_v36  ;;  %v4215_v51 = vsel %vm575_vm0, %v12104_v4, -inf }
 0x6f2   : > { %v4230_v58 = vsub.f32 %v11878_v61, %v4064_v25 }
 0x6f3   : > { %4201 = vmax.xlane.f32.xlu0 %v4200_v30  ;;  %v12159_v0 = vpop.xlane.xlu1 %4066  ;;  %v4320_v54 = vmul.f32 1.442695, %v4237_v24  ;;  %10083 = vpow2.f32 %v4298_v14  ;;  %v4310_v30 = vmul.f32 1.442695, %v4232_v39 }
 0x6f4   : > { %v4306_v61 = vmul.f32 1.442695, %v4230_v58 }
 0x6f5   : > { %v4088_v10 = vpop.xlane.xlu0 %4087  ;;  %4204 = vmax.xlane.f32.xlu1 %v4203_v33  ;;  %10085 = vpow2.f32 %v4320_v54  ;;  %v4209_v33 = vsel %vm575_vm0, %v12106_v9, -inf }
 0x6f6   : > { %10087 = vpow2.f32 %v4310_v30  ;;  %v4238_v19 = vsub.f32 %v11918_v44, %v4088_v10  ;;  %v4233_v44 = vsub.f32 %v11880_v43, %v12140_v12  ;;  %v4241_v12 = vsub.f32 %v11922_v13, %v12148_v26 }
 0x6f7   : > { %4195 = vmax.xlane.f32.xlu0 %v4194_v31  ;;  %v12171_v57 = vpop.xlane.xlu1 %4090  ;;  %v4440_v31 = vsel %vm575_vm0, %v12180_v37, 0.0  ;;  %10089 = vpow2.f32 %v4300_v15  ;;  %v4231_v26 = vsub.f32 %v11882_v29, %v12159_v0 }
 0x6f8   : > { %10091 = vpow2.f32 %v4326_v63  ;;  %v4322_v10 = vmul.f32 1.442695, %v4238_v19  ;;  %v4312_v43 = vmul.f32 1.442695, %v4233_v44  ;;  %v4328_v13 = vmul.f32 1.442695, %v4241_v12 }
 0x6f9   : > { %v4106_v20 = vpop.xlane.xlu0 %4105  ;;  %4198 = vmax.xlane.f32.xlu1 %v4197_v11  ;;  %v12186_v22 = vpop.eup %10077  ;;  %10093 = vpow2.f32 %v4316_v17  ;;  %v4239_v29 = vsub.f32 %v11924_v42, %v12171_v57 }
 0x6fa   : > { %v12193_v36 = vpop.eup %10079  ;;  %v4458_v11 = vsel %vm575_vm0, %v12186_v22, 0.0  ;;  %v4244_v25 = vsub.f32 %v11902_v2, %v4106_v20  ;;  %10095 = vpow2.f32 %v4306_v61 }
 0x6fb   : > { %4213 = vmax.xlane.f32.xlu0 %v4212_v8  ;;  %v12189_v52 = vpop.xlane.xlu1 %4108  ;;  %v12198_v14 = vpop.eup %10081  ;;  %v4464_v39 = vsel %vm575_vm0, %v12193_v36, 0.0  ;;  %10097 = vpow2.f32 %v4322_v10 }
 0x6fc   : > { %v4443_v47 = vsel %vm575_vm0, %v12198_v14, 0.0  ;;  %v4334_v2 = vmul.f32 1.442695, %v4244_v25  ;;  %v4245_v12 = vsub.f32 %v11908_v38, %v12189_v52 }
 0x6fd   : > { %4216 = vmax.xlane.f32.xlu1 %v4215_v51  ;;  %v12176_v49 = vpop.xlane.xlu0 %4129  ;;  %v12203_v8 = vpop.eup %10083 }
 0x6fe   : > { %v4434_v56 = vsel %vm575_vm0, %v12203_v8, 0.0  ;;  %10099 = vpow2.f32 %v4334_v2  ;;  %v4252_v42 = vsub.f32 %v11940_v16, %v12176_v49 }
 0x6ff   : > { %4207 = vmax.xlane.f32.xlu0 %v4206_v59  ;;  %v12207_v54 = vpop.xlane.xlu1 %4132  ;;  %v12211_v51 = vpop.eup %10085  ;;  %10101 = vpow2.f32 %v4312_v43 }
 0x700   : > { %v12216_v59 = vpop.eup %10087  ;;  %v4467_v15 = vsel %vm575_vm0, %v12211_v51, 0.0 }
 0x701   : > { %4210 = vmax.xlane.f32.xlu1 %v4209_v33  ;;  %v4100_v24 = vpop.xlane.xlu0 %4099  ;;  %v12222_v3 = vpop.eup %10089  ;;  %v4452_v58 = vsel %vm575_vm0, %v12216_v59, 0.0 }
 0x702   : > { %v4242_v20 = vsub.f32 %v11904_v62, %v4100_v24  ;;  %v4437_v17 = vsel %vm575_vm0, %v12222_v3, 0.0 }
 0x703   : > { %4441 = vadd.xlane.f32.xlu0 %v4440_v31  ;;  %v4103_v63 = vpop.xlane.xlu1 %4102  ;;  %v12227_v31 = vpop.eup %10091 }
 0x704   : > { %v4330_v62 = vmul.f32 1.442695, %v4242_v20  ;;  %v12233_v19 = vpop.eup %10093  ;;  %v4476_v61 = vsel %vm575_vm0, %v12227_v31, 0.0  ;;  %v4324_v20 = vmul.f32 1.442695, %v4239_v29 }
 0x705   : > { %4459 = vadd.xlane.f32.xlu1 %v4458_v11  ;;  %v4124_v30 = vpop.xlane.xlu0 %4123  ;;  %v12238_v25 = vpop.eup %10095  ;;  %v4461_v0 = vsel %vm575_vm0, %v12233_v19, 0.0 }
 0x706   : > { %v4250_v33 = vsub.f32 %v11944_v6, %v4124_v30  ;;  %10103 = vpow2.f32 %v4330_v62  ;;  %v4243_v6 = vsub.f32 %v11910_v40, %v4103_v63  ;;  %v12244_v44 = vpop.eup %10097  ;;  %v4336_v63 = vmul.f32 1.442695, %v4245_v12 }
 0x707   : > { %4465 = vadd.xlane.f32.xlu0 %v4464_v39  ;;  %10105 = vpow2.f32 %v4328_v13  ;;  %v4308_v39 = vmul.f32 1.442695, %v4231_v26  ;;  %v4470_v57 = vsel %vm575_vm0, %v12244_v44, 0.0  ;;  %v4127_v38 = vpop.xlane.xlu1 %4126 }
 0x708   : > { %v4346_v24 = vmul.f32 1.442695, %v4250_v33  ;;  %v4332_v40 = vmul.f32 1.442695, %v4243_v6  ;;  %v12249_v2 = vpop.eup %10099 }
 0x709   : > { %4444 = vadd.xlane.f32.xlu1 %v4443_v47  ;;  %v4118_v11 = vpop.xlane.xlu0 %4117  ;;  %v4446_v47 = vsel %vm575_vm0, %v12238_v25, 0.0  ;;  %v12255_v30 = vpop.eup %10101 }
 0x70a   : > { %10107 = vpow2.f32 %v4346_v24  ;;  %v4248_v10 = vsub.f32 %v11928_v53, %v4118_v11  ;;  %v4488_v53 = vsel %vm575_vm0, %v12249_v2, 0.0  ;;  %v4455_v16 = vsel %vm575_vm0, %v12255_v30, 0.0 }
 0x70b   : > { %4435 = vadd.xlane.f32.xlu0 %v4434_v56  ;;  %10109 = vpow2.f32 %v4308_v39  ;;  %v4251_v24 = vsub.f32 %v11952_v5, %v4127_v38 }
 0x70c   : > { %10111 = vpow2.f32 %v4332_v40  ;;  %v4342_v56 = vmul.f32 1.442695, %v4248_v10 }
 0x70d   : > { %4468 = vadd.xlane.f32.xlu1 %v4467_v15  ;;  %10113 = vpow2.f32 %v4324_v20  ;;  %v4350_v15 = vmul.f32 1.442695, %v4252_v42  ;;  %v4348_v39 = vmul.f32 1.442695, %v4251_v24 }
 0x70e   : > { %10115 = vpow2.f32 %v4342_v56 }
 0x70f   : > { %4453 = vadd.xlane.f32.xlu0 %v4452_v58  ;;  %10117 = vpow2.f32 %v4350_v15  ;;  %v4253_v58 = vsub.f32 %v11946_v32, %v12207_v54 }
 0x710   : > { %v12259_v43 = vpop.eup %10103  ;;  %10119 = vpow2.f32 %v4336_v63 }
 0x711   : > { %4438 = vadd.xlane.f32.xlu1 %v4437_v17  ;;  %v12265_v49 = vpop.eup %10105  ;;  %v4482_v62 = vsel %vm575_vm0, %v12259_v43, 0.0  ;;  %v4352_v6 = vmul.f32 1.442695, %v4253_v58 }
 0x712   : > { %v4479_v52 = vsel %vm575_vm0, %v12265_v49, 0.0 }
 0x713   : > { %4477 = vadd.xlane.f32.xlu0 %v4476_v61  ;;  %10121 = vpow2.f32 %v4352_v6 }
 0x714   : > { %v12269_v33 = vpop.eup %10107  ;;  %10123 = vpow2.f32 %v4348_v39 }
 0x715   : > { %4462 = vadd.xlane.f32.xlu1 %v4461_v0  ;;  %v12275_v13 = vpop.eup %10109  ;;  %v4506_v26 = vsel %vm575_vm0, %v12269_v33, 0.0 }
 0x716   : > { %v12279_v17 = vpop.eup %10111  ;;  %v4449_v32 = vsel %vm575_vm0, %v12275_v13, 0.0 }
 0x717   : > { %4447 = vadd.xlane.f32.xlu0 %v4446_v47  ;;  %v12284_v54 = vpop.eup %10113  ;;  %v4485_v11 = vsel %vm575_vm0, %v12279_v17, 0.0 }
 0x718   : > { %v12288_v61 = vpop.eup %10115  ;;  %v4473_v29 = vsel %vm575_vm0, %v12284_v54, 0.0 }
 0x719   : > { %4471 = vadd.xlane.f32.xlu1 %v4470_v57  ;;  %13756 = vst [vmem:[#allocation67_spill] sm:$0xff] %v12288_v61  ;;  %v12292_v0 = vpop.eup %10117  ;;  %v4500_v5 = vsel %vm575_vm0, %v12288_v61, 0.0 }
 0x71a   : > { %v4512_v40 = vsel %vm575_vm0, %v12292_v0, 0.0  ;;  %v12298_v10 = vpop.eup %10119 }
 0x71b   : > { %4489 = vadd.xlane.f32.xlu0 %v4488_v53  ;;  %v4491_v47 = vsel %vm575_vm0, %v12298_v10, 0.0  ;;  %v4121_v53 = vpop.xlane.xlu1 %4120 }
 0x71c   : > { %v4249_v63 = vsub.f32 %v11934_v28, %v4121_v53 }
 0x71d   : > { %4456 = vadd.xlane.f32.xlu1 %v4455_v16  ;;  %v12302_v20 = vpop.eup %10121 }
 0x71e   : > { %v4515_v42 = vsel %vm575_vm0, %v12302_v20, 0.0  ;;  %v12306_v57 = vpop.eup %10123 }
 0x71f   : > { %4483 = vadd.xlane.f32.xlu0 %v4482_v62  ;;  %v4509_v56 = vsel %vm575_vm0, %v12306_v57, 0.0 }
 0x721   : > { %4480 = vadd.xlane.f32.xlu1 %v4479_v52 }
 0x723   : > { %4507 = vadd.xlane.f32.xlu0 %v4506_v26 }
 0x725   : > { %4450 = vadd.xlane.f32.xlu1 %v4449_v32  ;;  %v4344_v32 = vmul.f32 1.442695, %v4249_v63 }
 0x727   : > { %4486 = vadd.xlane.f32.xlu0 %v4485_v11 }
 0x729   : > { %4474 = vadd.xlane.f32.xlu1 %v4473_v29 }
 0x72b   : > { %4501 = vadd.xlane.f32.xlu0 %v4500_v5 }
 0x72d   : > { %4513 = vadd.xlane.f32.xlu1 %v4512_v40  ;;  %v13757_v40 = vld [vmem:[#allocation48_spill] sm:$0xff] }
 0x731   : > { %4492 = vadd.xlane.f32.xlu1 %v4491_v47 }
 0x735   : > { %4516 = vadd.xlane.f32.xlu1 %v4515_v42 }
 0x739   : > { %4510 = vadd.xlane.f32.xlu1 %v4509_v56 }
 0x744   : > { %v4142_v12 = vpop.xlane.xlu0 %4141 }
 0x745   : > { %v4256_v15 = vsub.f32 %v12015_v45, %v4142_v12 }
 0x746   : > { %v4145_v16 = vpop.xlane.xlu1 %4144 }
 0x747   : > { %v4358_v62 = vmul.f32 1.442695, %v4256_v15  ;;  %v4257_v52 = vsub.f32 %v12022_v7, %v4145_v16 }
 0x748   : > { %v4112_v58 = vpop.xlane.xlu0 %4111 }
 0x749   : > { %10125 = vpow2.f32 %v4358_v62  ;;  %v4246_v38 = vsub.f32 %v11932_v41, %v4112_v58  ;;  %v4360_v29 = vmul.f32 1.442695, %v4257_v52 }
 0x74a   : > { %v4115_v26 = vpop.xlane.xlu1 %4114 }
 0x74b   : > { %v4338_v6 = vmul.f32 1.442695, %v4246_v38  ;;  %v4247_v24 = vsub.f32 %v11938_v35, %v4115_v26 }
 0x74c   : > { %v4136_v11 = vpop.xlane.xlu0 %4135 }
 0x74d   : > { %10127 = vpow2.f32 %v4338_v6  ;;  %v4340_v39 = vmul.f32 1.442695, %v4247_v24  ;;  %v4254_v45 = vsub.f32 %v12017_v21, %v4136_v11 }
 0x74e   : > { %v4139_v5 = vpop.xlane.xlu1 %4138 }
 0x74f   : > { %10129 = vpow2.f32 %v4340_v39  ;;  %v4354_v28 = vmul.f32 1.442695, %v4254_v45  ;;  %v4255_v47 = vsub.f32 %v13757_v40, %v4139_v5 }
 0x750   : > { %10131 = vpow2.f32 %v4344_v32  ;;  %v4418_v41 = vpop.xlane.xlu0 %4417 }
 0x751   : > { %10133 = vpow2.f32 %v4354_v28  ;;  %v4356_v7 = vmul.f32 1.442695, %v4255_v47 }
 0x752   : > { %10135 = vpow2.f32 %v4360_v29  ;;  %v4421_v42 = vpop.xlane.xlu1 %4420 }
 0x753   : > { %v12317_v56 = vpop.eup %10125  ;;  %10137 = vpow2.f32 %v4356_v7 }
 0x754   : > { %13758 = vst [vmem:[#allocation48_spill] sm:$0xff] %v12317_v56  ;;  %10139 = vrcp.f32 %v4421_v42  ;;  %v4412_v35 = vpop.xlane.xlu0 %4411  ;;  %v4524_v21 = vsel %vm575_vm0, %v12317_v56, 0.0 }
 0x755   : > { %10141 = vrcp.f32 %v4412_v35  ;;  %4525 = vadd.xlane.f32.xlu0 %v4524_v21  ;;  %v13765_v35 = vld [vmem:[#allocation24_spill] sm:$0xff] }
 0x756   : > { %10143 = vrcp.f32 %v4418_v41  ;;  %v4415_v53 = vpop.xlane.xlu1 %4414  ;;  %v13764_v41 = vld [vmem:[#allocation53_spill] sm:$0xff]  ;;  %v9404_v21 = vunpack.i.h.bf16 %v13765_v35 }
 0x757   : > { %v12321_v12 = vpop.eup %10127  ;;  %10145 = vrcp.f32 %v4415_v53  ;;  %v9403_v53 = vunpack.i.l.bf16 %v13765_v35 }
 0x758   : > { %v4430_v15 = vpop.xlane.xlu0 %4429  ;;  %v4494_v16 = vsel %vm575_vm0, %v12321_v12, 0.0 }
 0x759   : > { %v12325_v62 = vpop.eup %10129  ;;  %4495 = vadd.xlane.f32.xlu0 %v4494_v16  ;;  %v13766_v16 = vld [vmem:[#allocation56_spill] sm:$0xff] }
 0x75a   : > { %13759 = vst [vmem:[#allocation68_spill] sm:$0xff] %v12325_v62  ;;  %v12327_v63 = vpop.eup %10131  ;;  %v4433_v58 = vpop.xlane.xlu1 %4432  ;;  %v4497_v6 = vsel %vm575_vm0, %v12325_v62, 0.0 }
 0x75b   : > { %13760 = vst [vmem:[#allocation69_spill] sm:$0xff] %v12327_v63  ;;  %v12329_v38 = vpop.eup %10133  ;;  %10147 = vrcp.f32 %v4433_v58  ;;  %v4503_v40 = vsel %vm575_vm0, %v12327_v63, 0.0  ;;  %v13769_v63 = vld [vmem:[#allocation33_spill] sm:$0xff] }
 0x75c   : > { %13761 = vst [vmem:[#allocation70_spill] sm:$0xff] %v12329_v38  ;;  %v12331_v52 = vpop.eup %10135  ;;  %v4424_v26 = vpop.xlane.xlu0 %4423  ;;  %v4518_v24 = vsel %vm575_vm0, %v12329_v38, 0.0 }
 0x75d   : > { %13762 = vst [vmem:[#allocation71_spill] sm:$0xff] %v12331_v52  ;;  %v12337_v32 = vpop.eup %10137  ;;  %10149 = vrcp.f32 %v4424_v26  ;;  %4498 = vadd.xlane.f32.xlu0 %v4497_v6  ;;  %4519 = vadd.xlane.f32.xlu1 %v4518_v24  ;;  %v13767_v26 = vld [vmem:[#allocation59_spill] sm:$0xff]  ;;  %v13768_v24 = vld [vmem:[#allocation52_spill] sm:$0xff] }
 0x75e   : > { %13763 = vst [vmem:[#allocation72_spill] sm:$0xff] %v12337_v32  ;;  %v10140_v11 = vpop.eup %10139  ;;  %10151 = vrcp.f32 %v4430_v15  ;;  %v4427_v39 = vpop.xlane.xlu1 %4426  ;;  %v4521_v28 = vsel %vm575_vm0, %v12337_v32, 0.0 }
 0x75f   : > { %v10142_v45 = vpop.eup %10141  ;;  %10153 = vrcp.f32 %v4427_v39  ;;  %v4669_v7 = vmul.f32 %v10140_v11, %v13764_v41 }
 0x760   : > { %v10144_v29 = vpop.eup %10143  ;;  %v4154_v5 = vpop.xlane.xlu0 %4153  ;;  %v4666_v58 = vmul.f32 %v10142_v45, %v13766_v16 }
 0x761   : > { %v10146_v47 = vpop.eup %10145  ;;  %v4260_v42 = vsub.f32 %v11962_v27, %v4154_v5  ;;  %4522 = vadd.xlane.f32.xlu0 %v4521_v28  ;;  %4504 = vadd.xlane.f32.xlu1 %v4503_v40  ;;  %v4668_v39 = vmul.f32 %v10144_v29, %v13768_v24  ;;  %v4527_v27 = vsel %vm575_vm0, %v12331_v52, 0.0  ;;  %v13770_v40 = vld [vmem:[#allocation54_spill] sm:$0xff]  ;;  %v13778_v52 = vld [vmem:[#allocation60_spill] sm:$0xff] }
 0x762   : > { %v4157_v15 = vpop.xlane.xlu1 %4156  ;;  %v4667_v6 = vmul.f32 %v10146_v47, %v13767_v26  ;;  %v3190_v47 = vpack.c.bf16 %v9404_v21, %v9403_v53  ;;  %v13774_v53 = vld [vmem:[#allocation61_spill] sm:$0xff] }
 0x763   : > { %v4366_v56 = vmul.f32 1.442695, %v4260_v42  ;;  %v4261_v61 = vsub.f32 %v13769_v63, %v4157_v15  ;;  %v4731_v5 = vpack.c.bf16 %v4669_v7, %v4668_v39  ;;  %v13771_v42 = vld [vmem:[#allocation28_spill] sm:$0xff]  ;;  %v13775_v39 = vld [vmem:[#allocation57_spill] sm:$0xff] }
 0x764   : > { %v4178_v32 = vpop.xlane.xlu0 %4177  ;;  %v4730_v11 = vpack.c.bf16 %v4667_v6, %v4666_v58  ;;  %v9409_v16 = vunpack.i.h.bf16 %v13771_v42  ;;  %v9408_v63 = vunpack.i.l.bf16 %v13771_v42  ;;  %v13773_v58 = vld [vmem:[#allocation25_spill] sm:$0xff] }
 0x765   : > { %10155 = vpow2.f32 %v4366_v56  ;;  %v4368_v28 = vmul.f32 1.442695, %v4261_v61  ;;  %v4268_v41 = vsub.f32 %v13770_v40, %v4178_v32  ;;  %4528 = vadd.xlane.f32.xlu1 %v4527_v27  ;;  %v10148_v35 = vpop.eup %10147  ;;  %v13772_v56 = vld [vmem:[#allocation27_spill] sm:$0xff]  ;;  %v9414_v26 = vunpack.i.h.bf16 %v13773_v58  ;;  %v13777_v40 = vld [vmem:[#allocation66_spill] sm:$0xff] }
 0x766   : > { %8673 = vmatprep.mubr.msk.bf16.mxu1 %vm575_vm0, %v4730_v11  ;;  %v4181_v45 = vpop.xlane.xlu1 %4180  ;;  %v4673_v6 = vmul.f32 %v10148_v35, %v13774_v53  ;;  %v9413_v24 = vunpack.i.l.bf16 %v13773_v58  ;;  %v13780_v58 = vld [vmem:[#allocation26_spill] sm:$0xff] }
 0x767   : > { %v10150_v29 = vpop.eup %10149  ;;  %10157 = vpow2.f32 %v4368_v28  ;;  %v4382_v15 = vmul.f32 1.442695, %v4268_v41  ;;  %8674 = vmatmul.mubr.msk.bf16.vlgmr.msra.gmra.mrb[72].mxu1 %vm575_vm0, %v4731_v5  ;;  %v4269_v27 = vsub.f32 %v13775_v39, %v4181_v45  ;;  %v13776_v28 = vld [vmem:[#allocation63_spill] sm:$0xff]  ;;  %v9424_v53 = vunpack.i.h.bf16 %v13780_v58 }
 0x768   : > { %v10152_v7 = vpop.eup %10151  ;;  %8682 = vmatpush3.bf16.msra.mxu1 %v13772_v56  ;;  %v4148_v61 = vpop.xlane.xlu0 %4147  ;;  %v4670_v5 = vmul.f32 %v10150_v29, %v13776_v28  ;;  %v3191_v56 = vpack.c.bf16 %v9409_v16, %v9408_v63  ;;  %v3192_v39 = vpack.c.bf16 %v9414_v26, %v9413_v24  ;;  %v9423_v16 = vunpack.i.l.bf16 %v13780_v58 }
 0x769   : > { %v10154_v32 = vpop.eup %10153  ;;  %10159 = vpow2.f32 %v4382_v15  ;;  %8683 = vmatprep.subr.bf16.mxu1 %v3190_v47  ;;  %v4258_v21 = vsub.f32 %v11966_v55, %v4148_v61  ;;  %v4672_v38 = vmul.f32 %v10152_v7, %v13778_v52  ;;  %v13779_v55 = vld [vmem:[#allocation55_spill] sm:$0xff]  ;;  %v4384_v45 = vmul.f32 1.442695, %v4269_v27  ;;  %v13781_v52 = vld [vmem:[#allocation34_spill] sm:$0xff] }
 0x76a   : > { %v4151_v11 = vpop.xlane.xlu1 %4150  ;;  %v4671_v41 = vmul.f32 %v10154_v32, %v13777_v40  ;;  %v13782_v7 = vld [vmem:[#allocation58_spill] sm:$0xff] }
 0x76b   : > { %v4362_v42 = vmul.f32 1.442695, %v4258_v21  ;;  %v4733_v61 = vpack.c.bf16 %v4673_v6, %v4672_v38 }
 0x76c   : > { %8684 = vmatpush3.bf16.msra.mxu1 %v3190_v47  ;;  %v4172_v15 = vpop.xlane.xlu0 %4171  ;;  %v4732_v62 = vpack.c.bf16 %v4671_v41, %v4670_v5  ;;  %v4259_v47 = vsub.f32 %v13781_v52, %v4151_v11  ;;  %v13784_v5 = vld [vmem:[#allocation49_spill] sm:$0xff]  ;;  %v12385_v41 = vpack.c.bf16 %v9424_v53, %v9423_v16  ;;  %v13786_v52 = vld [vmem:[#allocation50_spill] sm:$0xff] }
 0x76d   : > { %10161 = vpow2.f32 %v4362_v42  ;;  %8685 = vmatprep.subr.bf16.mxu1 %v3191_v56  ;;  %v4266_v35 = vsub.f32 %v13779_v55, %v4172_v15 }
 0x76e   : > { %8677 = vmatprep.mubr.msk.bf16.mxu1 %vm575_vm0, %v4732_v62  ;;  %v4175_v29 = vpop.xlane.xlu1 %4174  ;;  %v4364_v28 = vmul.f32 1.442695, %v4259_v47 }
 0x76f   : > { %v12370_v32 = vpop.eup %10155  ;;  %v4378_v63 = vmul.f32 1.442695, %v4266_v35  ;;  %v4267_v21 = vsub.f32 %v13782_v7, %v4175_v29  ;;  %8678 = vmatmul.mubr.msk.bf16.gmra.mrb[76].mxu1 %vm575_vm0, %v4733_v61  ;;  %v13785_v61 = vld [vmem:[#allocation62_spill] sm:$0xff] }
 0x770   : > { %8686 = vmatpush3.bf16.msra.mxu1 %v3191_v56  ;;  %v4166_v38 = vpop.xlane.xlu0 %4165  ;;  %v4536_v6 = vsel %vm575_vm0, %v12370_v32, 0.0 }
 0x771   : > { %v12378_v27 = vpop.eup %10157  ;;  %10163 = vpow2.f32 %v4378_v63  ;;  %v4380_v62 = vmul.f32 1.442695, %v4267_v21  ;;  %8687 = vmatprep.subr.bf16.mxu1 %v3192_v39  ;;  %4537 = vadd.xlane.f32.xlu1 %v4536_v6  ;;  %v4264_v40 = vsub.f32 %v13784_v5, %v4166_v38 }
 0x772   : > { %10165 = vpow2.f32 %v4384_v45  ;;  %v4169_v26 = vpop.xlane.xlu1 %4168  ;;  %v4539_v24 = vsel %vm575_vm0, %v12378_v27, 0.0 }
 0x773   : > { %v12382_v11 = vpop.eup %10159  ;;  %10167 = vpow2.f32 %v4380_v62  ;;  %4540 = vadd.xlane.f32.xlu0 %v4539_v24  ;;  %v4374_v35 = vmul.f32 1.442695, %v4264_v40 }
 0x774   : > { %13783 = vst [vmem:[#allocation53_spill] sm:$0xff] %v12382_v11  ;;  %8688 = vmatpush3.bf16.msra.mxu1 %v3192_v39  ;;  %v4190_v42 = vpop.xlane.xlu0 %4189  ;;  %v4560_v56 = vsel %vm575_vm0, %v12382_v11, 0.0  ;;  %10169 = vpow2.f32 %v4364_v28  ;;  %v13788_v28 = vld [vmem:[#allocation51_spill] sm:$0xff] }
 0x775   : > { %8713 = vmatprep.subr.bf16.mxu1 %v12385_v41  ;;  %4561 = vadd.xlane.f32.xlu1 %v4560_v56  ;;  %v4272_v58 = vsub.f32 %v13785_v61, %v4190_v42  ;;  %10171 = vpow2.f32 %v4374_v35  ;;  %v4265_v5 = vsub.f32 %v13788_v28, %v4169_v26 }
 0x776   : > { %v4193_v15 = vpop.xlane.xlu1 %4192 }
 0x777   : > { %v12390_v55 = vpop.eup %10161  ;;  %v4390_v16 = vmul.f32 1.442695, %v4272_v58  ;;  %v4376_v58 = vmul.f32 1.442695, %v4265_v5 }
 0x778   : > { %v4160_v45 = vpop.xlane.xlu0 %4159  ;;  %v4530_v53 = vsel %vm575_vm0, %v12390_v55, 0.0 }
 0x779   : > { %4531 = vadd.xlane.f32.xlu1 %v4530_v53  ;;  %v4262_v47 = vsub.f32 %v13786_v52, %v4160_v45  ;;  %10173 = vpow2.f32 %v4390_v16  ;;  %v13789_v45 = vld [vmem:[#allocation64_spill] sm:$0xff] }
 0x77a   : > { %v4163_v29 = vpop.xlane.xlu1 %4162  ;;  %v4273_v53 = vsub.f32 %v13789_v45, %v4193_v15 }
 0x77b   : > { %v12395_v39 = vpop.eup %10163  ;;  %v4370_v40 = vmul.f32 1.442695, %v4262_v47 }
 0x77c   : > { %v12398_v63 = vpop.eup %10165  ;;  %v4184_v7 = vpop.xlane.xlu0 %4183  ;;  %v4554_v21 = vsel %vm575_vm0, %v12395_v39, 0.0 }
 0x77d   : > { %13787 = vst [vmem:[#allocation24_spill] sm:$0xff] %v12398_v63  ;;  %v12402_v38 = vpop.eup %10167  ;;  %v4270_v6 = vsub.f32 %v12084_v48, %v4184_v7  ;;  %4555 = vadd.xlane.f32.xlu1 %v4554_v21  ;;  %v4563_v35 = vsel %vm575_vm0, %v12398_v63, 0.0  ;;  %v4392_v7 = vmul.f32 1.442695, %v4273_v53  ;;  %v4263_v21 = vsub.f32 %v12038_v1, %v4163_v29 }
 0x77e   : > { %v4187_v62 = vpop.xlane.xlu1 %4186  ;;  %v4557_v24 = vsel %vm575_vm0, %v12402_v38, 0.0  ;;  %v12410_v61 = vpop.eup %10169 }
 0x77f   : > { %v4386_v42 = vmul.f32 1.442695, %v4270_v6  ;;  %4558 = vadd.xlane.f32.xlu0 %v4557_v24  ;;  %v4533_v26 = vsel %vm575_vm0, %v12410_v61, 0.0  ;;  %v12415_v16 = vpop.eup %10171 }
 0x780   : > { %v4202_v56 = vpop.xlane.xlu0 %4201  ;;  %v4548_v24 = vsel %vm575_vm0, %v12415_v16, 0.0 }
 0x781   : > { %10175 = vpow2.f32 %v4386_v42  ;;  %4564 = vadd.xlane.f32.xlu1 %v4563_v35  ;;  %v4372_v42 = vmul.f32 1.442695, %v4263_v21  ;;  %v13792_v35 = vld [vmem:[#allocation65_spill] sm:$0xff] }
 0x782   : > { %v4205_v48 = vpop.xlane.xlu1 %4204  ;;  %10177 = vpow2.f32 %v4370_v40 }
 0x783   : > { %10179 = vpow2.f32 %v4376_v58  ;;  %v12420_v28 = vpop.eup %10173  ;;  %v4271_v58 = vsub.f32 %v13792_v35, %v4187_v62  ;;  %v4276_v62 = vsub.f32 %v12066_v60, %v4202_v56 }
 0x784   : > { %v4196_v52 = vpop.xlane.xlu0 %4195  ;;  %13790 = vst [vmem:[#allocation56_spill] sm:$0xff] %v12420_v28  ;;  %10181 = vpow2.f32 %v4392_v7  ;;  %v4572_v29 = vsel %vm575_vm0, %v12420_v28, 0.0 }
 0x785   : > { %4534 = vadd.xlane.f32.xlu1 %v4533_v26  ;;  %v4388_v7 = vmul.f32 1.442695, %v4271_v58  ;;  %v4274_v35 = vsub.f32 %v12068_v34, %v4196_v52 }
 0x786   : > { %v4199_v47 = vpop.xlane.xlu1 %4198 }
 0x787   : > { %v4394_v28 = vmul.f32 1.442695, %v4274_v35 }
 0x788   : > { %v4214_v6 = vpop.xlane.xlu0 %4213 }
 0x789   : > { %v4280_v15 = vsub.f32 %v12098_v46, %v4214_v6  ;;  %4549 = vadd.xlane.f32.xlu1 %v4548_v24 }
 0x78a   : > { %v12423_v5 = vpop.xlane.xlu1 %4216 }
 0x78b   : > { %v12425_v40 = vpop.eup %10175  ;;  %v4406_v45 = vmul.f32 1.442695, %v4280_v15  ;;  %v4277_v15 = vsub.f32 %v12074_v18, %v4205_v48 }
 0x78c   : > { %13791 = vst [vmem:[#allocation59_spill] sm:$0xff] %v12425_v40  ;;  %v12428_v53 = vpop.xlane.xlu0 %4207  ;;  %v4566_v1 = vsel %vm575_vm0, %v12425_v40, 0.0  ;;  %v12434_v26 = vpop.eup %10177 }
 0x78d   : > { %10183 = vpow2.f32 %v4406_v45  ;;  %4567 = vadd.xlane.f32.xlu0 %v4566_v1  ;;  %4573 = vadd.xlane.f32.xlu1 %v4572_v29  ;;  %v4542_v6 = vsel %vm575_vm0, %v12434_v26, 0.0  ;;  %v12441_v24 = vpop.eup %10179  ;;  %v4398_v1 = vmul.f32 1.442695, %v4276_v62  ;;  %v4275_v29 = vsub.f32 %v12076_v23, %v4199_v47 }
 0x78e   : > { %v12436_v46 = vpop.xlane.xlu1 %4210  ;;  %10185 = vpow2.f32 %v4372_v42  ;;  %v4551_v60 = vsel %vm575_vm0, %v12441_v24, 0.0  ;;  %v12448_v56 = vpop.eup %10181  ;;  %v4400_v58 = vmul.f32 1.442695, %v4277_v15  ;;  %v4278_v35 = vsub.f32 %v12100_v50, %v12428_v53 }
 0x78f   : > { %10187 = vpow2.f32 %v4388_v7  ;;  %13793 = vst [vmem:[#allocation52_spill] sm:$0xff] %v12448_v56  ;;  %v4396_v18 = vmul.f32 1.442695, %v4275_v29  ;;  %v4575_v23 = vsel %vm575_vm0, %v12448_v56, 0.0  ;;  %v4281_v50 = vsub.f32 %v12104_v4, %v12423_v5 }
 0x790   : > { %v4442_v21 = vpop.xlane.xlu0 %4441  ;;  %10189 = vpow2.f32 %v4398_v1  ;;  %v4402_v53 = vmul.f32 1.442695, %v4278_v35 }
 0x791   : > { %4543 = vadd.xlane.f32.xlu1 %v4542_v6  ;;  %10191 = vpow2.f32 %v4400_v58 }
 0x792   : > { %v4460_v45 = vpop.xlane.xlu1 %4459  ;;  %10193 = vpow2.f32 %v4394_v28 }
 0x793   : > { %10195 = vpow2.f32 %v4396_v18 }
 0x794   : > { %v4466_v42 = vpop.xlane.xlu0 %4465 }
 0x795   : > { %4552 = vadd.xlane.f32.xlu1 %v4551_v60 }
 0x796   : > { %v4445_v40 = vpop.xlane.xlu1 %4444 }
 0x797   : > { %v12450_v11 = vpop.eup %10183  ;;  %10197 = vrcp.f32 %v4445_v40 }
 0x798   : > { %13794 = vst [vmem:[#allocation33_spill] sm:$0xff] %v12450_v11  ;;  %v4436_v34 = vpop.xlane.xlu0 %4435  ;;  %v4596_v48 = vsel %vm575_vm0, %v12450_v11, 0.0  ;;  %v12456_v52 = vpop.eup %10185  ;;  %v13798_v11 = vld [vmem:[#allocation31_spill] sm:$0xff] }
 0x799   : > { %4597 = vadd.xlane.f32.xlu0 %v4596_v48  ;;  %4576 = vadd.xlane.f32.xlu1 %v4575_v23  ;;  %v4545_v62 = vsel %vm575_vm0, %v12456_v52, 0.0  ;;  %v12460_v6 = vpop.eup %10187  ;;  %10199 = vrcp.f32 %v4436_v34 }
 0x79a   : > { %v4469_v47 = vpop.xlane.xlu1 %4468  ;;  %13795 = vst [vmem:[#allocation54_spill] sm:$0xff] %v12460_v6  ;;  %10201 = vrcp.f32 %v4442_v21  ;;  %v4569_v28 = vsel %vm575_vm0, %v12460_v6, 0.0  ;;  %v12468_v40 = vpop.eup %10189 }
 0x79b   : > { %13796 = vst [vmem:[#allocation28_spill] sm:$0xff] %v12468_v40  ;;  %v12470_v60 = vpop.eup %10191  ;;  %v4584_v18 = vsel %vm575_vm0, %v12468_v40, 0.0  ;;  %v13799_v40 = vld [vmem:[#allocation29_spill] sm:$0xff] }
 0x79c   : > { %v4454_v7 = vpop.xlane.xlu0 %4453  ;;  %v12472_v21 = vpop.eup %10193 }
 0x79d   : > { %4546 = vadd.xlane.f32.xlu1 %v4545_v62  ;;  %13797 = vst [vmem:[#allocation27_spill] sm:$0xff] %v12472_v21  ;;  %v12478_v34 = vpop.eup %10195  ;;  %v4408_v62 = vmul.f32 1.442695, %v4281_v50  ;;  %v4578_v4 = vsel %vm575_vm0, %v12472_v21, 0.0  ;;  %v9434_v50 = vunpack.i.h.bf16 %v13798_v11  ;;  %v9444_v21 = vunpack.i.h.bf16 %v13799_v40 }
 0x79e   : > { %v4439_v15 = vpop.xlane.xlu1 %4438 }
 0x79f   : > { %10203 = vrcp.f32 %v4439_v15 }
 0x7a0   : > { %10205 = vrcp.f32 %v4469_v47  ;;  %v12464_v1 = vpop.xlane.xlu0 %4477 }
 0x7a1   : > { %10207 = vrcp.f32 %v4460_v45  ;;  %4570 = vadd.xlane.f32.xlu1 %v4569_v28  ;;  %v4279_v45 = vsub.f32 %v12106_v9, %v12436_v46 }
 0x7a2   : > { %10209 = vrcp.f32 %v4466_v42  ;;  %v4463_v29 = vpop.xlane.xlu1 %4462  ;;  %v10198_v42 = vpop.eup %10197 }
 0x7a3   : > { %10211 = vrcp.f32 %v4463_v29  ;;  %v10200_v23 = vpop.eup %10199  ;;  %v4404_v35 = vmul.f32 1.442695, %v4279_v45  ;;  %v4677_v28 = vmul.f32 %v10198_v42, %v12198_v14  ;;  %v4587_v14 = vsel %vm575_vm0, %v12470_v60, 0.0 }
 0x7a4   : > { %v4448_v58 = vpop.xlane.xlu0 %4447  ;;  %v10202_v47 = vpop.eup %10201  ;;  %10213 = vpow2.f32 %v4402_v53  ;;  %v4674_v9 = vmul.f32 %v10200_v23, %v12203_v8  ;;  %v9433_v53 = vunpack.i.l.bf16 %v13798_v11  ;;  %v9443_v8 = vunpack.i.l.bf16 %v13799_v40  ;;  %v13800_v11 = vld [vmem:[#allocation39_spill] sm:$0xff] }
 0x7a5   : > { %4585 = vadd.xlane.f32.xlu1 %v4584_v18  ;;  %v4676_v6 = vmul.f32 %v10202_v47, %v12180_v37  ;;  %10215 = vpow2.f32 %v4408_v62 }
 0x7a6   : > { %v4472_v48 = vpop.xlane.xlu1 %4471  ;;  %10217 = vpow2.f32 %v4404_v35 }
 0x7a7   : > { %10219 = vrcp.f32 %v4454_v7 }
 0x7a8   : > { %v12482_v15 = vpop.xlane.xlu0 %4489  ;;  %10221 = vrcp.f32 %v4448_v58 }
 0x7a9   : > { %v10204_v5 = vpop.eup %10203  ;;  %4579 = vadd.xlane.f32.xlu1 %v4578_v4 }
 0x7aa   : > { %v10206_v29 = vpop.eup %10205  ;;  %v4457_v56 = vpop.xlane.xlu1 %4456  ;;  %v4675_v46 = vmul.f32 %v10204_v5, %v12222_v3  ;;  %v4735_v3 = vpack.c.bf16 %v4677_v28, %v4676_v6  ;;  %v9469_v5 = vunpack.i.h.bf16 %v13800_v11  ;;  %v13801_v6 = vld [vmem:[#allocation23_spill] sm:$0xff]  ;;  %v13803_v28 = vld [vmem:[#allocation37_spill] sm:$0xff] }
 0x7ab   : > { %v10208_v18 = vpop.eup %10207  ;;  %v4685_v23 = vmul.f32 %v10206_v29, %v12211_v51  ;;  %v3198_v51 = vpack.c.bf16 %v9434_v50, %v9433_v53  ;;  %10223 = vrcp.f32 %v4457_v56  ;;  %v3199_v56 = vpack.c.bf16 %v9444_v21, %v9443_v8  ;;  %v13804_v50 = vld [vmem:[#allocation30_spill] sm:$0xff] }
 0x7ac   : > { %v10210_v63 = vpop.eup %10209  ;;  %v4484_v45 = vpop.xlane.xlu0 %4483  ;;  %v4734_v42 = vpack.c.bf16 %v4675_v46, %v4674_v9  ;;  %v4682_v47 = vmul.f32 %v10208_v18, %v12186_v22  ;;  %v9468_v9 = vunpack.i.l.bf16 %v13800_v11  ;;  %v4581_v22 = vsel %vm575_vm0, %v12478_v34, 0.0  ;;  %v13806_v11 = vld [vmem:[#allocation38_spill] sm:$0xff] }
 0x7ad   : > { %v10212_v4 = vpop.eup %10211  ;;  %4588 = vadd.xlane.f32.xlu1 %v4587_v14  ;;  %v4684_v46 = vmul.f32 %v10210_v63, %v12193_v36  ;;  %10225 = vrcp.f32 %v4472_v48  ;;  %v13802_v63 = vld [vmem:[#allocation32_spill] sm:$0xff]  ;;  %v9479_v29 = vunpack.i.h.bf16 %v13803_v28  ;;  %v9478_v18 = vunpack.i.l.bf16 %v13803_v28  ;;  %v13805_v14 = vld [vmem:[#allocation35_spill] sm:$0xff] }
 0x7ae   : > { %8689 = vmatprep.mubr.msk.bf16.mxu1 %vm575_vm0, %v4734_v42  ;;  %v4481_v37 = vpop.xlane.xlu1 %4480  ;;  %v4683_v62 = vmul.f32 %v10212_v4, %v12233_v19  ;;  %v12511_v36 = vpop.eup %10213  ;;  %v9454_v58 = vunpack.i.h.bf16 %v13802_v63  ;;  %v9453_v35 = vunpack.i.l.bf16 %v13802_v63  ;;  %10227 = vrcp.f32 %v4484_v45 }
 0x7af   : > { %9531 = vrot.lane.b32.xlu0 %v13801_v6, %s10464_s18  ;;  %8690 = vmatmul.mubr.msk.bf16.vlgmr.msra.gmra.mrb[80].mxu1 %vm575_vm0, %v4735_v3  ;;  %v4739_v40 = vpack.c.bf16 %v4685_v23, %v4684_v46  ;;  %v3202_v48 = vpack.c.bf16 %v9469_v5, %v9468_v9  ;;  %v4590_v45 = vsel %vm575_vm0, %v12511_v36, 0.0  ;;  %v12522_v21 = vpop.eup %10215  ;;  %v9464_v42 = vunpack.i.h.bf16 %v13805_v14  ;;  %s7995_s18 = sshll.u32 %s10590_s0, 10 }
 0x7b0   : > { %8714 = vmatpush3.bf16.msra.mxu1 %v12385_v41  ;;  %v12507_v7 = vpop.xlane.xlu0 %4507  ;;  %v4738_v19 = vpack.c.bf16 %v4683_v62, %v4682_v47  ;;  %v9463_v4 = vunpack.i.l.bf16 %v13805_v14  ;;  %v3200_v3 = vpack.c.bf16 %v9454_v58, %v9453_v35  ;;  %v12527_v23 = vpop.eup %10217  ;;  %v9489_v5 = vunpack.i.h.bf16 %v13806_v11 }
 0x7b1   : > { %8715 = vmatprep.subr.bf16.mxu1 %v3198_v51  ;;  %4582 = vadd.xlane.f32.xlu1 %v4581_v22  ;;  %v3203_v47 = vpack.c.bf16 %v9479_v29, %v9478_v18  ;;  %v10220_v62 = vpop.eup %10219  ;;  %v4593_v28 = vsel %vm575_vm0, %v12527_v23, 0.0 }
 0x7b2   : > { %8705 = vmatprep.mubr.msk.bf16.mxu0 %vm575_vm0, %v4738_v19  ;;  %v4451_v41 = vpop.xlane.xlu1 %4450  ;;  %v10222_v9 = vpop.eup %10221  ;;  %v13807_v19 = vld [vmem:[#allocation42_spill] sm:$0xff]  ;;  %v3205_v35 = vpack.c.bf16 %v9464_v42, %v9463_v4 }
 0x7b3   : > { %10229 = vrcp.f32 %v4451_v41  ;;  %8706 = vmatmul.mubr.msk.bf16.vlgmr.msra.gmra.mrb[92].mxu0 %vm575_vm0, %v4739_v40  ;;  %v9499_v40 = vunpack.i.h.bf16 %v13807_v19  ;;  %v9498_v63 = vunpack.i.l.bf16 %v13807_v19 }
 0x7b4   : > { %10231 = vrcp.f32 %v4481_v37  ;;  %8716 = vmatpush3.bf16.msra.mxu1 %v3198_v51  ;;  %8730 = vmatpush3.bf16.msra.mxu0 %v13804_v50  ;;  %v4487_v53 = vpop.xlane.xlu0 %4486  ;;  %v9488_v37 = vunpack.i.l.bf16 %v13806_v11  ;;  %v4678_v50 = vmul.f32 %v10222_v9, %v12238_v25 }
 0x7b5   : > { %10233 = vrcp.f32 %v4487_v53  ;;  %8717 = vmatprep.subr.bf16.mxu1 %v3199_v56  ;;  %8731 = vmatprep.subr.bf16.mxu0 %v3202_v48  ;;  %v10224_v46 = vpop.eup %10223  ;;  %v12541_v14 = vpack.c.bf16 %v9499_v40, %v9498_v63 }
 0x7b6   : > { %10235 = vrcp.f32 %v12464_v1  ;;  %4591 = vadd.xlane.f32.xlu1 %v4590_v45  ;;  %v4475_v8 = vpop.xlane.xlu1 %4474  ;;  %v4599_v1 = vsel %vm575_vm0, %v12522_v21, 0.0  ;;  %v3204_v58 = vpack.c.bf16 %v9489_v5, %v9488_v37  ;;  %v4681_v29 = vmul.f32 %v10224_v46, %v12255_v30 }
 0x7b7   : > { %10237 = vrcp.f32 %v4475_v8  ;;  %v10226_v22 = vpop.eup %10225 }
 0x7b8   : > { %8718 = vmatpush3.bf16.msra.mxu1 %v3199_v56  ;;  %8732 = vmatpush3.bf16.msra.mxu0 %v3202_v48  ;;  %v10228_v41 = vpop.eup %10227  ;;  %10239 = vrcp.f32 %v12482_v15  ;;  %v4680_v15 = vmul.f32 %v10220_v62, %v12216_v59  ;;  %v4686_v37 = vmul.f32 %v10226_v22, %v12244_v44 }
 0x7b9   : > { %8719 = vmatprep.subr.bf16.mxu1 %v3200_v3  ;;  %8733 = vmatprep.subr.bf16.mxu0 %v3203_v47  ;;  %v4690_v8 = vmul.f32 %v10228_v41, %v12259_v43 }
 0x7ba   : > { %4600 = vadd.xlane.f32.xlu1 %v4599_v1  ;;  %v4514_v51 = vpop.xlane.xlu1 %4513  ;;  %v4737_v11 = vpack.c.bf16 %v4681_v29, %v4680_v15 }
 0x7bc   : > { %8720 = vmatpush3.bf16.msra.mxu1 %v3200_v3  ;;  %8734 = vmatpush3.bf16.msra.mxu0 %v3203_v47 }
 0x7bd   : > { %v10230_v56 = vpop.eup %10229  ;;  %8735 = vmatprep.subr.bf16.mxu0 %v3204_v58  ;;  %8745 = vmatprep.subr.bf16.mxu1 %v3205_v35 }
 0x7be   : > { %v10232_v18 = vpop.eup %10231  ;;  %4594 = vadd.xlane.f32.xlu1 %v4593_v28  ;;  %v4493_v48 = vpop.xlane.xlu1 %4492  ;;  %v4679_v53 = vmul.f32 %v10230_v56, %v12275_v13  ;;  %v13810_v28 = vld [vmem:[#allocation40_spill] sm:$0xff] }
 0x7bf   : > { %v10234_v45 = vpop.eup %10233  ;;  %10241 = vrcp.f32 %v4493_v48  ;;  %v4689_v25 = vmul.f32 %v10232_v18, %v12265_v49  ;;  %v9494_v29 = vunpack.i.h.bf16 %v13810_v28  ;;  %v9493_v18 = vunpack.i.l.bf16 %v13810_v28 }
 0x7c0   : > { %v10236_v42 = vpop.eup %10235  ;;  %8736 = vmatpush3.bf16.msra.mxu0 %v3204_v58  ;;  %v4736_v4 = vpack.c.bf16 %v4679_v53, %v4678_v50  ;;  %v4691_v30 = vmul.f32 %v10234_v45, %v12279_v17  ;;  %v13811_v53 = vld [vmem:[#allocation43_spill] sm:$0xff] }
 0x7c1   : > { %v10238_v3 = vpop.eup %10237  ;;  %8761 = vmatprep.subr.bf16.mxu0 %v12541_v14  ;;  %v4688_v43 = vmul.f32 %v10236_v42, %v12227_v31  ;;  %v9509_v45 = vunpack.i.h.bf16 %v13811_v53  ;;  %v9508_v15 = vunpack.i.l.bf16 %v13811_v53  ;;  %v13820_v53 = vld [vmem:[#allocation71_spill] sm:$0xff] }
 0x7c2   : > { %8693 = vmatprep.mubr.msk.bf16.mxu1 %vm575_vm0, %v4736_v4  ;;  %v4517_v13 = vpop.xlane.xlu1 %4516  ;;  %v4742_v5 = vpack.c.bf16 %v4691_v30, %v4690_v8  ;;  %v4687_v59 = vmul.f32 %v10238_v3, %v12284_v54  ;;  %v10240_v62 = vpop.eup %10239  ;;  %v13808_v54 = vld [vmem:[#allocation36_spill] sm:$0xff]  ;;  %v3208_v30 = vpack.c.bf16 %v9494_v29, %v9493_v18 }
 0x7c3   : > { %8694 = vmatmul.mubr.msk.bf16.gmra.mrb[84].mxu1 %vm575_vm0, %v4737_v11  ;;  %10243 = vrcp.f32 %v4517_v13  ;;  %v4741_v47 = vpack.c.bf16 %v4689_v25, %v4688_v43  ;;  %v9474_v9 = vunpack.i.h.bf16 %v13808_v54  ;;  %v9473_v31 = vunpack.i.l.bf16 %v13808_v54  ;;  %v4502_v13 = vpop.xlane.xlu0 %4501  ;;  %v13814_v54 = vld [vmem:[#allocation68_spill] sm:$0xff] }
 0x7c4   : > { %8721 = vmatprep.mubr.msk.bf16.mxu1 %vm575_vm0, %v4742_v5  ;;  %v4740_v17 = vpack.c.bf16 %v4687_v59, %v4686_v37  ;;  %10245 = vrcp.f32 %v12507_v7  ;;  %v4692_v1 = vmul.f32 %v10240_v62, %v12249_v2  ;;  %v13809_v7 = vld [vmem:[#allocation41_spill] sm:$0xff]  ;;  %v3210_v11 = vpack.c.bf16 %v9509_v45, %v9508_v15 }
 0x7c5   : > { %10247 = vrcp.f32 %v4514_v51  ;;  %v9484_v19 = vunpack.i.h.bf16 %v13809_v7  ;;  %v9483_v51 = vunpack.i.l.bf16 %v13809_v7  ;;  %v3206_v63 = vpack.c.bf16 %v9474_v9, %v9473_v31 }
 0x7c6   : > { %8709 = vmatprep.mubr.msk.bf16.mxu0 %vm575_vm0, %v4740_v17  ;;  %v4511_v49 = vpop.xlane.xlu1 %4510 }
 0x7c7   : > { %10249 = vrcp.f32 %v4511_v49  ;;  %8710 = vmatmul.mubr.msk.bf16.gmra.mrb[96].mxu0 %vm575_vm0, %v4741_v47 }
 0x7c9   : > { %v10242_v44 = vpop.eup %10241 }
 0x7ca   : > { %v4693_v46 = vmul.f32 %v10242_v44, %v12298_v10  ;;  %v3207_v10 = vpack.c.bf16 %v9484_v19, %v9483_v51  ;;  %v13815_v19 = vld [vmem:[#allocation70_spill] sm:$0xff] }
 0x7cc   : > { %v4743_v22 = vpack.c.bf16 %v4693_v46, %v4692_v1 }
 0x7cd   : > { %v10244_v40 = vpop.eup %10243 }
 0x7ce   : > { %8722 = vmatmul.mubr.msk.bf16.vlgmr.msra.gmra.mrb[88].mxu1 %vm575_vm0, %v4743_v22  ;;  %v10246_v58 = vpop.eup %10245  ;;  %v4701_v2 = vmul.f32 %v10244_v40, %v12302_v20  ;;  %v13812_v20 = vld [vmem:[#allocation44_spill] sm:$0xff] }
 0x7cf   : > { %9526 = vrot.lane.b32.xlu1 %v13801_v6, %s10463_s6  ;;  %8746 = vmatpush3.bf16.msra.mxu1 %v3205_v35  ;;  %v10248_v41 = vpop.eup %10247  ;;  %v4698_v48 = vmul.f32 %v10246_v58, %v12269_v33  ;;  %v9504_v4 = vunpack.i.h.bf16 %v13812_v20  ;;  %v9503_v8 = vunpack.i.l.bf16 %v13812_v20  ;;  %v13813_v33 = vld [vmem:[#allocation45_spill] sm:$0xff]  ;;  %v13816_v40 = vld [vmem:[#allocation72_spill] sm:$0xff] }
 0x7d0   : > { %8747 = vmatprep.subr.bf16.mxu1 %v3206_v63  ;;  %v4700_v6 = vmul.f32 %v10248_v41, %v12292_v0  ;;  %v9519_v3 = vunpack.i.h.bf16 %v13813_v33  ;;  %v13817_v41 = vld [vmem:[#allocation67_spill] sm:$0xff] }
 0x7d1   : > { %v10250_v56 = vpop.eup %10249  ;;  %v12581_v0 = vpack.c.bf16 %v9504_v4, %v9503_v8 }
 0x7d2   : > { %v4699_v50 = vmul.f32 %v10250_v56, %v12306_v57  ;;  %v4747_v42 = vpack.c.bf16 %v4701_v2, %v4700_v6  ;;  %v9518_v57 = vunpack.i.l.bf16 %v13813_v33  ;;  %v13818_v2 = vld [vmem:[#allocation69_spill] sm:$0xff] }
 0x7d3   : > { %8748 = vmatpush3.bf16.msra.mxu1 %v3206_v63 }
 0x7d4   : > { %8749 = vmatprep.subr.bf16.mxu1 %v3207_v10  ;;  %v4746_v35 = vpack.c.bf16 %v4699_v50, %v4698_v48  ;;  %v3211_v25 = vpack.c.bf16 %v9519_v3, %v9518_v57  ;;  %v13819_v48 = vld [vmem:[#allocation48_spill] sm:$0xff] }
 0x7d6   : > { %8737 = vmatprep.mubr.msk.bf16.mxu0 %vm575_vm0, %v4746_v35 }
 0x7d7   : > { %8750 = vmatpush3.bf16.msra.mxu1 %v3207_v10  ;;  %8738 = vmatmul.mubr.msk.bf16.vlgmr.msra.gmra.mrb[100].mxu0 %vm575_vm0, %v4747_v42 }
 0x7d8   : > { %8751 = vmatprep.subr.bf16.mxu1 %v3208_v30  ;;  %8762 = vmatpush3.bf16.msra.mxu0 %v12541_v14 }
 0x7d9   : > { %8763 = vmatprep.subr.bf16.mxu0 %v3210_v11 }
 0x7db   : > { %8752 = vmatpush3.bf16.msra.mxu1 %v3208_v30 }
 0x7dc   : > { %8764 = vmatpush3.bf16.msra.mxu0 %v3210_v11  ;;  %8777 = vmatprep.subr.bf16.mxu1 %v12581_v0 }
 0x7dd   : > { %8765 = vmatprep.subr.bf16.mxu0 %v3211_v25 }
 0x7e0   : > { %8766 = vmatpush3.bf16.msra.mxu0 %v3211_v25 }
 0x7e2   : > { %v4526_v5 = vpop.xlane.xlu0 %4525 }
 0x7e6   : > { %v4496_v37 = vpop.xlane.xlu0 %4495 }
 0x7e7   : > { %10251 = vrcp.f32 %v4496_v37 }
 0x7ea   : > { %v4499_v59 = vpop.xlane.xlu0 %4498  ;;  %v4520_v43 = vpop.xlane.xlu1 %4519 }
 0x7eb   : > { %10253 = vrcp.f32 %v4499_v59 }
 0x7ec   : > { %10255 = vrcp.f32 %v4520_v43 }
 0x7ed   : > { %10257 = vrcp.f32 %v4502_v13 }
 0x7ee   : > { %v4523_v14 = vpop.xlane.xlu0 %4522  ;;  %v4505_v17 = vpop.xlane.xlu1 %4504 }
 0x7ef   : > { %10259 = vrcp.f32 %v4523_v14 }
 0x7f0   : > { %10261 = vrcp.f32 %v4505_v17 }
 0x7f1   : > { %10263 = vrcp.f32 %v4526_v5  ;;  %v10252_v49 = vpop.eup %10251 }
 0x7f2   : > { %v4529_v47 = vpop.xlane.xlu1 %4528  ;;  %v4694_v44 = vmul.f32 %v10252_v49, %v12321_v12 }
 0x7f3   : > { %10265 = vrcp.f32 %v4529_v47 }
 0x7f5   : > { %v10254_v62 = vpop.eup %10253 }
 0x7f6   : > { %v4695_v9 = vmul.f32 %v10254_v62, %v13814_v54  ;;  %v10256_v31 = vpop.eup %10255 }
 0x7f7   : > { %v10258_v1 = vpop.eup %10257  ;;  %v4702_v51 = vmul.f32 %v10256_v31, %v13815_v19 }
 0x7f8   : > { %v4744_v46 = vpack.c.bf16 %v4695_v9, %v4694_v44  ;;  %v4696_v56 = vmul.f32 %v10258_v1, %v13817_v41  ;;  %v13821_v44 = vld [vmem:[#allocation46_spill] sm:$0xff] }
 0x7f9   : > { %v10260_v22 = vpop.eup %10259 }
 0x7fa   : > { %v10262_v7 = vpop.eup %10261  ;;  %8725 = vmatprep.mubr.msk.bf16.mxu1 %vm575_vm0, %v4744_v46  ;;  %v4703_v63 = vmul.f32 %v10260_v22, %v13816_v40  ;;  %v13822_v22 = vld [vmem:[#allocation47_spill] sm:$0xff] }
 0x7fb   : > { %v10264_v58 = vpop.eup %10263  ;;  %v4697_v10 = vmul.f32 %v10262_v7, %v13818_v2  ;;  %v9523_v7 = vunpack.i.l.bf16 %v13822_v22 }
 0x7fc   : > { %v4748_v28 = vpack.c.bf16 %v4703_v63, %v4702_v51  ;;  %v4704_v50 = vmul.f32 %v10264_v58, %v13819_v48 }
 0x7fd   : > { %v10266_v12 = vpop.eup %10265  ;;  %v4745_v29 = vpack.c.bf16 %v4697_v10, %v4696_v56 }
 0x7fe   : > { %8741 = vmatprep.mubr.msk.bf16.mxu0 %vm575_vm0, %v4748_v28  ;;  %v4538_v18 = vpop.xlane.xlu1 %4537  ;;  %v4705_v45 = vmul.f32 %v10266_v12, %v13820_v53 }
 0x7ff   : > { %8726 = vmatmul.mubr.msk.bf16.gmra.mrb[92].mxu1 %vm575_vm0, %v4745_v29 }
 0x800   : > { %v4749_v15 = vpack.c.bf16 %v4705_v45, %v4704_v50  ;;  %v4541_v42 = vpop.xlane.xlu0 %4540 }
 0x802   : > { %8742 = vmatmul.mubr.msk.bf16.gmra.mrb[104].mxu0 %vm575_vm0, %v4749_v15  ;;  %v12596_v6 = vpop.xlane.xlu1 %4561 }
 0x806   : > { %v4532_v35 = vpop.xlane.xlu1 %4531 }
 0x80a   : > { %v4556_v20 = vpop.xlane.xlu1 %4555 }
 0x80b   : > { %10267 = vrcp.f32 %v4556_v20 }
 0x80c   : > { %v4559_v4 = vpop.xlane.xlu0 %4558 }
 0x80d   : > { %10269 = vrcp.f32 %v4559_v4 }
 0x80e   : > { %v12598_v8 = vpop.xlane.xlu1 %4564  ;;  %10271 = vrcp.f32 %v4541_v42 }
 0x80f   : > { %10273 = vrcp.f32 %v4532_v35 }
 0x810   : > { %10275 = vrcp.f32 %v4538_v18 }
 0x812   : > { %v4535_v30 = vpop.xlane.xlu1 %4534 }
 0x813   : > { %10277 = vrcp.f32 %v4535_v30 }
 0x815   : > { %v10268_v33 = vpop.eup %10267 }
 0x816   : > { %v4550_v3 = vpop.xlane.xlu1 %4549  ;;  %v4714_v11 = vmul.f32 %v10268_v33, %v12395_v39  ;;  %v9514_v39 = vunpack.i.h.bf16 %v13821_v44 }
 0x817   : > { %v10270_v57 = vpop.eup %10269 }
 0x818   : > { %v4715_v25 = vmul.f32 %v10270_v57, %v12402_v38  ;;  %v10272_v13 = vpop.eup %10271  ;;  %v9513_v38 = vunpack.i.l.bf16 %v13821_v44 }
 0x819   : > { %v10274_v59 = vpop.eup %10273  ;;  %v4709_v17 = vmul.f32 %v10272_v13, %v12378_v27  ;;  %v9524_v27 = vunpack.i.h.bf16 %v13822_v22 }
 0x81a   : > { %v12602_v5 = vpop.xlane.xlu1 %4573  ;;  %v4754_v37 = vpack.c.bf16 %v4715_v25, %v4714_v11  ;;  %v10276_v43 = vpop.eup %10275  ;;  %v4706_v49 = vmul.f32 %v10274_v59, %v12390_v55  ;;  %v3214_v55 = vpack.c.bf16 %v9514_v39, %v9513_v38 }
 0x81b   : > { %v4708_v54 = vmul.f32 %v10276_v43, %v12370_v32  ;;  %v12611_v1 = vpop.xlane.xlu0 %4567  ;;  %v3215_v32 = vpack.c.bf16 %v9524_v27, %v9523_v7  ;;  %v13827_v7 = vld [vmem:[#allocation54_spill] sm:$0xff] }
 0x81c   : > { %8769 = vmatprep.mubr.msk.bf16.mxu0 %vm575_vm0, %v4754_v37 }
 0x81d   : > { %v10278_v14 = vpop.eup %10277  ;;  %v4751_v31 = vpack.c.bf16 %v4709_v17, %v4708_v54 }
 0x81e   : > { %v4544_v47 = vpop.xlane.xlu1 %4543  ;;  %v4707_v62 = vmul.f32 %v10278_v14, %v12410_v61  ;;  %v13824_v14 = vld [vmem:[#allocation27_spill] sm:$0xff] }
 0x820   : > { %v4750_v9 = vpack.c.bf16 %v4707_v62, %v4706_v49 }
 0x822   : > { %8753 = vmatprep.mubr.msk.bf16.mxu1 %vm575_vm0, %v4750_v9  ;;  %v4553_v46 = vpop.xlane.xlu1 %4552 }
 0x823   : > { %8754 = vmatmul.mubr.msk.bf16.vlgmr.msra.gmra.mrb[96].mxu1 %vm575_vm0, %v4751_v31  ;;  %10279 = vrcp.f32 %v4553_v46 }
 0x824   : > { %8778 = vmatpush3.bf16.msra.mxu1 %v12581_v0  ;;  %10281 = vrcp.f32 %v4544_v47  ;;  %v13823_v0 = vmov 0.0|0.0   ;;  %v13825_v47 = vld [vmem:[#allocation28_spill] sm:$0xff] }
 0x825   : > { %8779 = vmatprep.subr.bf16.mxu1 %v3214_v55  ;;  %10283 = vrcp.f32 %v4550_v3 }
 0x826   : > { %v4598_v61 = vpop.xlane.xlu0 %4597  ;;  %v12618_v19 = vpop.xlane.xlu1 %4576 }
 0x828   : > { %8780 = vmatpush3.bf16.msra.mxu1 %v3214_v55 }
 0x829   : > { %8781 = vmatprep.subr.bf16.mxu1 %v3215_v32 }
 0x82a   : > { %v9532_v51 = vpop.permute.xlu0 %9531  ;;  %v4547_v40 = vpop.xlane.xlu1 %4546 }
 0x82b   : > { %v9534_v63 = vunpack.i.h.bf16 %v9532_v51  ;;  %v9533_v58 = vunpack.i.l.bf16 %v9532_v51  ;;  %10285 = vrcp.f32 %v4547_v40 }
 0x82c   : > { %8782 = vmatpush3.bf16.msra.mxu1 %v3215_v32 }
 0x82d   : > { %v3216_v41 = vpack.c.bf16 %v9534_v63, %v9533_v58  ;;  %v10280_v2 = vpop.eup %10279 }
 0x82e   : > { %v4571_v56 = vpop.xlane.xlu1 %4570  ;;  %v10282_v28 = vpop.eup %10281  ;;  %v4713_v18 = vmul.f32 %v10280_v2, %v12441_v24 }
 0x82f   : > { %8783 = vmatprep.subr.bf16.mxu1 %v3216_v41  ;;  %v10284_v12 = vpop.eup %10283  ;;  %v4710_v50 = vmul.f32 %v10282_v28, %v12434_v26 }
 0x830   : > { %8784 = vmatpush3.bf16.msra.mxu1 %v3216_v41  ;;  %v4712_v45 = vmul.f32 %v10284_v12, %v12415_v16  ;;  %v13830_v12 = vld [vmem:[#allocation33_spill] sm:$0xff] }
 0x831   : > { %8858 = vmatprep.subr.bf16.mxu1 %v13823_v0 }
 0x832   : > { %v4586_v10 = vpop.xlane.xlu1 %4585  ;;  %v4753_v35 = vpack.c.bf16 %v4713_v18, %v4712_v45 }
 0x835   : > { %v10286_v29 = vpop.eup %10285 }
 0x836   : > { %v4580_v48 = vpop.xlane.xlu1 %4579  ;;  %v4711_v53 = vmul.f32 %v10286_v29, %v12456_v52 }
 0x838   : > { %v4752_v15 = vpack.c.bf16 %v4711_v53, %v4710_v50  ;;  %v13831_v53 = vld [vmem:[#allocation52_spill] sm:$0xff] }
 0x83a   : > { %v12625_v42 = vpop.f32.mrb[72].mxu1  ;;  %8757 = vmatprep.mubr.msk.bf16.mxu1 %vm575_vm0, %v4752_v15  ;;  %v4589_v20 = vpop.xlane.xlu1 %4588 }
 0x83b   : > { %v12628_v4 = vpop.f32.mrb[73].mxu1  ;;  %8758 = vmatmul.mubr.msk.bf16.gmra.mrb[100].mxu1 %vm575_vm0, %v4753_v35  ;;  %10287 = vrcp.f32 %v4589_v20 }
 0x83c   : > { %v12631_v24 = vpop.f32.mrb[74].mxu1  ;;  %10289 = vrcp.f32 %v4580_v48 }
 0x83d   : > { %v12633_v26 = vpop.f32.mrb[75].mxu1  ;;  %10291 = vrcp.f32 %v4586_v10 }
 0x83e   : > { %v4583_v52 = vpop.xlane.xlu1 %4582 }
 0x83f   : > { %10293 = vrcp.f32 %v4583_v52 }
 0x840   : > { %10295 = vrcp.f32 %v12598_v8 }
 0x841   : > { %10297 = vrcp.f32 %v4571_v56 }
 0x842   : > { %v12635_v16 = vpop.f32.mrb[76].mxu1  ;;  %10299 = vrcp.f32 %v12596_v6 }
 0x843   : > { %v4592_v30 = vpop.xlane.xlu1 %4591  ;;  %v12637_v33 = vpop.f32.mrb[77].mxu1  ;;  %10301 = vrcp.f32 %v12611_v1  ;;  %v13826_v1 = vld [vmem:[#allocation24_spill] sm:$0xff] }
 0x844   : > { %v12639_v3 = vpop.f32.mrb[78].mxu1 }
 0x845   : > { %v12642_v57 = vpop.f32.mrb[79].mxu1  ;;  %v10288_v11 = vpop.eup %10287 }
 0x846   : > { %v10290_v25 = vpop.eup %10289  ;;  %v4725_v43 = vmul.f32 %v10288_v11, %v12470_v60 }
 0x847   : > { %v4601_v13 = vpop.xlane.xlu1 %4600  ;;  %v10292_v37 = vpop.eup %10291  ;;  %v4722_v17 = vmul.f32 %v10290_v25, %v13824_v14 }
 0x848   : > { %10303 = vrcp.f32 %v4601_v13  ;;  %v4724_v49 = vmul.f32 %v10292_v37, %v13825_v47 }
 0x849   : > { %v10294_v59 = vpop.eup %10293  ;;  %10305 = vrcp.f32 %v4592_v30 }
 0x84a   : > { %v4723_v8 = vmul.f32 %v10294_v59, %v12478_v34  ;;  %10307 = vrcp.f32 %v4598_v61  ;;  %v4759_v6 = vpack.c.bf16 %v4725_v43, %v4724_v49  ;;  %v10296_v39 = vpop.eup %10295 }
 0x84b   : > { %v4595_v62 = vpop.xlane.xlu1 %4594  ;;  %v10298_v38 = vpop.eup %10297  ;;  %v4717_v46 = vmul.f32 %v10296_v39, %v13826_v1 }
 0x84c   : > { %10309 = vrcp.f32 %v4595_v62  ;;  %v4758_v44 = vpack.c.bf16 %v4723_v8, %v4722_v17  ;;  %v10300_v9 = vpop.eup %10299  ;;  %v4719_v55 = vmul.f32 %v10298_v38, %v13827_v7 }
 0x84d   : > { %10311 = vrcp.f32 %v12618_v19  ;;  %v10302_v31 = vpop.eup %10301  ;;  %v13828_v19 = vld [vmem:[#allocation53_spill] sm:$0xff] }
 0x84e   : > { %8785 = vmatprep.mubr.msk.bf16.mxu1 %vm575_vm0, %v4758_v44  ;;  %10313 = vrcp.f32 %v12602_v5  ;;  %v4716_v32 = vmul.f32 %v10300_v9, %v13828_v19  ;;  %v13829_v5 = vld [vmem:[#allocation59_spill] sm:$0xff] }
 0x84f   : > { %v9527_v60 = vpop.permute.xlu1 %9526  ;;  %8786 = vmatmul.mubr.msk.bf16.vlgmr.msra.gmra.mrb[104].mxu1 %vm575_vm0, %v4759_v6  ;;  %v4718_v40 = vmul.f32 %v10302_v31, %v13829_v5 }
 0x850   : > { %v9529_v54 = vunpack.i.h.bf16 %v9527_v60  ;;  %v9528_v34 = vunpack.i.l.bf16 %v9527_v60  ;;  %v4755_v58 = vpack.c.bf16 %v4717_v46, %v4716_v32 }
 0x851   : > { %v4756_v2 = vpack.c.bf16 %v4719_v55, %v4718_v40 }
 0x852   : > { %v3212_v22 = vpack.c.bf16 %v9529_v54, %v9528_v34  ;;  %v10304_v27 = vpop.eup %10303 }
 0x853   : > { %v10306_v61 = vpop.eup %10305  ;;  %v4729_v41 = vmul.f32 %v10304_v27, %v12522_v21  ;;  %v13832_v21 = vld [vmem:[#allocation56_spill] sm:$0xff] }
 0x854   : > { %8767 = vmatprep.subr.bf16.mxu0 %v3212_v22  ;;  %v10308_v51 = vpop.eup %10307  ;;  %v4726_v10 = vmul.f32 %v10306_v61, %v12511_v36  ;;  %v13833_v36 = vmov 0.0  }
 0x855   : > { %8768 = vmatpush3.bf16.msra.mxu0 %v3212_v22  ;;  %v4728_v29 = vmul.f32 %v10308_v51, %v13830_v12 }
 0x856   : > { %v10310_v63 = vpop.eup %10309 }
 0x857   : > { %v10312_v56 = vpop.eup %10311  ;;  %v4727_v28 = vmul.f32 %v10310_v63, %v12527_v23  ;;  %v4761_v50 = vpack.c.bf16 %v4729_v41, %v4728_v29 }
 0x858   : > { %8770 = vmatmul.mubr.msk.bf16.vlgmr.msra.gmra.mrb[108].mxu0 %vm575_vm0, %v4755_v58  ;;  %v10314_v18 = vpop.eup %10313  ;;  %v4721_v45 = vmul.f32 %v10312_v56, %v13831_v53  ;;  %v9920_v53 = vld [vmem:[%s13593_s10 + $0x8] sm:$0xff]  }
 0x859   : > { %8773 = vmatprep.mubr.msk.bf16.mxu0 %vm575_vm0, %v4756_v2  ;;  %v4760_v48 = vpack.c.bf16 %v4727_v28, %v4726_v10  ;;  %v4720_v15 = vmul.f32 %v10314_v18, %v13832_v21 }
 0x85b   : > { %8789 = vmatprep.mubr.msk.bf16.mxu1 %vm575_vm0, %v4760_v48  ;;  %v4757_v23 = vpack.c.bf16 %v4721_v45, %v4720_v15 }
 0x85c   : > { %8790 = vmatmul.mubr.msk.bf16.gmra.mrb[108].mxu1 %vm575_vm0, %v4761_v50  ;;  %v9919_v50 = vld [vmem:[%s13593_s10] sm:$0xff]  }
 0x85d   : > { %8817 = vmatprep.mubr.msk.f32.mxu1 %vm10455_vm2, %v13833_v36  ;;  %8793 = vmatprep.subr.bf16.mxu0 %v9919_v50 }
 0x85e   : > { %8794 = vmatpush3.bf16.msra.mxu0 %v9919_v50 }
 0x85f   : > { %8795 = vmatprep.subr.bf16.mxu0 %v9920_v53 }
 0x860   : > { %8774 = vmatmul.mubr.msk.bf16.gmra.mrb[112].mxu0 %vm575_vm0, %v4757_v23 }
 0x862   : > { %8796 = vmatpush3.bf16.msra.mxu0 %v9920_v53 }
 0x882   : > { %v8691_v35 = vpop.f32.mrb[80].mxu1 }
 0x883   : > { %v4885_v20 = vpop.f32.mrb[81].mxu1 }
 0x884   : > { %v8692_v52 = vpop.f32.mrb[82].mxu1 }
 0x885   : > { %v9535_v30 = vpack.i.bf16 %v8692_v52, %v8691_v35  ;;  %v4888_v11 = vpop.f32.mrb[83].mxu1 }
 0x886   : > { %v9545_v25 = vpack.i.bf16 %v4888_v11, %v4885_v20  ;;  %v8707_v13 = vpop.f32.mrb[92].mxu0 }
 0x887   : > { %9536 = vrot.lane.b32.xlu1 %v9535_v30, %s10465_s30  ;;  %v4962_v37 = vpop.f32.mrb[93].mxu0 }
 0x888   : > { %v8708_v59 = vpop.f32.mrb[94].mxu0 }
 0x889   : > { %v9540_v43 = vpack.i.bf16 %v8708_v59, %v8707_v13  ;;  %v4965_v14 = vpop.f32.mrb[95].mxu0 }
 0x88a   : > { %v9550_v17 = vpack.i.bf16 %v4965_v14, %v4962_v37 }
 0x88b   : > { %9541 = vrot.lane.b32.xlu1 %v9540_v43, %s10466_s23 }
 0x88f   : > { %9546 = vrot.lane.b32.xlu1 %v9545_v25, %s10465_s30 }
 0x893   : > { %9551 = vrot.lane.b32.xlu1 %v9550_v17, %s10466_s23 }
 0x896   : > { %v8695_v8 = vpop.f32.mrb[84].mxu1 }
 0x897   : > { %v4901_v47 = vpop.f32.mrb[85].mxu1 }
 0x898   : > { %v8696_v49 = vpop.f32.mrb[86].mxu1 }
 0x899   : > { %v9555_v62 = vpack.i.bf16 %v8696_v49, %v8695_v8  ;;  %v4904_v44 = vpop.f32.mrb[87].mxu1 }
 0x89a   : > { %v9565_v6 = vpack.i.bf16 %v4904_v44, %v4901_v47  ;;  %v8711_v39 = vpop.f32.mrb[96].mxu0  ;;  %v9921_v47 = vld [vmem:[%s13593_s10 + $0x10] sm:$0xff]  }
 0x89b   : > { %9556 = vrot.lane.b32.xlu1 %v9555_v62, %s10465_s30  ;;  %v4978_v60 = vpop.f32.mrb[97].mxu0  ;;  %8797 = vmatprep.subr.bf16.mxu0 %v9921_v47  ;;  %v9922_v62 = vld [vmem:[%s13593_s10 + $0x18] sm:$0xff]  }
 0x89c   : > { %9566 = vrot.lane.b32.xlu0 %v9565_v6, %s10465_s30  ;;  %v8712_v38 = vpop.f32.mrb[98].mxu0  ;;  %8798 = vmatpush3.bf16.msra.mxu0 %v9921_v47 }
 0x89d   : > { %v9560_v54 = vpack.i.bf16 %v8712_v38, %v8711_v39  ;;  %v4981_v34 = vpop.f32.mrb[99].mxu0  ;;  %8799 = vmatprep.subr.bf16.mxu0 %v9922_v62 }
 0x89e   : > { %v9570_v9 = vpack.i.bf16 %v4981_v34, %v4978_v60 }
 0x89f   : > { %9561 = vrot.lane.b32.xlu1 %v9560_v54, %s10466_s23 }
 0x8a0   : > { %9571 = vrot.lane.b32.xlu0 %v9570_v9, %s10466_s23  ;;  %8800 = vmatpush3.bf16.msra.mxu0 %v9922_v62 }
 0x8a1   : > { %v8723_v31 = vpop.f32.mrb[88].mxu1 }
 0x8a2   : > { %v5039_v1 = vpop.f32.mrb[89].mxu1 }
 0x8a3   : > { %v8724_v46 = vpop.f32.mrb[90].mxu1 }
 0x8a4   : > { %v9575_v22 = vpack.i.bf16 %v8724_v46, %v8723_v31  ;;  %v5042_v27 = vpop.f32.mrb[91].mxu1 }
 0x8a5   : > { %v9585_v7 = vpack.i.bf16 %v5042_v27, %v5039_v1 }
 0x8a6   : > { %9576 = vrot.lane.b32.xlu1 %v9575_v22, %s10467_s24 }
 0x8aa   : > { %v8739_v55 = vpop.f32.mrb[100].mxu0 }
 0x8ab   : > { %v5116_v61 = vpop.f32.mrb[101].mxu0 }
 0x8ac   : > { %v8740_v19 = vpop.f32.mrb[102].mxu0 }
 0x8ad   : > { %v9580_v32 = vpack.i.bf16 %v8740_v19, %v8739_v55  ;;  %v5119_v51 = vpop.f32.mrb[103].mxu0 }
 0x8ae   : > { %v9590_v5 = vpack.i.bf16 %v5119_v51, %v5116_v61 }
 0x8af   : > { %9581 = vrot.lane.b32.xlu1 %v9580_v32, %s10468_s25 }
 0x8b0   : > { %9591 = vrot.lane.b32.xlu0 %v9590_v5, %s10468_s25 }
 0x8b3   : > { %9586 = vrot.lane.b32.xlu1 %v9585_v7, %s10467_s24 }
 0x8d2   : > { %v8727_v40 = vpop.f32.mrb[92].mxu1 }
 0x8d3   : > { %v5055_v63 = vpop.f32.mrb[93].mxu1 }
 0x8d4   : > { %v8728_v58 = vpop.f32.mrb[94].mxu1 }
 0x8d5   : > { %v9595_v41 = vpack.i.bf16 %v8728_v58, %v8727_v40  ;;  %v5058_v56 = vpop.f32.mrb[95].mxu1  ;;  %v12677_v2 = vpop.f32.mrb[104].mxu0 }
 0x8d6   : > { %v9600_v10 = vpack.i.bf16 %v5058_v56, %v5055_v63  ;;  %v12679_v28 = vpop.f32.mrb[105].mxu0 }
 0x8d7   : > { %9596 = vrot.lane.b32.xlu1 %v9595_v41, %s10467_s24  ;;  %v8744_v12 = vpop.f32.mrb[106].mxu0 }
 0x8d8   : > { %9601 = vrot.lane.b32.xlu0 %v9600_v10, %s10467_s24  ;;  %v9640_v29 = vpack.i.bf16 %v8744_v12, %v12677_v2  ;;  %v5135_v18 = vpop.f32.mrb[107].mxu0  ;;  %s10470_s24 = smov 48  }
 0x8d9   : > { %v9635_v48 = vpack.i.bf16 %v5135_v18, %v12679_v28 }
 0x8f6   : > { %v8755_v45 = vpop.f32.mrb[96].mxu1 }
 0x8f7   : > { %v5193_v21 = vpop.f32.mrb[97].mxu1 }
 0x8f8   : > { %v8756_v15 = vpop.f32.mrb[98].mxu1 }
 0x8f9   : > { %v9605_v36 = vpack.i.bf16 %v8756_v15, %v8755_v45  ;;  %v5196_v23 = vpop.f32.mrb[99].mxu1  ;;  %v9537_v32 = vpop.permute.xlu1 %9536 }
 0x8fa   : > { %v9615_v35 = vpack.i.bf16 %v5196_v23, %v5193_v21  ;;  %v9538_v18 = vunpack.i.l.bf16 %v9537_v32 }
 0x8fb   : > { %9606 = vrot.lane.b32.xlu1 %v9605_v36, %s10469_s1 }
 0x8fc   : > { %9616 = vrot.lane.b32.xlu0 %v9615_v35, %s10469_s1 }
 0x8fd   : > { %v9542_v51 = vpop.permute.xlu1 %9541 }
 0x8fe   : > { %v9543_v50 = vunpack.i.l.bf16 %v9542_v51  ;;  %v9544_v21 = vunpack.i.h.bf16 %v9542_v51 }
 0x901   : > { %v9547_v5 = vpop.permute.xlu1 %9546 }
 0x902   : > { %v9548_v53 = vunpack.i.l.bf16 %v9547_v5  ;;  %v9549_v15 = vunpack.i.h.bf16 %v9547_v5 }
 0x905   : > { %v9552_v40 = vpop.permute.xlu1 %9551 }
 0x906   : > { %v9553_v36 = vunpack.i.l.bf16 %v9552_v40  ;;  %v9554_v23 = vunpack.i.h.bf16 %v9552_v40 }
 0x90d   : > { %v12701_v63 = vpop.permute.xlu1 %9556 }
 0x90e   : > { %v8759_v20 = vpop.f32.mrb[100].mxu1  ;;  %v12705_v56 = vpop.permute.xlu0 %9566  ;;  %v9559_v47 = vunpack.i.h.bf16 %v12701_v63 }
 0x90f   : > { %v5209_v52 = vpop.f32.mrb[101].mxu1 }
 0x910   : > { %v8760_v30 = vpop.f32.mrb[102].mxu1 }
 0x911   : > { %v9650_v11 = vpack.i.bf16 %v8760_v30, %v8759_v20  ;;  %v5212_v25 = vpop.f32.mrb[103].mxu1  ;;  %v12703_v58 = vpop.permute.xlu1 %9561 }
 0x912   : > { %v9645_v13 = vpack.i.bf16 %v5212_v25, %v5209_v52  ;;  %v12707_v10 = vpop.permute.xlu0 %9571  ;;  %v5604_v52 = vsel %vm3229_vm4, %v12625_v42, %v9538_v18 }
 0x913   : > { %v5613_v25 = vsel %vm5610_vm5, %v5604_v52, %v9543_v50 }
 0x918   : > { %v9577_v41 = vpop.permute.xlu1 %9576 }
 0x919   : > { %v9578_v35 = vunpack.i.l.bf16 %v9577_v41  ;;  %v9579_v30 = vunpack.i.h.bf16 %v9577_v41 }
 0x921   : > { %v9582_v2 = vpop.permute.xlu1 %9581 }
 0x922   : > { %v8787_v37 = vpop.f32.mrb[104].mxu1  ;;  %v9592_v12 = vpop.permute.xlu0 %9591  ;;  %v9584_v62 = vunpack.i.h.bf16 %v9582_v2 }
 0x923   : > { %v5347_v59 = vpop.f32.mrb[105].mxu1 }
 0x924   : > { %v8788_v43 = vpop.f32.mrb[106].mxu1 }
 0x925   : > { %v9625_v14 = vpack.i.bf16 %v8788_v43, %v8787_v37  ;;  %v5350_v17 = vpop.f32.mrb[107].mxu1  ;;  %v9587_v28 = vpop.permute.xlu1 %9586 }
 0x926   : > { %v9630_v8 = vpack.i.bf16 %v5350_v17, %v5347_v59  ;;  %v9589_v37 = vunpack.i.h.bf16 %v9587_v28  ;;  %v9588_v59 = vunpack.i.l.bf16 %v9587_v28  ;;  %v5603_v17 = vsel %vm3229_vm4, %v12633_v26, %v9549_v15 }
 0x927   : > { %v5612_v42 = vsel %vm5610_vm5, %v5603_v17, %v9554_v23  ;;  %v9574_v17 = vunpack.i.h.bf16 %v12707_v10 }
 0x928   : > { %v5621_v26 = vsel %vm5619_vm6, %v5612_v42, %v9589_v37 }
 0x92b   : > { %v8771_v49 = vpop.f32.mrb[108].mxu0 }
 0x92c   : > { %v5270_v44 = vpop.f32.mrb[109].mxu0 }
 0x92d   : > { %v8772_v6 = vpop.f32.mrb[110].mxu0 }
 0x92e   : > { %v9610_v39 = vpack.i.bf16 %v8772_v6, %v8771_v49  ;;  %v5273_v60 = vpop.f32.mrb[111].mxu0  ;;  %v5622_v49 = vsel %vm5619_vm6, %v5613_v25, %v9578_v35  ;;  %v9558_v35 = vunpack.i.l.bf16 %v12701_v63  ;;  %v9569_v25 = vunpack.i.h.bf16 %v12705_v56 }
 0x92f   : > { %v9620_v38 = vpack.i.bf16 %v5273_v60, %v5270_v44  ;;  %v8791_v54 = vpop.f32.mrb[108].mxu1  ;;  %v9594_v44 = vunpack.i.h.bf16 %v9592_v12  ;;  %v9573_v63 = vunpack.i.l.bf16 %v12707_v10 }
 0x930   : > { %v5363_v34 = vpop.f32.mrb[109].mxu1  ;;  %9611 = vrot.lane.b32.xlu1 %v9610_v39, %s10470_s24 }
 0x931   : > { %v8792_v9 = vpop.f32.mrb[110].mxu1  ;;  %9621 = vrot.lane.b32.xlu0 %v9620_v38, %s10470_s24  ;;  %v5629_v51 = vsel %vm612_vm3, %v5621_v26, %v9594_v44 }
 0x932   : > { %v9670_v31 = vpack.i.bf16 %v8792_v9, %v8791_v54  ;;  %v5366_v1 = vpop.f32.mrb[111].mxu1 }
 0x933   : > { %v9665_v46 = vpack.i.bf16 %v5366_v1, %v5363_v34  ;;  %v8775_v22 = vpop.f32.mrb[112].mxu0  ;;  %v9593_v1 = vunpack.i.l.bf16 %v9592_v12 }
 0x934   : > { %9626 = vrot.lane.b32.xlu1 %v9625_v14, %s10471_s19  ;;  %v5286_v27 = vpop.f32.mrb[113].mxu0 }
 0x935   : > { %9631 = vrot.lane.b32.xlu0 %v9630_v8, %s10471_s19  ;;  %v8776_v7 = vpop.f32.mrb[114].mxu0  ;;  %v9583_v8 = vunpack.i.l.bf16 %v9582_v2 }
 0x936   : > { %v9660_v55 = vpack.i.bf16 %v8776_v7, %v8775_v22  ;;  %v5289_v61 = vpop.f32.mrb[115].mxu0 }
 0x937   : > { %v9655_v19 = vpack.i.bf16 %v5289_v61, %v5286_v27 }
 0x938   : > { %9641 = vrot.lane.b32.xlu1 %v9640_v29, %s10468_s25  ;;  %v9539_v29 = vunpack.i.h.bf16 %v9537_v32 }
 0x939   : > { %9636 = vrot.lane.b32.xlu0 %v9635_v48, %s10468_s25  ;;  %s13844_s25 = sld [smem:[#allocation77_spill]] }
 0x93a   : > { %v5605_v20 = vsel %vm3229_vm4, %v12631_v24, %v9539_v29 }
 0x93b   : > { %v5614_v14 = vsel %vm5610_vm5, %v5605_v20, %v9544_v21 }
 0x93c   : > { %9651 = vrot.lane.b32.xlu1 %v9650_v11, %s10469_s1 }
 0x93d   : > { %9646 = vrot.lane.b32.xlu0 %v9645_v13, %s10469_s1  ;;  %v5602_v13 = vsel %vm3229_vm4, %v12628_v4, %v9548_v53  ;;  %v5623_v4 = vsel %vm5619_vm6, %v5614_v14, %v9579_v30  ;;  %v9563_v14 = vunpack.i.l.bf16 %v12703_v58  ;;  %s566_s1 = sand.u32 1, %s10443_s28  }
 0x93e   : > { %v5611_v24 = vsel %vm5610_vm5, %v5602_v13, %v9553_v36  ;;  %v5631_v27 = vsel %vm612_vm3, %v5623_v4, %v9584_v62  ;;  %v9568_v13 = vunpack.i.l.bf16 %v12705_v56  ;;  %v5607_v56 = vsel %vm3229_vm4, %v12642_v57, %v9569_v25  ;;  %s7703_s22 = sshll.u32 %s566_s1, 6  ;;  %s13541_s0 = scalar_lea.sflag [#allocation5], %s566_s1 }
 0x93f   : > { %v5620_v38 = vsel %vm5619_vm6, %v5611_v24, %v9588_v59  ;;  %v5609_v24 = vsel %vm3229_vm4, %v12639_v3, %v9559_v47  ;;  %v5616_v44 = vsel %vm5610_vm5, %v5607_v56, %v9574_v17  ;;  %v9923_v17 = vld [vmem:[%s13595_s12 + $0x40] sm:$0xff]   ;;  %s13505_s6 = scalar_lea.vmem [#allocation4], %s7703_s22  ;;  %s13528_s2 = scalar_lea.hbm %s13844_s25, %s7995_s18 }
 0x940   : > { %9661 = vrot.lane.b32.xlu1 %v9660_v55, %s10470_s24  ;;  %v5628_v32 = vsel %vm612_vm3, %v5620_v38, %v9593_v1  ;;  %8318 = vmatprep.subr.bf16.mxu0 %v9923_v17  ;;  %v10388_v56 = vld [vmem:[%s10680_s26] sm:$0x1]  ;;  %s10395_s22 = scalar_lea.vmem %s10394_s29, 2048 }
 0x941   : > { %9656 = vrot.lane.b32.xlu0 %v9655_v19, %s10470_s24 }
 0x944   : > { %9671 = vrot.lane.b32.xlu1 %v9670_v31, %s10471_s19  ;;  %v5630_v31 = vsel %vm612_vm3, %v5622_v49, %v9583_v8  ;;  %v5608_v8 = vsel %vm3229_vm4, %v12635_v16, %v9558_v35 }
 0x945   : > { %9666 = vrot.lane.b32.xlu0 %v9665_v46, %s10471_s19  ;;  %v5617_v4 = vsel %vm5610_vm5, %v5608_v8, %v9563_v14  ;;  %v5794_v14 = vld [vmem:[%s13599_s16 + $0x18] sm:$0xff]  ;;  %v9926_v8 = vld [vmem:[%s13595_s12 + $0x8] sm:$0xff]  }
 0x949   : > { %v12709_v48 = vpop.permute.xlu1 %9596 }
 0x94a   : > { %v12711_v45 = vpop.permute.xlu0 %9601  ;;  %v9599_v49 = vunpack.i.h.bf16 %v12709_v48  ;;  %v9598_v10 = vunpack.i.l.bf16 %v12709_v48 }
 0x94b   : > { %v9604_v16 = vunpack.i.h.bf16 %v12711_v45  ;;  %v9603_v47 = vunpack.i.l.bf16 %v12711_v45 }
 0x94d   : > { %v5625_v45 = vsel %vm5619_vm6, %v5616_v44, %v9604_v16 }
 0x96d   : > { %v9607_v11 = vpop.permute.xlu1 %9606 }
 0x96e   : > { %v9617_v43 = vpop.permute.xlu0 %9616  ;;  %v9609_v6 = vunpack.i.h.bf16 %v9607_v11  ;;  %v9608_v39 = vunpack.i.l.bf16 %v9607_v11 }
 0x96f   : > { %v9619_v54 = vunpack.i.h.bf16 %v9617_v43  ;;  %v9618_v34 = vunpack.i.l.bf16 %v9617_v43  ;;  %v9564_v43 = vunpack.i.h.bf16 %v12703_v58  ;;  %v5606_v58 = vsel %vm3229_vm4, %v12637_v33, %v9568_v13  ;;  %v5791_v13 = vld [vmem:[%s13599_s16] sm:$0xff] }
 0x970   : > { %v5639_v61 = vsel %vm5636_vm7, %v5630_v31, %v9608_v39  ;;  %v5640_v19 = vsel %vm5636_vm7, %v5631_v27, %v9609_v6  ;;  %v5615_v57 = vsel %vm5610_vm5, %v5606_v58, %v9573_v63  ;;  %v9928_v58 = vld [vmem:[%s13595_s12 + $0x10] sm:$0xff]  }
 0x971   : > { %v5637_v40 = vsel %vm5636_vm7, %v5628_v32, %v9618_v34  ;;  %v5638_v41 = vsel %vm5636_vm7, %v5629_v51, %v9619_v54  ;;  %v5618_v3 = vsel %vm5610_vm5, %v5609_v24, %v9564_v43  ;;  %v5626_v54 = vsel %vm5619_vm6, %v5617_v4, %v9598_v10  ;;  %v5793_v43 = vld [vmem:[%s13599_s16 + $0x10] sm:$0xff]  ;;  %v9924_v24 = vld [vmem:[%s13595_s12] sm:$0xff]   ;;  %v9930_v10 = vld [vmem:[%s13595_s12 + $0x18] sm:$0xff]  }
 0x972   : > { %v5627_v34 = vsel %vm5619_vm6, %v5618_v3, %v9599_v49  ;;  %v8862_v63 = vpack.c.bf16 %v5794_v14, %v5793_v43  ;;  %v9929_v49 = vld [vmem:[%s13595_s12 + $0x58] sm:$0xff]   ;;  %v9933_v43 = vld [vmem:[%s13595_s12 + $0x68] sm:$0xff]  }
 0x9a2   : > { %v9612_v60 = vpop.permute.xlu1 %9611 }
 0x9a3   : > { %v9622_v9 = vpop.permute.xlu0 %9621  ;;  %v9614_v46 = vunpack.i.h.bf16 %v9612_v60  ;;  %v9613_v22 = vunpack.i.l.bf16 %v9612_v60 }
 0x9a4   : > { %v9624_v7 = vunpack.i.h.bf16 %v9622_v9  ;;  %v9623_v55 = vunpack.i.l.bf16 %v9622_v9 }
 0x9a5   : > { %v5649_v29 = vsel %vm5645_vm8, %v5640_v19, %v9614_v46  ;;  %v5648_v18 = vsel %vm5645_vm8, %v5639_v61, %v9613_v22  ;;  %v5624_v46 = vsel %vm5619_vm6, %v5615_v57, %v9603_v47  ;;  %v13834_v57 = vld [vmem:[#allocation18_spill] sm:$0xff] }
 0x9a6   : > { %v9627_v5 = vpop.permute.xlu1 %9626  ;;  %v5647_v21 = vsel %vm5645_vm8, %v5638_v41, %v9624_v7  ;;  %v5646_v15 = vsel %vm5645_vm8, %v5637_v40, %v9623_v55 }
 0x9a7   : > { %v9629_v2 = vunpack.i.h.bf16 %v9627_v5  ;;  %v9628_v28 = vunpack.i.l.bf16 %v9627_v5  ;;  %v9632_v12 = vpop.permute.xlu0 %9631 }
 0x9a8   : > { %v9634_v50 = vunpack.i.h.bf16 %v9632_v12  ;;  %v9633_v53 = vunpack.i.l.bf16 %v9632_v12 }
 0x9a9   : > { %v5657_v36 = vsel %vm5654_vm9, %v5648_v18, %v9628_v28  ;;  %v5658_v23 = vsel %vm5654_vm9, %v5649_v29, %v9629_v2 }
 0x9aa   : > { %v5664_v20 = vpack.c.bf16 %v5658_v23, %v5657_v36  ;;  %v5655_v52 = vsel %vm5654_vm9, %v5646_v15, %v9633_v53  ;;  %v5656_v30 = vsel %vm5654_vm9, %v5647_v21, %v9634_v50  ;;  %v9642_v11 = vpop.permute.xlu1 %9641 }
 0x9ab   : > { %v5663_v37 = vpack.c.bf16 %v5656_v30, %v5655_v52  ;;  %v9637_v59 = vpop.permute.xlu0 %9636  ;;  %v9644_v6 = vunpack.i.h.bf16 %v9642_v11  ;;  %v9643_v39 = vunpack.i.l.bf16 %v9642_v11 }
 0x9ac   : > { %v9639_v33 = vunpack.i.h.bf16 %v9637_v59  ;;  %v9638_v60 = vunpack.i.l.bf16 %v9637_v59 }
 0x9ad   : > { %8801 = vmatprep.mubr.msk.bf16.mxu0 %vm575_vm0, %v5663_v37  ;;  %v5635_v7 = vsel %vm612_vm3, %v5627_v34, %v9644_v6  ;;  %v5634_v55 = vsel %vm612_vm3, %v5626_v54, %v9643_v39  ;;  %v5792_v37 = vld [vmem:[%s13599_s16 + $0x8] sm:$0xff]  ;;  %v13836_v54 = vld [vmem:[#allocation17_spill] sm:$0xff] }
 0x9ae   : > { %v9652_v42 = vpop.permute.xlu1 %9651  ;;  %8802 = vmatmul.mubr.msk.bf16.vlgmr.msra.gmra.mrb[116].mxu0 %vm575_vm0, %v5664_v20  ;;  %v5633_v32 = vsel %vm612_vm3, %v5625_v45, %v9639_v33  ;;  %v5632_v51 = vsel %vm612_vm3, %v5624_v46, %v9638_v60  ;;  %v8859_v59 = vpack.c.bf16 %v5792_v37, %v5791_v13  ;;  %v13835_v60 = vld [vmem:[#allocation15_spill] sm:$0xff]  ;;  %v9931_v13 = vld [vmem:[%s13595_s12 + $0x60] sm:$0xff]  }
 0x9af   : > { %v9647_v62 = vpop.permute.xlu0 %9646  ;;  %v9654_v38 = vunpack.i.h.bf16 %v9652_v42  ;;  %v9653_v26 = vunpack.i.l.bf16 %v9652_v42  ;;  %8319 = vmatpush3.bf16.msra.mxu0 %v9924_v24  ;;  %v9927_v42 = vld [vmem:[%s13595_s12 + $0x50] sm:$0xff]   ;;  %v9932_v37 = vld [vmem:[%s13595_s12 + $0x20] sm:$0xff]  }
 0x9b0   : > { %v9649_v9 = vunpack.i.h.bf16 %v9647_v62  ;;  %v9648_v31 = vunpack.i.l.bf16 %v9647_v62  ;;  %8860 = vmatpush3.bf16.msra.mxu1 %v8859_v59  ;;  %v7881_v62 = vld [vmem:[%s13594_s11] ss:$0 sm:$0xff] }
 0x9b1   : > { %v5643_v5 = vsel %vm5636_vm7, %v5634_v55, %v9653_v26  ;;  %v5644_v40 = vsel %vm5636_vm7, %v5635_v7, %v9654_v38  ;;  %8861 = vmatprep.subr.bf16.mxu1 %v13823_v0  ;;  %v9925_v0 = vld [vmem:[%s13595_s12 + $0x48] sm:$0xff]  }
 0x9b2   : > { %v9662_v48 = vpop.permute.xlu1 %9661  ;;  %v5641_v2 = vsel %vm5636_vm7, %v5632_v51, %v9648_v31  ;;  %v5642_v28 = vsel %vm5636_vm7, %v5633_v32, %v9649_v9  ;;  %8320 = vmatprep.subr.bf16.mxu0 %v9925_v0  ;;  %v13837_v31 = vld [vmem:[#allocation16_spill] sm:$0xff] }
 0x9b3   : > { %v9657_v1 = vpop.permute.xlu0 %9656  ;;  %v9664_v22 = vunpack.i.h.bf16 %v9662_v48  ;;  %v9663_v27 = vunpack.i.l.bf16 %v9662_v48  ;;  %8321 = vmatpush3.bf16.msra.mxu0 %v9926_v8 }
 0x9b4   : > { %v9659_v61 = vunpack.i.h.bf16 %v9657_v1  ;;  %v9658_v19 = vunpack.i.l.bf16 %v9657_v1  ;;  %8863 = vmatpush3.bf16.msra.mxu1 %v8862_v63  ;;  %8322 = vmatprep.subr.bf16.mxu0 %v9927_v42  ;;  %v9934_v63 = vld [vmem:[%s13595_s12 + $0x28] sm:$0xff]  }
 0x9b5   : > { %v5653_v50 = vsel %vm5645_vm8, %v5644_v40, %v9664_v22  ;;  %v5652_v53 = vsel %vm5645_vm8, %v5643_v5, %v9663_v27 }
 0x9b6   : > { %v9672_v41 = vpop.permute.xlu1 %9671  ;;  %v5651_v36 = vsel %vm5645_vm8, %v5642_v28, %v9659_v61  ;;  %v5650_v23 = vsel %vm5645_vm8, %v5641_v2, %v9658_v19 }
 0x9b7   : > { %v9674_v12 = vunpack.i.h.bf16 %v9672_v41  ;;  %v9673_v29 = vunpack.i.l.bf16 %v9672_v41  ;;  %v9667_v18 = vpop.permute.xlu0 %9666  ;;  %8818 = vmatmul.mubr.msk.f32.vlgmr.msra.gmra.mrb[112].mxu1 %vm612_vm3, %v10388_v56  ;;  %8323 = vmatpush3.bf16.msra.mxu0 %v9928_v58  ;;  %v13838_v41 = vld [vmem:[#allocation22_spill] sm:$0xff] }
 0x9b8   : > { %v9669_v21 = vunpack.i.h.bf16 %v9667_v18  ;;  %v9668_v15 = vunpack.i.l.bf16 %v9667_v18  ;;  %8324 = vmatprep.subr.bf16.mxu0 %v9929_v49  ;;  %v9935_v49 = vld [vmem:[%s13595_s12 + $0x70] sm:$0xff]  }
 0x9b9   : > { %v5661_v35 = vsel %vm5654_vm9, %v5652_v53, %v9673_v29  ;;  %v5662_v20 = vsel %vm5654_vm9, %v5653_v50, %v9674_v12  ;;  %v13839_v50 = vld [vmem:[#allocation20_spill] sm:$0xff] }
 0x9ba   : > { %v5666_v52 = vpack.c.bf16 %v5662_v20, %v5661_v35  ;;  %v5659_v30 = vsel %vm5654_vm9, %v5650_v23, %v9668_v15  ;;  %v5660_v11 = vsel %vm5654_vm9, %v5651_v36, %v9669_v21  ;;  %v13840_v23 = vld [vmem:[#allocation21_spill] sm:$0xff] }
 0x9bb   : > { %v5665_v25 = vpack.c.bf16 %v5660_v11, %v5659_v30  ;;  %8325 = vmatpush3.bf16.msra.mxu0 %v9930_v10  ;;  %v9936_v10 = vld [vmem:[%s13595_s12 + $0xc0] sm:$0xff]  }
 0x9bc   : > { %8326 = vmatprep.subr.bf16.mxu0 %v9931_v13  ;;  %8358 = vmatprep.subr.bf16.mxu1 %v9936_v10  ;;  %v12970_v13 = vld [vmem:[%s13595_s12 + $0x100] sm:$0xff]  }
 0x9bd   : > { %8805 = vmatprep.mubr.msk.bf16.mxu0 %vm575_vm0, %v5665_v25 }
 0x9be   : > { %8806 = vmatmul.mubr.msk.bf16.gmra.mrb[120].mxu0 %vm575_vm0, %v5666_v52  ;;  %v13841_v52 = vld [vmem:[#allocation19_spill] sm:$0xff] }
 0x9bf   : > { %8327 = vmatpush3.bf16.msra.mxu0 %v9932_v37  ;;  %v9950_v37 = vld [vmem:[%s13595_s12 + $0xa0] sm:$0xff]  }
 0x9c0   : > { %8328 = vmatprep.subr.bf16.mxu0 %v9933_v43  ;;  %v9952_v43 = vld [vmem:[%s13595_s12 + $0xa8] sm:$0xff]  }
 0x9c3   : > { %8329 = vmatpush3.bf16.msra.mxu0 %v9934_v63 }
 0x9c4   : > { %8330 = vmatprep.subr.bf16.mxu0 %v9935_v49 }
 0xa81   : > { %v8803_v4 = vpop.f32.mrb[116].mxu0 }
 0xa82   : > { %v5761_v3 = vadd.f32 %v8803_v4, %v7881_v62  ;;  %v5752_v16 = vpop.f32.mrb[117].mxu0 }
 0xa83   : > { %v5753_v47 = vadd.f32 %v7881_v62, %v5752_v16  ;;  %v8804_v44 = vpop.f32.mrb[118].mxu0  ;;  %v9938_v16 = vld [vmem:[%s13595_s12 + $0x80] sm:$0xff]  }
 0xa84   : > { %v12836_v6 = vadd.f32 %v5761_v3, %v13834_v57  ;;  %v5764_v39 = vadd.f32 %v8804_v44, %v7881_v62  ;;  %v5755_v33 = vpop.f32.mrb[119].mxu0  ;;  %v9937_v3 = vld [vmem:[%s13595_s12 + $0x30] sm:$0xff]   ;;  %8359 = vmatpush3.bf16.msra.mxu1 %v9938_v16 }
 0xa85   : > { %v12839_v38 = vadd.f32 %v5753_v47, %v13835_v60  ;;  %v5756_v26 = vadd.f32 %v7881_v62, %v5755_v33  ;;  %8331 = vmatpush3.bf16.msra.mxu0 %v9937_v3  ;;  %v9939_v60 = vld [vmem:[%s13595_s12 + $0x78] sm:$0xff]  }
 0xa86   : > { %v7893_v48 = vmul.f32 -1.442695, %v12836_v6  ;;  %v12843_v34 = vadd.f32 %v5764_v39, %v13836_v54  ;;  %v9941_v54 = vld [vmem:[%s13595_s12 + $0x38] sm:$0xff]   ;;  %8332 = vmatprep.subr.bf16.mxu0 %v9939_v60 }
 0xa87   : > { %v7891_v9 = vmul.f32 -1.442695, %v12839_v38  ;;  %v12847_v1 = vadd.f32 %v5756_v26, %v13837_v31  ;;  %v9940_v26 = vld [vmem:[%s13595_s12 + $0xc8] sm:$0xff]   ;;  %v9956_v60 = vld [vmem:[%s13595_s12 + $0xf8] sm:$0xff]  }
 0xa88   : > { %10315 = vpow2.f32 %v7893_v48  ;;  %v7894_v45 = vmul.f32 -1.442695, %v12843_v34  ;;  %v5938_v48 = vld [vmem:[#allocation2 + $0x1] sm:$0xff]  ;;  %8360 = vmatprep.subr.bf16.mxu1 %v9940_v26 }
 0xa89   : > { %10317 = vpow2.f32 %v7891_v9  ;;  %v7892_v46 = vmul.f32 -1.442695, %v12847_v1  ;;  %v9942_v9 = vld [vmem:[%s13595_s12 + $0x88] sm:$0xff]   ;;  %8333 = vmatpush3.bf16.msra.mxu0 %v9941_v54  ;;  %v9957_v54 = vld [vmem:[%s13595_s12 + $0xb8] sm:$0xff]  }
 0xa8a   : > { %10319 = vpow2.f32 %v7894_v45  ;;  %8361 = vmatpush3.bf16.msra.mxu1 %v9942_v9  ;;  %8820 = vmatprep.subr.bf16.mxu0 %v12970_v13 }
 0xa8b   : > { %10321 = vpow2.f32 %v7892_v46 }
 0xa91   : > { %v8807_v22 = vpop.f32.mrb[120].mxu0 }
 0xa92   : > { %v10316_v27 = vpop.eup %10315  ;;  %v5777_v7 = vadd.f32 %v8807_v22, %v7881_v62  ;;  %v5768_v55 = vpop.f32.mrb[121].mxu0 }
 0xa93   : > { %v10318_v61 = vpop.eup %10317  ;;  %v5892_v19 = vadd.f32 1.0, %v10316_v27  ;;  %v5769_v32 = vadd.f32 %v7881_v62, %v5768_v55  ;;  %v8808_v51 = vpop.f32.mrb[122].mxu0 }
 0xa94   : > { %v10320_v5 = vpop.eup %10319  ;;  %v5890_v40 = vadd.f32 1.0, %v10318_v61  ;;  %v12852_v2 = vadd.f32 %v5777_v7, %v13838_v41  ;;  %v5780_v28 = vadd.f32 %v8808_v51, %v7881_v62  ;;  %v5771_v12 = vpop.f32.mrb[123].mxu0 }
 0xa95   : > { %v10322_v29 = vpop.eup %10321  ;;  %10323 = vrcp.f32 %v5892_v19  ;;  %v5893_v18 = vadd.f32 1.0, %v10320_v5  ;;  %v12855_v53 = vadd.f32 %v5769_v32, %v13839_v50  ;;  %v5772_v21 = vadd.f32 %v7881_v62, %v5771_v12  ;;  %v9943_v19 = vld [vmem:[%s13595_s12 + $0xd0] sm:$0xff]  }
 0xa96   : > { %10325 = vrcp.f32 %v5890_v40  ;;  %v5891_v15 = vadd.f32 1.0, %v10322_v29  ;;  %v7897_v36 = vmul.f32 -1.442695, %v12852_v2  ;;  %v12859_v35 = vadd.f32 %v5780_v28, %v13840_v23  ;;  %v9945_v32 = vld [vmem:[%s13595_s12 + $0x90] sm:$0xff]   ;;  %8362 = vmatprep.subr.bf16.mxu1 %v9943_v19  ;;  %v9946_v28 = vld [vmem:[%s13595_s12 + $0xd8] sm:$0xff]  }
 0xa97   : > { %10327 = vrcp.f32 %v5893_v18  ;;  %v7895_v20 = vmul.f32 -1.442695, %v12855_v53  ;;  %v12863_v30 = vadd.f32 %v5772_v21, %v13841_v52  ;;  %8363 = vmatpush3.bf16.msra.mxu1 %v9945_v32  ;;  %v9947_v18 = vld [vmem:[%s13595_s12 + $0x98] sm:$0xff]  }
 0xa98   : > { %10329 = vrcp.f32 %v5891_v15  ;;  %v7898_v11 = vmul.f32 -1.442695, %v12859_v35  ;;  %8364 = vmatprep.subr.bf16.mxu1 %v9946_v28  ;;  %v6137_v28 = vld [vmem:[#allocation2 + $0x91] sm:$0xff] }
 0xa99   : > { %10331 = vpow2.f32 %v7897_v36  ;;  %v7896_v25 = vmul.f32 -1.442695, %v12863_v30 }
 0xa9a   : > { %10333 = vpow2.f32 %v7895_v20 }
 0xa9b   : > { %10335 = vpow2.f32 %v7898_v11  ;;  %v9948_v11 = vld [vmem:[%s13595_s12 + $0xe0] sm:$0xff]   ;;  %8365 = vmatpush3.bf16.msra.mxu1 %v9947_v18 }
 0xa9c   : > { %10337 = vpow2.f32 %v7896_v25  ;;  %8366 = vmatprep.subr.bf16.mxu1 %v9948_v11 }
 0xa9f   : > { %v10324_v59 = vpop.eup %10323  ;;  %8367 = vmatpush3.bf16.msra.mxu1 %v9950_v37 }
 0xaa0   : > { %v10326_v14 = vpop.eup %10325  ;;  %v5916_v17 = vmul.f32 %v10324_v59, %v12836_v6  ;;  %v9951_v59 = vld [vmem:[%s13595_s12 + $0xe8] sm:$0xff]  }
 0xaa1   : > { %v10328_v24 = vpop.eup %10327  ;;  %v5914_v0 = vmul.f32 %v10326_v14, %v12839_v38  ;;  %8368 = vmatprep.subr.bf16.mxu1 %v9951_v59 }
 0xaa2   : > { %v10330_v8 = vpop.eup %10329  ;;  %5924 = vst.msk [vmem:[#allocation2 + $0x31] sm:$0xff] %vm575_vm0, %v5916_v17  ;;  %v5917_v42 = vmul.f32 %v10328_v24, %v12843_v34  ;;  %v6193_v17 = vld [vmem:[#allocation2 + $0x92] sm:$0xff] }
 0xaa3   : > { %v10332_v56 = vpop.eup %10331  ;;  %5922 = vst.msk [vmem:[#allocation2 + $0x11] sm:$0xff] %vm575_vm0, %v5914_v0  ;;  %v5915_v58 = vmul.f32 %v10330_v8, %v12847_v1  ;;  %8369 = vmatpush3.bf16.msra.mxu1 %v9952_v43 }
 0xaa4   : > { %v10334_v62 = vpop.eup %10333  ;;  %5925 = vst.msk [vmem:[#allocation2 + $0x41] sm:$0xff] %vm575_vm0, %v5917_v42  ;;  %v5896_v4 = vadd.f32 1.0, %v10332_v56 }
 0xaa5   : > { %v10336_v47 = vpop.eup %10335  ;;  %5923 = vst.msk [vmem:[#allocation2 + $0x21] sm:$0xff] %vm575_vm0, %v5915_v58  ;;  %v5894_v44 = vadd.f32 1.0, %v10334_v62 }
 0xaa6   : > { %v10338_v57 = vpop.eup %10337  ;;  %10339 = vrcp.f32 %v5896_v4  ;;  %v5897_v39 = vadd.f32 1.0, %v10336_v47  ;;  %v9953_v47 = vld [vmem:[%s13595_s12 + $0xf0] sm:$0xff]  }
 0xaa7   : > { %10341 = vrcp.f32 %v5894_v44  ;;  %v5895_v33 = vadd.f32 1.0, %v10338_v57  ;;  %v9955_v44 = vld [vmem:[%s13595_s12 + $0xb0] sm:$0xff]   ;;  %8370 = vmatprep.subr.bf16.mxu1 %v9953_v47 }
 0xaa8   : > { %10343 = vrcp.f32 %v5897_v39  ;;  %8371 = vmatpush3.bf16.msra.mxu1 %v9955_v44 }
 0xaa9   : > { %10345 = vrcp.f32 %v5895_v33  ;;  %v12916_v22 = vld [vmem:[#allocation2 + $0x32] sm:$0xff]  ;;  %8372 = vmatprep.subr.bf16.mxu1 %v9956_v60 }
 0xaaa   : > { %v12911_v31 = vld [vmem:[#allocation2 + $0x11] sm:$0xff] }
 0xaab   : > { %v9680_v45 = vpack.i.bf16 %v12911_v31, %v5938_v48  ;;  %v12914_v46 = vld [vmem:[#allocation2 + $0x10] sm:$0xff]  ;;  %v12937_v40 = vld [vmem:[#allocation2 + $0x40] sm:$0xff] }
 0xaac   : > { %v12918_v27 = vld [vmem:[#allocation2 + $0x20] sm:$0xff]  ;;  %v12935_v5 = vld [vmem:[#allocation2 + $0x31] sm:$0xff]  ;;  %8373 = vmatpush3.bf16.msra.mxu1 %v9957_v54 }
 0xaad   : > { %v12920_v7 = vld [vmem:[#allocation2 + $0x21] sm:$0xff]  ;;  %9681 = vrot.lane.b32.xlu1 %v9680_v45, %s10456_s27  ;;  %v9675_v61 = vpack.i.bf16 %v12918_v27, %v12914_v46  ;;  %v12948_v29 = vld [vmem:[#allocation2 + $0x30] sm:$0xff] }
 0xaae   : > { %v12922_v55 = vld [vmem:[#allocation2 + $0x22] sm:$0xff]  ;;  %v12942_v41 = vpack.i.bf16 %v12935_v5, %v12920_v7  ;;  %v9685_v15 = vpack.i.bf16 %v12937_v40, %v12948_v29  ;;  %v6066_v45 = vld [vmem:[#allocation2 + $0x12] sm:$0xff] }
 0xaaf   : > { %v6194_v51 = vpack.c.bf16 %v12916_v22, %v12922_v55  ;;  %9676 = vrot.lane.b32.xlu0 %v9675_v61, %s10456_s27  ;;  %v12984_v14 = vld [vmem:[#allocation2 + $0x41] sm:$0xff]  ;;  %v9720_v61 = vpack.i.bf16 %v12922_v55, %v6066_v45 }
 0xab0   : > { %v10340_v12 = vpop.eup %10339  ;;  %v12988_v24 = vld [vmem:[#allocation2 + $0x42] sm:$0xff] }
 0xab1   : > { %6198 = vst.msk [vmem:[#allocation3 + $0x20] sm:$0xff] %vm575_vm0, %v6194_v51  ;;  %v10342_v50 = vpop.eup %10341  ;;  %v5920_v21 = vmul.f32 %v10340_v12, %v12852_v2  ;;  %9691 = vrot.lane.b32.xlu1 %v12942_v41, %s10456_s27  ;;  %v9730_v19 = vpack.i.bf16 %v12988_v24, %v12916_v22 }
 0xab2   : > { %v10344_v36 = vpop.eup %10343  ;;  %v5918_v23 = vmul.f32 %v10342_v50, %v12855_v53  ;;  %v5930_v50 = vld [vmem:[#allocation2] sm:$0xff] }
 0xab3   : > { %v10346_v20 = vpop.eup %10345  ;;  %5928 = vst.msk [vmem:[#allocation2 + $0x71] sm:$0xff] %vm575_vm0, %v5920_v21  ;;  %v5921_v52 = vmul.f32 %v10344_v36, %v12859_v35  ;;  %9686 = vrot.lane.b32.xlu0 %v9685_v15, %s10456_s27  ;;  %v5994_v36 = vld [vmem:[#allocation2 + $0x2] sm:$0xff] }
 0xab4   : > { %5926 = vst.msk [vmem:[#allocation2 + $0x51] sm:$0xff] %vm575_vm0, %v5918_v23  ;;  %v5919_v25 = vmul.f32 %v10346_v20, %v12863_v30 }
 0xab5   : > { %5929 = vst.msk [vmem:[#allocation2 + $0x81] sm:$0xff] %vm575_vm0, %v5921_v52 }
 0xab6   : > { %5927 = vst.msk [vmem:[#allocation2 + $0x61] sm:$0xff] %vm575_vm0, %v5919_v25 }
 0xaba   : > { %v12996_v56 = vld [vmem:[#allocation2 + $0x72] sm:$0xff] }
 0xabb   : > { %v12986_v63 = vld [vmem:[#allocation2 + $0x51] sm:$0xff] }
 0xabc   : > { %v12990_v0 = vld [vmem:[#allocation2 + $0x52] sm:$0xff]  ;;  %v9700_v8 = vpack.i.bf16 %v12986_v63, %v12984_v14  ;;  %v6073_v58 = vld [vmem:[#allocation2 + $0x82] sm:$0xff] }
 0xabd   : > { %v12994_v42 = vld [vmem:[#allocation2 + $0x50] sm:$0xff]  ;;  %v6195_v49 = vpack.c.bf16 %v12990_v0, %v12988_v24  ;;  %v13000_v10 = vld [vmem:[#allocation2 + $0x60] sm:$0xff]  ;;  %v6197_v3 = vpack.c.bf16 %v6193_v17, %v6073_v58  ;;  %v9750_v12 = vpack.i.bf16 %v6073_v58, %v12996_v56 }
 0xabe   : > { %v13002_v62 = vld [vmem:[#allocation2 + $0x61] sm:$0xff]  ;;  %9701 = vrot.lane.b32.xlu1 %v9700_v8, %s10456_s27  ;;  %v9695_v16 = vpack.i.bf16 %v13000_v10, %v12994_v42  ;;  %v13018_v39 = vld [vmem:[#allocation2 + $0x71] sm:$0xff] }
 0xabf   : > { %v13004_v4 = vld [vmem:[#allocation2 + $0x62] sm:$0xff]  ;;  %6199 = vst.msk [vmem:[#allocation3 + $0x48] sm:$0xff] %vm575_vm0, %v6195_v49  ;;  %6201 = vst.msk [vmem:[#allocation3 + $0x98] sm:$0xff] %vm575_vm0, %v6197_v3  ;;  %v9715_v26 = vpack.i.bf16 %v13018_v39, %v13002_v62  ;;  %v13030_v48 = vld [vmem:[#allocation2 + $0x70] sm:$0xff] }
 0xac0   : > { %v6196_v57 = vpack.c.bf16 %v12996_v56, %v13004_v4  ;;  %v13020_v33 = vld [vmem:[#allocation2 + $0x80] sm:$0xff]  ;;  %9696 = vrot.lane.b32.xlu0 %v9695_v16, %s10456_s27  ;;  %v9740_v32 = vpack.i.bf16 %v13004_v4, %v12990_v0  ;;  %v9949_v16 = vld [vmem:[%s13595_s12 + $0x108] sm:$0xff]  }
 0xac1   : > { %v9705_v9 = vpack.i.bf16 %v13020_v33, %v13030_v48  ;;  %v13050_v51 = vld [vmem:[#allocation2 + $0x81] sm:$0xff] }
 0xac2   : > { %6200 = vst.msk [vmem:[#allocation3 + $0x70] sm:$0xff] %vm575_vm0, %v6196_v57  ;;  %9716 = vrot.lane.b32.xlu1 %v9715_v26, %s10456_s27 }
 0xac4   : > { %9706 = vrot.lane.b32.xlu0 %v9705_v9, %s10456_s27 }
 0xac6   : > { %9721 = vrot.lane.b32.xlu1 %v9720_v61, %s10456_s27 }
 0xac8   : > { %9711 = vrot.lane.b32.xlu0 %v12942_v41, %s10456_s27  ;;  %v9745_v41 = vpack.i.bf16 %v6137_v28, %v13050_v51  ;;  %v13842_v28 = vld [vmem:[#allocation14_spill] sm:$0xff] }
 0xaca   : > { %9731 = vrot.lane.b32.xlu1 %v9730_v19, %s10456_s27 }
 0xacc   : > { %9726 = vrot.lane.b32.xlu0 %v9700_v8, %s10456_s27 }
 0xace   : > { %9741 = vrot.lane.b32.xlu1 %v9740_v32, %s10456_s27 }
 0xad0   : > { %9736 = vrot.lane.b32.xlu0 %v9715_v26, %s10456_s27  ;;  %v9954_v26 = vld [vmem:[%s13595_s12 + $0x110] sm:$0xff]  }
 0xad2   : > { %9751 = vrot.lane.b32.xlu1 %v9750_v12, %s10456_s27 }
 0xad4   : > { %9746 = vrot.lane.b32.xlu0 %v9745_v41, %s10456_s27 }
 0xb1f   : > { %v9682_v18 = vpop.permute.xlu1 %9681 }
 0xb20   : > { %v9684_v21 = vunpack.i.h.bf16 %v9682_v18  ;;  %v9683_v15 = vunpack.i.l.bf16 %v9682_v18 }
 0xb21   : > { %v9677_v23 = vpop.permute.xlu0 %9676 }
 0xb22   : > { %v9679_v20 = vunpack.i.h.bf16 %v9677_v23  ;;  %v9678_v52 = vunpack.i.l.bf16 %v9677_v23  ;;  %v5978_v11 = vsel %vm575_vm0, %v5930_v50, %v9683_v15  ;;  %v5979_v25 = vsel %vm575_vm0, %v12914_v46, %v9684_v21 }
 0xb23   : > { %v9692_v43 = vpop.permute.xlu1 %9691  ;;  %v5986_v58 = vpack.c.bf16 %v5979_v25, %v5978_v11 }
 0xb24   : > { %v6042_v37 = vsel %vm575_vm0, %v5994_v36, %v9678_v52  ;;  %v6043_v59 = vsel %vm575_vm0, %v6066_v45, %v9679_v20  ;;  %v9694_v47 = vunpack.i.h.bf16 %v9692_v43  ;;  %v9693_v44 = vunpack.i.l.bf16 %v9692_v43 }
 0xb25   : > { %v6050_v17 = vpack.c.bf16 %v6043_v59, %v6042_v37  ;;  %v9687_v8 = vpop.permute.xlu0 %9686 }
 0xb26   : > { %v9689_v49 = vunpack.i.h.bf16 %v9687_v8  ;;  %v9688_v3 = vunpack.i.l.bf16 %v9687_v8  ;;  %v5981_v54 = vsel %vm575_vm0, %v12948_v29, %v9694_v47  ;;  %v5980_v9 = vsel %vm575_vm0, %v12918_v27, %v9693_v44 }
 0xb27   : > { %6561 = vmatprep.mubr.bf16.mxu0 %v6050_v17  ;;  %v5987_v45 = vpack.c.bf16 %v5981_v54, %v5980_v9 }
 0xb28   : > { %v6045_v46 = vsel %vm575_vm0, %v12916_v22, %v9689_v49  ;;  %v6044_v57 = vsel %vm575_vm0, %v12922_v55, %v9688_v3  ;;  %6562 = vmatmul.mubr.bf16.vlgmr.msra.gmra.mrb[124].mxu0 %v5986_v58  ;;  %v5795_v22 = vld [vmem:[%s13600_s17] sm:$0x1]  ;;  %v5862_v55 = vpop.f32.mrb[112].mxu1 }
 0xb29   : > { %v6051_v60 = vpack.c.bf16 %v6045_v46, %v6044_v57  ;;  %8821 = vmatpush3.bf16.msra.mxu0 %v12970_v13  ;;  %v9958_v13 = vld [vmem:[%s13595_s12 + $0x118] sm:$0xff]   ;;  %v5863_v61 = vadd.f32 %v5862_v55, %v5795_v22  ;;  %v8819_v19 = vpop.f32.mrb[113].mxu1 }
 0xb2a   : > { %8822 = vmatprep.subr.bf16.mxu0 %v9949_v16 }
 0xb2b   : > { %6569 = vmatprep.mubr.bf16.mxu0 %v6051_v60  ;;  %v13084_v12 = vrot.slane %v5863_v61, %v13842_v28 }
 0xb2d   : > { %8823 = vmatpush3.bf16.msra.mxu0 %v9949_v16  ;;  %6737 = vrot.lane.b32.xlu0 %v13084_v12, %s10456_s27 }
 0xb2e   : > { %8824 = vmatprep.subr.bf16.mxu0 %v9954_v26 }
 0xb30   : > { %v9702_v32 = vpop.permute.xlu1 %9701  ;;  %6570 = vmatmul.mubr.bf16.gmra.mrb[128].mxu0 %v5987_v45 }
 0xb31   : > { %v9704_v41 = vunpack.i.h.bf16 %v9702_v32  ;;  %v9703_v18 = vunpack.i.l.bf16 %v9702_v32  ;;  %8825 = vmatpush3.bf16.msra.mxu0 %v9954_v26 }
 0xb32   : > { %v9697_v50 = vpop.permute.xlu0 %9696  ;;  %8826 = vmatprep.subr.bf16.mxu0 %v9958_v13 }
 0xb33   : > { %v9699_v21 = vunpack.i.h.bf16 %v9697_v50  ;;  %v9698_v15 = vunpack.i.l.bf16 %v9697_v50  ;;  %v5983_v36 = vsel %vm575_vm0, %v12994_v42, %v9704_v41  ;;  %v5982_v23 = vsel %vm575_vm0, %v12937_v40, %v9703_v18 }
 0xb34   : > { %v9717_v20 = vpop.permute.xlu1 %9716  ;;  %v5988_v59 = vpack.c.bf16 %v5983_v36, %v5982_v23 }
 0xb35   : > { %v6047_v52 = vsel %vm575_vm0, %v12990_v0, %v9699_v21  ;;  %v6046_v11 = vsel %vm575_vm0, %v12988_v24, %v9698_v15  ;;  %8827 = vmatpush3.bf16.msra.mxu0 %v9958_v13  ;;  %v9719_v8 = vunpack.i.h.bf16 %v9717_v20  ;;  %v9718_v58 = vunpack.i.l.bf16 %v9717_v20 }
 0xb36   : > { %v6052_v25 = vpack.c.bf16 %v6047_v52, %v6046_v11  ;;  %v9707_v37 = vpop.permute.xlu0 %9706 }
 0xb37   : > { %v9709_v43 = vunpack.i.h.bf16 %v9707_v37  ;;  %v9708_v17 = vunpack.i.l.bf16 %v9707_v37  ;;  %v5985_v60 = vsel %vm575_vm0, %v13030_v48, %v9719_v8  ;;  %v5984_v26 = vsel %vm575_vm0, %v13000_v10, %v9718_v58 }
 0xb38   : > { %v9722_v49 = vpop.permute.xlu1 %9721  ;;  %6577 = vmatprep.mubr.bf16.mxu0 %v6052_v25  ;;  %v5989_v13 = vpack.c.bf16 %v5985_v60, %v5984_v26  ;;  %v9962_v60 = vld [vmem:[%s13597_s14 + $0x8] sm:$0xff]  }
 0xb39   : > { %v6049_v3 = vsel %vm575_vm0, %v12996_v56, %v9709_v43  ;;  %v6048_v16 = vsel %vm575_vm0, %v13004_v4, %v9708_v17  ;;  %v9724_v0 = vunpack.i.h.bf16 %v9722_v49  ;;  %v9723_v47 = vunpack.i.l.bf16 %v9722_v49  ;;  %6578 = vmatmul.mubr.bf16.gmra.mrb[132].mxu0 %v5988_v59  ;;  %v6211_v59 = vld [vmem:[#allocation3 + $0x48] sm:$0xff] }
 0xb3a   : > { %v6053_v24 = vpack.c.bf16 %v6049_v3, %v6048_v16  ;;  %v9712_v44 = vpop.permute.xlu0 %9711  ;;  %v9968_v26 = vld [vmem:[%s13597_s14 + $0xc8] sm:$0xff]  }
 0xb3b   : > { %v9714_v46 = vunpack.i.h.bf16 %v9712_v44  ;;  %v9713_v57 = vunpack.i.l.bf16 %v9712_v44  ;;  %v6107_v54 = vsel %vm575_vm0, %v12920_v7, %v9724_v0  ;;  %v6106_v56 = vsel %vm575_vm0, %v12911_v31, %v9723_v47 }
 0xb3c   : > { %6585 = vmatprep.mubr.bf16.mxu0 %v6053_v24  ;;  %v9732_v22 = vpop.permute.xlu1 %9731  ;;  %v6114_v61 = vpack.c.bf16 %v6107_v54, %v6106_v56  ;;  %v6221_v24 = vld [vmem:[#allocation3 + $0x98] sm:$0xff]  ;;  %v9963_v54 = vld [vmem:[%s13597_s14 + $0x50] sm:$0xff]   ;;  %v9970_v56 = vld [vmem:[%s13597_s14 + $0x88] sm:$0xff]  }
 0xb3d   : > { %v6171_v4 = vsel %vm575_vm0, %v12948_v29, %v9714_v46  ;;  %v6170_v9 = vsel %vm575_vm0, %v12918_v27, %v9713_v57  ;;  %v9734_v28 = vunpack.i.h.bf16 %v9732_v22  ;;  %v9733_v41 = vunpack.i.l.bf16 %v9732_v22  ;;  %v6206_v29 = vld [vmem:[#allocation3 + $0x20] sm:$0xff]  ;;  %v9961_v57 = vld [vmem:[%s13597_s14 + $0x48] sm:$0xff]   ;;  %v9969_v22 = vld [vmem:[%s13597_s14 + $0x18] sm:$0xff]  }
 0xb3e   : > { %v6178_v55 = vpack.c.bf16 %v6171_v4, %v6170_v9  ;;  %v9727_v45 = vpop.permute.xlu0 %9726  ;;  %v9960_v46 = vld [vmem:[%s13597_s14] sm:$0xff]   ;;  %v9965_v4 = vld [vmem:[%s13597_s14 + $0x10] sm:$0xff]   ;;  %v9967_v9 = vld [vmem:[%s13597_s14 + $0x58] sm:$0xff]  }
 0xb3f   : > { %v9729_v19 = vunpack.i.h.bf16 %v9727_v45  ;;  %v9728_v32 = vunpack.i.l.bf16 %v9727_v45  ;;  %v6109_v15 = vsel %vm575_vm0, %v12984_v14, %v9734_v28  ;;  %v6108_v36 = vsel %vm575_vm0, %v12935_v5, %v9733_v41  ;;  %v6216_v5 = vld [vmem:[#allocation3 + $0x70] sm:$0xff] }
 0xb40   : > { %6626 = vmatprep.mubr.bf16.mxu1 %v6178_v55  ;;  %v6115_v52 = vpack.c.bf16 %v6109_v15, %v6108_v36  ;;  %v6129_v14 = vld [vmem:[#allocation2 + $0x90] sm:$0xff] }
 0xb41   : > { %v6173_v31 = vsel %vm575_vm0, %v12994_v42, %v9729_v19  ;;  %v6172_v7 = vsel %vm575_vm0, %v12937_v40, %v9728_v32  ;;  %6586 = vmatmul.mubr.bf16.gmra.mrb[136].mxu0 %v5989_v13  ;;  %6627 = vmatmul.mubr.bf16.vlgmr.msra.gmra.mrb[116].mxu1 %v6114_v61  ;;  %v9742_v42 = vpop.permute.xlu1 %9741 }
 0xb42   : > { %v6179_v27 = vpack.c.bf16 %v6173_v31, %v6172_v7  ;;  %v9737_v18 = vpop.permute.xlu0 %9736  ;;  %8828 = vmatprep.mubr.msk.bf16.mxu0 %vm575_vm0, %v6206_v29  ;;  %v9744_v11 = vunpack.i.h.bf16 %v9742_v42  ;;  %v9743_v25 = vunpack.i.l.bf16 %v9742_v42 }
 0xb43   : > { %v9739_v50 = vunpack.i.h.bf16 %v9737_v18  ;;  %v9738_v21 = vunpack.i.l.bf16 %v9737_v18 }
 0xb44   : > { %6634 = vmatprep.mubr.bf16.mxu1 %v6179_v27 }
 0xb45   : > { %v6175_v40 = vsel %vm575_vm0, %v13030_v48, %v9739_v50  ;;  %v6174_v23 = vsel %vm575_vm0, %v13000_v10, %v9738_v21  ;;  %v6111_v48 = vsel %vm575_vm0, %v13002_v62, %v9744_v11  ;;  %v6110_v10 = vsel %vm575_vm0, %v12986_v63, %v9743_v25  ;;  %v9752_v8 = vpop.permute.xlu1 %9751 }
 0xb46   : > { %v9747_v20 = vpop.permute.xlu0 %9746  ;;  %v6180_v37 = vpack.c.bf16 %v6175_v40, %v6174_v23  ;;  %v6116_v3 = vpack.c.bf16 %v6111_v48, %v6110_v10  ;;  %v9754_v16 = vunpack.i.h.bf16 %v9752_v8  ;;  %v9753_v0 = vunpack.i.l.bf16 %v9752_v8  ;;  %v13178_v40 = vld [vmem:[%s13596_s13] ss:$0 sm:$0xff] }
 0xb47   : > { %v9749_v43 = vunpack.i.h.bf16 %v9747_v20  ;;  %v9748_v17 = vunpack.i.l.bf16 %v9747_v20 }
 0xb48   : > { %v6113_v62 = vsel %vm575_vm0, %v13050_v51, %v9754_v16  ;;  %v6112_v63 = vsel %vm575_vm0, %v13018_v39, %v9753_v0  ;;  %v9964_v51 = vld [vmem:[%s13597_s14 + $0xc0] sm:$0xff]  }
 0xb49   : > { %6635 = vmatmul.mubr.bf16.gmra.mrb[120].mxu1 %v6115_v52  ;;  %8829 = vmatmul.mubr.msk.bf16.vlgmr.msra.gmra.mrb[140].mxu0 %vm575_vm0, %v6211_v59  ;;  %v6177_v58 = vsel %vm575_vm0, %v6129_v14, %v9749_v43  ;;  %v6176_v49 = vsel %vm575_vm0, %v13020_v33, %v9748_v17  ;;  %v6117_v44 = vpack.c.bf16 %v6113_v62, %v6112_v63  ;;  %v9959_v33 = vld [vmem:[%s13597_s14 + $0x40] sm:$0xff]  }
 0xb4a   : > { %6642 = vmatprep.mubr.bf16.mxu1 %v6180_v37  ;;  %8832 = vmatprep.mubr.msk.bf16.mxu0 %vm575_vm0, %v6216_v5  ;;  %v6181_v47 = vpack.c.bf16 %v6177_v58, %v6176_v49  ;;  %v9966_v39 = vld [vmem:[%s13597_s14 + $0x80] sm:$0xff]  }
 0xb4b   : > { %8406 = vmatprep.subr.bf16.mxu1 %v9959_v33  ;;  %8446 = vmatprep.subr.bf16.mxu0 %v9964_v51 }
 0xb4c   : > { %8407 = vmatpush3.bf16.msra.mxu1 %v9960_v46  ;;  %8447 = vmatpush3.bf16.msra.mxu0 %v9966_v39 }
 0xb4d   : > { %8408 = vmatprep.subr.bf16.mxu1 %v9961_v57  ;;  %8448 = vmatprep.subr.bf16.mxu0 %v9968_v26 }
 0xb50   : > { %8409 = vmatpush3.bf16.msra.mxu1 %v9962_v60  ;;  %8449 = vmatpush3.bf16.msra.mxu0 %v9970_v56 }
 0xb51   : > { %6643 = vmatmul.mubr.bf16.gmra.mrb[124].mxu1 %v6116_v3  ;;  %8833 = vmatmul.mubr.msk.bf16.gmra.mrb[144].mxu0 %vm575_vm0, %v6221_v24 }
 0xb52   : > { %6650 = vmatprep.mubr.bf16.mxu1 %v6181_v47  ;;  %8410 = vmatprep.subr.bf16.mxu1 %v9963_v54 }
 0xb54   : > { %8411 = vmatpush3.bf16.msra.mxu1 %v9965_v4 }
 0xb55   : > { %8412 = vmatprep.subr.bf16.mxu1 %v9967_v9 }
 0xb58   : > { %8413 = vmatpush3.bf16.msra.mxu1 %v9969_v22 }
 0xb59   : > { %6651 = vmatmul.mubr.bf16.gmra.mrb[128].mxu1 %v6117_v44 }
 0xb9f   : > { %v13186_v3 = vpop.permute.xlu0 %6737 }
 0xbfb   : > { %v8334_v55 = vpop.f32.mrb[124].mxu0 }
 0xbfc   : > { %v8335_v45 = vpop.f32.mrb[125].mxu0 }
 0xbfd   : > { %v8336_v13 = vadd.f32 %v8335_v45, %v8334_v55  ;;  %v8337_v61 = vpop.f32.mrb[126].mxu0 }
 0xbfe   : > { %v8338_v19 = vpop.f32.mrb[127].mxu0 }
 0xbff   : > { %v8339_v32 = vadd.f32 %v8338_v19, %v8337_v61  ;;  %v6564_v25 = vadd.f32 %v8336_v13, %v13178_v40 }
 0xc01   : > { %v6567_v48 = vadd.f32 %v8339_v32, %v13178_v40 }
 0xc03   : > { %v8340_v28 = vpop.f32.mrb[128].mxu0 }
 0xc04   : > { %v8341_v41 = vpop.f32.mrb[129].mxu0 }
 0xc05   : > { %v8342_v31 = vadd.f32 %v8341_v41, %v8340_v28  ;;  %v8343_v7 = vpop.f32.mrb[130].mxu0 }
 0xc06   : > { %v8344_v29 = vpop.f32.mrb[131].mxu0 }
 0xc07   : > { %v8345_v27 = vadd.f32 %v8344_v29, %v8343_v7  ;;  %v6572_v62 = vadd.f32 %v8342_v31, %v13178_v40 }
 0xc09   : > { %v6575_v57 = vadd.f32 %v8345_v27, %v13178_v40 }
 0xc0c   : > { %v8346_v18 = vpop.f32.mrb[132].mxu0 }
 0xc0d   : > { %v8347_v50 = vpop.f32.mrb[133].mxu0 }
 0xc0e   : > { %v8348_v21 = vadd.f32 %v8347_v50, %v8346_v18  ;;  %v8349_v15 = vpop.f32.mrb[134].mxu0 }
 0xc0f   : > { %v8350_v36 = vpop.f32.mrb[135].mxu0 }
 0xc10   : > { %v8351_v42 = vadd.f32 %v8350_v36, %v8349_v15  ;;  %v6580_v15 = vadd.f32 %v8348_v21, %v13178_v40 }
 0xc12   : > { %v6583_v36 = vadd.f32 %v8351_v42, %v13178_v40 }
 0xc14   : > { %v8352_v23 = vpop.f32.mrb[136].mxu0  ;;  %v8374_v20 = vpop.f32.mrb[116].mxu1 }
 0xc15   : > { %v8353_v52 = vpop.f32.mrb[137].mxu0  ;;  %v8375_v11 = vpop.f32.mrb[117].mxu1 }
 0xc16   : > { %v13181_v37 = vadd.f32 %v8353_v52, %v8352_v23  ;;  %v8376_v59 = vadd.f32 %v8375_v11, %v8374_v20  ;;  %v8355_v43 = vpop.f32.mrb[138].mxu0  ;;  %v8377_v17 = vpop.f32.mrb[118].mxu1 }
 0xc17   : > { %v8356_v5 = vpop.f32.mrb[139].mxu0  ;;  %v8378_v14 = vpop.f32.mrb[119].mxu1 }
 0xc18   : > { %v13184_v10 = vadd.f32 %v8356_v5, %v8355_v43  ;;  %v8379_v8 = vadd.f32 %v8378_v14, %v8377_v17  ;;  %v6629_v58 = vadd.f32 %v8376_v59, %v6564_v25 }
 0xc1a   : > { %v6632_v49 = vadd.f32 %v8379_v8, %v6567_v48 }
 0xc1c   : > { %v8380_v16 = vpop.f32.mrb[120].mxu1  ;;  %v8830_v0 = vpop.f32.mrb[140].mxu0 }
 0xc1d   : > { %v8381_v47 = vpop.f32.mrb[121].mxu1  ;;  %v6693_v24 = vpop.f32.mrb[141].mxu0 }
 0xc1e   : > { %v8382_v63 = vadd.f32 %v8381_v47, %v8380_v16  ;;  %v6694_v44 = vadd.f32 %v6693_v24, %v6629_v58  ;;  %v8383_v33 = vpop.f32.mrb[122].mxu1  ;;  %v8831_v46 = vpop.f32.mrb[142].mxu0  ;;  %v6588_v58 = vadd.f32 %v13181_v37, %v13178_v40 }
 0xc1f   : > { %v8384_v51 = vpop.f32.mrb[123].mxu1  ;;  %v6696_v39 = vpop.f32.mrb[143].mxu0 }
 0xc20   : > { %v6637_v60 = vadd.f32 %v8382_v63, %v6572_v62  ;;  %v6728_v26 = vmul.f32 %v13084_v12, %v6694_v44  ;;  %v8385_v54 = vadd.f32 %v8384_v51, %v8383_v33  ;;  %v6697_v56 = vadd.f32 %v6696_v39, %v6632_v49 }
 0xc21   : > { %v6591_v63 = vadd.f32 %v13184_v10, %v13178_v40 }
 0xc22   : > { %v6702_v4 = vadd.f32 %v8830_v0, %v6637_v60  ;;  %v6640_v9 = vadd.f32 %v8385_v54, %v6575_v57  ;;  %v6729_v22 = vmul.f32 %v13084_v12, %v6697_v56  ;;  %v13193_v55 = vadd.f32 %v13186_v3, %v6728_v26 }
 0xc24   : > { %v6730_v45 = vmul.f32 %v13084_v12, %v6702_v4  ;;  %v6705_v13 = vadd.f32 %v8831_v46, %v6640_v9  ;;  %v13197_v61 = vadd.f32 %v13186_v3, %v6729_v22  ;;  %v7940_v19 = vmul.f32 -1.442695, %v13193_v55  ;;  %v8386_v32 = vpop.f32.mrb[124].mxu1  ;;  %v8834_v28 = vpop.f32.mrb[144].mxu0 }
 0xc25   : > { %v8387_v41 = vpop.f32.mrb[125].mxu1  ;;  %v6709_v31 = vpop.f32.mrb[145].mxu0 }
 0xc26   : > { %v6731_v7 = vmul.f32 %v13084_v12, %v6705_v13  ;;  %v13202_v29 = vadd.f32 %v13186_v3, %v6730_v45  ;;  %10347 = vpow2.f32 %v7940_v19  ;;  %v7941_v27 = vmul.f32 -1.442695, %v13197_v61  ;;  %v8389_v18 = vpop.f32.mrb[126].mxu1  ;;  %v8835_v50 = vpop.f32.mrb[146].mxu0  ;;  %v9971_v19 = vld [vmem:[%s13597_s14 + $0x60] sm:$0xff]  }
 0xc27   : > { %v8388_v23 = vadd.f32 %v8387_v41, %v8386_v32  ;;  %v8390_v20 = vpop.f32.mrb[127].mxu1  ;;  %v6712_v52 = vpop.f32.mrb[147].mxu0  ;;  %v9972_v32 = vld [vmem:[%s13597_s14 + $0xd0] sm:$0xff]   ;;  %8414 = vmatprep.subr.bf16.mxu1 %v9971_v19 }
 0xc28   : > { %v13208_v11 = vadd.f32 %v13186_v3, %v6731_v7  ;;  %10349 = vpow2.f32 %v7941_v27  ;;  %v7942_v25 = vmul.f32 -1.442695, %v13202_v29  ;;  %v8391_v59 = vadd.f32 %v8390_v20, %v8389_v18  ;;  %8450 = vmatprep.subr.bf16.mxu0 %v9972_v32  ;;  %v9976_v27 = vld [vmem:[%s13597_s14 + $0xd8] sm:$0xff]   ;;  %v9977_v18 = vld [vmem:[%s13597_s14 + $0x28] sm:$0xff]  }
 0xc29   : > { %v6645_v43 = vadd.f32 %v8388_v23, %v6580_v15 }
 0xc2a   : > { %10351 = vpow2.f32 %v7942_v25  ;;  %v7943_v17 = vmul.f32 -1.442695, %v13208_v11  ;;  %v6648_v5 = vadd.f32 %v8391_v59, %v6583_v36  ;;  %v9979_v25 = vld [vmem:[%s13597_s14 + $0x70] sm:$0xff]   ;;  %v9980_v59 = vld [vmem:[%s13597_s14 + $0xe0] sm:$0xff]  }
 0xc2b   : > { %v6710_v14 = vadd.f32 %v6709_v31, %v6645_v43  ;;  %v9973_v31 = vld [vmem:[%s13597_s14 + $0x20] sm:$0xff]  }
 0xc2c   : > { %10353 = vpow2.f32 %v7943_v17  ;;  %v6713_v21 = vadd.f32 %v6712_v52, %v6648_v5  ;;  %v8392_v48 = vpop.f32.mrb[128].mxu1  ;;  %8415 = vmatpush3.bf16.msra.mxu1 %v9973_v31  ;;  %v9982_v5 = vld [vmem:[%s13597_s14 + $0xa0] sm:$0xff]  }
 0xc2d   : > { %v6732_v42 = vmul.f32 %v13084_v12, %v6710_v14  ;;  %v8393_v8 = vpop.f32.mrb[129].mxu1 }
 0xc2e   : > { %v6733_v49 = vmul.f32 %v13084_v12, %v6713_v21  ;;  %v8394_v16 = vadd.f32 %v8393_v8, %v8392_v48  ;;  %v8395_v0 = vpop.f32.mrb[130].mxu1  ;;  %v9984_v8 = vld [vmem:[%s13597_s14 + $0xe8] sm:$0xff]  }
 0xc2f   : > { %v13217_v47 = vadd.f32 %v13186_v3, %v6732_v42  ;;  %v8396_v24 = vpop.f32.mrb[131].mxu1  ;;  %v9983_v42 = vld [vmem:[%s13597_s14 + $0x78] sm:$0xff]  }
 0xc30   : > { %v10348_v62 = vpop.eup %10347  ;;  %v13222_v44 = vadd.f32 %v13186_v3, %v6733_v49  ;;  %v6653_v33 = vadd.f32 %v8394_v16, %v6588_v58  ;;  %v8397_v46 = vadd.f32 %v8396_v24, %v8395_v0  ;;  %v9986_v16 = vld [vmem:[%s13597_s14 + $0xa8] sm:$0xff]  }
 0xc31   : > { %v6772_v57 = vadd.f32 1.0, %v10348_v62  ;;  %v7944_v37 = vmul.f32 -1.442695, %v13217_v47  ;;  %v6820_v24 = vld [vmem:[#allocation2 + $0x1] sm:$0xff] }
 0xc32   : > { %v10350_v51 = vpop.eup %10349  ;;  %v7945_v39 = vmul.f32 -1.442695, %v13222_v44  ;;  %v6718_v60 = vadd.f32 %v8834_v28, %v6653_v33  ;;  %v6656_v26 = vadd.f32 %v8397_v46, %v6591_v63  ;;  %v9987_v46 = vld [vmem:[%s13597_s14 + $0xf0] sm:$0xff]  }
 0xc33   : > { %v6773_v54 = vadd.f32 1.0, %v10350_v51  ;;  %10355 = vrcp.f32 %v6772_v57  ;;  %v9989_v57 = vld [vmem:[%s13597_s14 + $0xb0] sm:$0xff]  }
 0xc34   : > { %v10352_v56 = vpop.eup %10351  ;;  %10357 = vpow2.f32 %v7944_v37  ;;  %v6734_v4 = vmul.f32 %v13084_v12, %v6718_v60  ;;  %v6721_v40 = vadd.f32 %v8835_v50, %v6656_v26  ;;  %v9978_v50 = vld [vmem:[%s13597_s14 + $0x98] sm:$0xff]  }
 0xc35   : > { %v6774_v10 = vadd.f32 1.0, %v10352_v56  ;;  %10359 = vrcp.f32 %v6773_v54 }
 0xc36   : > { %v10354_v9 = vpop.eup %10353  ;;  %10361 = vpow2.f32 %v7945_v39  ;;  %v13228_v22 = vadd.f32 %v13186_v3, %v6734_v4  ;;  %v6735_v45 = vmul.f32 %v13084_v12, %v6721_v40  ;;  %v9974_v12 = vld [vmem:[%s13597_s14 + $0x90] sm:$0xff]  }
 0xc37   : > { %v6775_v13 = vadd.f32 1.0, %v10354_v9  ;;  %10363 = vrcp.f32 %v6774_v10  ;;  %8451 = vmatpush3.bf16.msra.mxu0 %v9974_v12  ;;  %v9990_v9 = vld [vmem:[%s13597_s14 + $0xf8] sm:$0xff]  }
 0xc38   : > { %v7946_v28 = vmul.f32 -1.442695, %v13228_v22  ;;  %v13239_v41 = vadd.f32 %v13186_v3, %v6735_v45  ;;  %v9975_v3 = vld [vmem:[%s13597_s14 + $0x68] sm:$0xff]   ;;  %8452 = vmatprep.subr.bf16.mxu0 %v9976_v27  ;;  %v9991_v45 = vld [vmem:[%s13597_s14 + $0xb8] sm:$0xff]  }
 0xc39   : > { %10365 = vrcp.f32 %v6775_v13  ;;  %8416 = vmatprep.subr.bf16.mxu1 %v9975_v3 }
 0xc3a   : > { %10367 = vpow2.f32 %v7946_v28  ;;  %v7947_v7 = vmul.f32 -1.442695, %v13239_v41  ;;  %8417 = vmatpush3.bf16.msra.mxu1 %v9977_v18 }
 0xc3b   : > { %8453 = vmatpush3.bf16.msra.mxu0 %v9978_v50  ;;  %8418 = vmatprep.subr.bf16.mxu1 %v9979_v25 }
 0xc3c   : > { %10369 = vpow2.f32 %v7947_v7  ;;  %8454 = vmatprep.subr.bf16.mxu0 %v9980_v59 }
 0xc3d   : > { %v10356_v15 = vpop.eup %10355 }
 0xc3e   : > { %v10358_v36 = vpop.eup %10357  ;;  %v6796_v23 = vmul.f32 %v10356_v15, %v13193_v55  ;;  %v9981_v55 = vld [vmem:[%s13597_s14 + $0x30] sm:$0xff]   ;;  %v13354_v15 = vld [vmem:[%s13597_s14 + $0x100] sm:$0xff]  }
 0xc3f   : > { %v10360_v20 = vpop.eup %10359  ;;  %v6776_v52 = vadd.f32 1.0, %v10358_v36  ;;  %8419 = vmatpush3.bf16.msra.mxu1 %v9981_v55  ;;  %8455 = vmatpush3.bf16.msra.mxu0 %v9982_v5  ;;  %v7075_v55 = vld [vmem:[#allocation2 + $0x92] sm:$0xff] }
 0xc40   : > { %v10362_v43 = vpop.eup %10361  ;;  %v6797_v17 = vmul.f32 %v10360_v20, %v13197_v61  ;;  %6804 = vst.msk [vmem:[#allocation2 + $0x11] sm:$0xff] %vm575_vm0, %v6796_v23  ;;  %8420 = vmatprep.subr.bf16.mxu1 %v9983_v42  ;;  %8456 = vmatprep.subr.bf16.mxu0 %v9984_v8 }
 0xc41   : > { %v10364_v14 = vpop.eup %10363  ;;  %10371 = vrcp.f32 %v6776_v52  ;;  %v6777_v21 = vadd.f32 1.0, %v10362_v43 }
 0xc42   : > { %v6798_v48 = vmul.f32 %v10364_v14, %v13202_v29  ;;  %6805 = vst.msk [vmem:[#allocation2 + $0x21] sm:$0xff] %vm575_vm0, %v6797_v17  ;;  %v9985_v29 = vld [vmem:[%s13597_s14 + $0x38] sm:$0xff]  }
 0xc43   : > { %v10366_v61 = vpop.eup %10365  ;;  %10373 = vrcp.f32 %v6777_v21  ;;  %8421 = vmatpush3.bf16.msra.mxu1 %v9985_v29  ;;  %8457 = vmatpush3.bf16.msra.mxu0 %v9986_v16 }
 0xc44   : > { %v10368_v58 = vpop.eup %10367  ;;  %v6799_v49 = vmul.f32 %v10366_v61, %v13208_v11  ;;  %6806 = vst.msk [vmem:[#allocation2 + $0x31] sm:$0xff] %vm575_vm0, %v6798_v48  ;;  %8458 = vmatprep.subr.bf16.mxu0 %v9987_v46  ;;  %8836 = vmatprep.subr.bf16.mxu1 %v13354_v15 }
 0xc45   : > { %v6778_v0 = vadd.f32 1.0, %v10368_v58 }
 0xc46   : > { %v10370_v62 = vpop.eup %10369  ;;  %6807 = vst.msk [vmem:[#allocation2 + $0x41] sm:$0xff] %vm575_vm0, %v6799_v49 }
 0xc47   : > { %10375 = vrcp.f32 %v6778_v0  ;;  %v6779_v11 = vadd.f32 1.0, %v10370_v62  ;;  %v13292_v63 = vld [vmem:[#allocation2 + $0x11] sm:$0xff]  ;;  %8459 = vmatpush3.bf16.msra.mxu0 %v9989_v57 }
 0xc48   : > { %v9760_v33 = vpack.i.bf16 %v13292_v63, %v6820_v24  ;;  %v13301_v37 = vld [vmem:[#allocation2 + $0x10] sm:$0xff]  ;;  %8460 = vmatprep.subr.bf16.mxu0 %v9990_v9 }
 0xc49   : > { %10377 = vrcp.f32 %v6779_v11  ;;  %v13303_v51 = vld [vmem:[#allocation2 + $0x20] sm:$0xff]  ;;  %v13338_v12 = vld [vmem:[#allocation2 + $0x12] sm:$0xff] }
 0xc4a   : > { %9761 = vrot.lane.b32.xlu0 %v9760_v33, %s10456_s27  ;;  %v9755_v39 = vpack.i.bf16 %v13303_v51, %v13301_v37  ;;  %v13308_v60 = vld [vmem:[#allocation2 + $0x21] sm:$0xff]  ;;  %v7019_v24 = vld [vmem:[#allocation2 + $0x91] sm:$0xff] }
 0xc4b   : > { %v10372_v26 = vpop.eup %10371  ;;  %v13310_v54 = vld [vmem:[#allocation2 + $0x31] sm:$0xff]  ;;  %v13312_v56 = vld [vmem:[#allocation2 + $0x22] sm:$0xff]  ;;  %8461 = vmatpush3.bf16.msra.mxu0 %v9991_v45 }
 0xc4c   : > { %v13314_v4 = vld [vmem:[#allocation2 + $0x32] sm:$0xff]  ;;  %v6800_v40 = vmul.f32 %v10372_v26, %v13217_v47  ;;  %9756 = vrot.lane.b32.xlu1 %v9755_v39, %s10456_s27  ;;  %v9770_v10 = vpack.i.bf16 %v13310_v54, %v13308_v60  ;;  %v9780_v7 = vpack.i.bf16 %v13312_v56, %v13338_v12  ;;  %v6812_v33 = vld [vmem:[#allocation2] sm:$0xff] }
 0xc4d   : > { %v7076_v13 = vpack.c.bf16 %v13314_v4, %v13312_v56  ;;  %v10374_v19 = vpop.eup %10373  ;;  %v13328_v32 = vld [vmem:[#allocation2 + $0x30] sm:$0xff]  ;;  %v13330_v47 = vld [vmem:[#allocation2 + $0x40] sm:$0xff] }
 0xc4e   : > { %6808 = vst.msk [vmem:[#allocation2 + $0x51] sm:$0xff] %vm575_vm0, %v6800_v40  ;;  %v6801_v28 = vmul.f32 %v10374_v19, %v13222_v44  ;;  %9771 = vrot.lane.b32.xlu0 %v9770_v10, %s10456_s27  ;;  %v9765_v31 = vpack.i.bf16 %v13330_v47, %v13328_v32  ;;  %v13349_v50 = vld [vmem:[#allocation2 + $0x41] sm:$0xff] }
 0xc4f   : > { %7080 = vst.msk [vmem:[#allocation3 + $0x20] sm:$0xff] %vm575_vm0, %v7076_v13  ;;  %v13358_v23 = vld [vmem:[#allocation2 + $0x42] sm:$0xff] }
 0xc50   : > { %6809 = vst.msk [vmem:[#allocation2 + $0x61] sm:$0xff] %vm575_vm0, %v6801_v28  ;;  %9766 = vrot.lane.b32.xlu1 %v9765_v31, %s10456_s27  ;;  %v9800_v43 = vpack.i.bf16 %v13358_v23, %v13314_v4  ;;  %v6876_v26 = vld [vmem:[#allocation2 + $0x2] sm:$0xff] }
 0xc51   : > { %v10376_v3 = vpop.eup %10375 }
 0xc52   : > { %v6802_v44 = vmul.f32 %v10376_v3, %v13228_v22  ;;  %9781 = vrot.lane.b32.xlu0 %v9780_v7, %s10456_s27 }
 0xc53   : > { %v10378_v27 = vpop.eup %10377 }
 0xc54   : > { %6810 = vst.msk [vmem:[#allocation2 + $0x71] sm:$0xff] %vm575_vm0, %v6802_v44  ;;  %v6803_v18 = vmul.f32 %v10378_v27, %v13239_v41  ;;  %9776 = vrot.lane.b32.xlu1 %v9770_v10, %s10456_s27 }
 0xc55   : > { %v13356_v36 = vld [vmem:[#allocation2 + $0x51] sm:$0xff] }
 0xc56   : > { %v13360_v22 = vld [vmem:[#allocation2 + $0x52] sm:$0xff]  ;;  %6811 = vst.msk [vmem:[#allocation2 + $0x81] sm:$0xff] %vm575_vm0, %v6803_v18  ;;  %v9785_v41 = vpack.i.bf16 %v13356_v36, %v13349_v50 }
 0xc57   : > { %v7077_v20 = vpack.c.bf16 %v13360_v22, %v13358_v23  ;;  %v13368_v52 = vld [vmem:[#allocation2 + $0x50] sm:$0xff]  ;;  %v13370_v25 = vld [vmem:[#allocation2 + $0x60] sm:$0xff] }
 0xc58   : > { %9786 = vrot.lane.b32.xlu0 %v9785_v41, %s10456_s27  ;;  %v9790_v59 = vpack.i.bf16 %v13370_v25, %v13368_v52  ;;  %v13379_v17 = vld [vmem:[#allocation2 + $0x61] sm:$0xff] }
 0xc59   : > { %7081 = vst.msk [vmem:[#allocation3 + $0x48] sm:$0xff] %vm575_vm0, %v7077_v20  ;;  %v13383_v14 = vld [vmem:[#allocation2 + $0x62] sm:$0xff] }
 0xc5a   : > { %9791 = vrot.lane.b32.xlu1 %v9790_v59, %s10456_s27  ;;  %v9820_v16 = vpack.i.bf16 %v13383_v14, %v13360_v22 }
 0xc5b   : > { %v13381_v5 = vld [vmem:[#allocation2 + $0x71] sm:$0xff] }
 0xc5c   : > { %v13385_v21 = vld [vmem:[#allocation2 + $0x72] sm:$0xff]  ;;  %9801 = vrot.lane.b32.xlu0 %v9800_v43, %s10456_s27  ;;  %v9810_v48 = vpack.i.bf16 %v13381_v5, %v13379_v17  ;;  %v9992_v43 = vld [vmem:[%s13597_s14 + $0x108] sm:$0xff]  }
 0xc5d   : > { %v7078_v61 = vpack.c.bf16 %v13385_v21, %v13383_v14  ;;  %v13392_v42 = vld [vmem:[#allocation2 + $0x70] sm:$0xff]  ;;  %v13394_v8 = vld [vmem:[#allocation2 + $0x80] sm:$0xff] }
 0xc5e   : > { %v6955_v58 = vld [vmem:[#allocation2 + $0x82] sm:$0xff]  ;;  %9796 = vrot.lane.b32.xlu1 %v9785_v41, %s10456_s27  ;;  %v9805_v49 = vpack.i.bf16 %v13394_v8, %v13392_v42 }
 0xc5f   : > { %7082 = vst.msk [vmem:[#allocation3 + $0x70] sm:$0xff] %vm575_vm0, %v7078_v61  ;;  %v7079_v29 = vpack.c.bf16 %v7075_v55, %v6955_v58  ;;  %v13406_v0 = vld [vmem:[#allocation2 + $0x81] sm:$0xff]  ;;  %v9830_v62 = vpack.i.bf16 %v6955_v58, %v13385_v21 }
 0xc60   : > { %9811 = vrot.lane.b32.xlu0 %v9810_v48, %s10456_s27  ;;  %v9825_v11 = vpack.i.bf16 %v7019_v24, %v13406_v0 }
 0xc61   : > { %7083 = vst.msk [vmem:[#allocation3 + $0x98] sm:$0xff] %vm575_vm0, %v7079_v29 }
 0xc62   : > { %9806 = vrot.lane.b32.xlu1 %v9805_v49, %s10456_s27 }
 0xc64   : > { %9821 = vrot.lane.b32.xlu0 %v9820_v16, %s10456_s27 }
 0xc66   : > { %9816 = vrot.lane.b32.xlu1 %v9810_v48, %s10456_s27 }
 0xc68   : > { %9831 = vrot.lane.b32.xlu0 %v9830_v62, %s10456_s27 }
 0xc6a   : > { %9826 = vrot.lane.b32.xlu1 %v9825_v11, %s10456_s27  ;;  %s7636_s27 = sshll.u32 %s13505_s6, 4  ;;  %s13533_s27 = int_to_ptr.vmem [resolvable:$true] %s7636_s27 }
 0xc6b   : > { %s10389_s26 = scalar_lea.vmem %s13533_s27, 1024  ;;  %p10396_p0 = scmp.lt.s32.totalorder %s13533_s27, %s10394_s29 }
 0xc6c   : > { %p10390_p11 = scmp.ne.s32.totalorder %s13533_s27, %s10389_s26  ;;  %p10397_p1 = scmp.lt.s32.totalorder %s10395_s22, %s10389_s26 }
 0xc6e   : > { %p10391_p12 = pnand %p10390_p11, %p10607_p5  ;;  %p10398_p2 = por %p10397_p1, %p10396_p0 }
 0xc70   : > { %p10392_p13 = pneg %p10391_p12 }
 0xc72   : > { %p10399_p3 = pnand %p10398_p2, %p10392_p13 }
 0xcbc   : > { %v9762_v46 = vpop.permute.xlu0 %9761 }
 0xcbd   : > { %v9764_v57 = vunpack.i.h.bf16 %v9762_v46  ;;  %v9763_v39 = vunpack.i.l.bf16 %v9762_v46 }
 0xcbe   : > { %v9757_v40 = vpop.permute.xlu1 %9756 }
 0xcbf   : > { %v6860_v10 = vsel %vm575_vm0, %v6812_v33, %v9763_v39  ;;  %v6861_v9 = vsel %vm575_vm0, %v13301_v37, %v9764_v57  ;;  %v9759_v45 = vunpack.i.h.bf16 %v9757_v40  ;;  %v9758_v13 = vunpack.i.l.bf16 %v9757_v40 }
 0xcc0   : > { %v6868_v19 = vpack.c.bf16 %v6861_v9, %v6860_v10  ;;  %v9772_v28 = vpop.permute.xlu0 %9771 }
 0xcc1   : > { %v6924_v31 = vsel %vm575_vm0, %v6876_v26, %v9758_v13  ;;  %v6925_v7 = vsel %vm575_vm0, %v13338_v12, %v9759_v45  ;;  %v9774_v3 = vunpack.i.h.bf16 %v9772_v28  ;;  %v9773_v44 = vunpack.i.l.bf16 %v9772_v28  ;;  %v9994_v26 = vld [vmem:[%s13597_s14 + $0x118] sm:$0xff]  }
 0xcc2   : > { %v6932_v27 = vpack.c.bf16 %v6925_v7, %v6924_v31  ;;  %v9767_v18 = vpop.permute.xlu1 %9766 }
 0xcc3   : > { %v6863_v41 = vsel %vm575_vm0, %v13328_v32, %v9774_v3  ;;  %v6862_v20 = vsel %vm575_vm0, %v13303_v51, %v9773_v44  ;;  %v9769_v37 = vunpack.i.h.bf16 %v9767_v18  ;;  %v9768_v59 = vunpack.i.l.bf16 %v9767_v18 }
 0xcc4   : > { %v6869_v55 = vpack.c.bf16 %v6863_v41, %v6862_v20  ;;  %v9782_v48 = vpop.permute.xlu0 %9781  ;;  %7443 = vmatprep.mubr.bf16.mxu1 %v6932_v27 }
 0xcc5   : > { %v6927_v12 = vsel %vm575_vm0, %v13314_v4, %v9769_v37  ;;  %v6926_v61 = vsel %vm575_vm0, %v13312_v56, %v9768_v59  ;;  %v9784_v58 = vunpack.i.h.bf16 %v9782_v48  ;;  %v9783_v49 = vunpack.i.l.bf16 %v9782_v48  ;;  %7444 = vmatmul.mubr.bf16.vlgmr.msra.gmra.mrb[132].mxu1 %v6868_v19  ;;  %v9993_v56 = vld [vmem:[%s13597_s14 + $0x110] sm:$0xff]  }
 0xcc6   : > { %v6933_v29 = vpack.c.bf16 %v6927_v12, %v6926_v61  ;;  %v9777_v16 = vpop.permute.xlu1 %9776  ;;  %8837 = vmatpush3.bf16.msra.mxu1 %v13354_v15 }
 0xcc7   : > { %v6989_v24 = vsel %vm575_vm0, %v13308_v60, %v9784_v58  ;;  %v6988_v62 = vsel %vm575_vm0, %v13292_v63, %v9783_v49  ;;  %v9779_v11 = vunpack.i.h.bf16 %v9777_v16  ;;  %v9778_v33 = vunpack.i.l.bf16 %v9777_v16  ;;  %8838 = vmatprep.subr.bf16.mxu1 %v9992_v43 }
 0xcc8   : > { %v6996_v4 = vpack.c.bf16 %v6989_v24, %v6988_v62  ;;  %7451 = vmatprep.mubr.bf16.mxu1 %v6933_v29 }
 0xcc9   : > { %v7053_v46 = vsel %vm575_vm0, %v13328_v32, %v9779_v11  ;;  %v7052_v15 = vsel %vm575_vm0, %v13303_v51, %v9778_v33 }
 0xcca   : > { %v7060_v57 = vpack.c.bf16 %v7053_v46, %v7052_v15  ;;  %v9787_v60 = vpop.permute.xlu0 %9786  ;;  %8839 = vmatpush3.bf16.msra.mxu1 %v9992_v43 }
 0xccb   : > { %v9789_v39 = vunpack.i.h.bf16 %v9787_v60  ;;  %v9788_v63 = vunpack.i.l.bf16 %v9787_v60  ;;  %8840 = vmatprep.subr.bf16.mxu1 %v9993_v56 }
 0xccc   : > { %v9792_v40 = vpop.permute.xlu1 %9791  ;;  %7508 = vmatprep.mubr.bf16.mxu0 %v7060_v57 }
 0xccd   : > { %v6865_v10 = vsel %vm575_vm0, %v13368_v52, %v9789_v39  ;;  %v6864_v32 = vsel %vm575_vm0, %v13330_v47, %v9788_v63  ;;  %v9794_v9 = vunpack.i.h.bf16 %v9792_v40  ;;  %v9793_v51 = vunpack.i.l.bf16 %v9792_v40  ;;  %7452 = vmatmul.mubr.bf16.gmra.mrb[136].mxu1 %v6869_v55  ;;  %7509 = vmatmul.mubr.bf16.vlgmr.msra.gmra.mrb[148].mxu0 %v6996_v4 }
 0xcce   : > { %v6870_v45 = vpack.c.bf16 %v6865_v10, %v6864_v32  ;;  %v9802_v13 = vpop.permute.xlu0 %9801  ;;  %8841 = vmatpush3.bf16.msra.mxu1 %v9993_v56 }
 0xccf   : > { %v6929_v19 = vsel %vm575_vm0, %v13360_v22, %v9794_v9  ;;  %v6928_v28 = vsel %vm575_vm0, %v13358_v23, %v9793_v51  ;;  %v9804_v31 = vunpack.i.h.bf16 %v9802_v13  ;;  %v9803_v7 = vunpack.i.l.bf16 %v9802_v13  ;;  %8842 = vmatprep.subr.bf16.mxu1 %v9994_v26  ;;  %v7088_v9 = vld [vmem:[#allocation3 + $0x20] sm:$0xff]  ;;  %v7103_v13 = vld [vmem:[#allocation3 + $0x98] sm:$0xff] }
 0xcd0   : > { %v6934_v3 = vpack.c.bf16 %v6929_v19, %v6928_v28  ;;  %v9797_v44 = vpop.permute.xlu1 %9796 }
 0xcd1   : > { %v6991_v27 = vsel %vm575_vm0, %v13349_v50, %v9804_v31  ;;  %v6990_v18 = vsel %vm575_vm0, %v13310_v54, %v9803_v7  ;;  %v9799_v41 = vunpack.i.h.bf16 %v9797_v44  ;;  %v9798_v20 = vunpack.i.l.bf16 %v9797_v44 }
 0xcd2   : > { %v6997_v37 = vpack.c.bf16 %v6991_v27, %v6990_v18  ;;  %v9812_v59 = vpop.permute.xlu0 %9811  ;;  %7459 = vmatprep.mubr.bf16.mxu1 %v6934_v3  ;;  %8843 = vmatpush3.bf16.msra.mxu1 %v9994_v26  ;;  %v7011_v26 = vld [vmem:[#allocation2 + $0x90] sm:$0xff] }
 0xcd3   : > { %v7055_v23 = vsel %vm575_vm0, %v13368_v52, %v9799_v41  ;;  %v7054_v22 = vsel %vm575_vm0, %v13330_v47, %v9798_v20  ;;  %v9814_v43 = vunpack.i.h.bf16 %v9812_v59  ;;  %v9813_v55 = vunpack.i.l.bf16 %v9812_v59 }
 0xcd4   : > { %v7061_v48 = vpack.c.bf16 %v7055_v23, %v7054_v22  ;;  %v9807_v12 = vpop.permute.xlu1 %9806 }
 0xcd5   : > { %v6867_v50 = vsel %vm575_vm0, %v13392_v42, %v9814_v43  ;;  %v6866_v54 = vsel %vm575_vm0, %v13370_v25, %v9813_v55  ;;  %v9809_v61 = vunpack.i.h.bf16 %v9807_v12  ;;  %v9808_v58 = vunpack.i.l.bf16 %v9807_v12  ;;  %7460 = vmatmul.mubr.bf16.gmra.mrb[140].mxu1 %v6870_v45 }
 0xcd6   : > { %v6871_v49 = vpack.c.bf16 %v6867_v50, %v6866_v54  ;;  %v9822_v29 = vpop.permute.xlu0 %9821  ;;  %7516 = vmatprep.mubr.bf16.mxu0 %v7061_v48 }
 0xcd7   : > { %v6931_v52 = vsel %vm575_vm0, %v13385_v21, %v9809_v61  ;;  %v6930_v47 = vsel %vm575_vm0, %v13383_v14, %v9808_v58  ;;  %v9824_v16 = vunpack.i.h.bf16 %v9822_v29  ;;  %v9823_v24 = vunpack.i.l.bf16 %v9822_v29  ;;  %7517 = vmatmul.mubr.bf16.gmra.mrb[152].mxu0 %v6997_v37 }
 0xcd8   : > { %v6935_v62 = vpack.c.bf16 %v6931_v52, %v6930_v47  ;;  %v9817_v11 = vpop.permute.xlu1 %9816 }
 0xcd9   : > { %v6993_v33 = vsel %vm575_vm0, %v13379_v17, %v9824_v16  ;;  %v6992_v56 = vsel %vm575_vm0, %v13356_v36, %v9823_v24  ;;  %v9819_v4 = vunpack.i.h.bf16 %v9817_v11  ;;  %v9818_v46 = vunpack.i.l.bf16 %v9817_v11 }
 0xcda   : > { %v6998_v15 = vpack.c.bf16 %v6993_v33, %v6992_v56  ;;  %v9832_v57 = vpop.permute.xlu0 %9831  ;;  %7467 = vmatprep.mubr.bf16.mxu1 %v6935_v62 }
 0xcdb   : > { %v7057_v21 = vsel %vm575_vm0, %v13392_v42, %v9819_v4  ;;  %v7056_v14 = vsel %vm575_vm0, %v13370_v25, %v9818_v46  ;;  %v9834_v60 = vunpack.i.h.bf16 %v9832_v57  ;;  %v9833_v39 = vunpack.i.l.bf16 %v9832_v57 }
 0xcdc   : > { %v7062_v63 = vpack.c.bf16 %v7057_v21, %v7056_v14  ;;  %v9827_v40 = vpop.permute.xlu1 %9826 }
 0xcdd   : > { %v6995_v17 = vsel %vm575_vm0, %v13406_v0, %v9834_v60  ;;  %v6994_v36 = vsel %vm575_vm0, %v13381_v5, %v9833_v39  ;;  %v9829_v10 = vunpack.i.h.bf16 %v9827_v40  ;;  %v9828_v32 = vunpack.i.l.bf16 %v9827_v40  ;;  %7468 = vmatmul.mubr.bf16.gmra.mrb[144].mxu1 %v6871_v49  ;;  %v7093_v0 = vld [vmem:[#allocation3 + $0x48] sm:$0xff]  ;;  %v7098_v5 = vld [vmem:[#allocation3 + $0x70] sm:$0xff] }
 0xcde   : > { %v6999_v51 = vpack.c.bf16 %v6995_v17, %v6994_v36  ;;  %7524 = vmatprep.mubr.bf16.mxu0 %v7062_v63  ;;  %8844 = vmatprep.mubr.msk.bf16.mxu1 %vm575_vm0, %v7088_v9 }
 0xcdf   : > { %v7059_v25 = vsel %vm575_vm0, %v7011_v26, %v9829_v10  ;;  %v7058_v42 = vsel %vm575_vm0, %v13394_v8, %v9828_v32  ;;  %7525 = vmatmul.mubr.bf16.gmra.mrb[156].mxu0 %v6998_v15  ;;  %v13491_v8 = vld [vmem:[%s13598_s15] ss:$0 sm:$0xff] }
 0xce0   : > { %v7063_v45 = vpack.c.bf16 %v7059_v25, %v7058_v42 }
 0xce2   : > { %7532 = vmatprep.mubr.bf16.mxu0 %v7063_v45 }
 0xce5   : > { %8845 = vmatmul.mubr.msk.bf16.vlgmr.msra.gmra.mrb[148].mxu1 %vm575_vm0, %v7093_v0 }
 0xce6   : > { %8848 = vmatprep.mubr.msk.bf16.mxu1 %vm575_vm0, %v7098_v5 }
 0xce7   : > { %7533 = vmatmul.mubr.bf16.gmra.mrb[160].mxu0 %v6999_v51 }
 0xced   : > { %8849 = vmatmul.mubr.msk.bf16.gmra.mrb[152].mxu1 %vm575_vm0, %v7103_v13 }
 0xd98   : > { %v8422_v19 = vpop.f32.mrb[132].mxu1 }
 0xd99   : > { %v8423_v28 = vpop.f32.mrb[133].mxu1 }
 0xd9a   : > { %v8424_v31 = vadd.f32 %v8423_v28, %v8422_v19  ;;  %v8425_v7 = vpop.f32.mrb[134].mxu1 }
 0xd9b   : > { %v8426_v3 = vpop.f32.mrb[135].mxu1 }
 0xd9c   : > { %v8427_v44 = vadd.f32 %v8426_v3, %v8425_v7  ;;  %v7446_v37 = vadd.f32 %v8424_v31, %v13491_v8 }
 0xd9e   : > { %v7449_v12 = vadd.f32 %v8427_v44, %v13491_v8 }
 0xda0   : > { %v8428_v27 = vpop.f32.mrb[136].mxu1  ;;  %v8462_v18 = vpop.f32.mrb[148].mxu0 }
 0xda1   : > { %v8429_v41 = vpop.f32.mrb[137].mxu1  ;;  %v8463_v20 = vpop.f32.mrb[149].mxu0 }
 0xda2   : > { %v8430_v59 = vadd.f32 %v8429_v41, %v8428_v27  ;;  %v8464_v23 = vadd.f32 %v8463_v20, %v8462_v18  ;;  %v8431_v22 = vpop.f32.mrb[138].mxu1  ;;  %v8465_v43 = vpop.f32.mrb[150].mxu0 }
 0xda3   : > { %v8432_v55 = vpop.f32.mrb[139].mxu1  ;;  %v8466_v48 = vpop.f32.mrb[151].mxu0 }
 0xda4   : > { %v8433_v50 = vadd.f32 %v8432_v55, %v8431_v22  ;;  %v8467_v54 = vadd.f32 %v8466_v48, %v8465_v43  ;;  %v7511_v61 = vadd.f32 %v8464_v23, %v7446_v37  ;;  %v7454_v11 = vadd.f32 %v8430_v59, %v13491_v8 }
 0xda6   : > { %v7514_v58 = vadd.f32 %v8467_v54, %v7449_v12  ;;  %v7457_v15 = vadd.f32 %v8433_v50, %v13491_v8 }
 0xda8   : > { %v8434_v49 = vpop.f32.mrb[140].mxu1 }
 0xda9   : > { %v8435_v29 = vpop.f32.mrb[141].mxu1 }
 0xdaa   : > { %v8468_v52 = vpop.f32.mrb[152].mxu0  ;;  %v8436_v47 = vadd.f32 %v8435_v29, %v8434_v49  ;;  %v8437_v16 = vpop.f32.mrb[142].mxu1 }
 0xdab   : > { %v8469_v24 = vpop.f32.mrb[153].mxu0  ;;  %v8438_v62 = vpop.f32.mrb[143].mxu1 }
 0xdac   : > { %v8470_v33 = vadd.f32 %v8469_v24, %v8468_v52  ;;  %v8471_v56 = vpop.f32.mrb[154].mxu0  ;;  %v8439_v4 = vadd.f32 %v8438_v62, %v8437_v16  ;;  %v7462_v10 = vadd.f32 %v8436_v47, %v13491_v8 }
 0xdad   : > { %v8472_v46 = vpop.f32.mrb[155].mxu0 }
 0xdae   : > { %v8473_v57 = vadd.f32 %v8472_v46, %v8471_v56  ;;  %v7519_v21 = vadd.f32 %v8470_v33, %v7454_v11  ;;  %v7465_v42 = vadd.f32 %v8439_v4, %v13491_v8 }
 0xdb0   : > { %v8440_v14 = vpop.f32.mrb[144].mxu1  ;;  %v7522_v60 = vadd.f32 %v8473_v57, %v7457_v15 }
 0xdb1   : > { %v8441_v39 = vpop.f32.mrb[145].mxu1 }
 0xdb2   : > { %v8474_v63 = vpop.f32.mrb[156].mxu0  ;;  %v8442_v26 = vadd.f32 %v8441_v39, %v8440_v14  ;;  %v8443_v40 = vpop.f32.mrb[146].mxu1 }
 0xdb3   : > { %v8475_v17 = vpop.f32.mrb[157].mxu0  ;;  %v8444_v36 = vpop.f32.mrb[147].mxu1 }
 0xdb4   : > { %v8476_v32 = vadd.f32 %v8475_v17, %v8474_v63  ;;  %v8477_v9 = vpop.f32.mrb[158].mxu0  ;;  %v8445_v51 = vadd.f32 %v8444_v36, %v8443_v40  ;;  %v7470_v20 = vadd.f32 %v8442_v26, %v13491_v8 }
 0xdb5   : > { %v8478_v25 = vpop.f32.mrb[159].mxu0 }
 0xdb6   : > { %v8479_v45 = vadd.f32 %v8478_v25, %v8477_v9  ;;  %v7527_v0 = vadd.f32 %v8476_v32, %v7462_v10  ;;  %v7473_v55 = vadd.f32 %v8445_v51, %v13491_v8 }
 0xdb8   : > { %v8846_v5 = vpop.f32.mrb[148].mxu1  ;;  %v7530_v13 = vadd.f32 %v8479_v45, %v7465_v42 }
 0xdb9   : > { %v7584_v19 = vadd.f32 %v8846_v5, %v7519_v21  ;;  %v7575_v28 = vpop.f32.mrb[149].mxu1 }
 0xdba   : > { %v8480_v31 = vpop.f32.mrb[160].mxu0  ;;  %v7576_v7 = vadd.f32 %v7575_v28, %v7511_v61  ;;  %v8847_v3 = vpop.f32.mrb[150].mxu1 }
 0xdbb   : > { %v7608_v44 = vadd.f32 %v7584_v19, %v12836_v6  ;;  %v8481_v27 = vpop.f32.mrb[161].mxu0  ;;  %v7587_v18 = vadd.f32 %v8847_v3, %v7522_v60  ;;  %v7578_v41 = vpop.f32.mrb[151].mxu1 }
 0xdbc   : > { %v8482_v37 = vadd.f32 %v8481_v27, %v8480_v31  ;;  %v7606_v59 = vadd.f32 %v7576_v7, %v12839_v38  ;;  %v8483_v23 = vpop.f32.mrb[162].mxu0  ;;  %v7579_v22 = vadd.f32 %v7578_v41, %v7514_v58 }
 0xdbd   : > { %7616 = vst.msk [vmem:[%s13505_s6 + $0x10] sm:$0xff] %vm575_vm0, %v7608_v44  ;;  %v7609_v6 = vadd.f32 %v7587_v18, %v12843_v34  ;;  %v8484_v43 = vpop.f32.mrb[163].mxu0 }
 0xdbe   : > { %7614 = vst.msk [vmem:[%s13505_s6] sm:$0xff] %vm575_vm0, %v7606_v59  ;;  %v8485_v38 = vadd.f32 %v8484_v43, %v8483_v23  ;;  %v7607_v48 = vadd.f32 %v7579_v22, %v12847_v1  ;;  %v7535_v12 = vadd.f32 %v8482_v37, %v7470_v20 }
 0xdbf   : > { %7617 = vst.msk [vmem:[%s13505_s6 + $0x18] sm:$0xff] %vm575_vm0, %v7609_v6 }
 0xdc0   : > { %7615 = vst.msk [vmem:[%s13505_s6 + $0x8] sm:$0xff] %vm575_vm0, %v7607_v48  ;;  %v8850_v50 = vpop.f32.mrb[152].mxu1  ;;  %v7538_v54 = vadd.f32 %v8485_v38, %v7473_v55 }
 0xdc1   : > { %v7600_v61 = vadd.f32 %v8850_v50, %v7535_v12  ;;  %v7591_v34 = vpop.f32.mrb[153].mxu1 }
 0xdc2   : > { %v7592_v58 = vadd.f32 %v7591_v34, %v7527_v0  ;;  %v8851_v8 = vpop.f32.mrb[154].mxu1 }
 0xdc3   : > { %v7612_v49 = vadd.f32 %v7600_v61, %v12852_v2  ;;  %v7603_v1 = vadd.f32 %v8851_v8, %v7538_v54  ;;  %v7594_v29 = vpop.f32.mrb[155].mxu1 }
 0xdc4   : > { %v7610_v52 = vadd.f32 %v7592_v58, %v12855_v53  ;;  %v7595_v47 = vadd.f32 %v7594_v29, %v7530_v13 }
 0xdc5   : > { %7620 = vst.msk [vmem:[%s13505_s6 + $0x30] sm:$0xff] %vm575_vm0, %v7612_v49  ;;  %v7613_v16 = vadd.f32 %v7603_v1, %v12859_v35 }
 0xdc6   : > { %7618 = vst.msk [vmem:[%s13505_s6 + $0x20] sm:$0xff] %vm575_vm0, %v7610_v52  ;;  %v7611_v2 = vadd.f32 %v7595_v47, %v12863_v30 }
 0xdc7   : > { %7621 = vst.msk [vmem:[%s13505_s6 + $0x38] sm:$0xff] %vm575_vm0, %v7613_v16 }
 0xdc8   : > { %7619 = vst.msk [vmem:[%s13505_s6 + $0x28] sm:$0xff] %vm575_vm0, %v7611_v2 }
 0xdc9   : > { %10402 = shalt.err (!%p10399_p3)
}
 0xdca   : > { %s10403_s1 = scalar_lea.hbm %s13528_s2, 1024  ;;  %s10407_s24 = scalar_lea.hbm %s13844_s25, 2048 }
 0xdcb   : > { %p10404_p4 = scmp.ne.s32.totalorder %s13528_s2, %s10403_s1  ;;  %p10408_p9 = scmp.lt.u32.totalorder %s13528_s2, %s13844_s25 }
 0xdcc   : > { %p10409_p10 = scmp.lt.u32.totalorder %s10407_s24, %s10403_s1  ;;  %p10411_p12 = scmp.lt.u32.totalorder %s10403_s1, %s13528_s2 }
 0xdcd   : > { %p10405_p7 = pnand %p10404_p4, %p10607_p5 }
 0xdce   : > { %p10410_p11 = por %p10409_p10, %p10408_p9 }
 0xdcf   : > { %p10406_p8 = pneg %p10405_p7 }
 0xdd0   : > { %p10412_p13 = por %p10411_p12, %p10410_p11 }
 0xdd2   : > { %p10413_p0 = pnand %p10412_p13, %p10406_p8 }
 0xdd4   : > { %10416 = shalt.err (!%p10413_p0)
}
 0xdd5   : > { %s10473_s26 = smov 128  }
 0xdd6   : > { %8896 = dma.vmem_to_hbm [thread:$0]  (%p10607_p5), %s13533_s27, 1024, %s13528_s2, %s13541_s0, %s10473_s26, %s10473_s26, %s10465_s30  }
 0xdd7 PF: > { %s13845_s29 = sld [smem:[#allocation9_spill]]  ;;  %s13846_s22 = sld [smem:[#allocation7_spill]] }
 0xddd   : > { %p8902_p1 = scmp.ge.s32.totalorder %s13845_s29, 2  ;;  %s7651_s18 = sand.u32 1, %s13846_s22  }
 0xdde   : > { %s7652_s1 = scalar_lea.sflag [#allocation5], %s7651_s18 }
 0xddf   : > { %p8899_p2 = pnand %p8902_p1, %p10611_p6 }
 0xde1   : > { %10434 = dma.done.wait (!%p8899_p2), %s7652_s1, 1024  }
 0xde2   : > { %10436 = vsyncadd (!%p8899_p2), %s7652_s1, 4294966272  ;;  %s13848_s30 = sld [smem:[#allocation10_spill]]  ;;  %s13849_s24 = sld [smem:[#allocation8_spill]] }
 0xde3   : > { %s13850_s29 = sld [smem:[#allocation11_spill]]  ;;  %s13851_s27 = smov %s10443_s28 }
 0xde8   : > { %p28_p3 = scmp.ge.s32.totalorder %s13848_s30, 4   ;;  %s13852_s28 = smov %s13849_s24 }
 0xdea   :  { %30 = sbr.rel (!%p28_p3) target bundleno = 9 (0x9), region = 130 }
 0xdf1   :  { %7657 = vsyncpa [#allocation5], 1 }
 0xdf2   :  { %7659 = vsyncpa [#allocation5 + $0x1], 1 }

</bundles_post_ra>
